<compile_context>
chip_gen: v7x
topology: tpu7x:2x2x1
jax: 0.10.0
libtpu: 0.0.40
codegen_flags: <defaults>
</compile_context>

<pallas_src>
import math

import jax
import jax.numpy as jnp
from jax.experimental import pallas as pl
from jax.experimental.pallas import tpu as pltpu


# ---------------------------------------------------------------------------
# Module dimensions (fixed by the PyTorch __init__).
# ---------------------------------------------------------------------------
INPUT_SIZE = 31 * 1024      # 31744
HIDDEN1 = 512
HIDDEN2 = 256
EMBED_SIZE = 77 * 1024      # 78848

# Tiling choices (all divide exactly, all multiples of 128 on the lane axis).
PROJ1_TK = 3968             # 31744 = 3968 * 8  -> 8 reduction steps (~4 MB W1 blocks)
PROJ1_TN = 256              # 512   = 256  * 2  -> parallel axis of extent 2
PROJ3_TN = 3584             # 78848 = 3584 * 22 -> 22 parallel output tiles (~3.5 MB W3 blocks)

_VMEM_LIMIT = 32 * 1024 * 1024   # peak double-buffered usage ~8.5 MB; safe on v5e/v6e/v7x


def _gelu_exact(x):
    # PyTorch nn.GELU() default (erf-based, not tanh approximation).
    return 0.5 * x * (1.0 + jax.lax.erf(x * (1.0 / math.sqrt(2.0))))


# ---------------------------------------------------------------------------
# Kernel 1: h1 = gelu(x @ W1 + b1)
#   grid = (N tiles, K tiles); K is the reduction axis (last, "arbitrary"),
#   N tiles are independent ("parallel") so megacore can shard W1 streaming.
# ---------------------------------------------------------------------------
def _proj1_kernel(x_ref, w_ref, b_ref, o_ref, acc_ref):
    k = pl.program_id(1)

    @pl.when(k == 0)
    def _():
        acc_ref[...] = jnp.zeros_like(acc_ref)

    acc_ref[...] += jnp.dot(
        x_ref[...], w_ref[...], preferred_element_type=jnp.float32
    )

    @pl.when(k == pl.num_programs(1) - 1)
    def _():
        o_ref[...] = _gelu_exact(acc_ref[...] + b_ref[...]).astype(o_ref.dtype)


def proj1(x, w1, b1):
    """x: (M, 31744) f32 -> (M, 512) f32, fused bias + GELU."""
    M, K = x.shape
    assert K == INPUT_SIZE and w1.shape == (INPUT_SIZE, HIDDEN1)
    nk = K // PROJ1_TK
    nj = HIDDEN1 // PROJ1_TN
    b1_2d = b1.reshape(1, HIDDEN1)

    return pl.pallas_call(
        _proj1_kernel,
        out_shape=jax.ShapeDtypeStruct((M, HIDDEN1), x.dtype),
        grid_spec=pltpu.PrefetchScalarGridSpec(
            num_scalar_prefetch=0,
            grid=(nj, nk),
            in_specs=[
                pl.BlockSpec((M, PROJ1_TK), lambda j, k: (0, k)),        # x tile
                pl.BlockSpec((PROJ1_TK, PROJ1_TN), lambda j, k: (k, j)), # W1 tile
                pl.BlockSpec((1, PROJ1_TN), lambda j, k: (0, j)),        # b1 tile
            ],
            out_specs=pl.BlockSpec((M, PROJ1_TN), lambda j, k: (0, j)),
            scratch_shapes=[pltpu.VMEM((M, PROJ1_TN), jnp.float32)],
        ),
        compiler_params=pltpu.CompilerParams(
            dimension_semantics=("parallel", "arbitrary"),
            vmem_limit_bytes=_VMEM_LIMIT,
        ),
    )(x, w1, b1_2d)


# ---------------------------------------------------------------------------
# Kernel 2: out = gelu(h1 @ W2 + b2) @ W3 + b3   (proj2 fused into proj3)
#   grid = (N3 tiles,), fully parallel.  h1 / W2 / b2 use constant index maps
#   so they are DMA'd once and stay resident in VMEM; the tiny proj2 matmul
#   (M x 512 @ 512 x 256) is recomputed per tile and hides under the ~3.5 MB
#   W3 block DMA.  No K reduction -> no accumulator scratch needed; output
#   is written lane-dense (3584 wide) in one shot.
# ---------------------------------------------------------------------------
def _proj23_kernel(h1_ref, w2_ref, b2_ref, w3_ref, b3_ref, o_ref):
    h2 = _gelu_exact(
        jnp.dot(h1_ref[...], w2_ref[...], preferred_element_type=jnp.float32)
        + b2_ref[...]
    )
    out = (
        jnp.dot(h2.astype(w3_ref.dtype), w3_ref[...],
                preferred_element_type=jnp.float32)
        + b3_ref[...]
    )
    o_ref[...] = out.astype(o_ref.dtype)


def proj2_proj3(h1, w2, b2, w3, b3):
    """h1: (M, 512) f32 -> (M, 78848) f32."""
    M, K1 = h1.shape
    assert K1 == HIDDEN1
    assert w2.shape == (HIDDEN1, HIDDEN2) and w3.shape == (HIDDEN2, EMBED_SIZE)
    nj = EMBED_SIZE // PROJ3_TN
    b2_2d = b2.reshape(1, HIDDEN2)
    b3_2d = b3.reshape(1, EMBED_SIZE)

    return pl.pallas_call(
        _proj23_kernel,
        out_shape=jax.ShapeDtypeStruct((M, EMBED_SIZE), h1.dtype),
        grid_spec=pltpu.PrefetchScalarGridSpec(
            num_scalar_prefetch=0,
            grid=(nj,),
            in_specs=[
                pl.BlockSpec((M, HIDDEN1), lambda j: (0, 0)),        # h1 (resident)
                pl.BlockSpec((HIDDEN1, HIDDEN2), lambda j: (0, 0)),  # W2 (resident)
                pl.BlockSpec((1, HIDDEN2), lambda j: (0, 0)),        # b2 (resident)
                pl.BlockSpec((HIDDEN2, PROJ3_TN), lambda j: (0, j)), # W3 tile
                pl.BlockSpec((1, PROJ3_TN), lambda j: (0, j)),       # b3 tile
            ],
            out_specs=pl.BlockSpec((M, PROJ3_TN), lambda j: (0, j)),
        ),
        compiler_params=pltpu.CompilerParams(
            dimension_semantics=("parallel",),
            vmem_limit_bytes=_VMEM_LIMIT,
        ),
    )(h1, w2, b2_2d, w3, b3_2d)


# ---------------------------------------------------------------------------
# Full module forward.
# ---------------------------------------------------------------------------
def init_params(key):
    """Deterministic synthetic weights (shapes from the module __init__)."""
    ks = jax.random.split(key, 6)
    scale = 0.02
    return {
        "w1": scale * jax.random.normal(ks[0], (INPUT_SIZE, HIDDEN1), jnp.float32),
        "b1": scale * jax.random.normal(ks[1], (HIDDEN1,), jnp.float32),
        "w2": scale * jax.random.normal(ks[2], (HIDDEN1, HIDDEN2), jnp.float32),
        "b2": scale * jax.random.normal(ks[3], (HIDDEN2,), jnp.float32),
        "w3": scale * jax.random.normal(ks[4], (HIDDEN2, EMBED_SIZE), jnp.float32),
        "b3": scale * jax.random.normal(ks[5], (EMBED_SIZE,), jnp.float32),
    }


@jax.jit
def audio_embedding_processor(x, params):
    """x: any shape with leading batch dim that flattens to (B, 31*1024)."""
    batch = x.shape[0]
    x = x.reshape(batch, -1)                       # x.view(batch, -1)
    assert x.shape[1] == INPUT_SIZE

    h1 = proj1(x, params["w1"], params["b1"])                      # gelu(xW1+b1)
    h3 = proj2_proj3(h1, params["w2"], params["b2"],
                     params["w3"], params["b3"])                   # fused proj2+3

    return h3.reshape(batch, 77, 1024)             # x.view(batch, 77, 1024)


def _reference(x, params):
    """Pure-JAX f32 reference at highest matmul precision."""
    hp = jax.lax.Precision.HIGHEST
    batch = x.shape[0]
    x = x.reshape(batch, -1)
    h = _gelu_exact(jnp.dot(x, params["w1"], precision=hp) + params["b1"])
    h = _gelu_exact(jnp.dot(h, params["w2"], precision=hp) + params["b2"])
    h = jnp.dot(h, params["w3"], precision=hp) + params["b3"]
    return h.reshape(batch, 77, 1024)


if __name__ == "__main__":
    key = jax.random.PRNGKey(0)
    pkey, xkey = jax.random.split(key)
    params = init_params(pkey)

    # Small batch; feature sizes are fixed by the module definition.
    batch = 2
    x = jax.random.normal(xkey, (batch, 31, 1024), jnp.float32)

    out = audio_embedding_processor(x, params)
    out = jax.block_until_ready(out)
    assert out.shape == (batch, 77, 1024), out.shape

    ref = jax.block_until_ready(_reference(x, params))
    max_err = float(jnp.max(jnp.abs(out - ref)))
    # Tolerance sized for MXU multi-pass f32 rounding over a 31744-long
    # reduction; a real tiling/indexing bug produces errors orders of
    # magnitude larger.
    assert max_err < 2e-2, max_err

    print("KERNEL_OK")
</pallas_src>

<mosaic_0001>
module attributes {stable_mosaic.version = 11 : i64} {
  func.func @_proj1_kernel(%arg0: i32, %arg1: i32, %arg2: memref<2x3968xf32, #tpu.memory_space<vmem>>, %arg3: memref<3968x256xf32, #tpu.memory_space<vmem>>, %arg4: memref<1x256xf32, #tpu.memory_space<vmem>>, %arg5: memref<2x256xf32, #tpu.memory_space<vmem>>, %arg6: memref<2x256xf32, #tpu.memory_space<vmem>>) attributes {dimension_semantics = [#tpu.dimension_semantics<parallel>, #tpu.dimension_semantics<arbitrary>], iteration_bounds = array<i64: 2, 8>, scalar_prefetch = 0 : i64, scratch_operands = 1 : i64, tpu.core_type = #tpu.core_type<tc>, window_params = [{transform_indices = @transform_0, window_bounds = array<i64: 2, 3968>}, {transform_indices = @transform_1, window_bounds = array<i64: 3968, 256>}, {transform_indices = @transform_2, window_bounds = array<i64: 1, 256>}, {transform_indices = @transform_3, window_bounds = array<i64: 2, 256>}]} {
    %c0_i32 = arith.constant 0 : i32
    %0 = arith.cmpi eq, %arg1, %c0_i32 : i32
    %1 = arith.extui %0 : i1 to i32
    %c0_i32_0 = arith.constant 0 : i32
    %2 = arith.cmpi ne, %1, %c0_i32_0 : i32
    scf.if %2 {
      %cst_9 = arith.constant 0.000000e+00 : f32
      %12 = vector.broadcast %cst_9 : f32 to vector<2x256xf32>
      %c0_10 = arith.constant 0 : index
      %c0_11 = arith.constant 0 : index
      %13 = vector.load %arg6[%c0_10, %c0_11] : memref<2x256xf32, #tpu.memory_space<vmem>>, vector<2x256xf32>
      tpu.vector_store %arg6[%c0_10, %c0_11], %12 {strides = array<i32>} : memref<2x256xf32, #tpu.memory_space<vmem>>, vector<2x256xf32>,
    } else {
    }
    %c0 = arith.constant 0 : index
    %c0_1 = arith.constant 0 : index
    %3 = vector.load %arg6[%c0, %c0_1] : memref<2x256xf32, #tpu.memory_space<vmem>>, vector<2x256xf32>
    %c0_2 = arith.constant 0 : index
    %c0_3 = arith.constant 0 : index
    %4 = vector.load %arg2[%c0_2, %c0_3] : memref<2x3968xf32, #tpu.memory_space<vmem>>, vector<2x3968xf32>
    %c0_4 = arith.constant 0 : index
    %c0_5 = arith.constant 0 : index
    %5 = vector.load %arg3[%c0_4, %c0_5] : memref<3968x256xf32, #tpu.memory_space<vmem>>, vector<3968x256xf32>
    %cst = arith.constant dense<0.000000e+00> : vector<2x256xf32>
    %6 = tpu.matmul %4, %5, %cst {dimension_numbers = #tpu.dot_dimension_numbers<[1], [0], [0], [1], [0, 0, 1, 1], [], []>} : vector<2x3968xf32>, vector<3968x256xf32>, vector<2x256xf32> -> vector<2x256xf32>
    %7 = arith.addf %3, %6 : vector<2x256xf32>
    %c0_6 = arith.constant 0 : index
    %c0_7 = arith.constant 0 : index
    %8 = vector.load %arg6[%c0_6, %c0_7] : memref<2x256xf32, #tpu.memory_space<vmem>>, vector<2x256xf32>
    tpu.vector_store %arg6[%c0_6, %c0_7], %7 {strides = array<i32>} : memref<2x256xf32, #tpu.memory_space<vmem>>, vector<2x256xf32>,
    %c7_i32 = arith.constant 7 : i32
    %9 = arith.cmpi eq, %arg1, %c7_i32 : i32
    %10 = arith.extui %9 : i1 to i32
    %c0_i32_8 = arith.constant 0 : i32
    %11 = arith.cmpi ne, %10, %c0_i32_8 : i32
    scf.if %11 {
      %c0_9 = arith.constant 0 : index
      %c0_10 = arith.constant 0 : index
      %12 = vector.load %arg6[%c0_9, %c0_10] : memref<2x256xf32, #tpu.memory_space<vmem>>, vector<2x256xf32>
      %c0_11 = arith.constant 0 : index
      %c0_12 = arith.constant 0 : index
      %13 = vector.load %arg4[%c0_11, %c0_12] : memref<1x256xf32, #tpu.memory_space<vmem>>, vector<1x256xf32>
      %14 = vector.broadcast %13 : vector<1x256xf32> to vector<2x256xf32>
      %15 = arith.addf %12, %14 : vector<2x256xf32>
      %cst_13 = arith.constant 5.000000e-01 : f32
      %16 = vector.broadcast %cst_13 : f32 to vector<2x256xf32>
      %17 = arith.mulf %16, %15 : vector<2x256xf32>
      %cst_14 = arith.constant 0.707106769 : f32
      %18 = vector.broadcast %cst_14 : f32 to vector<2x256xf32>
      %19 = arith.mulf %15, %18 : vector<2x256xf32>
      %20 = math.erf %19 : vector<2x256xf32>
      %cst_15 = arith.constant 1.000000e+00 : f32
      %21 = vector.broadcast %cst_15 : f32 to vector<2x256xf32>
      %22 = arith.addf %21, %20 : vector<2x256xf32>
      %23 = arith.mulf %17, %22 : vector<2x256xf32>
      %c0_16 = arith.constant 0 : index
      %c0_17 = arith.constant 0 : index
      %24 = vector.load %arg5[%c0_16, %c0_17] : memref<2x256xf32, #tpu.memory_space<vmem>>, vector<2x256xf32>
      tpu.vector_store %arg5[%c0_16, %c0_17], %23 {strides = array<i32>} : memref<2x256xf32, #tpu.memory_space<vmem>>, vector<2x256xf32>,
    } else {
    }
    return
  }
  func.func @transform_0(%arg0: i32, %arg1: i32) -> (i32, i32) {
    %c0_i32 = arith.constant 0 : i32
    %c0_i32_0 = arith.constant 0 : i32
    return %c0_i32, %arg1 : i32, i32
  }
  func.func @transform_1(%arg0: i32, %arg1: i32) -> (i32, i32) {
    %c0_i32 = arith.constant 0 : i32
    return %arg1, %arg0 : i32, i32
  }
  func.func @transform_2(%arg0: i32, %arg1: i32) -> (i32, i32) {
    %c0_i32 = arith.constant 0 : i32
    %c0_i32_0 = arith.constant 0 : i32
    return %c0_i32, %arg0 : i32, i32
  }
  func.func @transform_3(%arg0: i32, %arg1: i32) -> (i32, i32) {
    %c0_i32 = arith.constant 0 : i32
    %c0_i32_0 = arith.constant 0 : i32
    return %c0_i32, %arg0 : i32, i32
  }
}

module attributes {stable_mosaic.version = 11 : i64} {
  func.func @_proj23_kernel(%arg0: i32, %arg1: memref<2x512xf32, #tpu.memory_space<vmem>>, %arg2: memref<512x256xf32, #tpu.memory_space<vmem>>, %arg3: memref<1x256xf32, #tpu.memory_space<vmem>>, %arg4: memref<256x3584xf32, #tpu.memory_space<vmem>>, %arg5: memref<1x3584xf32, #tpu.memory_space<vmem>>, %arg6: memref<2x3584xf32, #tpu.memory_space<vmem>>) attributes {dimension_semantics = [#tpu.dimension_semantics<parallel>], iteration_bounds = array<i64: 22>, scalar_prefetch = 0 : i64, scratch_operands = 0 : i64, tpu.core_type = #tpu.core_type<tc>, window_params = [{pipeline_mode = #tpu.pipeline_mode<synchronous>, transform_indices = @transform_0, window_bounds = array<i64: 2, 512>}, {pipeline_mode = #tpu.pipeline_mode<synchronous>, transform_indices = @transform_1, window_bounds = array<i64: 512, 256>}, {pipeline_mode = #tpu.pipeline_mode<synchronous>, transform_indices = @transform_2, window_bounds = array<i64: 1, 256>}, {transform_indices = @transform_3, window_bounds = array<i64: 256, 3584>}, {transform_indices = @transform_4, window_bounds = array<i64: 1, 3584>}, {transform_indices = @transform_5, window_bounds = array<i64: 2, 3584>}]} {
    %c0 = arith.constant 0 : index
    %c0_0 = arith.constant 0 : index
    %0 = vector.load %arg1[%c0, %c0_0] : memref<2x512xf32, #tpu.memory_space<vmem>>, vector<2x512xf32>
    %c0_1 = arith.constant 0 : index
    %c0_2 = arith.constant 0 : index
    %1 = vector.load %arg2[%c0_1, %c0_2] : memref<512x256xf32, #tpu.memory_space<vmem>>, vector<512x256xf32>
    %cst = arith.constant dense<0.000000e+00> : vector<2x256xf32>
    %2 = tpu.matmul %0, %1, %cst {dimension_numbers = #tpu.dot_dimension_numbers<[1], [0], [0], [1], [0, 0, 1, 1], [], []>} : vector<2x512xf32>, vector<512x256xf32>, vector<2x256xf32> -> vector<2x256xf32>
    %c0_3 = arith.constant 0 : index
    %c0_4 = arith.constant 0 : index
    %3 = vector.load %arg3[%c0_3, %c0_4] : memref<1x256xf32, #tpu.memory_space<vmem>>, vector<1x256xf32>
    %4 = vector.broadcast %3 : vector<1x256xf32> to vector<2x256xf32>
    %5 = arith.addf %2, %4 : vector<2x256xf32>
    %cst_5 = arith.constant 5.000000e-01 : f32
    %6 = vector.broadcast %cst_5 : f32 to vector<2x256xf32>
    %7 = arith.mulf %6, %5 : vector<2x256xf32>
    %cst_6 = arith.constant 0.707106769 : f32
    %8 = vector.broadcast %cst_6 : f32 to vector<2x256xf32>
    %9 = arith.mulf %5, %8 : vector<2x256xf32>
    %10 = math.erf %9 : vector<2x256xf32>
    %cst_7 = arith.constant 1.000000e+00 : f32
    %11 = vector.broadcast %cst_7 : f32 to vector<2x256xf32>
    %12 = arith.addf %11, %10 : vector<2x256xf32>
    %13 = arith.mulf %7, %12 : vector<2x256xf32>
    %c0_8 = arith.constant 0 : index
    %c0_9 = arith.constant 0 : index
    %14 = vector.load %arg4[%c0_8, %c0_9] : memref<256x3584xf32, #tpu.memory_space<vmem>>, vector<256x3584xf32>
    %cst_10 = arith.constant dense<0.000000e+00> : vector<2x3584xf32>
    %15 = tpu.matmul %13, %14, %cst_10 {dimension_numbers = #tpu.dot_dimension_numbers<[1], [0], [0], [1], [0, 0, 1, 1], [], []>} : vector<2x256xf32>, vector<256x3584xf32>, vector<2x3584xf32> -> vector<2x3584xf32>
    %c0_11 = arith.constant 0 : index
    %c0_12 = arith.constant 0 : index
    %16 = vector.load %arg5[%c0_11, %c0_12] : memref<1x3584xf32, #tpu.memory_space<vmem>>, vector<1x3584xf32>
    %17 = vector.broadcast %16 : vector<1x3584xf32> to vector<2x3584xf32>
    %18 = arith.addf %15, %17 : vector<2x3584xf32>
    %c0_13 = arith.constant 0 : index
    %c0_14 = arith.constant 0 : index
    %19 = vector.load %arg6[%c0_13, %c0_14] : memref<2x3584xf32, #tpu.memory_space<vmem>>, vector<2x3584xf32>
    tpu.vector_store %arg6[%c0_13, %c0_14], %18 {strides = array<i32>} : memref<2x3584xf32, #tpu.memory_space<vmem>>, vector<2x3584xf32>,
    return
  }
  func.func @transform_0(%arg0: i32) -> (i32, i32) {
    %c0_i32 = arith.constant 0 : i32
    %c0_i32_0 = arith.constant 0 : i32
    %c0_i32_1 = arith.constant 0 : i32
    return %c0_i32, %c0_i32_0 : i32, i32
  }
  func.func @transform_1(%arg0: i32) -> (i32, i32) {
    %c0_i32 = arith.constant 0 : i32
    %c0_i32_0 = arith.constant 0 : i32
    %c0_i32_1 = arith.constant 0 : i32
    return %c0_i32, %c0_i32_0 : i32, i32
  }
  func.func @transform_2(%arg0: i32) -> (i32, i32) {
    %c0_i32 = arith.constant 0 : i32
    %c0_i32_0 = arith.constant 0 : i32
    %c0_i32_1 = arith.constant 0 : i32
    return %c0_i32, %c0_i32_0 : i32, i32
  }
  func.func @transform_3(%arg0: i32) -> (i32, i32) {
    %c0_i32 = arith.constant 0 : i32
    %c0_i32_0 = arith.constant 0 : i32
    return %c0_i32, %arg0 : i32, i32
  }
  func.func @transform_4(%arg0: i32) -> (i32, i32) {
    %c0_i32 = arith.constant 0 : i32
    %c0_i32_0 = arith.constant 0 : i32
    return %c0_i32, %arg0 : i32, i32
  }
  func.func @transform_5(%arg0: i32) -> (i32, i32) {
    %c0_i32 = arith.constant 0 : i32
    %c0_i32_0 = arith.constant 0 : i32
    return %c0_i32, %arg0 : i32, i32
  }
}

</mosaic_0001>

<bundles_post_ra>
// kernel: audio_embedding_processor.3
= control target key start
LH: loop header
LB: loop body
LE: loop exit
PB: predicated region body
PF: predicated region fallthrough
CT: control target
= control target key end

     0   :  { %s5684_s0 = inlined_call_operand.vmem [shape: f32[2,512], index: 0, kind: input, shape index: {}]   ;;  %s5685_s1 = inlined_call_operand.hbm [shape: f32[512,256], index: 1, kind: input, shape index: {}]   ;;  %s5686_s2 = inlined_call_operand.hbm [shape: f32[1,256], index: 2, kind: input, shape index: {}]   ;;  %s5687_s3 = inlined_call_operand.hbm [shape: f32[256,78848], index: 3, kind: input, shape index: {}]   ;;  %s5688_s4 = inlined_call_operand.hbm [shape: f32[1,78848], index: 4, kind: input, shape index: {}]   ;;  %s5689_s5 = inlined_call_operand.hbm [shape: f32[2,78848], index: 5, kind: output, shape index: {}]  }
   0x1   :  { %5701 = sst [smem:[#allocation17_spill]] %s5685_s1 }
   0x2   :  { %5702 = sst [smem:[#allocation18_spill]] %s5687_s3 }
   0x3   :  { %10 = vsyncpa [#allocation3], 0 }
   0x4   :  { %11 = vsyncpa [#allocation6], 0 }
   0x5   :  { %12 = vsyncpa [#allocation4], 0 }
   0x6   :  { %14 = vsyncpa [#allocation4 + $0x1], 0  ;;  %s4310_s18 = smov 0   ;;  %s4312_s19 = smov 0  }
   0x7   :  { %s4314_s20 = smov 0   ;;  %s4316_s21 = smov 0  }
   0x8 LB: > { %s4331_s22 = sadd.s32 4294967295, %s4267_s21   ;;  %s2944_s23 = sadd.s32 4294967294, %s4267_s21   ;;  %s4267_s21 = sphi %s4316_s21, %s5731_s21   ;;  %s4263_s20 = sphi %s4314_s20, %s5735_s20   ;;  %s4259_s19 = sphi %s4312_s19, %s5734_s19   ;;  %s4255_s18 = sphi %s4310_s18, %s5733_s18  }
   0x9   : > { %s4335_s24 = sadd.s32 1, %s4267_s21   ;;  %s90_s25 = sadd.s32 1, %s4263_s20 }
   0xa   : > { %5703 = sst [smem:[#allocation14_spill]] %s4335_s24  ;;  %s87_s26 = ssub.s32 %s4267_s21, %s4335_s24 }
   0xb   : > { %p97_p0 = scmp.ne.s32.totalorder %s4263_s20, %s4259_s19  ;;  %p88_p1 = scmp.eq.s32.totalorder %s87_s26, 0 }
   0xc   : > { %p98_p2 = scmp.eq.s32.totalorder %s4267_s21, 0  ;;  %p103_p3 = scmp.ne.s32.totalorder %s4259_s19, %s4255_s18 }
   0xd   : > { %p5690_p4 = scmp.eq.s32.totalorder %s4331_s22, 0  ;;  %p153_p7 = scmp.eq.s32.totalorder %s4331_s22, 21 }
   0xe   : > { %s4347_s27 = scalar_select %p88_p1, %s4263_s20, %s90_s25  }
   0xf   : > { %p4349_p5 = por %p98_p2, %p97_p0  ;;  %p4355_p6 = por %p5690_p4, %p103_p3 }
  0x10   : > { %5704 = sst [smem:[#allocation15_spill]] %s4347_s27  ;;  %p159_p8 = scmp.eq.s32.totalorder %s2944_s23, 21 }
  0x11   : > { %s5705_s28 = scalar_select %p4349_p5, 1, 0 }
  0x12   : > { %s5706_s29 = scalar_select %p4355_p6, 1, 0 }
  0x13   : > { %p2945_p9 = scmp.ge.s32.totalorder %s4267_s21, 1  ;;  %p166_p10 = scmp.lt.s32.totalorder %s4267_s21, 23 }
  0x14   : > { %p4362_p11 = por %p153_p7, %p97_p0  ;;  %p4366_p12 = por %p159_p8, %p103_p3 }
  0x15   : > { %p4370_p13 = pnand %p2945_p9, %p166_p10  ;;  %s4269_s8 = smov [#allocation2]  }
  0x16   : > { %s5707_s30 = scalar_select %p4362_p11, 1, 0 }
  0x17   : > { %s5708_s6 = scalar_select %p4366_p12, 1, 0 }
  0x18   : > { %s5710_s7 = scalar_select %p4370_p13, 1, 0 }
  0x19   : > { %5709 = sst [smem:[#allocation16_spill]] %s5708_s6  ;;  %p4007_p1 = pneg %p4370_p13 }
  0x1a   : > { %s181_s9 = sshll.u32 %s4269_s8, 4  ;;  %s206_s11 = sand.u32 1, %s4267_s21   ;;  %s182_s9 = int_to_ptr.vmem [resolvable:$true] %s181_s9 }
  0x1b   : > { %p4378_p2 = pnand %p4007_p1, %p5690_p4  ;;  %s5712_s1 = sld [smem:[#allocation17_spill]] }
  0x1d   : > { %p5694_p7 = pneg %p4378_p2 }
  0x21   : > { %s4077_s14 = scalar_lea.hbm %s5712_s1, 16384 }
  0x22   : > { %p4078_p3 = scmp.ne.s32.totalorder %s5712_s1, %s4077_s14  ;;  %p4084_p10 = scmp.lt.u32.totalorder %s4077_s14, %s5712_s1 }
  0x24   : > { %p4080_p8 = pnand %p5694_p7, %p4078_p3 }
  0x26   : > { %p4081_p9 = pneg %p4080_p8 }
  0x28   : > { %p4086_p1 = pnand %p4084_p10, %p4081_p9 }
  0x2a   : > { %4089 = shalt.err (!%p4086_p1)
}
  0x2b   : > { %s4090_s25 = scalar_lea.vmem %s182_s9, 16384  ;;  %p4098_p11 = scmp.lt.s32.totalorder %s182_s9, %s182_s9 }
  0x2c   : > { %p4091_p4 = scmp.ne.s32.totalorder %s182_s9, %s4090_s25  ;;  %p4099_p6 = scmp.lt.s32.totalorder %s4090_s25, %s4090_s25 }
  0x2e   : > { %p4093_p0 = pnand %p4091_p4, %p5694_p7  ;;  %p4100_p13 = por %p4099_p6, %p4098_p11 }
  0x30   : > { %p4094_p12 = pneg %p4093_p0 }
  0x32   : > { %p4101_p5 = pnand %p4100_p13, %p4094_p12 }
  0x34   : > { %4104 = shalt.err (!%p4101_p5)
}
  0x35   : > { %s4270_s26 = smov 256   ;;  %s4271_s8 = smov 16  }
  0x36   : > { %4010 = dma.hbm_to_vmem [thread:$0]  (!%p4378_p2), %s5712_s1, 16384, %s182_s9, [#allocation3], %s4270_s26, %s4270_s26, %s4271_s8  }
  0x37   : > { %p5713_p4 = scmp.ne.s32.totalorder %s5705_s28, 0  ;;  %p5714_p0 = scmp.lt.s32.totalorder %s4267_s21, 22 }
  0x38   : > { %s208_s15 = sand.u32 1, %s4263_s20   ;;  %s2957_s17 = smul.u32 3584, %s4267_s21 }
  0x39   : > { %p4410_p3 = pnand %p5714_p0, %p5713_p4  ;;  %s3988_s16 = smul.u32 7168, %s208_s15 }
  0x3a   : > { %s5716_s3 = sld [smem:[#allocation18_spill]]  ;;  %s4425_s26 = scalar_lea.sflag [#allocation3], %s206_s11 }
  0x3b   : > { %s5715_s14 = scalar_select %p4410_p3, 1, 0 }
  0x3c   : > { %s210_s28 = scalar_lea.vmem [#allocation7], %s3988_s16  ;;  %p5698_p6 = pneg %p4410_p3 }
  0x3d   : > { %s217_s9 = sshll.u32 %s210_s28, 4  ;;  %s4423_s9 = int_to_ptr.vmem [resolvable:$true] %s217_s9 }
  0x40   : > { %s4421_s27 = scalar_lea.hbm %s5716_s3, %s2957_s17  ;;  %s4110_s17 = scalar_lea.hbm %s5716_s3, 2523136 }
  0x41   : > { %s4105_s8 = scalar_lea.hbm %s4421_s27, 114688  ;;  %p4111_p13 = scmp.lt.u32.totalorder %s4421_s27, %s5716_s3 }
  0x42   : > { %p4106_p5 = scmp.ne.s32.totalorder %s4421_s27, %s4105_s8  ;;  %p4112_p8 = scmp.lt.u32.totalorder %s4110_s17, %s4105_s8 }
  0x43   : > { %p4114_p10 = scmp.lt.u32.totalorder %s4105_s8, %s4421_s27 }
  0x44   : > { %p4108_p11 = pnand %p5698_p6, %p4106_p5  ;;  %p4113_p9 = por %p4112_p8, %p4111_p13 }
  0x46   : > { %p4109_p12 = pneg %p4108_p11  ;;  %p4115_p1 = por %p4114_p10, %p4113_p9 }
  0x48   : > { %p4116_p4 = pnand %p4115_p1, %p4109_p12 }
  0x4a   : > { %4119 = shalt.err (!%p4116_p4)
}
  0x4b   : > { %s4120_s11 = scalar_lea.vmem %s4423_s9, 114688  ;;  %s4272_s16 = smov [#allocation7]  }
  0x4c   : > { %p4121_p0 = scmp.ne.s32.totalorder %s4423_s9, %s4120_s11  ;;  %s4125_s28 = sshll.u32 %s4272_s16, 4  ;;  %s4126_s28 = int_to_ptr.vmem [resolvable:$false] %s4125_s28 }
  0x4d   : > { %s4127_s12 = scalar_lea.vmem %s4126_s28, 229376  ;;  %p4128_p7 = scmp.lt.s32.totalorder %s4423_s9, %s4126_s28 }
  0x4e   : > { %p4123_p5 = pnand %p4121_p0, %p5698_p6  ;;  %p4129_p13 = scmp.lt.s32.totalorder %s4127_s12, %s4120_s11 }
  0x50   : > { %p4124_p11 = pneg %p4123_p5  ;;  %p4130_p8 = por %p4129_p13, %p4128_p7 }
  0x52   : > { %p4131_p9 = pnand %p4130_p8, %p4124_p11 }
  0x54   : > { %4134 = shalt.err (!%p4131_p9)
}
  0x55   : > { %s4273_s8 = smov 78848   ;;  %s4274_s13 = smov 3584  }
  0x56   : > { %s4275_s17 = smov 224   ;;  %s3989_s23 = smul.u32 28, %s208_s15 }
  0x57   : > { %4017 = dma.hbm_to_vmem [thread:$0]  (!%p4410_p3), %s4421_s27, 114688, %s4423_s9, %s4425_s26, %s4273_s8, %s4274_s13, %s4275_s17  }
  0x58   : > { %s4276_s25 = smov [#allocation5]   ;;  %s2958_s11 = smul.u32 448, %s4267_s21 }
  0x59   : > { %s195_s16 = sshll.u32 %s4276_s25, 4  ;;  %s4135_s1 = scalar_lea.hbm %s5686_s2, 32  ;;  %s196_s16 = int_to_ptr.vmem [resolvable:$true] %s195_s16 }
  0x5a   : > { %p4136_p7 = scmp.ne.s32.totalorder %s5686_s2, %s4135_s1  ;;  %p5717_p12 = pneg %p4378_p2 }
  0x5b   : > { %p4142_p4 = scmp.lt.u32.totalorder %s4135_s1, %s5686_s2 }
  0x5c   : > { %p4138_p10 = pnand %p4136_p7, %p5717_p12 }
  0x5e   : > { %p4139_p1 = pneg %p4138_p10 }
  0x60   : > { %p4144_p0 = pnand %p4142_p4, %p4139_p1 }
  0x62   : > { %4147 = shalt.err (!%p4144_p0)
}
  0x63   : > { %s4148_s15 = scalar_lea.vmem %s196_s16, 32  ;;  %p5718_p11 = pmov %p5717_p12 }
  0x64   : > { %p4149_p5 = scmp.ne.s32.totalorder %s196_s16, %s4148_s15  ;;  %p4156_p9 = scmp.lt.s32.totalorder %s196_s16, %s196_s16 }
  0x65   : > { %p4157_p6 = scmp.lt.s32.totalorder %s4148_s15, %s4148_s15 }
  0x66   : > { %p4151_p13 = pnand %p4149_p5, %p5718_p11 }
  0x67   : > { %p4158_p3 = por %p4157_p6, %p4156_p9 }
  0x68   : > { %p4152_p8 = pneg %p4151_p13 }
  0x6a   : > { %p4159_p7 = pnand %p4158_p3, %p4152_p8 }
  0x6c   : > { %4162 = shalt.err (!%p4159_p7)
}
  0x6d   : > { %4013 = dma.hbm_to_vmem [thread:$0]  (!%p4378_p2), %s5686_s2, 32, %s196_s16, [#allocation6]  }
  0x6e   : > { %s4479_s9 = scalar_lea.hbm %s5688_s4, %s2958_s11  ;;  %s231_s8 = scalar_lea.vmem [#allocation8], %s3989_s23 }
  0x6f   : > { %s239_s13 = sshll.u32 %s231_s8, 4  ;;  %s4163_s17 = scalar_lea.hbm %s4479_s9, 448  ;;  %s240_s13 = int_to_ptr.vmem [resolvable:$true] %s239_s13 }
  0x70   : > { %p4164_p3 = scmp.ne.s32.totalorder %s4479_s9, %s4163_s17  ;;  %p5719_p6 = scmp.ne.s32.totalorder %s5715_s14, 0 }
  0x71   : > { %s4168_s16 = scalar_lea.hbm %s5688_s4, 9856  ;;  %p4169_p2 = scmp.lt.u32.totalorder %s4479_s9, %s5688_s4 }
  0x72   : > { %p5720_p12 = pneg %p5719_p6  ;;  %p4170_p4 = scmp.lt.u32.totalorder %s4168_s16, %s4163_s17 }
  0x73   : > { %p4172_p5 = scmp.lt.u32.totalorder %s4163_s17, %s4479_s9 }
  0x74   : > { %p4166_p10 = pnand %p4164_p3, %p5720_p12  ;;  %p4171_p0 = por %p4170_p4, %p4169_p2 }
  0x76   : > { %p4167_p1 = pneg %p4166_p10  ;;  %p4173_p11 = por %p4172_p5, %p4171_p0 }
  0x78   : > { %p4174_p13 = pnand %p4173_p11, %p4167_p1 }
  0x7a   : > { %4177 = shalt.err (!%p4174_p13)
}
  0x7b   : > { %s4178_s23 = scalar_lea.vmem %s240_s13, 448  ;;  %p5721_p9 = pmov %p5720_p12 }
  0x7c   : > { %p4179_p8 = scmp.ne.s32.totalorder %s240_s13, %s4178_s23  ;;  %s4277_s12 = smov [#allocation8]  }
  0x7d   : > { %s4183_s27 = sshll.u32 %s4277_s12, 4  ;;  %s4184_s27 = int_to_ptr.vmem [resolvable:$false] %s4183_s27 }
  0x7e   : > { %p4181_p7 = pnand %p4179_p8, %p5721_p9  ;;  %s4185_s15 = scalar_lea.vmem %s4184_s27, 896 }
  0x7f   : > { %p4186_p12 = scmp.lt.s32.totalorder %s240_s13, %s4184_s27  ;;  %p4187_p10 = scmp.lt.s32.totalorder %s4185_s15, %s4178_s23 }
  0x80   : > { %p4182_p3 = pneg %p4181_p7 }
  0x81   : > { %p4188_p2 = por %p4187_p10, %p4186_p12 }
  0x83   : > { %p4189_p4 = pnand %p4188_p2, %p4182_p3 }
  0x85   : > { %4192 = shalt.err (!%p4189_p4)
}
  0x86   : > { %4020 = dma.hbm_to_vmem [thread:$0]  (!%p5719_p6), %s4479_s9, 448, %s240_s13, %s4425_s26  }
  0x87   : > { %p5722_p1 = scmp.ne.s32.totalorder %s5710_s7, 0 }
  0x88   : > { %p5723_p0 = scmp.eq.s32.totalorder (!%p5722_p1), %s4331_s22, 0 }
  0x89   : > { %248 = sbr.rel (%p5722_p1) target bundleno = 1200 (0x4b0), region = 40 }
  0x90   : > { %4238 = dma.done.wait (%p5723_p0), [#allocation3], 16384   ;;  %p5724_p5 = pmov %p5723_p0 }
  0x91   : > { %p5725_p11 = pmov %p5723_p0 }
  0x92   : > { %4240 = vsyncadd (%p5724_p5), [#allocation3], 4294950912 }
  0x93   : > { %4242 = dma.done.wait (%p5725_p11), [#allocation6], 32   ;;  %p5726_p13 = pmov %p5723_p0 }
  0x94   : > { %s258_s14 = sand.u32 1, %s4331_s22   ;;  %s4513_s26 = sand.u32 1, %s4259_s19  }
  0x95   : > { %4244 = vsyncadd (%p5726_p13), [#allocation6], 4294967264  ;;  %s3990_s7 = smul.u32 7168, %s4513_s26  ;;  %s259_s3 = scalar_lea.sflag [#allocation3], %s258_s14 }
  0x96   : > { %p5727_p6 = scmp.ne.s32.totalorder %s5706_s29, 0 }
  0x97   : > { %s4516_s24 = scalar_lea.vmem [#allocation7], %s3990_s7 }
  0x98   : > { %4246 = dma.done.wait (%p5727_p6), %s259_s3, 115136  }
  0x99   : > { %4248 = vsyncadd (%p5727_p6), %s259_s3, 4294852160  ;;  %v308_v0 = vld [vmem:[#allocation2 + $0x8] sm:$0xff]  ;;  %v310_v1 = vld [vmem:[#allocation2 + $0x18] sm:$0xff]  ;;  %v437_v25 = vlaneseq  ;;  %v4278_v26 = vmov 1983009808   ;;  %s3991_s6 = smul.u32 28, %s4513_s26 }
  0x9a   : > { %v307_v2 = vld [vmem:[#allocation2] sm:$0xff]  ;;  %v2960_v3 = vpack.c.bf16 %v310_v1, %v308_v0  ;;  %v309_v4 = vld [vmem:[#allocation2 + $0x10] sm:$0xff]  ;;  %v312_v5 = vld [vmem:[#allocation2 + $0x28] sm:$0xff]  ;;  %v450_v27 = vunpack.c.l.s4 %v4278_v26  ;;  %s3992_s8 = smul.u32 56, %s4513_s26  ;;  %s2821_s11 = scalar_lea.sflag [#allocation4], %s4513_s26 }
  0x9b   : > { %v314_v6 = vld [vmem:[#allocation2 + $0x38] sm:$0xff]  ;;  %v2962_v7 = vpack.c.bf16 %v309_v4, %v307_v2  ;;  %v311_v9 = vld [vmem:[#allocation2 + $0x20] sm:$0xff]  ;;  %v313_v10 = vld [vmem:[#allocation2 + $0x30] sm:$0xff]  ;;  %v4522_v34 = vshrl.u32 %v437_v25, 7  ;;  %s5137_s9 = scalar_lea.vmem [#allocation8], %s3991_s6  ;;  %s2959_s17 = smul.u32 896, %s4331_s22 }
  0x9c   : > { %v2964_v8 = vpack.c.bf16 %v314_v6, %v312_v5  ;;  %v316_v11 = vld [vmem:[#allocation2 + $0x48] sm:$0xff]  ;;  %2961 = vmatprep.subr.bf16.mxu0 %v2960_v3  ;;  %v318_v12 = vld [vmem:[#allocation2 + $0x58] sm:$0xff]  ;;  %v2966_v13 = vpack.c.bf16 %v313_v10, %v311_v9  ;;  %v315_v15 = vld [vmem:[#allocation2 + $0x40] sm:$0xff]  ;;  %v451_v35 = vunpack.c.0.s8 %v450_v27  ;;  %s5360_s13 = scalar_lea.vmem [#allocation9], %s3992_s8  ;;  %p5728_p9 = scmp.ne.s32.totalorder %s5707_s30, 0 }
  0x9d   : > { %2963 = vmatpush1.bf16.msra.mxu0 %v2962_v7  ;;  %v2968_v14 = vpack.c.bf16 %v318_v12, %v316_v11  ;;  %v317_v16 = vld [vmem:[#allocation2 + $0x50] sm:$0xff]  ;;  %v320_v17 = vld [vmem:[#allocation2 + $0x68] sm:$0xff]  ;;  %v322_v18 = vld [vmem:[#allocation2 + $0x78] sm:$0xff]  ;;  %s2835_s10 = sshll.u32 %s5360_s13, 4  ;;  %s5640_s28 = scalar_lea.hbm %s5689_s5, %s2959_s17  ;;  %s5642_s10 = int_to_ptr.vmem [resolvable:$true] %s2835_s10 }
  0x9e   : > { %2965 = vmatprep.subr.bf16.mxu0 %v2964_v8  ;;  %v2970_v19 = vpack.c.bf16 %v317_v16, %v315_v15  ;;  %v2972_v20 = vpack.c.bf16 %v322_v18, %v320_v17  ;;  %v319_v21 = vld [vmem:[#allocation2 + $0x60] sm:$0xff]  ;;  %v321_v22 = vld [vmem:[#allocation2 + $0x70] sm:$0xff]  ;;  %v324_v23 = vld [vmem:[#allocation2 + $0x88] sm:$0xff]  ;;  %v4525_v42 = vsub.s32 %v451_v35, %v4522_v34  ;;  %s4193_s23 = scalar_lea.vmem %s5642_s10, 896  ;;  %s4279_s22 = smov [#allocation9]  }
  0x9f   : > { %v326_v24 = vld [vmem:[#allocation2 + $0x98] sm:$0xff]  ;;  %v2974_v28 = vpack.c.bf16 %v321_v22, %v319_v21  ;;  %v323_v30 = vld [vmem:[#allocation2 + $0x80] sm:$0xff]  ;;  %v325_v31 = vld [vmem:[#allocation2 + $0x90] sm:$0xff]  ;;  %p4194_p8 = scmp.ne.s32.totalorder %s5642_s10, %s4193_s23  ;;  %s4197_s12 = sshll.u32 %s4279_s22, 4  ;;  %s4198_s12 = int_to_ptr.vmem [resolvable:$false] %s4197_s12 }
  0xa0   : > { %v2976_v29 = vpack.c.bf16 %v326_v24, %v324_v23  ;;  %v328_v32 = vld [vmem:[#allocation2 + $0xa8] sm:$0xff]  ;;  %v330_v33 = vld [vmem:[#allocation2 + $0xb8] sm:$0xff]  ;;  %v2978_v36 = vpack.c.bf16 %v325_v31, %v323_v30  ;;  %v327_v38 = vld [vmem:[#allocation2 + $0xa0] sm:$0xff]  ;;  %s4199_s27 = scalar_lea.vmem %s4198_s12, 1792  ;;  %p4200_p12 = scmp.lt.s32.totalorder %s5642_s10, %s4198_s12 }
  0xa1   : > { %2967 = vmatpush1.bf16.msra.mxu0 %v2966_v13  ;;  %v2980_v37 = vpack.c.bf16 %v330_v33, %v328_v32  ;;  %v329_v39 = vld [vmem:[#allocation2 + $0xb0] sm:$0xff]  ;;  %v332_v40 = vld [vmem:[#allocation2 + $0xc8] sm:$0xff]  ;;  %v334_v41 = vld [vmem:[#allocation2 + $0xd8] sm:$0xff]  ;;  %p4195_p7 = pnand %p4194_p8, %p5728_p9  ;;  %p4201_p10 = scmp.lt.s32.totalorder %s4199_s27, %s4193_s23 }
  0xa2   : > { %2969 = vmatprep.subr.bf16.mxu0 %v2968_v14  ;;  %v2982_v43 = vpack.c.bf16 %v329_v39, %v327_v38  ;;  %v2984_v44 = vpack.c.bf16 %v334_v41, %v332_v40  ;;  %v331_v45 = vld [vmem:[#allocation2 + $0xc0] sm:$0xff]  ;;  %v333_v46 = vld [vmem:[#allocation2 + $0xd0] sm:$0xff]  ;;  %v336_v48 = vld [vmem:[#allocation2 + $0xe8] sm:$0xff] }
  0xa3   : > { %v4530_v47 = vld [vmem:[%s5684_s0] sm:$0xff]  ;;  %v338_v49 = vld [vmem:[#allocation2 + $0xf8] sm:$0xff]  ;;  %v2986_v51 = vpack.c.bf16 %v333_v46, %v331_v45  ;;  %v337_v55 = vld [vmem:[#allocation2 + $0xf0] sm:$0xff]  ;;  %p4196_p3 = pneg %p4195_p7  ;;  %p4202_p2 = por %p4201_p10, %p4200_p12 }
  0xa4   : > { %v4534_v50 = vrot.slane %v4530_v47, %v4525_v42  ;;  %v2988_v53 = vpack.c.bf16 %v338_v49, %v336_v48  ;;  %v335_v54 = vld [vmem:[#allocation2 + $0xe0] sm:$0xff]  ;;  %v340_v56 = vld [vmem:[#allocation2 + $0x108] sm:$0xff]  ;;  %v342_v57 = vld [vmem:[#allocation2 + $0x118] sm:$0xff] }
  0xa5   : > { %2971 = vmatpush1.bf16.msra.mxu0 %v2970_v19  ;;  %v2990_v58 = vpack.c.bf16 %v337_v55, %v335_v54  ;;  %v2992_v59 = vpack.c.bf16 %v342_v57, %v340_v56  ;;  %v339_v60 = vld [vmem:[#allocation2 + $0x100] sm:$0xff]  ;;  %v341_v61 = vld [vmem:[#allocation2 + $0x110] sm:$0xff]  ;;  %v344_v62 = vld [vmem:[#allocation2 + $0x128] sm:$0xff]  ;;  %p4203_p4 = pnand %p4202_p2, %p4196_p3 }
  0xa6   : > { %2973 = vmatprep.subr.bf16.mxu0 %v2972_v20  ;;  %v463_v52 = vcombine.high %v4534_v50, %v4534_v50  ;;  %v346_v63 = vld [vmem:[#allocation2 + $0x138] sm:$0xff]  ;;  %v2994_v0 = vpack.c.bf16 %v341_v61, %v339_v60  ;;  %v343_v2 = vld [vmem:[#allocation2 + $0x120] sm:$0xff]  ;;  %v345_v3 = vld [vmem:[#allocation2 + $0x130] sm:$0xff] }
  0xa7   : > { %v2996_v1 = vpack.c.bf16 %v346_v63, %v344_v62  ;;  %v348_v4 = vld [vmem:[#allocation2 + $0x148] sm:$0xff]  ;;  %v350_v5 = vld [vmem:[#allocation2 + $0x158] sm:$0xff]  ;;  %v2998_v6 = vpack.c.bf16 %v345_v3, %v343_v2  ;;  %v347_v8 = vld [vmem:[#allocation2 + $0x140] sm:$0xff] }
  0xa8   : > { %533 = vmatprep.mubr.f32.mxu0 %v463_v52  ;;  %v3000_v7 = vpack.c.bf16 %v350_v5, %v348_v4  ;;  %v349_v9 = vld [vmem:[#allocation2 + $0x150] sm:$0xff]  ;;  %v352_v10 = vld [vmem:[#allocation2 + $0x168] sm:$0xff]  ;;  %v354_v11 = vld [vmem:[#allocation2 + $0x178] sm:$0xff]  ;;  %v448_v4 = vcombine.high %v4530_v47, %v4530_v47 }
  0xa9   : > { %2975 = vmatpush1.bf16.msra.mxu0 %v2974_v28  ;;  %v3002_v12 = vpack.c.bf16 %v349_v9, %v347_v8  ;;  %v3004_v13 = vpack.c.bf16 %v354_v11, %v352_v10  ;;  %v351_v14 = vld [vmem:[#allocation2 + $0x160] sm:$0xff]  ;;  %v353_v15 = vld [vmem:[#allocation2 + $0x170] sm:$0xff]  ;;  %v356_v16 = vld [vmem:[#allocation2 + $0x188] sm:$0xff] }
  0xaa   : > { %2977 = vmatprep.subr.bf16.mxu0 %v2976_v29  ;;  %v358_v17 = vld [vmem:[#allocation2 + $0x198] sm:$0xff]  ;;  %v622_v18 = vld [vmem:[%s4516_s24 + $0x8] sm:$0xff]  ;;  %v3006_v20 = vpack.c.bf16 %v353_v15, %v351_v14  ;;  %v621_v22 = vld [vmem:[%s4516_s24] sm:$0xff]  ;;  %v4563_v47 = vrot.slane %v448_v4, %v4525_v42 }
  0xab   : > { %v650_v19 = vld [vmem:[%s4516_s24 + $0xe8] sm:$0xff]  ;;  %v649_v23 = vld [vmem:[%s4516_s24 + $0xe0] sm:$0xff]  ;;  %v3008_v24 = vpack.c.bf16 %v358_v17, %v356_v16  ;;  %v362_v30 = vld [vmem:[#allocation2 + $0x1b8] sm:$0xff] }
  0xac   : > { %v3088_v21 = vpack.c.bf16 %v650_v19, %v622_v18  ;;  %v355_v25 = vld [vmem:[#allocation2 + $0x180] sm:$0xff]  ;;  %v357_v26 = vld [vmem:[#allocation2 + $0x190] sm:$0xff]  ;;  %v3090_v27 = vpack.c.bf16 %v649_v23, %v621_v22  ;;  %v360_v29 = vld [vmem:[#allocation2 + $0x1a8] sm:$0xff] }
  0xad   : > { %2979 = vmatpush1.bf16.msra.mxu0 %v2978_v36  ;;  %v678_v28 = vld [vmem:[%s4516_s24 + $0x1c8] sm:$0xff]  ;;  %v677_v33 = vld [vmem:[%s4516_s24 + $0x1c0] sm:$0xff]  ;;  %v3010_v36 = vpack.c.bf16 %v357_v26, %v355_v25  ;;  %v3012_v40 = vpack.c.bf16 %v362_v30, %v360_v29  ;;  %v366_v48 = vld [vmem:[#allocation2 + $0x1d8] sm:$0xff]  ;;  %v464_v29 = vcombine.high %v4563_v47, %v4563_v47 }
  0xae   : > { %2981 = vmatprep.subr.bf16.mxu0 %v2980_v37  ;;  %3089 = vmatprep.subr.bf16.mxu1 %v3088_v21  ;;  %v706_v31 = vld [vmem:[%s4516_s24 + $0x2a8] sm:$0xff]  ;;  %v705_v35 = vld [vmem:[%s4516_s24 + $0x2a0] sm:$0xff]  ;;  %v370_v63 = vld [vmem:[#allocation2 + $0x1f8] sm:$0xff] }
  0xaf   : > { %3091 = vmatpush1.bf16.msra.mxu1 %v3090_v27  ;;  %v3092_v32 = vpack.c.bf16 %v706_v31, %v678_v28  ;;  %v3094_v37 = vpack.c.bf16 %v705_v35, %v677_v33  ;;  %v734_v38 = vld [vmem:[%s4516_s24 + $0x388] sm:$0xff]  ;;  %v359_v41 = vld [vmem:[#allocation2 + $0x1a0] sm:$0xff]  ;;  %v378_v23 = vld [vmem:[#allocation2 + $0x238] sm:$0xff] }
  0xb0   : > { %v762_v39 = vld [vmem:[%s4516_s24 + $0x468] sm:$0xff]  ;;  %v733_v45 = vld [vmem:[%s4516_s24 + $0x380] sm:$0xff] }
  0xb1   : > { %2983 = vmatpush1.bf16.msra.mxu0 %v2982_v43  ;;  %v361_v43 = vld [vmem:[#allocation2 + $0x1b0] sm:$0xff]  ;;  %3093 = vmatprep.subr.bf16.mxu1 %v3092_v32  ;;  %v364_v46 = vld [vmem:[#allocation2 + $0x1c8] sm:$0xff]  ;;  %v367_v3 = vld [vmem:[#allocation2 + $0x1e0] sm:$0xff] }
  0xb2   : > { %2985 = vmatprep.subr.bf16.mxu0 %v2984_v44  ;;  %v3096_v44 = vpack.c.bf16 %v762_v39, %v734_v38  ;;  %v761_v49 = vld [vmem:[%s4516_s24 + $0x460] sm:$0xff]  ;;  %v790_v52 = vld [vmem:[%s4516_s24 + $0x548] sm:$0xff]  ;;  %v3014_v54 = vpack.c.bf16 %v361_v43, %v359_v41  ;;  %v382_v39 = vld [vmem:[#allocation2 + $0x258] sm:$0xff] }
  0xb3   : > { %3095 = vmatpush1.bf16.msra.mxu1 %v3094_v37  ;;  %v789_v56 = vld [vmem:[%s4516_s24 + $0x540] sm:$0xff]  ;;  %v365_v60 = vld [vmem:[#allocation2 + $0x1d0] sm:$0xff] }
  0xb4   : > { %3097 = vmatprep.subr.bf16.mxu1 %v3096_v44  ;;  %v817_v57 = vld [vmem:[%s4516_s24 + $0x620] sm:$0xff]  ;;  %v846_v61 = vld [vmem:[%s4516_s24 + $0x708] sm:$0xff] }
  0xb5   : > { %2987 = vmatpush1.bf16.msra.mxu0 %v2986_v51  ;;  %v3098_v51 = vpack.c.bf16 %v761_v49, %v733_v45  ;;  %v368_v62 = vld [vmem:[#allocation2 + $0x1e8] sm:$0xff]  ;;  %v369_v9 = vld [vmem:[#allocation2 + $0x1f0] sm:$0xff]  ;;  %v375_v28 = vld [vmem:[#allocation2 + $0x220] sm:$0xff] }
  0xb6   : > { %2989 = vmatprep.subr.bf16.mxu0 %v2988_v53  ;;  %v818_v53 = vld [vmem:[%s4516_s24 + $0x628] sm:$0xff]  ;;  %v3020_v8 = vpack.c.bf16 %v370_v63, %v368_v62  ;;  %v3022_v15 = vpack.c.bf16 %v369_v9, %v367_v3  ;;  %v901_v17 = vld [vmem:[%s4516_s24 + $0x8c0] sm:$0xff] }
  0xb7   : > { %v3100_v55 = vpack.c.bf16 %v818_v53, %v790_v52  ;;  %3099 = vmatpush1.bf16.msra.mxu1 %v3098_v51  ;;  %v902_v10 = vld [vmem:[%s4516_s24 + $0x8c8] sm:$0xff]  ;;  %v929_v18 = vld [vmem:[%s4516_s24 + $0x9a0] sm:$0xff]  ;;  %v386_v53 = vld [vmem:[#allocation2 + $0x278] sm:$0xff] }
  0xb8   : > { %v930_v11 = vld [vmem:[%s4516_s24 + $0x9a8] sm:$0xff]  ;;  %v3110_v26 = vpack.c.bf16 %v929_v18, %v901_v17  ;;  %v957_v30 = vld [vmem:[%s4516_s24 + $0xa80] sm:$0xff] }
  0xb9   : > { %2991 = vmatpush1.bf16.msra.mxu0 %v2990_v58  ;;  %v3016_v58 = vpack.c.bf16 %v366_v48, %v364_v46  ;;  %3101 = vmatprep.subr.bf16.mxu1 %v3100_v55  ;;  %v3108_v16 = vpack.c.bf16 %v930_v11, %v902_v10  ;;  %v373_v21 = vld [vmem:[#allocation2 + $0x210] sm:$0xff]  ;;  %v376_v22 = vld [vmem:[#allocation2 + $0x228] sm:$0xff]  ;;  %v379_v43 = vld [vmem:[#allocation2 + $0x240] sm:$0xff] }
  0xba   : > { %2993 = vmatprep.subr.bf16.mxu0 %v2992_v59  ;;  %v363_v59 = vld [vmem:[#allocation2 + $0x1c0] sm:$0xff]  ;;  %v986_v25 = vld [vmem:[%s4516_s24 + $0xb68] sm:$0xff]  ;;  %v3028_v32 = vpack.c.bf16 %v378_v23, %v376_v22  ;;  %v398_v23 = vld [vmem:[#allocation2 + $0x2d8] sm:$0xff] }
  0xbb   : > { %v3018_v2 = vpack.c.bf16 %v365_v60, %v363_v59  ;;  %v985_v31 = vld [vmem:[%s4516_s24 + $0xb60] sm:$0xff]  ;;  %v377_v33 = vld [vmem:[#allocation2 + $0x230] sm:$0xff] }
  0xbc   : > { %v1042_v37 = vld [vmem:[%s4516_s24 + $0xd28] sm:$0xff]  ;;  %v3030_v41 = vpack.c.bf16 %v377_v33, %v375_v28  ;;  %v1013_v45 = vld [vmem:[%s4516_s24 + $0xc40] sm:$0xff] }
  0xbd   : > { %2995 = vmatpush1.bf16.msra.mxu0 %v2994_v0  ;;  %v874_v0 = vld [vmem:[%s4516_s24 + $0x7e8] sm:$0xff]  ;;  %v1041_v46 = vld [vmem:[%s4516_s24 + $0xd20] sm:$0xff] }
  0xbe   : > { %2997 = vmatprep.subr.bf16.mxu0 %v2996_v1  ;;  %v3102_v1 = vpack.c.bf16 %v817_v57, %v789_v56  ;;  %v3104_v5 = vpack.c.bf16 %v874_v0, %v846_v61  ;;  %v380_v38 = vld [vmem:[#allocation2 + $0x248] sm:$0xff]  ;;  %v381_v49 = vld [vmem:[#allocation2 + $0x250] sm:$0xff]  ;;  %v383_v56 = vld [vmem:[#allocation2 + $0x260] sm:$0xff] }
  0xbf   : > { %v3032_v48 = vpack.c.bf16 %v382_v39, %v380_v38  ;;  %v1070_v51 = vld [vmem:[%s4516_s24 + $0xe08] sm:$0xff]  ;;  %v3034_v55 = vpack.c.bf16 %v381_v49, %v379_v43  ;;  %v1097_v59 = vld [vmem:[%s4516_s24 + $0xee0] sm:$0xff] }
  0xc0   : > { %3103 = vmatpush1.bf16.msra.mxu1 %v3102_v1  ;;  %v1098_v52 = vld [vmem:[%s4516_s24 + $0xee8] sm:$0xff]  ;;  %v390_v1 = vld [vmem:[#allocation2 + $0x298] sm:$0xff]  ;;  %v387_v4 = vld [vmem:[#allocation2 + $0x280] sm:$0xff] }
  0xc1   : > { %2999 = vmatpush1.bf16.msra.mxu0 %v2998_v6  ;;  %v845_v6 = vld [vmem:[%s4516_s24 + $0x700] sm:$0xff]  ;;  %3105 = vmatprep.subr.bf16.mxu1 %v3104_v5  ;;  %v3120_v57 = vpack.c.bf16 %v1098_v52, %v1070_v51  ;;  %v385_v61 = vld [vmem:[#allocation2 + $0x270] sm:$0xff]  ;;  %v414_v52 = vld [vmem:[#allocation2 + $0x358] sm:$0xff] }
  0xc2   : > { %3001 = vmatprep.subr.bf16.mxu0 %v3000_v7  ;;  %v873_v7 = vld [vmem:[%s4516_s24 + $0x7e0] sm:$0xff]  ;;  %v1126_v62 = vld [vmem:[%s4516_s24 + $0xfc8] sm:$0xff]  ;;  %v3038_v3 = vpack.c.bf16 %v385_v61, %v383_v56 }
  0xc3   : > { %v3106_v14 = vpack.c.bf16 %v873_v7, %v845_v6  ;;  %v1154_v63 = vld [vmem:[%s4516_s24 + $0x10a8] sm:$0xff]  ;;  %v1125_v6 = vld [vmem:[%s4516_s24 + $0xfc0] sm:$0xff] }
  0xc4   : > { %v388_v0 = vld [vmem:[#allocation2 + $0x288] sm:$0xff]  ;;  %v3124_v5 = vpack.c.bf16 %v1154_v63, %v1126_v62  ;;  %v389_v9 = vld [vmem:[#allocation2 + $0x290] sm:$0xff]  ;;  %v399_v33 = vld [vmem:[#allocation2 + $0x2e0] sm:$0xff] }
  0xc5   : > { %3003 = vmatpush1.bf16.msra.mxu0 %v3002_v12  ;;  %v372_v12 = vld [vmem:[#allocation2 + $0x208] sm:$0xff]  ;;  %3107 = vmatpush1.bf16.msra.mxu1 %v3106_v14  ;;  %v397_v28 = vld [vmem:[#allocation2 + $0x2d0] sm:$0xff]  ;;  %v422_v63 = vld [vmem:[#allocation2 + $0x398] sm:$0xff] }
  0xc6   : > { %3005 = vmatprep.subr.bf16.mxu0 %v3004_v13  ;;  %v374_v13 = vld [vmem:[#allocation2 + $0x218] sm:$0xff]  ;;  %3109 = vmatprep.subr.bf16.mxu1 %v3108_v16  ;;  %v1153_v7 = vld [vmem:[%s4516_s24 + $0x10a0] sm:$0xff]  ;;  %v1182_v10 = vld [vmem:[%s4516_s24 + $0x1188] sm:$0xff] }
  0xc7   : > { %v3024_v19 = vpack.c.bf16 %v374_v13, %v372_v12  ;;  %v1210_v11 = vld [vmem:[%s4516_s24 + $0x1268] sm:$0xff]  ;;  %v394_v13 = vld [vmem:[#allocation2 + $0x2b8] sm:$0xff]  ;;  %v3126_v14 = vpack.c.bf16 %v1153_v7, %v1125_v6  ;;  %v1181_v17 = vld [vmem:[%s4516_s24 + $0x1180] sm:$0xff] }
  0xc8   : > { %v392_v12 = vld [vmem:[#allocation2 + $0x2a8] sm:$0xff]  ;;  %v3128_v16 = vpack.c.bf16 %v1210_v11, %v1182_v10  ;;  %v409_v49 = vld [vmem:[#allocation2 + $0x330] sm:$0xff]  ;;  %v430_v11 = vld [vmem:[#allocation2 + $0x3d8] sm:$0xff] }
  0xc9   : > { %3007 = vmatpush1.bf16.msra.mxu0 %v3006_v20  ;;  %v371_v20 = vld [vmem:[#allocation2 + $0x200] sm:$0xff]  ;;  %3111 = vmatpush1.bf16.msra.mxu1 %v3110_v26  ;;  %v396_v22 = vld [vmem:[#allocation2 + $0x2c8] sm:$0xff]  ;;  %v417_v61 = vld [vmem:[#allocation2 + $0x370] sm:$0xff] }
  0xca   : > { %3009 = vmatprep.subr.bf16.mxu0 %v3008_v24  ;;  %v958_v24 = vld [vmem:[%s4516_s24 + $0xa88] sm:$0xff]  ;;  %v3026_v27 = vpack.c.bf16 %v373_v21, %v371_v20  ;;  %v1209_v18 = vld [vmem:[%s4516_s24 + $0x1260] sm:$0xff]  ;;  %v3048_v26 = vpack.c.bf16 %v398_v23, %v396_v22 }
  0xcb   : > { %v3112_v35 = vpack.c.bf16 %v986_v25, %v958_v24  ;;  %v391_v20 = vld [vmem:[#allocation2 + $0x2a0] sm:$0xff]  ;;  %v393_v21 = vld [vmem:[#allocation2 + $0x2b0] sm:$0xff]  ;;  %v3130_v24 = vpack.c.bf16 %v1209_v18, %v1181_v17  ;;  %v408_v43 = vld [vmem:[#allocation2 + $0x328] sm:$0xff] }
  0xcc   : > { %v3046_v25 = vpack.c.bf16 %v393_v21, %v391_v20  ;;  %v412_v51 = vld [vmem:[#allocation2 + $0x348] sm:$0xff]  ;;  %v434_v17 = vld [vmem:[#allocation2 + $0x3f8] sm:$0xff]  ;;  %v431_v20 = vld [vmem:[#allocation2 + $0x3e0] sm:$0xff] }
  0xcd   : > { %3011 = vmatpush1.bf16.msra.mxu0 %v3010_v36  ;;  %v1014_v36 = vld [vmem:[%s4516_s24 + $0xc48] sm:$0xff]  ;;  %3113 = vmatprep.subr.bf16.mxu1 %v3112_v35 }
  0xce   : > { %3013 = vmatprep.subr.bf16.mxu0 %v3012_v40  ;;  %v3114_v40 = vpack.c.bf16 %v985_v31, %v957_v30  ;;  %v3116_v44 = vpack.c.bf16 %v1042_v37, %v1014_v36  ;;  %v402_v30 = vld [vmem:[#allocation2 + $0x2f8] sm:$0xff]  ;;  %v401_v35 = vld [vmem:[#allocation2 + $0x2f0] sm:$0xff]  ;;  %v404_v36 = vld [vmem:[#allocation2 + $0x308] sm:$0xff] }
  0xcf   : > { %v406_v37 = vld [vmem:[#allocation2 + $0x318] sm:$0xff]  ;;  %v3054_v38 = vpack.c.bf16 %v401_v35, %v399_v33  ;;  %v416_v56 = vld [vmem:[#allocation2 + $0x368] sm:$0xff]  ;;  %v433_v21 = vld [vmem:[#allocation2 + $0x3f0] sm:$0xff] }
  0xd0   : > { %3115 = vmatpush1.bf16.msra.mxu1 %v3114_v40  ;;  %v3056_v39 = vpack.c.bf16 %v406_v37, %v404_v36  ;;  %v403_v40 = vld [vmem:[#allocation2 + $0x300] sm:$0xff]  ;;  %v420_v62 = vld [vmem:[#allocation2 + $0x388] sm:$0xff] }
  0xd1   : > { %3015 = vmatpush1.bf16.msra.mxu0 %v3014_v54  ;;  %v3118_v54 = vpack.c.bf16 %v1041_v46, %v1013_v45  ;;  %3117 = vmatprep.subr.bf16.mxu1 %v3116_v44  ;;  %v410_v44 = vld [vmem:[#allocation2 + $0x338] sm:$0xff]  ;;  %v428_v10 = vld [vmem:[#allocation2 + $0x3c8] sm:$0xff] }
  0xd2   : > { %3017 = vmatprep.subr.bf16.mxu0 %v3016_v58  ;;  %v1069_v58 = vld [vmem:[%s4516_s24 + $0xe00] sm:$0xff]  ;;  %v3060_v46 = vpack.c.bf16 %v410_v44, %v408_v43  ;;  %v626_v22 = vld [vmem:[%s4516_s24 + $0x28] sm:$0xff] }
  0xd3   : > { %v654_v23 = vld [vmem:[%s4516_s24 + $0x108] sm:$0xff]  ;;  %v709_v33 = vld [vmem:[%s4516_s24 + $0x2c0] sm:$0xff] }
  0xd4   : > { %3119 = vmatpush1.bf16.msra.mxu1 %v3118_v54  ;;  %v411_v54 = vld [vmem:[#allocation2 + $0x340] sm:$0xff]  ;;  %v738_v35 = vld [vmem:[%s4516_s24 + $0x3a8] sm:$0xff] }
  0xd5   : > { %3019 = vmatpush1.bf16.msra.mxu0 %v3018_v2  ;;  %v3122_v2 = vpack.c.bf16 %v1097_v59, %v1069_v58  ;;  %3121 = vmatprep.subr.bf16.mxu1 %v3120_v57  ;;  %v418_v57 = vld [vmem:[#allocation2 + $0x378] sm:$0xff]  ;;  %v766_v36 = vld [vmem:[%s4516_s24 + $0x488] sm:$0xff] }
  0xd6   : > { %3021 = vmatprep.subr.bf16.mxu0 %v3020_v8  ;;  %v3040_v8 = vpack.c.bf16 %v390_v1, %v388_v0  ;;  %v3068_v59 = vpack.c.bf16 %v418_v57, %v416_v56  ;;  %v3072_v1 = vpack.c.bf16 %v422_v63, %v420_v62  ;;  %v822_v43 = vld [vmem:[%s4516_s24 + $0x648] sm:$0xff] }
  0xd8   : > { %3123 = vmatpush1.bf16.msra.mxu1 %v3122_v2  ;;  %v419_v2 = vld [vmem:[#allocation2 + $0x380] sm:$0xff] }
  0xd9   : > { %3023 = vmatpush1.bf16.msra.mxu0 %v3022_v15  ;;  %v3042_v15 = vpack.c.bf16 %v389_v9, %v387_v4  ;;  %3125 = vmatprep.subr.bf16.mxu1 %v3124_v5  ;;  %v424_v4 = vld [vmem:[#allocation2 + $0x3a8] sm:$0xff]  ;;  %v426_v5 = vld [vmem:[#allocation2 + $0x3b8] sm:$0xff]  ;;  %v425_v9 = vld [vmem:[#allocation2 + $0x3b0] sm:$0xff] }
  0xda   : > { %3025 = vmatprep.subr.bf16.mxu0 %v3024_v19  ;;  %v3044_v19 = vpack.c.bf16 %v394_v13, %v392_v12  ;;  %v3076_v7 = vpack.c.bf16 %v426_v5, %v424_v4  ;;  %v3080_v13 = vpack.c.bf16 %v430_v11, %v428_v10 }
  0xdc   : > { %534 = vmatmul.mubr.f32.vlgmr.msra.gmra.mrb[0].mxu0 %v4534_v50  ;;  %v384_v50 = vld [vmem:[#allocation2 + $0x268] sm:$0xff]  ;;  %3127 = vmatpush1.bf16.msra.mxu1 %v3126_v14  ;;  %v427_v14 = vld [vmem:[#allocation2 + $0x3c0] sm:$0xff] }
  0xdd   : > { %3027 = vmatpush1.bf16.msra.mxu0 %v3026_v27  ;;  %604 = vmatprep.mubr.f32.mxu0 %v464_v29  ;;  %v3036_v60 = vpack.c.bf16 %v386_v53, %v384_v50  ;;  %v395_v27 = vld [vmem:[#allocation2 + $0x2c0] sm:$0xff]  ;;  %v400_v29 = vld [vmem:[#allocation2 + $0x2e8] sm:$0xff]  ;;  %v3064_v53 = vpack.c.bf16 %v414_v52, %v412_v51 }
  0xde   : > { %3029 = vmatprep.subr.bf16.mxu0 %v3028_v32  ;;  %3129 = vmatprep.subr.bf16.mxu1 %v3128_v16  ;;  %v3050_v31 = vpack.c.bf16 %v397_v28, %v395_v27  ;;  %v3052_v32 = vpack.c.bf16 %v402_v30, %v400_v29  ;;  %v432_v16 = vld [vmem:[#allocation2 + $0x3e8] sm:$0xff] }
  0xdf   : > { %v653_v27 = vld [vmem:[%s4516_s24 + $0x100] sm:$0xff]  ;;  %v682_v28 = vld [vmem:[%s4516_s24 + $0x1e8] sm:$0xff] }
  0xe0   : > { %3131 = vmatpush1.bf16.msra.mxu1 %v3130_v24  ;;  %v3086_v24 = vpack.c.bf16 %v433_v21, %v431_v20  ;;  %v710_v29 = vld [vmem:[%s4516_s24 + $0x2c8] sm:$0xff] }
  0xe1   : > { %3031 = vmatpush1.bf16.msra.mxu0 %v3030_v41  ;;  %v405_v41 = vld [vmem:[#allocation2 + $0x310] sm:$0xff] }
  0xe2   : > { %3033 = vmatprep.subr.bf16.mxu0 %v3032_v48  ;;  %v3058_v45 = vpack.c.bf16 %v405_v41, %v403_v40  ;;  %v407_v48 = vld [vmem:[#allocation2 + $0x320] sm:$0xff]  ;;  %v794_v41 = vld [vmem:[%s4516_s24 + $0x568] sm:$0xff] }
  0xe3   : > { %v3062_v50 = vpack.c.bf16 %v409_v49, %v407_v48  ;;  %v765_v40 = vld [vmem:[%s4516_s24 + $0x480] sm:$0xff]  ;;  %v850_v48 = vld [vmem:[%s4516_s24 + $0x728] sm:$0xff] }
  0xe4   : > { %v878_v49 = vld [vmem:[%s4516_s24 + $0x808] sm:$0xff] }
  0xe5   : > { %3035 = vmatpush1.bf16.msra.mxu0 %v3034_v55  ;;  %v413_v55 = vld [vmem:[#allocation2 + $0x350] sm:$0xff]  ;;  %v3232_v52 = vpack.c.bf16 %v878_v49, %v850_v48 }
  0xe6   : > { %3037 = vmatprep.subr.bf16.mxu0 %v3036_v60  ;;  %v3066_v58 = vpack.c.bf16 %v413_v55, %v411_v54  ;;  %v415_v60 = vld [vmem:[#allocation2 + $0x360] sm:$0xff]  ;;  %v906_v54 = vld [vmem:[%s4516_s24 + $0x8e8] sm:$0xff] }
  0xe7   : > { %v3070_v0 = vpack.c.bf16 %v417_v61, %v415_v60  ;;  %v934_v55 = vld [vmem:[%s4516_s24 + $0x9c8] sm:$0xff] }
  0xe8   : > { %v3236_v57 = vpack.c.bf16 %v934_v55, %v906_v54  ;;  %v962_v60 = vld [vmem:[%s4516_s24 + $0xaa8] sm:$0xff] }
  0xe9   : > { %3039 = vmatpush1.bf16.msra.mxu0 %v3038_v3  ;;  %v421_v3 = vld [vmem:[#allocation2 + $0x390] sm:$0xff] }
  0xea   : > { %3041 = vmatprep.subr.bf16.mxu0 %v3040_v8  ;;  %v3074_v6 = vpack.c.bf16 %v421_v3, %v419_v2  ;;  %v423_v8 = vld [vmem:[#allocation2 + $0x3a0] sm:$0xff]  ;;  %v990_v61 = vld [vmem:[%s4516_s24 + $0xb88] sm:$0xff] }
  0xeb   : > { %v3078_v12 = vpack.c.bf16 %v425_v9, %v423_v8  ;;  %v3240_v63 = vpack.c.bf16 %v990_v61, %v962_v60  ;;  %v1018_v2 = vld [vmem:[%s4516_s24 + $0xc68] sm:$0xff] }
  0xec   : > { %v1046_v3 = vld [vmem:[%s4516_s24 + $0xd48] sm:$0xff] }
  0xed   : > { %3043 = vmatpush1.bf16.msra.mxu0 %v3042_v15  ;;  %v429_v15 = vld [vmem:[#allocation2 + $0x3d0] sm:$0xff]  ;;  %v3244_v5 = vpack.c.bf16 %v1046_v3, %v1018_v2 }
  0xee   : > { %3045 = vmatprep.subr.bf16.mxu0 %v3044_v19  ;;  %v3082_v18 = vpack.c.bf16 %v429_v15, %v427_v14  ;;  %v3084_v19 = vpack.c.bf16 %v434_v17, %v432_v16  ;;  %v1074_v8 = vld [vmem:[%s4516_s24 + $0xe28] sm:$0xff] }
  0xef   : > { %v1102_v9 = vld [vmem:[%s4516_s24 + $0xf08] sm:$0xff] }
  0xf0   : > { %v3248_v11 = vpack.c.bf16 %v1102_v9, %v1074_v8  ;;  %v1130_v14 = vld [vmem:[%s4516_s24 + $0xfe8] sm:$0xff] }
  0xf1   : > { %3047 = vmatpush1.bf16.msra.mxu0 %v3046_v25  ;;  %v3216_v25 = vpack.c.bf16 %v654_v23, %v626_v22  ;;  %v1158_v15 = vld [vmem:[%s4516_s24 + $0x10c8] sm:$0xff] }
  0xf2   : > { %3049 = vmatprep.subr.bf16.mxu0 %v3048_v26  ;;  %v625_v26 = vld [vmem:[%s4516_s24 + $0x20] sm:$0xff]  ;;  %v3252_v17 = vpack.c.bf16 %v1158_v15, %v1130_v14  ;;  %v1186_v20 = vld [vmem:[%s4516_s24 + $0x11a8] sm:$0xff] }
  0xf3   : > { %v3218_v30 = vpack.c.bf16 %v653_v27, %v625_v26  ;;  %v1214_v21 = vld [vmem:[%s4516_s24 + $0x1288] sm:$0xff] }
  0xf4   : > { %v3256_v23 = vpack.c.bf16 %v1214_v21, %v1186_v20  ;;  %v1238_v27 = vld [vmem:[%s4516_s24 + $0x1348] sm:$0xff] }
  0xf5   : > { %3051 = vmatpush1.bf16.msra.mxu0 %v3050_v31  ;;  %v3220_v31 = vpack.c.bf16 %v710_v29, %v682_v28  ;;  %v1266_v28 = vld [vmem:[%s4516_s24 + $0x1428] sm:$0xff] }
  0xf6   : > { %3053 = vmatprep.subr.bf16.mxu0 %v3052_v32  ;;  %v681_v32 = vld [vmem:[%s4516_s24 + $0x1e0] sm:$0xff]  ;;  %v1242_v29 = vld [vmem:[%s4516_s24 + $0x1368] sm:$0xff] }
  0xf7   : > { %v3222_v37 = vpack.c.bf16 %v709_v33, %v681_v32  ;;  %v1237_v32 = vld [vmem:[%s4516_s24 + $0x1340] sm:$0xff]  ;;  %v1378_v54 = vld [vmem:[%s4516_s24 + $0x17a8] sm:$0xff] }
  0xf8   : > { %v1265_v33 = vld [vmem:[%s4516_s24 + $0x1420] sm:$0xff]  ;;  %v1354_v55 = vld [vmem:[%s4516_s24 + $0x16e8] sm:$0xff] }
  0xf9   : > { %3055 = vmatpush1.bf16.msra.mxu0 %v3054_v38  ;;  %v3224_v38 = vpack.c.bf16 %v766_v36, %v738_v35  ;;  %v3134_v36 = vpack.c.bf16 %v1265_v33, %v1237_v32  ;;  %v1434_v2 = vld [vmem:[%s4516_s24 + $0x1968] sm:$0xff]  ;;  %v435_v32 = vld [vmem:[#allocation5] sm:$0x3]  ;;  %v4683_v33 = vsub.s32 1, %v4522_v34 }
  0xfa   : > { %3057 = vmatprep.subr.bf16.mxu0 %v3056_v39  ;;  %v737_v39 = vld [vmem:[%s4516_s24 + $0x3a0] sm:$0xff]  ;;  %v1410_v3 = vld [vmem:[%s4516_s24 + $0x18a8] sm:$0xff] }
  0xfb   : > { %v3226_v44 = vpack.c.bf16 %v765_v40, %v737_v39  ;;  %v1294_v40 = vld [vmem:[%s4516_s24 + $0x1508] sm:$0xff] }
  0xfc   : > { %v1490_v14 = vld [vmem:[%s4516_s24 + $0x1b28] sm:$0xff] }
  0xfd   : > { %3059 = vmatpush1.bf16.msra.mxu0 %v3058_v45  ;;  %v3228_v45 = vpack.c.bf16 %v822_v43, %v794_v41  ;;  %v1322_v41 = vld [vmem:[%s4516_s24 + $0x15e8] sm:$0xff] }
  0xfe   : > { %3061 = vmatprep.subr.bf16.mxu0 %v3060_v46  ;;  %v793_v46 = vld [vmem:[%s4516_s24 + $0x560] sm:$0xff]  ;;  %v1298_v43 = vld [vmem:[%s4516_s24 + $0x1528] sm:$0xff] }
  0xff   : > { %v1466_v15 = vld [vmem:[%s4516_s24 + $0x1a68] sm:$0xff] }
 0x101   : > { %3063 = vmatpush1.bf16.msra.mxu0 %v3062_v50  ;;  %v849_v50 = vld [vmem:[%s4516_s24 + $0x720] sm:$0xff] }
 0x102   : > { %3065 = vmatprep.subr.bf16.mxu0 %v3064_v53  ;;  %v877_v53 = vld [vmem:[%s4516_s24 + $0x800] sm:$0xff] }
 0x103   : > { %v3234_v56 = vpack.c.bf16 %v877_v53, %v849_v50  ;;  %v1350_v53 = vld [vmem:[%s4516_s24 + $0x16c8] sm:$0xff] }
 0x105   : > { %3067 = vmatpush1.bf16.msra.mxu0 %v3066_v58  ;;  %v905_v58 = vld [vmem:[%s4516_s24 + $0x8e0] sm:$0xff] }
 0x106   : > { %3069 = vmatprep.subr.bf16.mxu0 %v3068_v59  ;;  %v933_v59 = vld [vmem:[%s4516_s24 + $0x9c0] sm:$0xff] }
 0x107   : > { %v3238_v62 = vpack.c.bf16 %v933_v59, %v905_v58  ;;  %v1349_v58 = vld [vmem:[%s4516_s24 + $0x16c0] sm:$0xff] }
 0x108   : > { %v1377_v59 = vld [vmem:[%s4516_s24 + $0x17a0] sm:$0xff] }
 0x109   : > { %3071 = vmatpush1.bf16.msra.mxu0 %v3070_v0  ;;  %v961_v0 = vld [vmem:[%s4516_s24 + $0xaa0] sm:$0xff]  ;;  %v3142_v61 = vpack.c.bf16 %v1377_v59, %v1349_v58 }
 0x10a   : > { %3073 = vmatprep.subr.bf16.mxu0 %v3072_v1  ;;  %v989_v1 = vld [vmem:[%s4516_s24 + $0xb80] sm:$0xff] }
 0x10b   : > { %v3242_v4 = vpack.c.bf16 %v989_v1, %v961_v0  ;;  %v1406_v1 = vld [vmem:[%s4516_s24 + $0x1888] sm:$0xff] }
 0x10d   : > { %3075 = vmatpush1.bf16.msra.mxu0 %v3074_v6  ;;  %v1017_v6 = vld [vmem:[%s4516_s24 + $0xc60] sm:$0xff] }
 0x10e   : > { %3077 = vmatprep.subr.bf16.mxu0 %v3076_v7  ;;  %v1045_v7 = vld [vmem:[%s4516_s24 + $0xd40] sm:$0xff] }
 0x10f   : > { %v3246_v10 = vpack.c.bf16 %v1045_v7, %v1017_v6  ;;  %v1405_v6 = vld [vmem:[%s4516_s24 + $0x1880] sm:$0xff] }
 0x110   : > { %v1433_v7 = vld [vmem:[%s4516_s24 + $0x1960] sm:$0xff] }
 0x111   : > { %3079 = vmatpush1.bf16.msra.mxu0 %v3078_v12  ;;  %v1073_v12 = vld [vmem:[%s4516_s24 + $0xe20] sm:$0xff]  ;;  %v3146_v9 = vpack.c.bf16 %v1433_v7, %v1405_v6  ;;  %v742_v6 = vld [vmem:[%s4516_s24 + $0x3c8] sm:$0xff] }
 0x112   : > { %3081 = vmatprep.subr.bf16.mxu0 %v3080_v13  ;;  %v1101_v13 = vld [vmem:[%s4516_s24 + $0xf00] sm:$0xff]  ;;  %v770_v7 = vld [vmem:[%s4516_s24 + $0x4a8] sm:$0xff] }
 0x113   : > { %v3250_v16 = vpack.c.bf16 %v1101_v13, %v1073_v12  ;;  %v1462_v13 = vld [vmem:[%s4516_s24 + $0x1a48] sm:$0xff] }
 0x115   : > { %3083 = vmatpush1.bf16.msra.mxu0 %v3082_v18  ;;  %v1129_v18 = vld [vmem:[%s4516_s24 + $0xfe0] sm:$0xff] }
 0x116   : > { %3085 = vmatprep.subr.bf16.mxu0 %v3084_v19  ;;  %v1157_v19 = vld [vmem:[%s4516_s24 + $0x10c0] sm:$0xff] }
 0x117   : > { %v3254_v22 = vpack.c.bf16 %v1157_v19, %v1129_v18  ;;  %v1461_v18 = vld [vmem:[%s4516_s24 + $0x1a40] sm:$0xff] }
 0x118   : > { %v1489_v19 = vld [vmem:[%s4516_s24 + $0x1b20] sm:$0xff] }
 0x119   : > { %3087 = vmatpush1.bf16.msra.mxu0 %v3086_v24  ;;  %v1185_v24 = vld [vmem:[%s4516_s24 + $0x11a0] sm:$0xff]  ;;  %v3150_v21 = vpack.c.bf16 %v1489_v19, %v1461_v18  ;;  %v798_v18 = vld [vmem:[%s4516_s24 + $0x588] sm:$0xff] }
 0x11a   : > { %3217 = vmatprep.subr.bf16.mxu0 %v3216_v25  ;;  %v1213_v25 = vld [vmem:[%s4516_s24 + $0x1280] sm:$0xff]  ;;  %v826_v19 = vld [vmem:[%s4516_s24 + $0x668] sm:$0xff] }
 0x11b   : > { %v3258_v26 = vpack.c.bf16 %v1213_v25, %v1185_v24  ;;  %v624_v25 = vld [vmem:[%s4516_s24 + $0x18] sm:$0xff] }
 0x11c   : > { %605 = vmatmul.mubr.f32.vlgmr.msra.gmra.mrb[0].mxu0 %v4563_v47  ;;  %v821_v47 = vld [vmem:[%s4516_s24 + $0x640] sm:$0xff] }
 0x11d   : > { %3219 = vmatpush1.bf16.msra.mxu0 %v3218_v30  ;;  %v3230_v51 = vpack.c.bf16 %v821_v47, %v793_v46  ;;  %v3132_v30 = vpack.c.bf16 %v1266_v28, %v1238_v27  ;;  %v1293_v46 = vld [vmem:[%s4516_s24 + $0x1500] sm:$0xff]  ;;  %v630_v27 = vld [vmem:[%s4516_s24 + $0x48] sm:$0xff] }
 0x11e   : > { %3221 = vmatprep.subr.bf16.mxu0 %v3220_v31  ;;  %v1270_v31 = vld [vmem:[%s4516_s24 + $0x1448] sm:$0xff]  ;;  %v1321_v47 = vld [vmem:[%s4516_s24 + $0x15e0] sm:$0xff] }
 0x11f   : > { %v3260_v35 = vpack.c.bf16 %v1270_v31, %v1242_v29  ;;  %3133 = vmatprep.subr.bf16.mxu1 %v3132_v30  ;;  %v3138_v49 = vpack.c.bf16 %v1321_v47, %v1293_v46  ;;  %v658_v29 = vld [vmem:[%s4516_s24 + $0x128] sm:$0xff]  ;;  %v4680_v31 = vsub.s32 0, %v4522_v34 }
 0x120   : > { %3135 = vmatpush1.bf16.msra.mxu1 %v3134_v36  ;;  %v3344_v30 = vpack.c.bf16 %v658_v29, %v630_v27  ;;  %v444_v36 = vrot.slane %v435_v32, %v4683_v33  ;;  %v825_v27 = vld [vmem:[%s4516_s24 + $0x660] sm:$0xff]  ;;  %v876_v29 = vld [vmem:[%s4516_s24 + $0x7f8] sm:$0xff] }
 0x121   : > { %3223 = vmatpush1.bf16.msra.mxu0 %v3222_v37  ;;  %v1241_v37 = vld [vmem:[%s4516_s24 + $0x1360] sm:$0xff] }
 0x122   : > { %3225 = vmatprep.subr.bf16.mxu0 %v3224_v38  ;;  %v1269_v38 = vld [vmem:[%s4516_s24 + $0x1440] sm:$0xff] }
 0x123   : > { %v3262_v39 = vpack.c.bf16 %v1269_v38, %v1241_v37 }
 0x125   : > { %3227 = vmatpush1.bf16.msra.mxu0 %v3226_v44  ;;  %v3136_v44 = vpack.c.bf16 %v1322_v41, %v1294_v40 }
 0x126   : > { %3229 = vmatprep.subr.bf16.mxu0 %v3228_v45  ;;  %v1326_v45 = vld [vmem:[%s4516_s24 + $0x1608] sm:$0xff] }
 0x127   : > { %v3264_v48 = vpack.c.bf16 %v1326_v45, %v1298_v43  ;;  %3137 = vmatprep.subr.bf16.mxu1 %v3136_v44  ;;  %v623_v45 = vld [vmem:[%s4516_s24 + $0x10] sm:$0xff] }
 0x128   : > { %3139 = vmatpush1.bf16.msra.mxu1 %v3138_v49  ;;  %v629_v49 = vld [vmem:[%s4516_s24 + $0x40] sm:$0xff] }
 0x129   : > { %3231 = vmatpush1.bf16.msra.mxu0 %v3230_v51  ;;  %v1297_v51 = vld [vmem:[%s4516_s24 + $0x1520] sm:$0xff] }
 0x12a   : > { %3233 = vmatprep.subr.bf16.mxu0 %v3232_v52  ;;  %v1325_v52 = vld [vmem:[%s4516_s24 + $0x1600] sm:$0xff] }
 0x12b   : > { %v3266_v50 = vpack.c.bf16 %v1325_v52, %v1297_v51  ;;  %v657_v51 = vld [vmem:[%s4516_s24 + $0x120] sm:$0xff] }
 0x12d   : > { %3235 = vmatpush1.bf16.msra.mxu0 %v3234_v56  ;;  %v3140_v56 = vpack.c.bf16 %v1378_v54, %v1350_v53  ;;  %v680_v53 = vld [vmem:[%s4516_s24 + $0x1d8] sm:$0xff] }
 0x12e   : > { %3237 = vmatprep.subr.bf16.mxu0 %v3236_v57  ;;  %v1382_v57 = vld [vmem:[%s4516_s24 + $0x17c8] sm:$0xff] }
 0x12f   : > { %v3268_v60 = vpack.c.bf16 %v1382_v57, %v1354_v55  ;;  %3141 = vmatprep.subr.bf16.mxu1 %v3140_v56  ;;  %v708_v55 = vld [vmem:[%s4516_s24 + $0x2b8] sm:$0xff]  ;;  %v686_v56 = vld [vmem:[%s4516_s24 + $0x208] sm:$0xff] }
 0x130   : > { %3143 = vmatpush1.bf16.msra.mxu1 %v3142_v61  ;;  %v714_v57 = vld [vmem:[%s4516_s24 + $0x2e8] sm:$0xff]  ;;  %v679_v61 = vld [vmem:[%s4516_s24 + $0x1d0] sm:$0xff] }
 0x131   : > { %3239 = vmatpush1.bf16.msra.mxu0 %v3238_v62  ;;  %v1353_v62 = vld [vmem:[%s4516_s24 + $0x16e0] sm:$0xff] }
 0x132   : > { %3241 = vmatprep.subr.bf16.mxu0 %v3240_v63  ;;  %v1381_v63 = vld [vmem:[%s4516_s24 + $0x17c0] sm:$0xff] }
 0x133   : > { %v3270_v0 = vpack.c.bf16 %v1381_v63, %v1353_v62  ;;  %v707_v62 = vld [vmem:[%s4516_s24 + $0x2b0] sm:$0xff] }
 0x135   : > { %3243 = vmatpush1.bf16.msra.mxu0 %v3242_v4  ;;  %v3144_v4 = vpack.c.bf16 %v1434_v2, %v1406_v1  ;;  %v713_v1 = vld [vmem:[%s4516_s24 + $0x2e0] sm:$0xff]  ;;  %v736_v2 = vld [vmem:[%s4516_s24 + $0x398] sm:$0xff] }
 0x136   : > { %3245 = vmatprep.subr.bf16.mxu0 %v3244_v5  ;;  %v1438_v5 = vld [vmem:[%s4516_s24 + $0x1988] sm:$0xff] }
 0x137   : > { %v3272_v8 = vpack.c.bf16 %v1438_v5, %v1410_v3  ;;  %3145 = vmatprep.subr.bf16.mxu1 %v3144_v4  ;;  %v3156_v3 = vpack.c.bf16 %v708_v55, %v680_v53  ;;  %v3348_v4 = vpack.c.bf16 %v714_v57, %v686_v56  ;;  %v764_v5 = vld [vmem:[%s4516_s24 + $0x478] sm:$0xff]  ;;  %v937_v55 = vld [vmem:[%s4516_s24 + $0x9e0] sm:$0xff] }
 0x138   : > { %3147 = vmatpush1.bf16.msra.mxu1 %v3146_v9  ;;  %v960_v56 = vld [vmem:[%s4516_s24 + $0xa98] sm:$0xff] }
 0x139   : > { %3247 = vmatpush1.bf16.msra.mxu0 %v3246_v10  ;;  %v1409_v10 = vld [vmem:[%s4516_s24 + $0x18a0] sm:$0xff]  ;;  %v988_v57 = vld [vmem:[%s4516_s24 + $0xb78] sm:$0xff] }
 0x13a   : > { %3249 = vmatprep.subr.bf16.mxu0 %v3248_v11  ;;  %v1437_v11 = vld [vmem:[%s4516_s24 + $0x1980] sm:$0xff] }
 0x13b   : > { %v3274_v12 = vpack.c.bf16 %v1437_v11, %v1409_v10  ;;  %v735_v10 = vld [vmem:[%s4516_s24 + $0x390] sm:$0xff] }
 0x13c   : > { %v763_v11 = vld [vmem:[%s4516_s24 + $0x470] sm:$0xff] }
 0x13d   : > { %3251 = vmatpush1.bf16.msra.mxu0 %v3250_v16  ;;  %v3148_v16 = vpack.c.bf16 %v1490_v14, %v1462_v13  ;;  %v3352_v13 = vpack.c.bf16 %v770_v7, %v742_v6  ;;  %v741_v14 = vld [vmem:[%s4516_s24 + $0x3c0] sm:$0xff]  ;;  %v1016_v6 = vld [vmem:[%s4516_s24 + $0xc58] sm:$0xff] }
 0x13e   : > { %3253 = vmatprep.subr.bf16.mxu0 %v3252_v17  ;;  %v1494_v17 = vld [vmem:[%s4516_s24 + $0x1b48] sm:$0xff]  ;;  %v1044_v7 = vld [vmem:[%s4516_s24 + $0xd38] sm:$0xff] }
 0x13f   : > { %v3276_v20 = vpack.c.bf16 %v1494_v17, %v1466_v15  ;;  %3149 = vmatprep.subr.bf16.mxu1 %v3148_v16  ;;  %v769_v15 = vld [vmem:[%s4516_s24 + $0x4a0] sm:$0xff]  ;;  %v792_v16 = vld [vmem:[%s4516_s24 + $0x558] sm:$0xff] }
 0x140   : > { %3151 = vmatpush1.bf16.msra.mxu1 %v3150_v21  ;;  %v820_v17 = vld [vmem:[%s4516_s24 + $0x638] sm:$0xff]  ;;  %v3354_v21 = vpack.c.bf16 %v769_v15, %v741_v14  ;;  %v3180_v14 = vpack.c.bf16 %v1044_v7, %v1016_v6  ;;  %v1245_v6 = vld [vmem:[%s4516_s24 + $0x1380] sm:$0xff] }
 0x141   : > { %3255 = vmatpush1.bf16.msra.mxu0 %v3254_v22  ;;  %v1465_v22 = vld [vmem:[%s4516_s24 + $0x1a60] sm:$0xff] }
 0x142   : > { %3257 = vmatprep.subr.bf16.mxu0 %v3256_v23  ;;  %v1493_v23 = vld [vmem:[%s4516_s24 + $0x1b40] sm:$0xff] }
 0x143   : > { %v3278_v24 = vpack.c.bf16 %v1493_v23, %v1465_v22  ;;  %v791_v22 = vld [vmem:[%s4516_s24 + $0x550] sm:$0xff]  ;;  %v1273_v7 = vld [vmem:[%s4516_s24 + $0x1460] sm:$0xff] }
 0x144   : > { %v819_v23 = vld [vmem:[%s4516_s24 + $0x630] sm:$0xff] }
 0x145   : > { %3259 = vmatpush1.bf16.msra.mxu0 %v3258_v26  ;;  %v652_v26 = vld [vmem:[%s4516_s24 + $0xf8] sm:$0xff] }
 0x146   : > { %3261 = vmatprep.subr.bf16.mxu0 %v3260_v35  ;;  %v3152_v28 = vpack.c.bf16 %v652_v26, %v624_v25  ;;  %v440_v35 = vrot.slane %v435_v32, %v4680_v31  ;;  %v3356_v25 = vpack.c.bf16 %v826_v19, %v798_v18  ;;  %v797_v26 = vld [vmem:[%s4516_s24 + $0x580] sm:$0xff]  ;;  %v882_v32 = vld [vmem:[%s4516_s24 + $0x828] sm:$0xff]  ;;  %v1072_v18 = vld [vmem:[%s4516_s24 + $0xe18] sm:$0xff] }
 0x147   : > { %v1100_v19 = vld [vmem:[%s4516_s24 + $0xef8] sm:$0xff] }
 0x148   : > { %3153 = vmatprep.subr.bf16.mxu1 %v3152_v28  ;;  %v848_v28 = vld [vmem:[%s4516_s24 + $0x718] sm:$0xff] }
 0x149   : > { %3263 = vmatpush1.bf16.msra.mxu0 %v3262_v39 }
 0x14a   : > { %3265 = vmatprep.subr.bf16.mxu0 %v3264_v48  ;;  %v651_v48 = vld [vmem:[%s4516_s24 + $0xf0] sm:$0xff] }
 0x14b   : > { %v3154_v59 = vpack.c.bf16 %v651_v48, %v623_v45  ;;  %v932_v45 = vld [vmem:[%s4516_s24 + $0x9b8] sm:$0xff] }
 0x14d   : > { %3267 = vmatpush1.bf16.msra.mxu0 %v3266_v50 }
 0x14e   : > { %3269 = vmatprep.subr.bf16.mxu0 %v3268_v60  ;;  %v3346_v60 = vpack.c.bf16 %v657_v51, %v629_v49  ;;  %v903_v51 = vld [vmem:[%s4516_s24 + $0x8d0] sm:$0xff] }
 0x151   : > { %3271 = vmatpush1.bf16.msra.mxu0 %v3270_v0  ;;  %v685_v0 = vld [vmem:[%s4516_s24 + $0x200] sm:$0xff] }
 0x152   : > { %3273 = vmatprep.subr.bf16.mxu0 %v3272_v8  ;;  %v3158_v8 = vpack.c.bf16 %v707_v62, %v679_v61  ;;  %v3350_v9 = vpack.c.bf16 %v713_v1, %v685_v0  ;;  %v959_v0 = vld [vmem:[%s4516_s24 + $0xa90] sm:$0xff] }
 0x153   : > { %v987_v1 = vld [vmem:[%s4516_s24 + $0xb70] sm:$0xff] }
 0x155   : > { %3275 = vmatpush1.bf16.msra.mxu0 %v3274_v12  ;;  %v3160_v12 = vpack.c.bf16 %v764_v5, %v736_v2  ;;  %v3176_v2 = vpack.c.bf16 %v988_v57, %v960_v56  ;;  %v993_v5 = vld [vmem:[%s4516_s24 + $0xba0] sm:$0xff] }
 0x156   : > { %3277 = vmatprep.subr.bf16.mxu0 %v3276_v20  ;;  %v3162_v20 = vpack.c.bf16 %v763_v11, %v735_v10  ;;  %v3178_v10 = vpack.c.bf16 %v987_v1, %v959_v0  ;;  %v1189_v56 = vld [vmem:[%s4516_s24 + $0x11c0] sm:$0xff] }
 0x157   : > { %v1217_v57 = vld [vmem:[%s4516_s24 + $0x12a0] sm:$0xff] }
 0x158   : > { %v3386_v1 = vpack.c.bf16 %v1217_v57, %v1189_v56 }
 0x159   : > { %3279 = vmatpush1.bf16.msra.mxu0 %v3278_v24  ;;  %v3164_v24 = vpack.c.bf16 %v820_v17, %v792_v16  ;;  %v1021_v16 = vld [vmem:[%s4516_s24 + $0xc80] sm:$0xff] }
 0x15a   : > { %3345 = vmatprep.subr.bf16.mxu0 %v3344_v30  ;;  %v854_v30 = vld [vmem:[%s4516_s24 + $0x748] sm:$0xff]  ;;  %v1049_v17 = vld [vmem:[%s4516_s24 + $0xd60] sm:$0xff] }
 0x1ef   : > { %v606_v37 = vpop.f32.mrb[0].mxu0 }
 0x1f0   : > { %v3984_v38 = vadd.f32 %v606_v37, %v440_v35  ;;  %v608_v39 = vpop.f32.mrb[1].mxu0  ;;  %v3166_v35 = vpack.c.bf16 %v819_v23, %v791_v22  ;;  %v847_v37 = vld [vmem:[%s4516_s24 + $0x710] sm:$0xff]  ;;  %v3374_v23 = vpack.c.bf16 %v1049_v17, %v1021_v16 }
 0x1f1   : > { %v3985_v40 = vadd.f32 %v608_v39, %v444_v36  ;;  %v3358_v36 = vpack.c.bf16 %v825_v27, %v797_v26  ;;  %v3168_v39 = vpack.c.bf16 %v876_v29, %v848_v28  ;;  %v3184_v26 = vpack.c.bf16 %v1100_v19, %v1072_v18  ;;  %v1077_v28 = vld [vmem:[%s4516_s24 + $0xe40] sm:$0xff] }
 0x1f2   : > { %v613_v41 = vmul.f32 0.70710677, %v3984_v38  ;;  %v611_v54 = vmul.f32 0.5, %v3984_v38  ;;  %v875_v38 = vld [vmem:[%s4516_s24 + $0x7f0] sm:$0xff]  ;;  %v1105_v29 = vld [vmem:[%s4516_s24 + $0xf20] sm:$0xff] }
 0x1f3   : > { %v614_v43 = vmul.f32 0.70710677, %v3985_v40  ;;  %v612_v52 = vmul.f32 0.5, %v3985_v40  ;;  %v3360_v40 = vpack.c.bf16 %v882_v32, %v854_v30  ;;  %v3170_v48 = vpack.c.bf16 %v875_v38, %v847_v37  ;;  %v1128_v30 = vld [vmem:[%s4516_s24 + $0xfd8] sm:$0xff]  ;;  %v1301_v18 = vld [vmem:[%s4516_s24 + $0x1540] sm:$0xff] }
 0x1f4   : > { %4072 = verf.f32 %v613_v41  ;;  %v853_v41 = vld [vmem:[%s4516_s24 + $0x740] sm:$0xff]  ;;  %v1156_v32 = vld [vmem:[%s4516_s24 + $0x10b8] sm:$0xff]  ;;  %v3378_v38 = vpack.c.bf16 %v1105_v29, %v1077_v28 }
 0x1f5   : > { %4074 = verf.f32 %v614_v43  ;;  %v881_v43 = vld [vmem:[%s4516_s24 + $0x820] sm:$0xff] }
 0x1f6   : > { %v3362_v49 = vpack.c.bf16 %v881_v43, %v853_v41  ;;  %v3188_v41 = vpack.c.bf16 %v1156_v32, %v1128_v30  ;;  %v1329_v19 = vld [vmem:[%s4516_s24 + $0x1620] sm:$0xff] }
 0x1f7   : > { %v1357_v30 = vld [vmem:[%s4516_s24 + $0x1700] sm:$0xff] }
 0x1f8   : > { %v1385_v32 = vld [vmem:[%s4516_s24 + $0x17e0] sm:$0xff] }
 0x1fe   : > { %v4073_v44 = vpop.eup %4072 }
 0x1ff   : > { %v4075_v46 = vpop.eup %4074  ;;  %v617_v47 = vadd.f32 1.0, %v4073_v44  ;;  %v904_v44 = vld [vmem:[%s4516_s24 + $0x8d8] sm:$0xff] }
 0x200   : > { %v618_v50 = vadd.f32 1.0, %v4075_v46  ;;  %v910_v46 = vld [vmem:[%s4516_s24 + $0x908] sm:$0xff] }
 0x201   : > { %v4699_v63 = vmul.f32 %v617_v47, %v611_v54  ;;  %v938_v47 = vld [vmem:[%s4516_s24 + $0x9e8] sm:$0xff]  ;;  %v909_v54 = vld [vmem:[%s4516_s24 + $0x900] sm:$0xff] }
 0x202   : > { %v4695_v58 = vmul.f32 %v618_v50, %v612_v52  ;;  %v931_v52 = vld [vmem:[%s4516_s24 + $0x9b0] sm:$0xff]  ;;  %v3172_v50 = vpack.c.bf16 %v932_v45, %v904_v44  ;;  %v3364_v53 = vpack.c.bf16 %v938_v47, %v910_v46  ;;  %v3366_v62 = vpack.c.bf16 %v937_v55, %v909_v54  ;;  %v1133_v44 = vld [vmem:[%s4516_s24 + $0x1000] sm:$0xff]  ;;  %v1184_v46 = vld [vmem:[%s4516_s24 + $0x1198] sm:$0xff] }
 0x203   : > { %v3174_v61 = vpack.c.bf16 %v931_v52, %v903_v51  ;;  %v1161_v45 = vld [vmem:[%s4516_s24 + $0x10e0] sm:$0xff]  ;;  %v1212_v47 = vld [vmem:[%s4516_s24 + $0x1278] sm:$0xff] }
 0x204   : > { %1729 = vmatprep.mubr.f32.mxu1 %v4695_v58  ;;  %1871 = vmatprep.mubr.f32.mxu0 %v4695_v58  ;;  %v3382_v52 = vpack.c.bf16 %v1161_v45, %v1133_v44  ;;  %v3192_v54 = vpack.c.bf16 %v1212_v47, %v1184_v46  ;;  %v1413_v46 = vld [vmem:[%s4516_s24 + $0x18c0] sm:$0xff] }
 0x205   : > { %1730 = vmatmul.mubr.f32.vlgmr.msra.gmra.mrb[0].mxu1 %v4699_v63  ;;  %1872 = vmatmul.mubr.f32.vlgmr.msra.gmra.mrb[2].mxu0 %v4699_v63  ;;  %v1441_v47 = vld [vmem:[%s4516_s24 + $0x19a0] sm:$0xff] }
 0x206   : > { %3155 = vmatpush1.bf16.msra.mxu1 %v3154_v59  ;;  %3347 = vmatpush1.bf16.msra.mxu0 %v3346_v60  ;;  %v966_v59 = vld [vmem:[%s4516_s24 + $0xac8] sm:$0xff] }
 0x207   : > { %1800 = vmatprep.mubr.f32.mxu1 %v4695_v58  ;;  %2013 = vmatprep.mubr.f32.mxu0 %v4695_v58  ;;  %v994_v60 = vld [vmem:[%s4516_s24 + $0xba8] sm:$0xff] }
 0x208   : > { %3157 = vmatprep.subr.bf16.mxu1 %v3156_v3  ;;  %3349 = vmatprep.subr.bf16.mxu0 %v3348_v4  ;;  %v3368_v3 = vpack.c.bf16 %v994_v60, %v966_v59  ;;  %v965_v4 = vld [vmem:[%s4516_s24 + $0xac0] sm:$0xff]  ;;  %v1240_v59 = vld [vmem:[%s4516_s24 + $0x1358] sm:$0xff] }
 0x209   : > { %v3370_v11 = vpack.c.bf16 %v993_v5, %v965_v4  ;;  %v1268_v60 = vld [vmem:[%s4516_s24 + $0x1438] sm:$0xff] }
 0x20a   : > { %3159 = vmatpush1.bf16.msra.mxu1 %v3158_v8  ;;  %3351 = vmatpush1.bf16.msra.mxu0 %v3350_v9  ;;  %v1022_v8 = vld [vmem:[%s4516_s24 + $0xc88] sm:$0xff]  ;;  %v3196_v4 = vpack.c.bf16 %v1268_v60, %v1240_v59  ;;  %v1469_v59 = vld [vmem:[%s4516_s24 + $0x1a80] sm:$0xff] }
 0x20b   : > { %3161 = vmatprep.subr.bf16.mxu1 %v3160_v12  ;;  %3353 = vmatprep.subr.bf16.mxu0 %v3352_v13  ;;  %v1050_v9 = vld [vmem:[%s4516_s24 + $0xd68] sm:$0xff]  ;;  %v1015_v12 = vld [vmem:[%s4516_s24 + $0xc50] sm:$0xff]  ;;  %v1497_v60 = vld [vmem:[%s4516_s24 + $0x1b60] sm:$0xff] }
 0x20c   : > { %v1043_v13 = vld [vmem:[%s4516_s24 + $0xd30] sm:$0xff]  ;;  %v3372_v15 = vpack.c.bf16 %v1050_v9, %v1022_v8  ;;  %v1296_v8 = vld [vmem:[%s4516_s24 + $0x1518] sm:$0xff] }
 0x20d   : > { %v3182_v22 = vpack.c.bf16 %v1043_v13, %v1015_v12  ;;  %v1324_v9 = vld [vmem:[%s4516_s24 + $0x15f8] sm:$0xff]  ;;  %v3390_v13 = vpack.c.bf16 %v1273_v7, %v1245_v6  ;;  %v627_v6 = vld [vmem:[%s4516_s24 + $0x30] sm:$0xff] }
 0x20e   : > { %3163 = vmatpush1.bf16.msra.mxu1 %v3162_v20  ;;  %3355 = vmatpush1.bf16.msra.mxu0 %v3354_v21  ;;  %v1078_v20 = vld [vmem:[%s4516_s24 + $0xe48] sm:$0xff]  ;;  %v3200_v16 = vpack.c.bf16 %v1324_v9, %v1296_v8  ;;  %v655_v7 = vld [vmem:[%s4516_s24 + $0x110] sm:$0xff]  ;;  %v633_v8 = vld [vmem:[%s4516_s24 + $0x60] sm:$0xff] }
 0x20f   : > { %3165 = vmatprep.subr.bf16.mxu1 %v3164_v24  ;;  %3357 = vmatprep.subr.bf16.mxu0 %v3356_v25  ;;  %v1106_v21 = vld [vmem:[%s4516_s24 + $0xf28] sm:$0xff]  ;;  %v1071_v24 = vld [vmem:[%s4516_s24 + $0xe10] sm:$0xff]  ;;  %v661_v9 = vld [vmem:[%s4516_s24 + $0x140] sm:$0xff] }
 0x210   : > { %v1099_v25 = vld [vmem:[%s4516_s24 + $0xef0] sm:$0xff]  ;;  %v3376_v27 = vpack.c.bf16 %v1106_v21, %v1078_v20  ;;  %v1352_v20 = vld [vmem:[%s4516_s24 + $0x16d8] sm:$0xff] }
 0x211   : > { %v3186_v37 = vpack.c.bf16 %v1099_v25, %v1071_v24  ;;  %v1380_v21 = vld [vmem:[%s4516_s24 + $0x17b8] sm:$0xff]  ;;  %v3394_v25 = vpack.c.bf16 %v1329_v19, %v1301_v18  ;;  %v689_v18 = vld [vmem:[%s4516_s24 + $0x220] sm:$0xff] }
 0x212   : > { %3167 = vmatpush1.bf16.msra.mxu1 %v3166_v35  ;;  %3359 = vmatpush1.bf16.msra.mxu0 %v3358_v36  ;;  %v1134_v35 = vld [vmem:[%s4516_s24 + $0x1008] sm:$0xff]  ;;  %v3204_v28 = vpack.c.bf16 %v1380_v21, %v1352_v20  ;;  %v717_v21 = vld [vmem:[%s4516_s24 + $0x300] sm:$0xff] }
 0x213   : > { %3169 = vmatprep.subr.bf16.mxu1 %v3168_v39  ;;  %3361 = vmatprep.subr.bf16.mxu0 %v3360_v40  ;;  %v1162_v36 = vld [vmem:[%s4516_s24 + $0x10e8] sm:$0xff]  ;;  %v1127_v39 = vld [vmem:[%s4516_s24 + $0xfd0] sm:$0xff] }
 0x214   : > { %v1155_v40 = vld [vmem:[%s4516_s24 + $0x10b0] sm:$0xff]  ;;  %v3380_v43 = vpack.c.bf16 %v1162_v36, %v1134_v35  ;;  %v1408_v35 = vld [vmem:[%s4516_s24 + $0x1898] sm:$0xff] }
 0x215   : > { %v3190_v51 = vpack.c.bf16 %v1155_v40, %v1127_v39  ;;  %v1436_v36 = vld [vmem:[%s4516_s24 + $0x1978] sm:$0xff]  ;;  %v3398_v40 = vpack.c.bf16 %v1385_v32, %v1357_v30  ;;  %v767_v30 = vld [vmem:[%s4516_s24 + $0x490] sm:$0xff]  ;;  %v745_v32 = vld [vmem:[%s4516_s24 + $0x3e0] sm:$0xff] }
 0x216   : > { %3171 = vmatpush1.bf16.msra.mxu1 %v3170_v48  ;;  %3363 = vmatpush1.bf16.msra.mxu0 %v3362_v49  ;;  %v1190_v48 = vld [vmem:[%s4516_s24 + $0x11c8] sm:$0xff]  ;;  %v3208_v44 = vpack.c.bf16 %v1436_v36, %v1408_v35  ;;  %v773_v36 = vld [vmem:[%s4516_s24 + $0x4c0] sm:$0xff] }
 0x217   : > { %3173 = vmatprep.subr.bf16.mxu1 %v3172_v50  ;;  %3365 = vmatprep.subr.bf16.mxu0 %v3364_v53  ;;  %v1218_v49 = vld [vmem:[%s4516_s24 + $0x12a8] sm:$0xff]  ;;  %v1183_v50 = vld [vmem:[%s4516_s24 + $0x1190] sm:$0xff] }
 0x218   : > { %v1211_v53 = vld [vmem:[%s4516_s24 + $0x1270] sm:$0xff]  ;;  %v3384_v55 = vpack.c.bf16 %v1218_v49, %v1190_v48  ;;  %v1464_v48 = vld [vmem:[%s4516_s24 + $0x1a58] sm:$0xff] }
 0x219   : > { %v3194_v0 = vpack.c.bf16 %v1211_v53, %v1183_v50  ;;  %v1492_v49 = vld [vmem:[%s4516_s24 + $0x1b38] sm:$0xff]  ;;  %v3402_v53 = vpack.c.bf16 %v1441_v47, %v1413_v46  ;;  %v823_v46 = vld [vmem:[%s4516_s24 + $0x650] sm:$0xff]  ;;  %v801_v47 = vld [vmem:[%s4516_s24 + $0x5a0] sm:$0xff] }
 0x21a   : > { %3175 = vmatpush1.bf16.msra.mxu1 %v3174_v61  ;;  %3367 = vmatpush1.bf16.msra.mxu0 %v3366_v62  ;;  %v1246_v61 = vld [vmem:[%s4516_s24 + $0x1388] sm:$0xff]  ;;  %v3212_v56 = vpack.c.bf16 %v1492_v49, %v1464_v48  ;;  %v829_v49 = vld [vmem:[%s4516_s24 + $0x680] sm:$0xff] }
 0x21b   : > { %3177 = vmatprep.subr.bf16.mxu1 %v3176_v2  ;;  %3369 = vmatprep.subr.bf16.mxu0 %v3368_v3  ;;  %v1274_v62 = vld [vmem:[%s4516_s24 + $0x1468] sm:$0xff]  ;;  %v1239_v2 = vld [vmem:[%s4516_s24 + $0x1350] sm:$0xff] }
 0x21c   : > { %v1267_v3 = vld [vmem:[%s4516_s24 + $0x1430] sm:$0xff]  ;;  %v3388_v5 = vpack.c.bf16 %v1274_v62, %v1246_v61  ;;  %v628_v61 = vld [vmem:[%s4516_s24 + $0x38] sm:$0xff] }
 0x21d   : > { %v3198_v12 = vpack.c.bf16 %v1267_v3, %v1239_v2  ;;  %v656_v62 = vld [vmem:[%s4516_s24 + $0x118] sm:$0xff]  ;;  %v3406_v3 = vpack.c.bf16 %v1497_v60, %v1469_v59  ;;  %v879_v59 = vld [vmem:[%s4516_s24 + $0x810] sm:$0xff]  ;;  %v857_v60 = vld [vmem:[%s4516_s24 + $0x760] sm:$0xff] }
 0x21e   : > { %3179 = vmatpush1.bf16.msra.mxu1 %v3178_v10  ;;  %3371 = vmatpush1.bf16.msra.mxu0 %v3370_v11  ;;  %v1302_v10 = vld [vmem:[%s4516_s24 + $0x1548] sm:$0xff] }
 0x21f   : > { %3181 = vmatprep.subr.bf16.mxu1 %v3180_v14  ;;  %3373 = vmatprep.subr.bf16.mxu0 %v3372_v15  ;;  %v1330_v11 = vld [vmem:[%s4516_s24 + $0x1628] sm:$0xff]  ;;  %v1295_v14 = vld [vmem:[%s4516_s24 + $0x1510] sm:$0xff] }
 0x220   : > { %v1323_v15 = vld [vmem:[%s4516_s24 + $0x15f0] sm:$0xff]  ;;  %v3392_v17 = vpack.c.bf16 %v1330_v11, %v1302_v10  ;;  %v684_v10 = vld [vmem:[%s4516_s24 + $0x1f8] sm:$0xff] }
 0x221   : > { %v3202_v24 = vpack.c.bf16 %v1323_v15, %v1295_v14  ;;  %v712_v11 = vld [vmem:[%s4516_s24 + $0x2d8] sm:$0xff]  ;;  %v3282_v14 = vpack.c.bf16 %v655_v7, %v627_v6  ;;  %v3474_v15 = vpack.c.bf16 %v661_v9, %v633_v8  ;;  %v907_v7 = vld [vmem:[%s4516_s24 + $0x8f0] sm:$0xff]  ;;  %v913_v9 = vld [vmem:[%s4516_s24 + $0x920] sm:$0xff] }
 0x222   : > { %3183 = vmatpush1.bf16.msra.mxu1 %v3182_v22  ;;  %3375 = vmatpush1.bf16.msra.mxu0 %v3374_v23  ;;  %v1358_v22 = vld [vmem:[%s4516_s24 + $0x1708] sm:$0xff]  ;;  %v3284_v19 = vpack.c.bf16 %v712_v11, %v684_v10  ;;  %v935_v8 = vld [vmem:[%s4516_s24 + $0x9d0] sm:$0xff]  ;;  %v941_v11 = vld [vmem:[%s4516_s24 + $0xa00] sm:$0xff] }
 0x223   : > { %3185 = vmatprep.subr.bf16.mxu1 %v3184_v26  ;;  %3377 = vmatprep.subr.bf16.mxu0 %v3376_v27  ;;  %v1386_v23 = vld [vmem:[%s4516_s24 + $0x17e8] sm:$0xff]  ;;  %v1351_v26 = vld [vmem:[%s4516_s24 + $0x16d0] sm:$0xff] }
 0x224   : > { %v1379_v27 = vld [vmem:[%s4516_s24 + $0x17b0] sm:$0xff]  ;;  %v3396_v29 = vpack.c.bf16 %v1386_v23, %v1358_v22  ;;  %v740_v22 = vld [vmem:[%s4516_s24 + $0x3b8] sm:$0xff] }
 0x225   : > { %v3206_v39 = vpack.c.bf16 %v1379_v27, %v1351_v26  ;;  %v768_v23 = vld [vmem:[%s4516_s24 + $0x498] sm:$0xff]  ;;  %v3478_v27 = vpack.c.bf16 %v717_v21, %v689_v18  ;;  %v969_v21 = vld [vmem:[%s4516_s24 + $0xae0] sm:$0xff] }
 0x226   : > { %3187 = vmatpush1.bf16.msra.mxu1 %v3186_v37  ;;  %3379 = vmatpush1.bf16.msra.mxu0 %v3378_v38  ;;  %v1414_v37 = vld [vmem:[%s4516_s24 + $0x18c8] sm:$0xff] }
 0x227   : > { %3189 = vmatprep.subr.bf16.mxu1 %v3188_v41  ;;  %3381 = vmatprep.subr.bf16.mxu0 %v3380_v43  ;;  %v1442_v38 = vld [vmem:[%s4516_s24 + $0x19a8] sm:$0xff]  ;;  %v1407_v41 = vld [vmem:[%s4516_s24 + $0x1890] sm:$0xff] }
 0x228   : > { %v1435_v43 = vld [vmem:[%s4516_s24 + $0x1970] sm:$0xff]  ;;  %v3400_v45 = vpack.c.bf16 %v1442_v38, %v1414_v37  ;;  %v796_v37 = vld [vmem:[%s4516_s24 + $0x578] sm:$0xff] }
 0x229   : > { %v3210_v50 = vpack.c.bf16 %v1435_v43, %v1407_v41  ;;  %v824_v38 = vld [vmem:[%s4516_s24 + $0x658] sm:$0xff]  ;;  %v3482_v43 = vpack.c.bf16 %v773_v36, %v745_v32  ;;  %v1019_v32 = vld [vmem:[%s4516_s24 + $0xc70] sm:$0xff]  ;;  %v1025_v36 = vld [vmem:[%s4516_s24 + $0xca0] sm:$0xff] }
 0x22a   : > { %3191 = vmatpush1.bf16.msra.mxu1 %v3190_v51  ;;  %3383 = vmatpush1.bf16.msra.mxu0 %v3382_v52  ;;  %v1470_v51 = vld [vmem:[%s4516_s24 + $0x1a88] sm:$0xff] }
 0x22b   : > { %3193 = vmatprep.subr.bf16.mxu1 %v3192_v54  ;;  %3385 = vmatprep.subr.bf16.mxu0 %v3384_v55  ;;  %v1498_v52 = vld [vmem:[%s4516_s24 + $0x1b68] sm:$0xff]  ;;  %v1463_v54 = vld [vmem:[%s4516_s24 + $0x1a50] sm:$0xff] }
 0x22c   : > { %v1491_v55 = vld [vmem:[%s4516_s24 + $0x1b30] sm:$0xff]  ;;  %v3404_v57 = vpack.c.bf16 %v1498_v52, %v1470_v51  ;;  %v852_v51 = vld [vmem:[%s4516_s24 + $0x738] sm:$0xff] }
 0x22d   : > { %v3214_v2 = vpack.c.bf16 %v1491_v55, %v1463_v54  ;;  %v880_v52 = vld [vmem:[%s4516_s24 + $0x818] sm:$0xff]  ;;  %v3486_v55 = vpack.c.bf16 %v829_v49, %v801_v47  ;;  %v1075_v47 = vld [vmem:[%s4516_s24 + $0xe30] sm:$0xff]  ;;  %v1081_v49 = vld [vmem:[%s4516_s24 + $0xe60] sm:$0xff] }
 0x22e   : > { %3195 = vmatpush1.bf16.msra.mxu1 %v3194_v0  ;;  %3387 = vmatpush1.bf16.msra.mxu0 %v3386_v1  ;;  %v634_v0 = vld [vmem:[%s4516_s24 + $0x68] sm:$0xff] }
 0x22f   : > { %3197 = vmatprep.subr.bf16.mxu1 %v3196_v4  ;;  %3389 = vmatprep.subr.bf16.mxu0 %v3388_v5  ;;  %v662_v1 = vld [vmem:[%s4516_s24 + $0x148] sm:$0xff]  ;;  %v3280_v4 = vpack.c.bf16 %v656_v62, %v628_v61  ;;  %v885_v62 = vld [vmem:[%s4516_s24 + $0x840] sm:$0xff] }
 0x230   : > { %v3472_v5 = vpack.c.bf16 %v662_v1, %v634_v0  ;;  %v908_v0 = vld [vmem:[%s4516_s24 + $0x8f8] sm:$0xff] }
 0x231   : > { %v936_v1 = vld [vmem:[%s4516_s24 + $0x9d8] sm:$0xff] }
 0x232   : > { %3199 = vmatpush1.bf16.msra.mxu1 %v3198_v12  ;;  %3391 = vmatpush1.bf16.msra.mxu0 %v3390_v13  ;;  %v690_v12 = vld [vmem:[%s4516_s24 + $0x228] sm:$0xff]  ;;  %v3300_v6 = vpack.c.bf16 %v936_v1, %v908_v0  ;;  %v1165_v1 = vld [vmem:[%s4516_s24 + $0x1100] sm:$0xff] }
 0x233   : > { %3201 = vmatprep.subr.bf16.mxu1 %v3200_v16  ;;  %3393 = vmatprep.subr.bf16.mxu0 %v3392_v17  ;;  %v718_v13 = vld [vmem:[%s4516_s24 + $0x308] sm:$0xff]  ;;  %v683_v16 = vld [vmem:[%s4516_s24 + $0x1f0] sm:$0xff] }
 0x234   : > { %v711_v17 = vld [vmem:[%s4516_s24 + $0x2d0] sm:$0xff]  ;;  %v3476_v20 = vpack.c.bf16 %v718_v13, %v690_v12  ;;  %v964_v12 = vld [vmem:[%s4516_s24 + $0xab8] sm:$0xff] }
 0x235   : > { %v3286_v26 = vpack.c.bf16 %v711_v17, %v683_v16  ;;  %v992_v13 = vld [vmem:[%s4516_s24 + $0xb98] sm:$0xff]  ;;  %v3302_v16 = vpack.c.bf16 %v935_v8, %v907_v7  ;;  %v3494_v17 = vpack.c.bf16 %v941_v11, %v913_v9  ;;  %v1187_v9 = vld [vmem:[%s4516_s24 + $0x11b0] sm:$0xff]  ;;  %v1193_v11 = vld [vmem:[%s4516_s24 + $0x11e0] sm:$0xff] }
 0x236   : > { %3203 = vmatpush1.bf16.msra.mxu1 %v3202_v24  ;;  %3395 = vmatpush1.bf16.msra.mxu0 %v3394_v25  ;;  %v746_v24 = vld [vmem:[%s4516_s24 + $0x3e8] sm:$0xff]  ;;  %v3304_v18 = vpack.c.bf16 %v992_v13, %v964_v12  ;;  %v1221_v13 = vld [vmem:[%s4516_s24 + $0x12c0] sm:$0xff] }
 0x237   : > { %3205 = vmatprep.subr.bf16.mxu1 %v3204_v28  ;;  %3397 = vmatprep.subr.bf16.mxu0 %v3396_v29  ;;  %v774_v25 = vld [vmem:[%s4516_s24 + $0x4c8] sm:$0xff]  ;;  %v3288_v28 = vpack.c.bf16 %v768_v23, %v740_v22  ;;  %v739_v29 = vld [vmem:[%s4516_s24 + $0x3b0] sm:$0xff]  ;;  %v997_v23 = vld [vmem:[%s4516_s24 + $0xbc0] sm:$0xff] }
 0x238   : > { %v3480_v35 = vpack.c.bf16 %v774_v25, %v746_v24  ;;  %v3290_v41 = vpack.c.bf16 %v767_v30, %v739_v29  ;;  %v1020_v24 = vld [vmem:[%s4516_s24 + $0xc78] sm:$0xff]  ;;  %v3498_v29 = vpack.c.bf16 %v997_v23, %v969_v21  ;;  %v1243_v21 = vld [vmem:[%s4516_s24 + $0x1370] sm:$0xff]  ;;  %v1249_v23 = vld [vmem:[%s4516_s24 + $0x13a0] sm:$0xff] }
 0x239   : > { %v1048_v25 = vld [vmem:[%s4516_s24 + $0xd58] sm:$0xff] }
 0x23a   : > { %3207 = vmatpush1.bf16.msra.mxu1 %v3206_v39  ;;  %3399 = vmatpush1.bf16.msra.mxu0 %v3398_v40  ;;  %v802_v39 = vld [vmem:[%s4516_s24 + $0x5a8] sm:$0xff]  ;;  %v3308_v30 = vpack.c.bf16 %v1048_v25, %v1020_v24  ;;  %v1277_v25 = vld [vmem:[%s4516_s24 + $0x1480] sm:$0xff] }
 0x23b   : > { %3209 = vmatprep.subr.bf16.mxu1 %v3208_v44  ;;  %3401 = vmatprep.subr.bf16.mxu0 %v3400_v45  ;;  %v830_v40 = vld [vmem:[%s4516_s24 + $0x688] sm:$0xff]  ;;  %v3292_v44 = vpack.c.bf16 %v824_v38, %v796_v37  ;;  %v795_v45 = vld [vmem:[%s4516_s24 + $0x570] sm:$0xff]  ;;  %v1053_v38 = vld [vmem:[%s4516_s24 + $0xd80] sm:$0xff] }
 0x23c   : > { %v3484_v48 = vpack.c.bf16 %v830_v40, %v802_v39  ;;  %v3294_v54 = vpack.c.bf16 %v823_v46, %v795_v45  ;;  %v1076_v39 = vld [vmem:[%s4516_s24 + $0xe38] sm:$0xff]  ;;  %v3502_v45 = vpack.c.bf16 %v1053_v38, %v1025_v36  ;;  %v1299_v36 = vld [vmem:[%s4516_s24 + $0x1530] sm:$0xff]  ;;  %v1305_v38 = vld [vmem:[%s4516_s24 + $0x1560] sm:$0xff] }
 0x23d   : > { %v1104_v40 = vld [vmem:[%s4516_s24 + $0xf18] sm:$0xff] }
 0x23e   : > { %3211 = vmatpush1.bf16.msra.mxu1 %v3210_v50  ;;  %3403 = vmatpush1.bf16.msra.mxu0 %v3402_v53  ;;  %v858_v50 = vld [vmem:[%s4516_s24 + $0x768] sm:$0xff]  ;;  %v3312_v46 = vpack.c.bf16 %v1104_v40, %v1076_v39  ;;  %v1333_v40 = vld [vmem:[%s4516_s24 + $0x1640] sm:$0xff] }
 0x23f   : > { %3213 = vmatprep.subr.bf16.mxu1 %v3212_v56  ;;  %3405 = vmatprep.subr.bf16.mxu0 %v3404_v57  ;;  %v886_v53 = vld [vmem:[%s4516_s24 + $0x848] sm:$0xff]  ;;  %v3296_v56 = vpack.c.bf16 %v880_v52, %v852_v51  ;;  %v851_v57 = vld [vmem:[%s4516_s24 + $0x730] sm:$0xff]  ;;  %v1109_v52 = vld [vmem:[%s4516_s24 + $0xf40] sm:$0xff] }
 0x240   : > { %v3488_v61 = vpack.c.bf16 %v886_v53, %v858_v50  ;;  %v1132_v50 = vld [vmem:[%s4516_s24 + $0xff8] sm:$0xff] }
 0x241   : > { %v1160_v53 = vld [vmem:[%s4516_s24 + $0x10d8] sm:$0xff] }
 0x242   : > { %3215 = vmatpush1.bf16.msra.mxu1 %v3214_v2  ;;  %3407 = vmatpush1.bf16.msra.mxu0 %v3406_v3  ;;  %v914_v2 = vld [vmem:[%s4516_s24 + $0x928] sm:$0xff] }
 0x243   : > { %3281 = vmatprep.subr.bf16.mxu1 %v3280_v4  ;;  %3473 = vmatprep.subr.bf16.mxu0 %v3472_v5  ;;  %v942_v3 = vld [vmem:[%s4516_s24 + $0xa08] sm:$0xff]  ;;  %v3298_v4 = vpack.c.bf16 %v879_v59, %v851_v57  ;;  %v3490_v5 = vpack.c.bf16 %v885_v62, %v857_v60  ;;  %v3506_v57 = vpack.c.bf16 %v1109_v52, %v1081_v49  ;;  %v1131_v60 = vld [vmem:[%s4516_s24 + $0xff0] sm:$0xff]  ;;  %v1137_v62 = vld [vmem:[%s4516_s24 + $0x1020] sm:$0xff] }
 0x244   : > { %v3492_v10 = vpack.c.bf16 %v942_v3, %v914_v2  ;;  %v3316_v59 = vpack.c.bf16 %v1160_v53, %v1132_v50  ;;  %v1188_v2 = vld [vmem:[%s4516_s24 + $0x11b8] sm:$0xff]  ;;  %v3510_v7 = vpack.c.bf16 %v1165_v1, %v1137_v62  ;;  %v1355_v49 = vld [vmem:[%s4516_s24 + $0x16f0] sm:$0xff]  ;;  %v1361_v52 = vld [vmem:[%s4516_s24 + $0x1720] sm:$0xff] }
 0x245   : > { %1801 = vmatmul.mubr.f32.vlgmr.msra.gmra.mrb[2].mxu1 %v4699_v63  ;;  %2014 = vmatmul.mubr.f32.vlgmr.msra.gmra.mrb[4].mxu0 %v4699_v63  ;;  %v1216_v3 = vld [vmem:[%s4516_s24 + $0x1298] sm:$0xff]  ;;  %v1389_v53 = vld [vmem:[%s4516_s24 + $0x1800] sm:$0xff]  ;;  %v1411_v62 = vld [vmem:[%s4516_s24 + $0x18b0] sm:$0xff] }
 0x246   : > { %3283 = vmatpush1.bf16.msra.mxu1 %v3282_v14  ;;  %1942 = vmatprep.mubr.f32.mxu1 %v4695_v58  ;;  %v970_v14 = vld [vmem:[%s4516_s24 + $0xae8] sm:$0xff]  ;;  %v3320_v8 = vpack.c.bf16 %v1216_v3, %v1188_v2  ;;  %v1417_v1 = vld [vmem:[%s4516_s24 + $0x18e0] sm:$0xff] }
 0x247   : > { %3475 = vmatpush1.bf16.msra.mxu0 %v3474_v15  ;;  %2155 = vmatprep.mubr.f32.mxu0 %v4695_v58  ;;  %v998_v15 = vld [vmem:[%s4516_s24 + $0xbc8] sm:$0xff]  ;;  %v1445_v3 = vld [vmem:[%s4516_s24 + $0x19c0] sm:$0xff] }
 0x248   : > { %3285 = vmatprep.subr.bf16.mxu1 %v3284_v19  ;;  %3477 = vmatprep.subr.bf16.mxu0 %v3476_v20  ;;  %v963_v19 = vld [vmem:[%s4516_s24 + $0xab0] sm:$0xff]  ;;  %v3496_v22 = vpack.c.bf16 %v998_v15, %v970_v14  ;;  %v1244_v14 = vld [vmem:[%s4516_s24 + $0x1378] sm:$0xff] }
 0x249   : > { %v991_v20 = vld [vmem:[%s4516_s24 + $0xb90] sm:$0xff]  ;;  %v1272_v15 = vld [vmem:[%s4516_s24 + $0x1458] sm:$0xff] }
 0x24a   : > { %3287 = vmatpush1.bf16.msra.mxu1 %v3286_v26  ;;  %v1026_v26 = vld [vmem:[%s4516_s24 + $0xca8] sm:$0xff] }
 0x24b   : > { %3479 = vmatpush1.bf16.msra.mxu0 %v3478_v27  ;;  %3289 = vmatprep.subr.bf16.mxu1 %v3288_v28  ;;  %v1054_v27 = vld [vmem:[%s4516_s24 + $0xd88] sm:$0xff]  ;;  %v3306_v28 = vpack.c.bf16 %v991_v20, %v963_v19  ;;  %v3514_v19 = vpack.c.bf16 %v1221_v13, %v1193_v11  ;;  %v3324_v20 = vpack.c.bf16 %v1272_v15, %v1244_v14  ;;  %v1467_v11 = vld [vmem:[%s4516_s24 + $0x1a70] sm:$0xff]  ;;  %v1473_v13 = vld [vmem:[%s4516_s24 + $0x1aa0] sm:$0xff] }
 0x24c   : > { %3481 = vmatprep.subr.bf16.mxu0 %v3480_v35  ;;  %v1047_v35 = vld [vmem:[%s4516_s24 + $0xd50] sm:$0xff]  ;;  %v3500_v37 = vpack.c.bf16 %v1054_v27, %v1026_v26  ;;  %v1300_v26 = vld [vmem:[%s4516_s24 + $0x1538] sm:$0xff]  ;;  %v1501_v15 = vld [vmem:[%s4516_s24 + $0x1b80] sm:$0xff] }
 0x24d   : > { %v1328_v27 = vld [vmem:[%s4516_s24 + $0x1618] sm:$0xff] }
 0x24e   : > { %3291 = vmatpush1.bf16.msra.mxu1 %v3290_v41  ;;  %v1082_v41 = vld [vmem:[%s4516_s24 + $0xe68] sm:$0xff] }
 0x24f   : > { %3483 = vmatpush1.bf16.msra.mxu0 %v3482_v43  ;;  %3293 = vmatprep.subr.bf16.mxu1 %v3292_v44  ;;  %v1110_v43 = vld [vmem:[%s4516_s24 + $0xf48] sm:$0xff]  ;;  %v3310_v44 = vpack.c.bf16 %v1047_v35, %v1019_v32  ;;  %v3518_v32 = vpack.c.bf16 %v1277_v25, %v1249_v23  ;;  %v3328_v35 = vpack.c.bf16 %v1328_v27, %v1300_v26  ;;  %v631_v23 = vld [vmem:[%s4516_s24 + $0x50] sm:$0xff]  ;;  %v637_v26 = vld [vmem:[%s4516_s24 + $0x80] sm:$0xff] }
 0x250   : > { %3485 = vmatprep.subr.bf16.mxu0 %v3484_v48  ;;  %v1103_v48 = vld [vmem:[%s4516_s24 + $0xf10] sm:$0xff]  ;;  %v3504_v51 = vpack.c.bf16 %v1110_v43, %v1082_v41  ;;  %v1356_v41 = vld [vmem:[%s4516_s24 + $0x16f8] sm:$0xff]  ;;  %v665_v27 = vld [vmem:[%s4516_s24 + $0x160] sm:$0xff] }
 0x251   : > { %v1384_v43 = vld [vmem:[%s4516_s24 + $0x17d8] sm:$0xff] }
 0x252   : > { %3295 = vmatpush1.bf16.msra.mxu1 %v3294_v54  ;;  %v1138_v54 = vld [vmem:[%s4516_s24 + $0x1028] sm:$0xff] }
 0x253   : > { %3487 = vmatpush1.bf16.msra.mxu0 %v3486_v55  ;;  %3297 = vmatprep.subr.bf16.mxu1 %v3296_v56  ;;  %v1166_v55 = vld [vmem:[%s4516_s24 + $0x1108] sm:$0xff]  ;;  %v3314_v56 = vpack.c.bf16 %v1103_v48, %v1075_v47  ;;  %v3522_v47 = vpack.c.bf16 %v1333_v40, %v1305_v38  ;;  %v3332_v48 = vpack.c.bf16 %v1384_v43, %v1356_v41  ;;  %v715_v38 = vld [vmem:[%s4516_s24 + $0x2f0] sm:$0xff]  ;;  %v721_v41 = vld [vmem:[%s4516_s24 + $0x320] sm:$0xff] }
 0x254   : > { %3489 = vmatprep.subr.bf16.mxu0 %v3488_v61  ;;  %v1159_v61 = vld [vmem:[%s4516_s24 + $0x10d0] sm:$0xff]  ;;  %v3508_v0 = vpack.c.bf16 %v1166_v55, %v1138_v54  ;;  %v1412_v54 = vld [vmem:[%s4516_s24 + $0x18b8] sm:$0xff] }
 0x255   : > { %v1440_v55 = vld [vmem:[%s4516_s24 + $0x1998] sm:$0xff] }
 0x256   : > { %3299 = vmatpush1.bf16.msra.mxu1 %v3298_v4  ;;  %v1194_v4 = vld [vmem:[%s4516_s24 + $0x11e8] sm:$0xff]  ;;  %v744_v43 = vld [vmem:[%s4516_s24 + $0x3d8] sm:$0xff] }
 0x257   : > { %3491 = vmatpush1.bf16.msra.mxu0 %v3490_v5  ;;  %3301 = vmatprep.subr.bf16.mxu1 %v3300_v6  ;;  %v1222_v5 = vld [vmem:[%s4516_s24 + $0x12c8] sm:$0xff]  ;;  %v3318_v6 = vpack.c.bf16 %v1159_v61, %v1131_v60  ;;  %v3526_v60 = vpack.c.bf16 %v1389_v53, %v1361_v52  ;;  %v3336_v61 = vpack.c.bf16 %v1440_v55, %v1412_v54  ;;  %v743_v52 = vld [vmem:[%s4516_s24 + $0x3d0] sm:$0xff]  ;;  %v749_v53 = vld [vmem:[%s4516_s24 + $0x400] sm:$0xff] }
 0x258   : > { %3493 = vmatprep.subr.bf16.mxu0 %v3492_v10  ;;  %v1215_v10 = vld [vmem:[%s4516_s24 + $0x1290] sm:$0xff]  ;;  %v3512_v12 = vpack.c.bf16 %v1222_v5, %v1194_v4  ;;  %v1468_v4 = vld [vmem:[%s4516_s24 + $0x1a78] sm:$0xff]  ;;  %v777_v55 = vld [vmem:[%s4516_s24 + $0x4e0] sm:$0xff] }
 0x259   : > { %v1496_v5 = vld [vmem:[%s4516_s24 + $0x1b58] sm:$0xff] }
 0x25a   : > { %3303 = vmatpush1.bf16.msra.mxu1 %v3302_v16  ;;  %v1250_v16 = vld [vmem:[%s4516_s24 + $0x13a8] sm:$0xff] }
 0x25b   : > { %3495 = vmatpush1.bf16.msra.mxu0 %v3494_v17  ;;  %3305 = vmatprep.subr.bf16.mxu1 %v3304_v18  ;;  %v1278_v17 = vld [vmem:[%s4516_s24 + $0x1488] sm:$0xff]  ;;  %v3322_v18 = vpack.c.bf16 %v1215_v10, %v1187_v9  ;;  %v3530_v9 = vpack.c.bf16 %v1445_v3, %v1417_v1  ;;  %v3340_v10 = vpack.c.bf16 %v1496_v5, %v1468_v4  ;;  %v799_v1 = vld [vmem:[%s4516_s24 + $0x590] sm:$0xff]  ;;  %v805_v3 = vld [vmem:[%s4516_s24 + $0x5c0] sm:$0xff] }
 0x25c   : > { %3497 = vmatprep.subr.bf16.mxu0 %v3496_v22  ;;  %v1271_v22 = vld [vmem:[%s4516_s24 + $0x1450] sm:$0xff]  ;;  %v3516_v24 = vpack.c.bf16 %v1278_v17, %v1250_v16  ;;  %v632_v16 = vld [vmem:[%s4516_s24 + $0x58] sm:$0xff]  ;;  %v833_v5 = vld [vmem:[%s4516_s24 + $0x6a0] sm:$0xff] }
 0x25d   : > { %v660_v17 = vld [vmem:[%s4516_s24 + $0x138] sm:$0xff] }
 0x25e   : > { %3307 = vmatpush1.bf16.msra.mxu1 %v3306_v28  ;;  %v1306_v28 = vld [vmem:[%s4516_s24 + $0x1568] sm:$0xff] }
 0x25f   : > { %3499 = vmatpush1.bf16.msra.mxu0 %v3498_v29  ;;  %3309 = vmatprep.subr.bf16.mxu1 %v3308_v30  ;;  %v1334_v29 = vld [vmem:[%s4516_s24 + $0x1648] sm:$0xff]  ;;  %v3326_v30 = vpack.c.bf16 %v1271_v22, %v1243_v21  ;;  %v3534_v21 = vpack.c.bf16 %v1501_v15, %v1473_v13  ;;  %v3408_v22 = vpack.c.bf16 %v660_v17, %v632_v16  ;;  %v855_v13 = vld [vmem:[%s4516_s24 + $0x750] sm:$0xff]  ;;  %v861_v15 = vld [vmem:[%s4516_s24 + $0x780] sm:$0xff] }
 0x260   : > { %3501 = vmatprep.subr.bf16.mxu0 %v3500_v37  ;;  %v1327_v37 = vld [vmem:[%s4516_s24 + $0x1610] sm:$0xff]  ;;  %v3520_v39 = vpack.c.bf16 %v1334_v29, %v1306_v28  ;;  %v688_v28 = vld [vmem:[%s4516_s24 + $0x218] sm:$0xff]  ;;  %v889_v17 = vld [vmem:[%s4516_s24 + $0x860] sm:$0xff] }
 0x261   : > { %v716_v29 = vld [vmem:[%s4516_s24 + $0x2f8] sm:$0xff] }
 0x262   : > { %3311 = vmatpush1.bf16.msra.mxu1 %v3310_v44  ;;  %v1362_v44 = vld [vmem:[%s4516_s24 + $0x1728] sm:$0xff]  ;;  %v3412_v40 = vpack.c.bf16 %v716_v29, %v688_v28  ;;  %v945_v29 = vld [vmem:[%s4516_s24 + $0xa20] sm:$0xff] }
 0x263   : > { %3503 = vmatpush1.bf16.msra.mxu0 %v3502_v45  ;;  %3313 = vmatprep.subr.bf16.mxu1 %v3312_v46  ;;  %v1390_v45 = vld [vmem:[%s4516_s24 + $0x1808] sm:$0xff]  ;;  %v3330_v46 = vpack.c.bf16 %v1327_v37, %v1299_v36  ;;  %v3602_v36 = vpack.c.bf16 %v665_v27, %v637_v26  ;;  %v687_v37 = vld [vmem:[%s4516_s24 + $0x210] sm:$0xff]  ;;  %v917_v27 = vld [vmem:[%s4516_s24 + $0x940] sm:$0xff] }
 0x264   : > { %3505 = vmatprep.subr.bf16.mxu0 %v3504_v51  ;;  %v1383_v51 = vld [vmem:[%s4516_s24 + $0x17d0] sm:$0xff]  ;;  %v3524_v50 = vpack.c.bf16 %v1390_v45, %v1362_v44  ;;  %v772_v44 = vld [vmem:[%s4516_s24 + $0x4b8] sm:$0xff] }
 0x265   : > { %v939_v26 = vld [vmem:[%s4516_s24 + $0x9f0] sm:$0xff] }
 0x266   : > { %3315 = vmatpush1.bf16.msra.mxu1 %v3314_v56  ;;  %v1418_v56 = vld [vmem:[%s4516_s24 + $0x18e8] sm:$0xff] }
 0x267   : > { %3507 = vmatpush1.bf16.msra.mxu0 %v3506_v57  ;;  %3317 = vmatprep.subr.bf16.mxu1 %v3316_v59  ;;  %v1446_v57 = vld [vmem:[%s4516_s24 + $0x19c8] sm:$0xff]  ;;  %v3334_v59 = vpack.c.bf16 %v1383_v51, %v1355_v49  ;;  %v3416_v51 = vpack.c.bf16 %v772_v44, %v744_v43  ;;  %v973_v43 = vld [vmem:[%s4516_s24 + $0xb00] sm:$0xff] }
 0x268   : > { %3509 = vmatprep.subr.bf16.mxu0 %v3508_v0  ;;  %v1439_v0 = vld [vmem:[%s4516_s24 + $0x1990] sm:$0xff]  ;;  %v3528_v2 = vpack.c.bf16 %v1446_v57, %v1418_v56  ;;  %v800_v56 = vld [vmem:[%s4516_s24 + $0x598] sm:$0xff] }
 0x269   : > { %v828_v57 = vld [vmem:[%s4516_s24 + $0x678] sm:$0xff] }
 0x26a   : > { %3319 = vmatpush1.bf16.msra.mxu1 %v3318_v6  ;;  %v1474_v6 = vld [vmem:[%s4516_s24 + $0x1aa8] sm:$0xff] }
 0x26b   : > { %3511 = vmatpush1.bf16.msra.mxu0 %v3510_v7  ;;  %3321 = vmatprep.subr.bf16.mxu1 %v3320_v8  ;;  %v1502_v7 = vld [vmem:[%s4516_s24 + $0x1b88] sm:$0xff]  ;;  %v3338_v8 = vpack.c.bf16 %v1439_v0, %v1411_v62  ;;  %v3610_v62 = vpack.c.bf16 %v777_v55, %v749_v53  ;;  %v3420_v0 = vpack.c.bf16 %v828_v57, %v800_v56  ;;  %v1023_v53 = vld [vmem:[%s4516_s24 + $0xc90] sm:$0xff]  ;;  %v1029_v55 = vld [vmem:[%s4516_s24 + $0xcc0] sm:$0xff] }
 0x26c   : > { %3513 = vmatprep.subr.bf16.mxu0 %v3512_v12  ;;  %v1495_v12 = vld [vmem:[%s4516_s24 + $0x1b50] sm:$0xff]  ;;  %v3532_v14 = vpack.c.bf16 %v1502_v7, %v1474_v6  ;;  %v856_v6 = vld [vmem:[%s4516_s24 + $0x758] sm:$0xff]  ;;  %v1057_v57 = vld [vmem:[%s4516_s24 + $0xda0] sm:$0xff] }
 0x26d   : > { %v884_v7 = vld [vmem:[%s4516_s24 + $0x838] sm:$0xff] }
 0x26e   : > { %3323 = vmatpush1.bf16.msra.mxu1 %v3322_v18  ;;  %v638_v18 = vld [vmem:[%s4516_s24 + $0x88] sm:$0xff] }
 0x26f   : > { %3515 = vmatpush1.bf16.msra.mxu0 %v3514_v19  ;;  %3325 = vmatprep.subr.bf16.mxu1 %v3324_v20  ;;  %v666_v19 = vld [vmem:[%s4516_s24 + $0x168] sm:$0xff]  ;;  %v3342_v20 = vpack.c.bf16 %v1495_v12, %v1467_v11  ;;  %v3614_v11 = vpack.c.bf16 %v833_v5, %v805_v3  ;;  %v3424_v12 = vpack.c.bf16 %v884_v7, %v856_v6  ;;  %v1079_v3 = vld [vmem:[%s4516_s24 + $0xe50] sm:$0xff]  ;;  %v1085_v5 = vld [vmem:[%s4516_s24 + $0xe80] sm:$0xff] }
 0x270   : > { %3517 = vmatprep.subr.bf16.mxu0 %v3516_v24  ;;  %v659_v24 = vld [vmem:[%s4516_s24 + $0x130] sm:$0xff]  ;;  %v3600_v25 = vpack.c.bf16 %v666_v19, %v638_v18  ;;  %v912_v18 = vld [vmem:[%s4516_s24 + $0x918] sm:$0xff]  ;;  %v1113_v7 = vld [vmem:[%s4516_s24 + $0xf60] sm:$0xff] }
 0x271   : > { %v940_v19 = vld [vmem:[%s4516_s24 + $0x9f8] sm:$0xff] }
 0x272   : > { %3327 = vmatpush1.bf16.msra.mxu1 %v3326_v30  ;;  %v3410_v30 = vpack.c.bf16 %v659_v24, %v631_v23  ;;  %v3618_v23 = vpack.c.bf16 %v889_v17, %v861_v15  ;;  %v3428_v24 = vpack.c.bf16 %v940_v19, %v912_v18  ;;  %v1135_v15 = vld [vmem:[%s4516_s24 + $0x1010] sm:$0xff]  ;;  %v1141_v17 = vld [vmem:[%s4516_s24 + $0x1040] sm:$0xff] }
 0x273   : > { %3519 = vmatpush1.bf16.msra.mxu0 %v3518_v32  ;;  %3329 = vmatprep.subr.bf16.mxu1 %v3328_v35  ;;  %v694_v32 = vld [vmem:[%s4516_s24 + $0x248] sm:$0xff]  ;;  %v1169_v19 = vld [vmem:[%s4516_s24 + $0x1120] sm:$0xff] }
 0x274   : > { %3521 = vmatprep.subr.bf16.mxu0 %v3520_v39  ;;  %v722_v35 = vld [vmem:[%s4516_s24 + $0x328] sm:$0xff]  ;;  %v693_v39 = vld [vmem:[%s4516_s24 + $0x240] sm:$0xff] }
 0x275   : > { %v3604_v45 = vpack.c.bf16 %v722_v35, %v694_v32  ;;  %v3606_v49 = vpack.c.bf16 %v721_v41, %v693_v39  ;;  %v996_v32 = vld [vmem:[%s4516_s24 + $0xbb8] sm:$0xff]  ;;  %v974_v35 = vld [vmem:[%s4516_s24 + $0xb08] sm:$0xff]  ;;  %v995_v41 = vld [vmem:[%s4516_s24 + $0xbb0] sm:$0xff] }
 0x276   : > { %3331 = vmatpush1.bf16.msra.mxu1 %v3330_v46  ;;  %v750_v46 = vld [vmem:[%s4516_s24 + $0x408] sm:$0xff] }
 0x277   : > { %3523 = vmatpush1.bf16.msra.mxu0 %v3522_v47  ;;  %3333 = vmatprep.subr.bf16.mxu1 %v3332_v48  ;;  %v778_v47 = vld [vmem:[%s4516_s24 + $0x4e8] sm:$0xff]  ;;  %v3414_v48 = vpack.c.bf16 %v715_v38, %v687_v37  ;;  %v3622_v38 = vpack.c.bf16 %v945_v29, %v917_v27  ;;  %v1191_v27 = vld [vmem:[%s4516_s24 + $0x11d0] sm:$0xff]  ;;  %v1197_v29 = vld [vmem:[%s4516_s24 + $0x1200] sm:$0xff] }
 0x278   : > { %3525 = vmatprep.subr.bf16.mxu0 %v3524_v50  ;;  %v771_v50 = vld [vmem:[%s4516_s24 + $0x4b0] sm:$0xff]  ;;  %v3608_v54 = vpack.c.bf16 %v778_v47, %v750_v46  ;;  %v1024_v46 = vld [vmem:[%s4516_s24 + $0xc98] sm:$0xff] }
 0x279   : > { %v1052_v47 = vld [vmem:[%s4516_s24 + $0xd78] sm:$0xff] }
 0x27a   : > { %3335 = vmatpush1.bf16.msra.mxu1 %v3334_v59  ;;  %v806_v59 = vld [vmem:[%s4516_s24 + $0x5c8] sm:$0xff] }
 0x27b   : > { %3527 = vmatpush1.bf16.msra.mxu0 %v3526_v60  ;;  %3337 = vmatprep.subr.bf16.mxu1 %v3336_v61  ;;  %v834_v60 = vld [vmem:[%s4516_s24 + $0x6a8] sm:$0xff]  ;;  %v3418_v61 = vpack.c.bf16 %v771_v50, %v743_v52  ;;  %v3436_v50 = vpack.c.bf16 %v1052_v47, %v1024_v46  ;;  %v1281_v47 = vld [vmem:[%s4516_s24 + $0x14a0] sm:$0xff] }
 0x27c   : > { %3529 = vmatprep.subr.bf16.mxu0 %v3528_v2  ;;  %v827_v2 = vld [vmem:[%s4516_s24 + $0x670] sm:$0xff]  ;;  %v3612_v4 = vpack.c.bf16 %v834_v60, %v806_v59  ;;  %v1080_v59 = vld [vmem:[%s4516_s24 + $0xe58] sm:$0xff] }
 0x27d   : > { %v1108_v60 = vld [vmem:[%s4516_s24 + $0xf38] sm:$0xff] }
 0x27e   : > { %3339 = vmatpush1.bf16.msra.mxu1 %v3338_v8  ;;  %v862_v8 = vld [vmem:[%s4516_s24 + $0x788] sm:$0xff] }
 0x27f   : > { %3531 = vmatpush1.bf16.msra.mxu0 %v3530_v9  ;;  %3341 = vmatprep.subr.bf16.mxu1 %v3340_v10  ;;  %v890_v9 = vld [vmem:[%s4516_s24 + $0x868] sm:$0xff]  ;;  %v3422_v10 = vpack.c.bf16 %v827_v2, %v799_v1  ;;  %v3630_v1 = vpack.c.bf16 %v1057_v57, %v1029_v55  ;;  %v3440_v2 = vpack.c.bf16 %v1108_v60, %v1080_v59  ;;  %v1303_v55 = vld [vmem:[%s4516_s24 + $0x1550] sm:$0xff]  ;;  %v1309_v57 = vld [vmem:[%s4516_s24 + $0x1580] sm:$0xff] }
 0x280   : > { %3533 = vmatprep.subr.bf16.mxu0 %v3532_v14  ;;  %v883_v14 = vld [vmem:[%s4516_s24 + $0x830] sm:$0xff]  ;;  %v3616_v16 = vpack.c.bf16 %v890_v9, %v862_v8  ;;  %v1136_v8 = vld [vmem:[%s4516_s24 + $0x1018] sm:$0xff]  ;;  %v1337_v60 = vld [vmem:[%s4516_s24 + $0x1660] sm:$0xff] }
 0x281   : > { %v1164_v9 = vld [vmem:[%s4516_s24 + $0x10f8] sm:$0xff] }
 0x282   : > { %3343 = vmatpush1.bf16.msra.mxu1 %v3342_v20  ;;  %v918_v20 = vld [vmem:[%s4516_s24 + $0x948] sm:$0xff] }
 0x283   : > { %3535 = vmatpush1.bf16.msra.mxu0 %v3534_v21  ;;  %3409 = vmatprep.subr.bf16.mxu1 %v3408_v22  ;;  %v946_v21 = vld [vmem:[%s4516_s24 + $0xa28] sm:$0xff]  ;;  %v3426_v22 = vpack.c.bf16 %v883_v14, %v855_v13  ;;  %v3634_v13 = vpack.c.bf16 %v1113_v7, %v1085_v5  ;;  %v3444_v14 = vpack.c.bf16 %v1164_v9, %v1136_v8  ;;  %v1359_v5 = vld [vmem:[%s4516_s24 + $0x1710] sm:$0xff]  ;;  %v1365_v7 = vld [vmem:[%s4516_s24 + $0x1740] sm:$0xff] }
 0x284   : > { %3601 = vmatprep.subr.bf16.mxu0 %v3600_v25  ;;  %v911_v25 = vld [vmem:[%s4516_s24 + $0x910] sm:$0xff]  ;;  %v3620_v28 = vpack.c.bf16 %v946_v21, %v918_v20  ;;  %v1192_v20 = vld [vmem:[%s4516_s24 + $0x11d8] sm:$0xff]  ;;  %v1393_v9 = vld [vmem:[%s4516_s24 + $0x1820] sm:$0xff] }
 0x285   : > { %1943 = vmatmul.mubr.f32.vlgmr.msra.gmra.mrb[4].mxu1 %v4699_v63  ;;  %v3430_v37 = vpack.c.bf16 %v939_v26, %v911_v25  ;;  %v1220_v21 = vld [vmem:[%s4516_s24 + $0x12b8] sm:$0xff]  ;;  %v3638_v25 = vpack.c.bf16 %v1169_v19, %v1141_v17  ;;  %v1415_v17 = vld [vmem:[%s4516_s24 + $0x18d0] sm:$0xff]  ;;  %v1421_v19 = vld [vmem:[%s4516_s24 + $0x1900] sm:$0xff] }
 0x286   : > { %2156 = vmatmul.mubr.f32.vlgmr.msra.gmra.mrb[6].mxu0 %v4699_v63  ;;  %3411 = vmatpush1.bf16.msra.mxu1 %v3410_v30  ;;  %v968_v30 = vld [vmem:[%s4516_s24 + $0xad8] sm:$0xff]  ;;  %v3448_v26 = vpack.c.bf16 %v1220_v21, %v1192_v20  ;;  %v1449_v21 = vld [vmem:[%s4516_s24 + $0x19e0] sm:$0xff] }
 0x287   : > { %2084 = vmatprep.mubr.f32.mxu1 %v4695_v58  ;;  %3603 = vmatpush1.bf16.msra.mxu0 %v3602_v36  ;;  %v1002_v36 = vld [vmem:[%s4516_s24 + $0xbe8] sm:$0xff]  ;;  %v3432_v39 = vpack.c.bf16 %v996_v32, %v968_v30  ;;  %v1225_v32 = vld [vmem:[%s4516_s24 + $0x12e0] sm:$0xff] }
 0x288   : > { %2297 = vmatprep.mubr.f32.mxu0 %v4695_v58  ;;  %3413 = vmatprep.subr.bf16.mxu1 %v3412_v40  ;;  %v967_v40 = vld [vmem:[%s4516_s24 + $0xad0] sm:$0xff]  ;;  %v3624_v44 = vpack.c.bf16 %v1002_v36, %v974_v35  ;;  %v1248_v35 = vld [vmem:[%s4516_s24 + $0x1398] sm:$0xff] }
 0x289   : > { %3605 = vmatprep.subr.bf16.mxu0 %v3604_v45  ;;  %v1001_v45 = vld [vmem:[%s4516_s24 + $0xbe0] sm:$0xff]  ;;  %v1276_v36 = vld [vmem:[%s4516_s24 + $0x1478] sm:$0xff] }
 0x28a   : > { %3415 = vmatpush1.bf16.msra.mxu1 %v3414_v48  ;;  %v1030_v48 = vld [vmem:[%s4516_s24 + $0xcc8] sm:$0xff]  ;;  %v3626_v52 = vpack.c.bf16 %v1001_v45, %v973_v43  ;;  %v1247_v43 = vld [vmem:[%s4516_s24 + $0x1390] sm:$0xff]  ;;  %v1253_v45 = vld [vmem:[%s4516_s24 + $0x13c0] sm:$0xff] }
 0x28b   : > { %3607 = vmatpush1.bf16.msra.mxu0 %v3606_v49  ;;  %3417 = vmatprep.subr.bf16.mxu1 %v3416_v51  ;;  %v1058_v49 = vld [vmem:[%s4516_s24 + $0xda8] sm:$0xff]  ;;  %v3434_v51 = vpack.c.bf16 %v995_v41, %v967_v40  ;;  %v3642_v40 = vpack.c.bf16 %v1225_v32, %v1197_v29  ;;  %v3452_v41 = vpack.c.bf16 %v1276_v36, %v1248_v35  ;;  %v1471_v29 = vld [vmem:[%s4516_s24 + $0x1a90] sm:$0xff]  ;;  %v1477_v32 = vld [vmem:[%s4516_s24 + $0x1ac0] sm:$0xff] }
 0x28c   : > { %3609 = vmatprep.subr.bf16.mxu0 %v3608_v54  ;;  %v1051_v54 = vld [vmem:[%s4516_s24 + $0xd70] sm:$0xff]  ;;  %v3628_v56 = vpack.c.bf16 %v1058_v49, %v1030_v48  ;;  %v1304_v48 = vld [vmem:[%s4516_s24 + $0x1558] sm:$0xff]  ;;  %v1505_v36 = vld [vmem:[%s4516_s24 + $0x1ba0] sm:$0xff] }
 0x28d   : > { %v1332_v49 = vld [vmem:[%s4516_s24 + $0x1638] sm:$0xff] }
 0x28e   : > { %3419 = vmatpush1.bf16.msra.mxu1 %v3418_v61  ;;  %v1086_v61 = vld [vmem:[%s4516_s24 + $0xe88] sm:$0xff] }
 0x28f   : > { %3611 = vmatpush1.bf16.msra.mxu0 %v3610_v62  ;;  %3421 = vmatprep.subr.bf16.mxu1 %v3420_v0  ;;  %v1114_v62 = vld [vmem:[%s4516_s24 + $0xf68] sm:$0xff]  ;;  %v3438_v0 = vpack.c.bf16 %v1051_v54, %v1023_v53  ;;  %v3646_v53 = vpack.c.bf16 %v1281_v47, %v1253_v45  ;;  %v3456_v54 = vpack.c.bf16 %v1332_v49, %v1304_v48  ;;  %v635_v45 = vld [vmem:[%s4516_s24 + $0x70] sm:$0xff]  ;;  %v641_v48 = vld [vmem:[%s4516_s24 + $0xa0] sm:$0xff] }
 0x290   : > { %3613 = vmatprep.subr.bf16.mxu0 %v3612_v4  ;;  %v1107_v4 = vld [vmem:[%s4516_s24 + $0xf30] sm:$0xff]  ;;  %v3632_v6 = vpack.c.bf16 %v1114_v62, %v1086_v61  ;;  %v1360_v61 = vld [vmem:[%s4516_s24 + $0x1718] sm:$0xff]  ;;  %v669_v49 = vld [vmem:[%s4516_s24 + $0x180] sm:$0xff] }
 0x291   : > { %v1388_v62 = vld [vmem:[%s4516_s24 + $0x17f8] sm:$0xff] }
 0x292   : > { %3423 = vmatpush1.bf16.msra.mxu1 %v3422_v10  ;;  %v1142_v10 = vld [vmem:[%s4516_s24 + $0x1048] sm:$0xff] }
 0x293   : > { %3615 = vmatpush1.bf16.msra.mxu0 %v3614_v11  ;;  %3425 = vmatprep.subr.bf16.mxu1 %v3424_v12  ;;  %v1170_v11 = vld [vmem:[%s4516_s24 + $0x1128] sm:$0xff]  ;;  %v3442_v12 = vpack.c.bf16 %v1107_v4, %v1079_v3  ;;  %v3650_v3 = vpack.c.bf16 %v1337_v60, %v1309_v57  ;;  %v3460_v4 = vpack.c.bf16 %v1388_v62, %v1360_v61  ;;  %v719_v57 = vld [vmem:[%s4516_s24 + $0x310] sm:$0xff]  ;;  %v725_v61 = vld [vmem:[%s4516_s24 + $0x340] sm:$0xff] }
 0x294   : > { %3617 = vmatprep.subr.bf16.mxu0 %v3616_v16  ;;  %v1163_v16 = vld [vmem:[%s4516_s24 + $0x10f0] sm:$0xff]  ;;  %v3636_v18 = vpack.c.bf16 %v1170_v11, %v1142_v10  ;;  %v1416_v10 = vld [vmem:[%s4516_s24 + $0x18d8] sm:$0xff] }
 0x295   : > { %v1444_v11 = vld [vmem:[%s4516_s24 + $0x19b8] sm:$0xff] }
 0x296   : > { %3427 = vmatpush1.bf16.msra.mxu1 %v3426_v22  ;;  %v1198_v22 = vld [vmem:[%s4516_s24 + $0x1208] sm:$0xff]  ;;  %v748_v62 = vld [vmem:[%s4516_s24 + $0x3f8] sm:$0xff] }
 0x297   : > { %3619 = vmatpush1.bf16.msra.mxu0 %v3618_v23  ;;  %3429 = vmatprep.subr.bf16.mxu1 %v3428_v24  ;;  %v1226_v23 = vld [vmem:[%s4516_s24 + $0x12e8] sm:$0xff]  ;;  %v3446_v24 = vpack.c.bf16 %v1163_v16, %v1135_v15  ;;  %v3654_v15 = vpack.c.bf16 %v1393_v9, %v1365_v7  ;;  %v3464_v16 = vpack.c.bf16 %v1444_v11, %v1416_v10  ;;  %v747_v7 = vld [vmem:[%s4516_s24 + $0x3f0] sm:$0xff]  ;;  %v753_v9 = vld [vmem:[%s4516_s24 + $0x420] sm:$0xff] }
 0x298   : > { %3621 = vmatprep.subr.bf16.mxu0 %v3620_v28  ;;  %v1219_v28 = vld [vmem:[%s4516_s24 + $0x12b0] sm:$0xff]  ;;  %v3640_v30 = vpack.c.bf16 %v1226_v23, %v1198_v22  ;;  %v1472_v22 = vld [vmem:[%s4516_s24 + $0x1a98] sm:$0xff]  ;;  %v781_v11 = vld [vmem:[%s4516_s24 + $0x500] sm:$0xff] }
 0x299   : > { %v1500_v23 = vld [vmem:[%s4516_s24 + $0x1b78] sm:$0xff] }
 0x29a   : > { %3431 = vmatpush1.bf16.msra.mxu1 %v3430_v37  ;;  %v1254_v37 = vld [vmem:[%s4516_s24 + $0x13c8] sm:$0xff] }
 0x29b   : > { %3623 = vmatpush1.bf16.msra.mxu0 %v3622_v38  ;;  %3433 = vmatprep.subr.bf16.mxu1 %v3432_v39  ;;  %v1282_v38 = vld [vmem:[%s4516_s24 + $0x14a8] sm:$0xff]  ;;  %v3450_v39 = vpack.c.bf16 %v1219_v28, %v1191_v27  ;;  %v3658_v27 = vpack.c.bf16 %v1449_v21, %v1421_v19  ;;  %v3468_v28 = vpack.c.bf16 %v1500_v23, %v1472_v22  ;;  %v803_v19 = vld [vmem:[%s4516_s24 + $0x5b0] sm:$0xff]  ;;  %v809_v21 = vld [vmem:[%s4516_s24 + $0x5e0] sm:$0xff] }
 0x29c   : > { %3625 = vmatprep.subr.bf16.mxu0 %v3624_v44  ;;  %v1275_v44 = vld [vmem:[%s4516_s24 + $0x1470] sm:$0xff]  ;;  %v3644_v46 = vpack.c.bf16 %v1282_v38, %v1254_v37  ;;  %v636_v37 = vld [vmem:[%s4516_s24 + $0x78] sm:$0xff]  ;;  %v837_v23 = vld [vmem:[%s4516_s24 + $0x6c0] sm:$0xff] }
 0x29d   : > { %v664_v38 = vld [vmem:[%s4516_s24 + $0x158] sm:$0xff] }
 0x29e   : > { %3435 = vmatpush1.bf16.msra.mxu1 %v3434_v51  ;;  %v1310_v51 = vld [vmem:[%s4516_s24 + $0x1588] sm:$0xff] }
 0x29f   : > { %3627 = vmatpush1.bf16.msra.mxu0 %v3626_v52  ;;  %3437 = vmatprep.subr.bf16.mxu1 %v3436_v50  ;;  %v1338_v52 = vld [vmem:[%s4516_s24 + $0x1668] sm:$0xff]  ;;  %v3454_v50 = vpack.c.bf16 %v1275_v44, %v1247_v43  ;;  %v3662_v43 = vpack.c.bf16 %v1505_v36, %v1477_v32  ;;  %v3536_v44 = vpack.c.bf16 %v664_v38, %v636_v37  ;;  %v859_v32 = vld [vmem:[%s4516_s24 + $0x770] sm:$0xff]  ;;  %v865_v36 = vld [vmem:[%s4516_s24 + $0x7a0] sm:$0xff] }
 0x2a0   : > { %3629 = vmatprep.subr.bf16.mxu0 %v3628_v56  ;;  %v1331_v56 = vld [vmem:[%s4516_s24 + $0x1630] sm:$0xff]  ;;  %v3648_v59 = vpack.c.bf16 %v1338_v52, %v1310_v51  ;;  %v692_v51 = vld [vmem:[%s4516_s24 + $0x238] sm:$0xff]  ;;  %v893_v38 = vld [vmem:[%s4516_s24 + $0x880] sm:$0xff] }
 0x2a1   : > { %v720_v52 = vld [vmem:[%s4516_s24 + $0x318] sm:$0xff] }
 0x2a2   : > { %3439 = vmatpush1.bf16.msra.mxu1 %v3438_v0  ;;  %v1366_v0 = vld [vmem:[%s4516_s24 + $0x1748] sm:$0xff]  ;;  %v3540_v60 = vpack.c.bf16 %v720_v52, %v692_v51  ;;  %v915_v51 = vld [vmem:[%s4516_s24 + $0x930] sm:$0xff] }
 0x2a3   : > { %3631 = vmatpush1.bf16.msra.mxu0 %v3630_v1  ;;  %3441 = vmatprep.subr.bf16.mxu1 %v3440_v2  ;;  %v1394_v1 = vld [vmem:[%s4516_s24 + $0x1828] sm:$0xff]  ;;  %v3458_v2 = vpack.c.bf16 %v1331_v56, %v1303_v55  ;;  %v3730_v55 = vpack.c.bf16 %v669_v49, %v641_v48  ;;  %v691_v56 = vld [vmem:[%s4516_s24 + $0x230] sm:$0xff]  ;;  %v3746_v48 = vpack.c.bf16 %v893_v38, %v865_v36 }
 0x2a4   : > { %3633 = vmatprep.subr.bf16.mxu0 %v3632_v6  ;;  %v1387_v6 = vld [vmem:[%s4516_s24 + $0x17f0] sm:$0xff]  ;;  %v3652_v8 = vpack.c.bf16 %v1394_v1, %v1366_v0  ;;  %v776_v0 = vld [vmem:[%s4516_s24 + $0x4d8] sm:$0xff]  ;;  %v1090_v36 = vld [vmem:[%s4516_s24 + $0xea8] sm:$0xff] }
 0x2a5   : > { %v943_v52 = vld [vmem:[%s4516_s24 + $0xa10] sm:$0xff] }
 0x2a6   : > { %3443 = vmatpush1.bf16.msra.mxu1 %v3442_v12  ;;  %v1422_v12 = vld [vmem:[%s4516_s24 + $0x1908] sm:$0xff] }
 0x2a7   : > { %3635 = vmatpush1.bf16.msra.mxu0 %v3634_v13  ;;  %3445 = vmatprep.subr.bf16.mxu1 %v3444_v14  ;;  %v1450_v13 = vld [vmem:[%s4516_s24 + $0x19e8] sm:$0xff]  ;;  %v3462_v14 = vpack.c.bf16 %v1387_v6, %v1359_v5  ;;  %v3544_v6 = vpack.c.bf16 %v776_v0, %v748_v62 }
 0x2a8   : > { %3637 = vmatprep.subr.bf16.mxu0 %v3636_v18  ;;  %v1443_v18 = vld [vmem:[%s4516_s24 + $0x19b0] sm:$0xff]  ;;  %v3656_v20 = vpack.c.bf16 %v1450_v13, %v1422_v12  ;;  %v804_v12 = vld [vmem:[%s4516_s24 + $0x5b8] sm:$0xff] }
 0x2a9   : > { %v832_v13 = vld [vmem:[%s4516_s24 + $0x698] sm:$0xff] }
 0x2aa   : > { %3447 = vmatpush1.bf16.msra.mxu1 %v3446_v24  ;;  %v1478_v24 = vld [vmem:[%s4516_s24 + $0x1ac8] sm:$0xff] }
 0x2ab   : > { %3639 = vmatpush1.bf16.msra.mxu0 %v3638_v25  ;;  %3449 = vmatprep.subr.bf16.mxu1 %v3448_v26  ;;  %v1506_v25 = vld [vmem:[%s4516_s24 + $0x1ba8] sm:$0xff]  ;;  %v3466_v26 = vpack.c.bf16 %v1443_v18, %v1415_v17  ;;  %v3738_v17 = vpack.c.bf16 %v781_v11, %v753_v9  ;;  %v3548_v18 = vpack.c.bf16 %v832_v13, %v804_v12  ;;  %v1028_v11 = vld [vmem:[%s4516_s24 + $0xcb8] sm:$0xff] }
 0x2ac   : > { %3641 = vmatprep.subr.bf16.mxu0 %v3640_v30  ;;  %v1499_v30 = vld [vmem:[%s4516_s24 + $0x1b70] sm:$0xff]  ;;  %v3660_v35 = vpack.c.bf16 %v1506_v25, %v1478_v24  ;;  %v860_v24 = vld [vmem:[%s4516_s24 + $0x778] sm:$0xff] }
 0x2ad   : > { %v888_v25 = vld [vmem:[%s4516_s24 + $0x858] sm:$0xff] }
 0x2ae   : > { %3451 = vmatpush1.bf16.msra.mxu1 %v3450_v39  ;;  %v642_v39 = vld [vmem:[%s4516_s24 + $0xa8] sm:$0xff]  ;;  %v1056_v12 = vld [vmem:[%s4516_s24 + $0xd98] sm:$0xff] }
 0x2af   : > { %3643 = vmatpush1.bf16.msra.mxu0 %v3642_v40  ;;  %3453 = vmatprep.subr.bf16.mxu1 %v3452_v41  ;;  %v670_v40 = vld [vmem:[%s4516_s24 + $0x188] sm:$0xff]  ;;  %v3470_v41 = vpack.c.bf16 %v1499_v30, %v1471_v29  ;;  %v3742_v29 = vpack.c.bf16 %v837_v23, %v809_v21  ;;  %v3552_v30 = vpack.c.bf16 %v888_v25, %v860_v24  ;;  %v1027_v24 = vld [vmem:[%s4516_s24 + $0xcb0] sm:$0xff] }
 0x2b0   : > { %3645 = vmatprep.subr.bf16.mxu0 %v3644_v46  ;;  %v663_v46 = vld [vmem:[%s4516_s24 + $0x150] sm:$0xff]  ;;  %v3728_v47 = vpack.c.bf16 %v670_v40, %v642_v39  ;;  %v916_v39 = vld [vmem:[%s4516_s24 + $0x938] sm:$0xff]  ;;  %v3564_v23 = vpack.c.bf16 %v1056_v12, %v1028_v11  ;;  %v1229_v11 = vld [vmem:[%s4516_s24 + $0x1300] sm:$0xff] }
 0x2b1   : > { %v944_v40 = vld [vmem:[%s4516_s24 + $0xa18] sm:$0xff]  ;;  %v1055_v25 = vld [vmem:[%s4516_s24 + $0xd90] sm:$0xff] }
 0x2b2   : > { %3455 = vmatpush1.bf16.msra.mxu1 %v3454_v50  ;;  %v3538_v50 = vpack.c.bf16 %v663_v46, %v635_v45  ;;  %v5140_v46 = vld [vmem:[%s5137_s9] sm:$0xff]  ;;  %v3556_v49 = vpack.c.bf16 %v944_v40, %v916_v39  ;;  %v3566_v38 = vpack.c.bf16 %v1055_v25, %v1027_v24  ;;  %v1279_v24 = vld [vmem:[%s4516_s24 + $0x1490] sm:$0xff] }
 0x2b3   : > { %3647 = vmatpush1.bf16.msra.mxu0 %v3646_v53  ;;  %3457 = vmatprep.subr.bf16.mxu1 %v3456_v54  ;;  %v698_v53 = vld [vmem:[%s4516_s24 + $0x268] sm:$0xff]  ;;  %v1532_v62 = vrot.slane %v5140_v46, %v4683_v33  ;;  %v1252_v12 = vld [vmem:[%s4516_s24 + $0x13b8] sm:$0xff]  ;;  %v1257_v25 = vld [vmem:[%s4516_s24 + $0x13e0] sm:$0xff] }
 0x2b4   : > { %3649 = vmatprep.subr.bf16.mxu0 %v3648_v59  ;;  %v726_v54 = vld [vmem:[%s4516_s24 + $0x348] sm:$0xff]  ;;  %v697_v59 = vld [vmem:[%s4516_s24 + $0x260] sm:$0xff] }
 0x2b5   : > { %v3732_v1 = vpack.c.bf16 %v726_v54, %v698_v53  ;;  %v3734_v5 = vpack.c.bf16 %v725_v61, %v697_v59  ;;  %v949_v54 = vld [vmem:[%s4516_s24 + $0xa40] sm:$0xff]  ;;  %v1006_v61 = vld [vmem:[%s4516_s24 + $0xc08] sm:$0xff] }
 0x2b6   : > { %3459 = vmatpush1.bf16.msra.mxu1 %v3458_v2  ;;  %v754_v2 = vld [vmem:[%s4516_s24 + $0x428] sm:$0xff] }
 0x2b7   : > { %3651 = vmatpush1.bf16.msra.mxu0 %v3650_v3  ;;  %3461 = vmatprep.subr.bf16.mxu1 %v3460_v4  ;;  %v782_v3 = vld [vmem:[%s4516_s24 + $0x508] sm:$0xff]  ;;  %v3542_v4 = vpack.c.bf16 %v719_v57, %v691_v56  ;;  %v1000_v56 = vld [vmem:[%s4516_s24 + $0xbd8] sm:$0xff]  ;;  %v1528_v57 = vrot.slane %v5140_v46, %v4680_v31 }
 0x2b8   : > { %3653 = vmatprep.subr.bf16.mxu0 %v3652_v8  ;;  %v775_v8 = vld [vmem:[%s4516_s24 + $0x4d0] sm:$0xff]  ;;  %v3736_v10 = vpack.c.bf16 %v782_v3, %v754_v2 }
 0x2ba   : > { %3463 = vmatpush1.bf16.msra.mxu1 %v3462_v14  ;;  %v810_v14 = vld [vmem:[%s4516_s24 + $0x5e8] sm:$0xff] }
 0x2bb   : > { %3655 = vmatpush1.bf16.msra.mxu0 %v3654_v15  ;;  %3465 = vmatprep.subr.bf16.mxu1 %v3464_v16  ;;  %v838_v15 = vld [vmem:[%s4516_s24 + $0x6c8] sm:$0xff]  ;;  %v3546_v16 = vpack.c.bf16 %v775_v8, %v747_v7 }
 0x2bc   : > { %3657 = vmatprep.subr.bf16.mxu0 %v3656_v20  ;;  %v831_v20 = vld [vmem:[%s4516_s24 + $0x690] sm:$0xff]  ;;  %v3740_v22 = vpack.c.bf16 %v838_v15, %v810_v14 }
 0x2be   : > { %3467 = vmatpush1.bf16.msra.mxu1 %v3466_v26  ;;  %v866_v26 = vld [vmem:[%s4516_s24 + $0x7a8] sm:$0xff] }
 0x2bf   : > { %3659 = vmatpush1.bf16.msra.mxu0 %v3658_v27  ;;  %3469 = vmatprep.subr.bf16.mxu1 %v3468_v28  ;;  %v894_v27 = vld [vmem:[%s4516_s24 + $0x888] sm:$0xff]  ;;  %v3550_v28 = vpack.c.bf16 %v831_v20, %v803_v19 }
 0x2c0   : > { %3661 = vmatprep.subr.bf16.mxu0 %v3660_v35  ;;  %v887_v35 = vld [vmem:[%s4516_s24 + $0x850] sm:$0xff]  ;;  %v3744_v37 = vpack.c.bf16 %v894_v27, %v866_v26  ;;  %v1033_v26 = vld [vmem:[%s4516_s24 + $0xce0] sm:$0xff] }
 0x2c1   : > { %v3554_v45 = vpack.c.bf16 %v887_v35, %v859_v32  ;;  %v1084_v32 = vld [vmem:[%s4516_s24 + $0xe78] sm:$0xff] }
 0x2c2   : > { %3471 = vmatpush1.bf16.msra.mxu1 %v3470_v41  ;;  %v5133_v41 = vsub.s32 4, %v4522_v34  ;;  %v1112_v35 = vld [vmem:[%s4516_s24 + $0xf58] sm:$0xff] }
 0x2c3   : > { %3663 = vmatpush1.bf16.msra.mxu0 %v3662_v43  ;;  %3537 = vmatprep.subr.bf16.mxu1 %v3536_v44  ;;  %v922_v43 = vld [vmem:[%s4516_s24 + $0x968] sm:$0xff]  ;;  %v3568_v40 = vpack.c.bf16 %v1112_v35, %v1084_v32  ;;  %v1336_v32 = vld [vmem:[%s4516_s24 + $0x1658] sm:$0xff] }
 0x2c4   : > { %3729 = vmatprep.subr.bf16.mxu0 %v3728_v47  ;;  %v950_v44 = vld [vmem:[%s4516_s24 + $0xa48] sm:$0xff]  ;;  %v5143_v47 = vsub.s32 5, %v4522_v34  ;;  %v1544_v59 = vrot.slane %v5140_v46, %v5133_v41 }
 0x2c5   : > { %2085 = vmatmul.mubr.f32.vlgmr.msra.gmra.mrb[6].mxu1 %v4699_v63  ;;  %v3748_v53 = vpack.c.bf16 %v950_v44, %v922_v43  ;;  %v1083_v43 = vld [vmem:[%s4516_s24 + $0xe70] sm:$0xff]  ;;  %v1314_v35 = vld [vmem:[%s4516_s24 + $0x15a8] sm:$0xff] }
 0x2c6   : > { %2298 = vmatmul.mubr.f32.vlgmr.msra.gmra.mrb[8].mxu0 %v4699_v63  ;;  %3539 = vmatpush1.bf16.msra.mxu1 %v3538_v50  ;;  %v921_v50 = vld [vmem:[%s4516_s24 + $0x960] sm:$0xff]  ;;  %v1548_v0 = vrot.slane %v5140_v46, %v5143_v47  ;;  %v1111_v44 = vld [vmem:[%s4516_s24 + $0xf50] sm:$0xff] }
 0x2c7   : > { %2226 = vmatprep.mubr.f32.mxu1 %v4695_v58  ;;  %3731 = vmatpush1.bf16.msra.mxu0 %v3730_v55  ;;  %v972_v55 = vld [vmem:[%s4516_s24 + $0xaf8] sm:$0xff]  ;;  %v3750_v2 = vpack.c.bf16 %v949_v54, %v921_v50  ;;  %v1146_v50 = vld [vmem:[%s4516_s24 + $0x1068] sm:$0xff]  ;;  %v3570_v54 = vpack.c.bf16 %v1111_v44, %v1083_v43  ;;  %v1335_v43 = vld [vmem:[%s4516_s24 + $0x1650] sm:$0xff] }
 0x2c8   : > { %2439 = vmatprep.mubr.f32.mxu0 %v4695_v58  ;;  %3541 = vmatprep.subr.bf16.mxu1 %v3540_v60  ;;  %v978_v60 = vld [vmem:[%s4516_s24 + $0xb28] sm:$0xff]  ;;  %v3560_v3 = vpack.c.bf16 %v1000_v56, %v972_v55  ;;  %v1313_v44 = vld [vmem:[%s4516_s24 + $0x15a0] sm:$0xff] }
 0x2c9   : > { %3733 = vmatprep.subr.bf16.mxu0 %v3732_v1  ;;  %v3558_v1 = vpack.c.bf16 %v943_v52, %v915_v51  ;;  %v3752_v9 = vpack.c.bf16 %v1006_v61, %v978_v60  ;;  %v1140_v51 = vld [vmem:[%s4516_s24 + $0x1038] sm:$0xff]  ;;  %v1145_v60 = vld [vmem:[%s4516_s24 + $0x1060] sm:$0xff] }
 0x2ca   : > { %3543 = vmatpush1.bf16.msra.mxu1 %v3542_v4  ;;  %v971_v4 = vld [vmem:[%s4516_s24 + $0xaf0] sm:$0xff]  ;;  %v1168_v52 = vld [vmem:[%s4516_s24 + $0x1118] sm:$0xff] }
 0x2cb   : > { %3735 = vmatpush1.bf16.msra.mxu0 %v3734_v5  ;;  %3545 = vmatprep.subr.bf16.mxu1 %v3544_v6  ;;  %v999_v5 = vld [vmem:[%s4516_s24 + $0xbd0] sm:$0xff]  ;;  %v977_v6 = vld [vmem:[%s4516_s24 + $0xb20] sm:$0xff]  ;;  %v3572_v56 = vpack.c.bf16 %v1168_v52, %v1140_v51  ;;  %v1392_v51 = vld [vmem:[%s4516_s24 + $0x1818] sm:$0xff] }
 0x2cc   : > { %3737 = vmatprep.subr.bf16.mxu0 %v3736_v10  ;;  %v1005_v10 = vld [vmem:[%s4516_s24 + $0xc00] sm:$0xff]  ;;  %v3562_v21 = vpack.c.bf16 %v999_v5, %v971_v4  ;;  %v1370_v52 = vld [vmem:[%s4516_s24 + $0x1768] sm:$0xff] }
 0x2ce   : > { %3547 = vmatpush1.bf16.msra.mxu1 %v3546_v16 }
 0x2cf   : > { %3739 = vmatpush1.bf16.msra.mxu0 %v3738_v17  ;;  %3549 = vmatprep.subr.bf16.mxu1 %v3548_v18  ;;  %v1034_v17 = vld [vmem:[%s4516_s24 + $0xce8] sm:$0xff] }
 0x2d0   : > { %3741 = vmatprep.subr.bf16.mxu0 %v3740_v22  ;;  %v1062_v18 = vld [vmem:[%s4516_s24 + $0xdc8] sm:$0xff]  ;;  %v3754_v22 = vpack.c.bf16 %v1005_v10, %v977_v6 }
 0x2d2   : > { %3551 = vmatpush1.bf16.msra.mxu1 %v3550_v28 }
 0x2d3   : > { %3743 = vmatpush1.bf16.msra.mxu0 %v3742_v29  ;;  %3553 = vmatprep.subr.bf16.mxu1 %v3552_v30  ;;  %v3756_v29 = vpack.c.bf16 %v1062_v18, %v1034_v17  ;;  %v1061_v30 = vld [vmem:[%s4516_s24 + $0xdc0] sm:$0xff]  ;;  %v1286_v17 = vld [vmem:[%s4516_s24 + $0x14c8] sm:$0xff] }
 0x2d4   : > { %3745 = vmatprep.subr.bf16.mxu0 %v3744_v37  ;;  %v1118_v37 = vld [vmem:[%s4516_s24 + $0xf88] sm:$0xff]  ;;  %v3758_v39 = vpack.c.bf16 %v1061_v30, %v1033_v26  ;;  %v1308_v30 = vld [vmem:[%s4516_s24 + $0x1578] sm:$0xff] }
 0x2d6   : > { %3555 = vmatpush1.bf16.msra.mxu1 %v3554_v45  ;;  %v1089_v45 = vld [vmem:[%s4516_s24 + $0xea0] sm:$0xff] }
 0x2d7   : > { %3747 = vmatpush1.bf16.msra.mxu0 %v3746_v48  ;;  %3557 = vmatprep.subr.bf16.mxu1 %v3556_v49  ;;  %v3760_v48 = vpack.c.bf16 %v1118_v37, %v1090_v36  ;;  %v1117_v49 = vld [vmem:[%s4516_s24 + $0xf80] sm:$0xff]  ;;  %v1342_v36 = vld [vmem:[%s4516_s24 + $0x1688] sm:$0xff] }
 0x2d8   : > { %v1731_v7 = vpop.f32.mrb[0].mxu1  ;;  %v1873_v8 = vpop.f32.mrb[2].mxu0  ;;  %3749 = vmatprep.subr.bf16.mxu0 %v3748_v53  ;;  %v1174_v53 = vld [vmem:[%s4516_s24 + $0x1148] sm:$0xff]  ;;  %v3762_v55 = vpack.c.bf16 %v1117_v49, %v1089_v45  ;;  %v3776_v45 = vpack.c.bf16 %v1342_v36, %v1314_v35  ;;  %v1364_v49 = vld [vmem:[%s4516_s24 + $0x1738] sm:$0xff] }
 0x2d9   : > { %v5167_v13 = vadd.f32 %v1731_v7, %v1528_v57  ;;  %v5169_v14 = vadd.f32 %v1873_v8, %v1544_v59  ;;  %v1733_v15 = vpop.f32.mrb[1].mxu1  ;;  %v1875_v16 = vpop.f32.mrb[3].mxu0  ;;  %v1139_v57 = vld [vmem:[%s4516_s24 + $0x1030] sm:$0xff]  ;;  %v3764_v61 = vpack.c.bf16 %v1174_v53, %v1146_v50  ;;  %v1398_v50 = vld [vmem:[%s4516_s24 + $0x1848] sm:$0xff] }
 0x2da   : > { %v5173_v19 = vadd.f32 %v1733_v15, %v1532_v62  ;;  %v5175_v20 = vadd.f32 %v1875_v16, %v1548_v0  ;;  %3559 = vmatpush1.bf16.msra.mxu1 %v3558_v1  ;;  %v1167_v59 = vld [vmem:[%s4516_s24 + $0x1110] sm:$0xff]  ;;  %v1173_v62 = vld [vmem:[%s4516_s24 + $0x1140] sm:$0xff]  ;;  %v1196_v0 = vld [vmem:[%s4516_s24 + $0x11f8] sm:$0xff] }
 0x2db   : > { %3751 = vmatpush1.bf16.msra.mxu0 %v3750_v2  ;;  %3561 = vmatprep.subr.bf16.mxu1 %v3560_v3  ;;  %v1224_v1 = vld [vmem:[%s4516_s24 + $0x12d8] sm:$0xff]  ;;  %v1202_v2 = vld [vmem:[%s4516_s24 + $0x1228] sm:$0xff]  ;;  %v3574_v4 = vpack.c.bf16 %v1167_v59, %v1139_v57  ;;  %v3766_v5 = vpack.c.bf16 %v1173_v62, %v1145_v60  ;;  %v1195_v7 = vld [vmem:[%s4516_s24 + $0x11f0] sm:$0xff]  ;;  %v3780_v60 = vpack.c.bf16 %v1398_v50, %v1370_v52 }
 0x2dc   : > { %v2687_v27 = vcombine.low %v5167_v13, %v5173_v19  ;;  %v2704_v28 = vcombine.low %v5169_v14, %v5175_v20  ;;  %3753 = vmatprep.subr.bf16.mxu0 %v3752_v9  ;;  %v1230_v3 = vld [vmem:[%s4516_s24 + $0x1308] sm:$0xff]  ;;  %v3576_v6 = vpack.c.bf16 %v1224_v1, %v1196_v0  ;;  %v1223_v8 = vld [vmem:[%s4516_s24 + $0x12d0] sm:$0xff]  ;;  %v1201_v9 = vld [vmem:[%s4516_s24 + $0x1220] sm:$0xff] }
 0x2dd   : > { %v3768_v10 = vpack.c.bf16 %v1230_v3, %v1202_v2  ;;  %v1280_v15 = vld [vmem:[%s4516_s24 + $0x1498] sm:$0xff]  ;;  %v1258_v16 = vld [vmem:[%s4516_s24 + $0x13e8] sm:$0xff]  ;;  %v3578_v18 = vpack.c.bf16 %v1223_v8, %v1195_v7  ;;  %v1391_v57 = vld [vmem:[%s4516_s24 + $0x1810] sm:$0xff] }
 0x2de   : > { %3563 = vmatpush1.bf16.msra.mxu1 %v3562_v21  ;;  %v3770_v21 = vpack.c.bf16 %v1229_v11, %v1201_v9  ;;  %v3772_v26 = vpack.c.bf16 %v1286_v17, %v1258_v16  ;;  %v1369_v59 = vld [vmem:[%s4516_s24 + $0x1760] sm:$0xff]  ;;  %v1420_v62 = vld [vmem:[%s4516_s24 + $0x18f8] sm:$0xff]  ;;  %v1426_v1 = vld [vmem:[%s4516_s24 + $0x1928] sm:$0xff] }
 0x2df   : > { %3755 = vmatpush1.bf16.msra.mxu0 %v3754_v22  ;;  %3565 = vmatprep.subr.bf16.mxu1 %v3564_v23  ;;  %v3580_v22 = vpack.c.bf16 %v1280_v15, %v1252_v12  ;;  %v1251_v23 = vld [vmem:[%s4516_s24 + $0x13b0] sm:$0xff]  ;;  %v1448_v0 = vld [vmem:[%s4516_s24 + $0x19d8] sm:$0xff]  ;;  %v1454_v2 = vld [vmem:[%s4516_s24 + $0x1a08] sm:$0xff] }
 0x2e0   : > { %3757 = vmatprep.subr.bf16.mxu0 %v3756_v29  ;;  %v1285_v29 = vld [vmem:[%s4516_s24 + $0x14c0] sm:$0xff]  ;;  %v3582_v37 = vpack.c.bf16 %v1279_v24, %v1251_v23  ;;  %v1447_v7 = vld [vmem:[%s4516_s24 + $0x19d0] sm:$0xff]  ;;  %v3784_v9 = vpack.c.bf16 %v1454_v2, %v1426_v1  ;;  %v1476_v11 = vld [vmem:[%s4516_s24 + $0x1ab8] sm:$0xff] }
 0x2e1   : > { %v1425_v8 = vld [vmem:[%s4516_s24 + $0x1920] sm:$0xff]  ;;  %v1504_v12 = vld [vmem:[%s4516_s24 + $0x1b98] sm:$0xff]  ;;  %v1482_v15 = vld [vmem:[%s4516_s24 + $0x1ae8] sm:$0xff] }
 0x2e2   : > { %3567 = vmatpush1.bf16.msra.mxu1 %v3566_v38  ;;  %v3774_v38 = vpack.c.bf16 %v1285_v29, %v1257_v25  ;;  %v1510_v16 = vld [vmem:[%s4516_s24 + $0x1bc8] sm:$0xff]  ;;  %v1503_v23 = vld [vmem:[%s4516_s24 + $0x1b90] sm:$0xff]  ;;  %v1481_v24 = vld [vmem:[%s4516_s24 + $0x1ae0] sm:$0xff] }
 0x2e3   : > { %3759 = vmatpush1.bf16.msra.mxu0 %v3758_v39  ;;  %3569 = vmatprep.subr.bf16.mxu1 %v3568_v40  ;;  %v3584_v39 = vpack.c.bf16 %v1336_v32, %v1308_v30  ;;  %v1307_v40 = vld [vmem:[%s4516_s24 + $0x1570] sm:$0xff]  ;;  %v3788_v25 = vpack.c.bf16 %v1510_v16, %v1482_v15  ;;  %v640_v29 = vld [vmem:[%s4516_s24 + $0x98] sm:$0xff]  ;;  %v646_v32 = vld [vmem:[%s4516_s24 + $0xc8] sm:$0xff] }
 0x2e4   : > { %3761 = vmatprep.subr.bf16.mxu0 %v3760_v48  ;;  %v1341_v48 = vld [vmem:[%s4516_s24 + $0x1680] sm:$0xff]  ;;  %v3586_v53 = vpack.c.bf16 %v1335_v43, %v1307_v40  ;;  %v668_v30 = vld [vmem:[%s4516_s24 + $0x178] sm:$0xff]  ;;  %v674_v35 = vld [vmem:[%s4516_s24 + $0x1a8] sm:$0xff] }
 0x2e5   : > { %v667_v40 = vld [vmem:[%s4516_s24 + $0x170] sm:$0xff]  ;;  %v3856_v43 = vpack.c.bf16 %v674_v35, %v646_v32  ;;  %v702_v52 = vld [vmem:[%s4516_s24 + $0x288] sm:$0xff]  ;;  %v1121_v19 = vld [vmem:[%s4516_s24 + $0xfa0] sm:$0xff] }
 0x2e6   : > { %3571 = vmatpush1.bf16.msra.mxu1 %v3570_v54  ;;  %v3778_v54 = vpack.c.bf16 %v1341_v48, %v1313_v44  ;;  %v645_v44 = vld [vmem:[%s4516_s24 + $0xc0] sm:$0xff]  ;;  %v696_v48 = vld [vmem:[%s4516_s24 + $0x258] sm:$0xff]  ;;  %v730_v50 = vld [vmem:[%s4516_s24 + $0x368] sm:$0xff] }
 0x2e7   : > { %3763 = vmatpush1.bf16.msra.mxu0 %v3762_v55  ;;  %3573 = vmatprep.subr.bf16.mxu1 %v3572_v56  ;;  %v3588_v55 = vpack.c.bf16 %v1392_v51, %v1364_v49  ;;  %v1363_v56 = vld [vmem:[%s4516_s24 + $0x1730] sm:$0xff]  ;;  %v724_v49 = vld [vmem:[%s4516_s24 + $0x338] sm:$0xff]  ;;  %v786_v1 = vld [vmem:[%s4516_s24 + $0x528] sm:$0xff] }
 0x2e8   : > { %3765 = vmatprep.subr.bf16.mxu0 %v3764_v61  ;;  %v1397_v61 = vld [vmem:[%s4516_s24 + $0x1840] sm:$0xff]  ;;  %v3590_v3 = vpack.c.bf16 %v1391_v57, %v1363_v56  ;;  %v3668_v57 = vpack.c.bf16 %v724_v49, %v696_v48  ;;  %v842_v15 = vld [vmem:[%s4516_s24 + $0x6e8] sm:$0xff]  ;;  %v948_v48 = vld [vmem:[%s4516_s24 + $0xa38] sm:$0xff]  ;;  %v5296_v49 = vsub.s32 2, %v4522_v34 }
 0x2e9   : > { %v701_v56 = vld [vmem:[%s4516_s24 + $0x280] sm:$0xff]  ;;  %v898_v32 = vld [vmem:[%s4516_s24 + $0x8a8] sm:$0xff] }
 0x2ea   : > { %3575 = vmatpush1.bf16.msra.mxu1 %v3574_v4  ;;  %v3782_v4 = vpack.c.bf16 %v1397_v61, %v1369_v59  ;;  %v729_v59 = vld [vmem:[%s4516_s24 + $0x360] sm:$0xff]  ;;  %v780_v61 = vld [vmem:[%s4516_s24 + $0x4f8] sm:$0xff] }
 0x2eb   : > { %3767 = vmatpush1.bf16.msra.mxu0 %v3766_v5  ;;  %3577 = vmatprep.subr.bf16.mxu1 %v3576_v6  ;;  %v3592_v5 = vpack.c.bf16 %v1448_v0, %v1420_v62  ;;  %v1419_v6 = vld [vmem:[%s4516_s24 + $0x18f0] sm:$0xff]  ;;  %v3860_v62 = vpack.c.bf16 %v730_v50, %v702_v52  ;;  %v758_v0 = vld [vmem:[%s4516_s24 + $0x448] sm:$0xff] }
 0x2ec   : > { %3769 = vmatprep.subr.bf16.mxu0 %v3768_v10  ;;  %v1453_v10 = vld [vmem:[%s4516_s24 + $0x1a00] sm:$0xff]  ;;  %v3594_v17 = vpack.c.bf16 %v1447_v7, %v1419_v6  ;;  %v779_v6 = vld [vmem:[%s4516_s24 + $0x4f0] sm:$0xff]  ;;  %v954_v52 = vld [vmem:[%s4516_s24 + $0xa68] sm:$0xff] }
 0x2ed   : > { %v757_v7 = vld [vmem:[%s4516_s24 + $0x440] sm:$0xff] }
 0x2ee   : > { %3579 = vmatpush1.bf16.msra.mxu1 %v3578_v18  ;;  %v3786_v18 = vpack.c.bf16 %v1453_v10, %v1425_v8  ;;  %v3864_v8 = vpack.c.bf16 %v786_v1, %v758_v0  ;;  %v808_v10 = vld [vmem:[%s4516_s24 + $0x5d8] sm:$0xff] }
 0x2ef   : > { %3771 = vmatpush1.bf16.msra.mxu0 %v3770_v21  ;;  %3581 = vmatprep.subr.bf16.mxu1 %v3580_v22  ;;  %v3596_v21 = vpack.c.bf16 %v1504_v12, %v1476_v11  ;;  %v1475_v22 = vld [vmem:[%s4516_s24 + $0x1ab0] sm:$0xff]  ;;  %v836_v11 = vld [vmem:[%s4516_s24 + $0x6b8] sm:$0xff]  ;;  %v814_v12 = vld [vmem:[%s4516_s24 + $0x608] sm:$0xff] }
 0x2f0   : > { %3773 = vmatprep.subr.bf16.mxu0 %v3772_v26  ;;  %v1509_v26 = vld [vmem:[%s4516_s24 + $0x1bc0] sm:$0xff]  ;;  %v3598_v36 = vpack.c.bf16 %v1503_v23, %v1475_v22  ;;  %v835_v22 = vld [vmem:[%s4516_s24 + $0x6b0] sm:$0xff]  ;;  %v976_v0 = vld [vmem:[%s4516_s24 + $0xb18] sm:$0xff] }
 0x2f1   : > { %v813_v23 = vld [vmem:[%s4516_s24 + $0x600] sm:$0xff]  ;;  %v1004_v1 = vld [vmem:[%s4516_s24 + $0xbf8] sm:$0xff] }
 0x2f2   : > { %3583 = vmatpush1.bf16.msra.mxu1 %v3582_v37  ;;  %v3790_v37 = vpack.c.bf16 %v1509_v26, %v1481_v24  ;;  %v3868_v24 = vpack.c.bf16 %v842_v15, %v814_v12  ;;  %v864_v26 = vld [vmem:[%s4516_s24 + $0x798] sm:$0xff]  ;;  %v1003_v12 = vld [vmem:[%s4516_s24 + $0xbf0] sm:$0xff]  ;;  %v981_v15 = vld [vmem:[%s4516_s24 + $0xb40] sm:$0xff] }
 0x2f3   : > { %3775 = vmatpush1.bf16.msra.mxu0 %v3774_v38  ;;  %3585 = vmatprep.subr.bf16.mxu1 %v3584_v39  ;;  %v3664_v38 = vpack.c.bf16 %v668_v30, %v640_v29  ;;  %v639_v39 = vld [vmem:[%s4516_s24 + $0x90] sm:$0xff]  ;;  %v892_v29 = vld [vmem:[%s4516_s24 + $0x878] sm:$0xff]  ;;  %v870_v30 = vld [vmem:[%s4516_s24 + $0x7c8] sm:$0xff] }
 0x2f4   : > { %3777 = vmatprep.subr.bf16.mxu0 %v3776_v45  ;;  %v673_v45 = vld [vmem:[%s4516_s24 + $0x1a0] sm:$0xff]  ;;  %v3666_v51 = vpack.c.bf16 %v667_v40, %v639_v39  ;;  %v891_v39 = vld [vmem:[%s4516_s24 + $0x870] sm:$0xff] }
 0x2f5   : > { %v869_v40 = vld [vmem:[%s4516_s24 + $0x7c0] sm:$0xff] }
 0x2f6   : > { %3587 = vmatpush1.bf16.msra.mxu1 %v3586_v53  ;;  %v3858_v53 = vpack.c.bf16 %v673_v45, %v645_v44  ;;  %v897_v44 = vld [vmem:[%s4516_s24 + $0x8a0] sm:$0xff]  ;;  %v920_v45 = vld [vmem:[%s4516_s24 + $0x958] sm:$0xff] }
 0x2f7   : > { %3779 = vmatpush1.bf16.msra.mxu0 %v3778_v54  ;;  %3589 = vmatprep.subr.bf16.mxu1 %v3588_v55  ;;  %v695_v54 = vld [vmem:[%s4516_s24 + $0x250] sm:$0xff] }
 0x2f8   : > { %3781 = vmatprep.subr.bf16.mxu0 %v3780_v60  ;;  %v723_v55 = vld [vmem:[%s4516_s24 + $0x330] sm:$0xff]  ;;  %v752_v60 = vld [vmem:[%s4516_s24 + $0x418] sm:$0xff] }
 0x2f9   : > { %v3670_v2 = vpack.c.bf16 %v723_v55, %v695_v54  ;;  %v5304_v54 = vsub.s32 3, %v4522_v34  ;;  %v3874_v55 = vpack.c.bf16 %v897_v44, %v869_v40  ;;  %v1059_v40 = vld [vmem:[%s4516_s24 + $0xdb0] sm:$0xff] }
 0x2fa   : > { %3591 = vmatpush1.bf16.msra.mxu1 %v3590_v3  ;;  %v3862_v3 = vpack.c.bf16 %v729_v59, %v701_v56  ;;  %v3684_v56 = vpack.c.bf16 %v948_v48, %v920_v45  ;;  %v947_v59 = vld [vmem:[%s4516_s24 + $0xa30] sm:$0xff] }
 0x2fb   : > { %3783 = vmatpush1.bf16.msra.mxu0 %v3782_v4  ;;  %3593 = vmatprep.subr.bf16.mxu1 %v3592_v5  ;;  %v3672_v4 = vpack.c.bf16 %v780_v61, %v752_v60  ;;  %v751_v5 = vld [vmem:[%s4516_s24 + $0x410] sm:$0xff]  ;;  %v925_v60 = vld [vmem:[%s4516_s24 + $0x980] sm:$0xff] }
 0x2fc   : > { %3785 = vmatprep.subr.bf16.mxu0 %v3784_v9  ;;  %v785_v9 = vld [vmem:[%s4516_s24 + $0x520] sm:$0xff]  ;;  %v3674_v16 = vpack.c.bf16 %v779_v6, %v751_v5  ;;  %v1010_v5 = vld [vmem:[%s4516_s24 + $0xc28] sm:$0xff]  ;;  %v1540_v6 = vrot.slane %v5140_v46, %v5304_v54 }
 0x2fe   : > { %3595 = vmatpush1.bf16.msra.mxu1 %v3594_v17  ;;  %v3866_v17 = vpack.c.bf16 %v785_v9, %v757_v7 }
 0x2ff   : > { %3787 = vmatpush1.bf16.msra.mxu0 %v3786_v18  ;;  %3597 = vmatprep.subr.bf16.mxu1 %v3596_v21  ;;  %v3676_v18 = vpack.c.bf16 %v836_v11, %v808_v10  ;;  %v807_v21 = vld [vmem:[%s4516_s24 + $0x5d0] sm:$0xff]  ;;  %v3688_v10 = vpack.c.bf16 %v1004_v1, %v976_v0 }
 0x300   : > { %3789 = vmatprep.subr.bf16.mxu0 %v3788_v25  ;;  %v841_v25 = vld [vmem:[%s4516_s24 + $0x6e0] sm:$0xff]  ;;  %v3678_v35 = vpack.c.bf16 %v835_v22, %v807_v21  ;;  %v975_v11 = vld [vmem:[%s4516_s24 + $0xb10] sm:$0xff]  ;;  %v1032_v21 = vld [vmem:[%s4516_s24 + $0xcd8] sm:$0xff] }
 0x301   : > { %v1060_v22 = vld [vmem:[%s4516_s24 + $0xdb8] sm:$0xff]  ;;  %v1087_v0 = vld [vmem:[%s4516_s24 + $0xe90] sm:$0xff] }
 0x302   : > { %3599 = vmatpush1.bf16.msra.mxu1 %v3598_v36  ;;  %v3870_v36 = vpack.c.bf16 %v841_v25, %v813_v23  ;;  %v1115_v1 = vld [vmem:[%s4516_s24 + $0xf70] sm:$0xff] }
 0x303   : > { %3791 = vmatpush1.bf16.msra.mxu0 %v3790_v37  ;;  %3665 = vmatprep.subr.bf16.mxu1 %v3664_v38  ;;  %v3680_v37 = vpack.c.bf16 %v892_v29, %v864_v26  ;;  %v863_v38 = vld [vmem:[%s4516_s24 + $0x790] sm:$0xff]  ;;  %v1038_v29 = vld [vmem:[%s4516_s24 + $0xd08] sm:$0xff] }
 0x304   : > { %3857 = vmatprep.subr.bf16.mxu0 %v3856_v43  ;;  %v3872_v43 = vpack.c.bf16 %v898_v32, %v870_v30  ;;  %v3682_v50 = vpack.c.bf16 %v891_v39, %v863_v38  ;;  %v1066_v30 = vld [vmem:[%s4516_s24 + $0xde8] sm:$0xff]  ;;  %v3692_v38 = vpack.c.bf16 %v1060_v22, %v1032_v21  ;;  %v1031_v39 = vld [vmem:[%s4516_s24 + $0xcd0] sm:$0xff] }
 0x305   : > { %2227 = vmatmul.mubr.f32.vlgmr.msra.gmra.mrb[8].mxu1 %v4699_v63  ;;  %v3884_v48 = vpack.c.bf16 %v1066_v30, %v1038_v29  ;;  %v1234_v21 = vld [vmem:[%s4516_s24 + $0x1328] sm:$0xff]  ;;  %v1227_v29 = vld [vmem:[%s4516_s24 + $0x12f0] sm:$0xff]  ;;  %v1205_v30 = vld [vmem:[%s4516_s24 + $0x1240] sm:$0xff] }
 0x306   : > { %2440 = vmatmul.mubr.f32.vlgmr.msra.gmra.mrb[10].mxu0 %v4699_v63  ;;  %3667 = vmatpush1.bf16.msra.mxu1 %v3666_v51  ;;  %v926_v51 = vld [vmem:[%s4516_s24 + $0x988] sm:$0xff] }
 0x307   : > { %2368 = vmatprep.mubr.f32.mxu1 %v4695_v58  ;;  %3859 = vmatpush1.bf16.msra.mxu0 %v3858_v53  ;;  %v5301_v53 = vld [vmem:[%s5137_s9 + $0x8] sm:$0xff]  ;;  %v3876_v61 = vpack.c.bf16 %v954_v52, %v926_v51  ;;  %v1088_v52 = vld [vmem:[%s4516_s24 + $0xe98] sm:$0xff] }
 0x308   : > { %2581 = vmatprep.mubr.f32.mxu0 %v4695_v58  ;;  %3669 = vmatprep.subr.bf16.mxu1 %v3668_v57  ;;  %v919_v57 = vld [vmem:[%s4516_s24 + $0x950] sm:$0xff]  ;;  %v1564_v7 = vrot.slane %v5301_v53, %v4683_v33  ;;  %v1065_v51 = vld [vmem:[%s4516_s24 + $0xde0] sm:$0xff] }
 0x309   : > { %3861 = vmatprep.subr.bf16.mxu0 %v3860_v62  ;;  %v953_v62 = vld [vmem:[%s4516_s24 + $0xa60] sm:$0xff] }
 0x30a   : > { %3671 = vmatpush1.bf16.msra.mxu1 %v3670_v2  ;;  %v1536_v2 = vrot.slane %v5140_v46, %v5296_v49  ;;  %v3878_v9 = vpack.c.bf16 %v953_v62, %v925_v60  ;;  %v1009_v46 = vld [vmem:[%s4516_s24 + $0xc20] sm:$0xff]  ;;  %v3694_v60 = vpack.c.bf16 %v1059_v40, %v1031_v39  ;;  %v1262_v39 = vld [vmem:[%s4516_s24 + $0x1408] sm:$0xff] }
 0x30b   : > { %3863 = vmatpush1.bf16.msra.mxu0 %v3862_v3  ;;  %3673 = vmatprep.subr.bf16.mxu1 %v3672_v4  ;;  %v1560_v3 = vrot.slane %v5301_v53, %v4680_v31  ;;  %v982_v4 = vld [vmem:[%s4516_s24 + $0xb48] sm:$0xff] }
 0x30c   : > { %3865 = vmatprep.subr.bf16.mxu0 %v3864_v8  ;;  %v3686_v8 = vpack.c.bf16 %v947_v59, %v919_v57  ;;  %v2695_v57 = vrot.slane %v2687_v27, %v4525_v42  ;;  %v1144_v27 = vld [vmem:[%s4516_s24 + $0x1058] sm:$0xff]  ;;  %v1290_v40 = vld [vmem:[%s4516_s24 + $0x14e8] sm:$0xff] }
 0x30e   : > { %3675 = vmatpush1.bf16.msra.mxu1 %v3674_v16 }
 0x30f   : > { %3867 = vmatpush1.bf16.msra.mxu0 %v3866_v17  ;;  %3677 = vmatprep.subr.bf16.mxu1 %v3676_v18  ;;  %v3880_v18 = vpack.c.bf16 %v1010_v5, %v982_v4  ;;  %v1172_v4 = vld [vmem:[%s4516_s24 + $0x1138] sm:$0xff]  ;;  %v1150_v5 = vld [vmem:[%s4516_s24 + $0x1088] sm:$0xff] }
 0x310   : > { %3869 = vmatprep.subr.bf16.mxu0 %v3868_v24 }
 0x312   : > { %3679 = vmatpush1.bf16.msra.mxu1 %v3678_v35 }
 0x313   : > { %3871 = vmatpush1.bf16.msra.mxu0 %v3870_v36  ;;  %3681 = vmatprep.subr.bf16.mxu1 %v3680_v37  ;;  %v3690_v36 = vpack.c.bf16 %v1003_v12, %v975_v11  ;;  %v3882_v37 = vpack.c.bf16 %v1009_v46, %v981_v15  ;;  %v1171_v11 = vld [vmem:[%s4516_s24 + $0x1130] sm:$0xff]  ;;  %v1149_v12 = vld [vmem:[%s4516_s24 + $0x1080] sm:$0xff]  ;;  %v1206_v46 = vld [vmem:[%s4516_s24 + $0x1248] sm:$0xff] }
 0x314   : > { %3873 = vmatprep.subr.bf16.mxu0 %v3872_v43  ;;  %v1037_v43 = vld [vmem:[%s4516_s24 + $0xd00] sm:$0xff] }
 0x316   : > { %3683 = vmatpush1.bf16.msra.mxu1 %v3682_v50  ;;  %v1116_v50 = vld [vmem:[%s4516_s24 + $0xf78] sm:$0xff] }
 0x317   : > { %3875 = vmatpush1.bf16.msra.mxu0 %v3874_v55  ;;  %3685 = vmatprep.subr.bf16.mxu1 %v3684_v56  ;;  %v1094_v55 = vld [vmem:[%s4516_s24 + $0xec8] sm:$0xff]  ;;  %v3696_v62 = vpack.c.bf16 %v1116_v50, %v1088_v52  ;;  %v1283_v52 = vld [vmem:[%s4516_s24 + $0x14b0] sm:$0xff]  ;;  %v1261_v50 = vld [vmem:[%s4516_s24 + $0x1400] sm:$0xff] }
 0x318   : > { %v1802_v16 = vpop.f32.mrb[2].mxu1  ;;  %v2015_v17 = vpop.f32.mrb[4].mxu0  ;;  %3877 = vmatprep.subr.bf16.mxu0 %v3876_v61  ;;  %v1122_v56 = vld [vmem:[%s4516_s24 + $0xfa8] sm:$0xff]  ;;  %v3886_v61 = vpack.c.bf16 %v1065_v51, %v1037_v43  ;;  %v1255_v51 = vld [vmem:[%s4516_s24 + $0x13d0] sm:$0xff] }
 0x319   : > { %v1803_v23 = vadd.f32 %v1802_v16, %v1536_v2  ;;  %v5328_v24 = vadd.f32 %v2015_v17, %v1560_v3  ;;  %v1804_v25 = vpop.f32.mrb[3].mxu1  ;;  %v2017_v26 = vpop.f32.mrb[5].mxu0  ;;  %v1093_v2 = vld [vmem:[%s4516_s24 + $0xec0] sm:$0xff]  ;;  %v3888_v13 = vpack.c.bf16 %v1122_v56, %v1094_v55  ;;  %v1200_v17 = vld [vmem:[%s4516_s24 + $0x1218] sm:$0xff]  ;;  %v3900_v55 = vpack.c.bf16 %v1290_v40, %v1262_v39  ;;  %v1486_v40 = vld [vmem:[%s4516_s24 + $0x1b08] sm:$0xff] }
 0x31a   : > { %v1805_v32 = vadd.f32 %v1804_v25, %v1540_v6  ;;  %v5332_v35 = vadd.f32 %v2017_v26, %v1564_v7  ;;  %3687 = vmatpush1.bf16.msra.mxu1 %v3686_v8  ;;  %v1178_v6 = vld [vmem:[%s4516_s24 + $0x1168] sm:$0xff]  ;;  %v3698_v7 = vpack.c.bf16 %v1115_v1, %v1087_v0  ;;  %v3890_v8 = vpack.c.bf16 %v1121_v19, %v1093_v2  ;;  %v1177_v16 = vld [vmem:[%s4516_s24 + $0x1160] sm:$0xff]  ;;  %v1199_v26 = vld [vmem:[%s4516_s24 + $0x1210] sm:$0xff] }
 0x31b   : > { %3879 = vmatpush1.bf16.msra.mxu0 %v3878_v9  ;;  %3689 = vmatprep.subr.bf16.mxu1 %v3688_v10  ;;  %v3700_v9 = vpack.c.bf16 %v1172_v4, %v1144_v27  ;;  %v1143_v10 = vld [vmem:[%s4516_s24 + $0x1050] sm:$0xff]  ;;  %v3892_v15 = vpack.c.bf16 %v1178_v6, %v1150_v5  ;;  %v3706_v43 = vpack.c.bf16 %v1227_v29, %v1199_v26  ;;  %v1289_v56 = vld [vmem:[%s4516_s24 + $0x14e0] sm:$0xff]  ;;  %v1368_v4 = vld [vmem:[%s4516_s24 + $0x1758] sm:$0xff] }
 0x31c   : > { %v2688_v44 = vcombine.low %v1803_v23, %v1805_v32  ;;  %v2721_v45 = vcombine.low %v5328_v24, %v5332_v35  ;;  %3881 = vmatprep.subr.bf16.mxu0 %v3880_v18  ;;  %v1228_v18 = vld [vmem:[%s4516_s24 + $0x12f8] sm:$0xff]  ;;  %v3702_v22 = vpack.c.bf16 %v1171_v11, %v1143_v10  ;;  %v3894_v23 = vpack.c.bf16 %v1177_v16, %v1149_v12  ;;  %v1311_v2 = vld [vmem:[%s4516_s24 + $0x1590] sm:$0xff]  ;;  %v1345_v27 = vld [vmem:[%s4516_s24 + $0x16a0] sm:$0xff] }
 0x31d   : > { %v3704_v25 = vpack.c.bf16 %v1228_v18, %v1200_v17  ;;  %v3896_v32 = vpack.c.bf16 %v1234_v21, %v1206_v46  ;;  %v3902_v0 = vpack.c.bf16 %v1289_v56, %v1261_v50  ;;  %v1396_v5 = vld [vmem:[%s4516_s24 + $0x1838] sm:$0xff]  ;;  %v1374_v6 = vld [vmem:[%s4516_s24 + $0x1788] sm:$0xff]  ;;  %v1367_v11 = vld [vmem:[%s4516_s24 + $0x1750] sm:$0xff] }
 0x31e   : > { %v2702_v59 = vrot.slane %v2688_v44, %v4525_v42  ;;  %3691 = vmatpush1.bf16.msra.mxu1 %v3690_v36  ;;  %v1233_v36 = vld [vmem:[%s4516_s24 + $0x1320] sm:$0xff]  ;;  %v3716_v10 = vpack.c.bf16 %v1396_v5, %v1368_v4  ;;  %v1395_v12 = vld [vmem:[%s4516_s24 + $0x1830] sm:$0xff]  ;;  %v1424_v18 = vld [vmem:[%s4516_s24 + $0x1918] sm:$0xff] }
 0x31f   : > { %3883 = vmatpush1.bf16.msra.mxu0 %v3882_v37  ;;  %3693 = vmatprep.subr.bf16.mxu1 %v3692_v38  ;;  %v1256_v37 = vld [vmem:[%s4516_s24 + $0x13d8] sm:$0xff]  ;;  %v3898_v44 = vpack.c.bf16 %v1233_v36, %v1205_v30  ;;  %v1401_v17 = vld [vmem:[%s4516_s24 + $0x1860] sm:$0xff]  ;;  %v1430_v21 = vld [vmem:[%s4516_s24 + $0x1948] sm:$0xff] }
 0x320   : > { %v2703_v3 = vcombine.low %v2695_v57, %v2702_v59  ;;  %3885 = vmatprep.subr.bf16.mxu0 %v3884_v48  ;;  %v1284_v38 = vld [vmem:[%s4516_s24 + $0x14b8] sm:$0xff]  ;;  %v1423_v29 = vld [vmem:[%s4516_s24 + $0x1910] sm:$0xff] }
 0x321   : > { %v3708_v48 = vpack.c.bf16 %v1284_v38, %v1256_v37  ;;  %v1312_v57 = vld [vmem:[%s4516_s24 + $0x1598] sm:$0xff]  ;;  %v1451_v30 = vld [vmem:[%s4516_s24 + $0x19f0] sm:$0xff]  ;;  %v1457_v37 = vld [vmem:[%s4516_s24 + $0x1a20] sm:$0xff] }
 0x322   : > { %2813 = vst [vmem:[%s5360_s13] sm:$0xff] %v2703_v3  ;;  %3695 = vmatpush1.bf16.msra.mxu1 %v3694_v60  ;;  %v1340_v59 = vld [vmem:[%s4516_s24 + $0x1678] sm:$0xff]  ;;  %v1318_v60 = vld [vmem:[%s4516_s24 + $0x15c8] sm:$0xff]  ;;  %v1339_v3 = vld [vmem:[%s4516_s24 + $0x1670] sm:$0xff] }
 0x323   : > { %3887 = vmatpush1.bf16.msra.mxu0 %v3886_v61  ;;  %3697 = vmatprep.subr.bf16.mxu1 %v3696_v62  ;;  %v1346_v61 = vld [vmem:[%s4516_s24 + $0x16a8] sm:$0xff]  ;;  %v3710_v62 = vpack.c.bf16 %v1283_v52, %v1255_v51  ;;  %v3712_v1 = vpack.c.bf16 %v1340_v59, %v1312_v57  ;;  %v1452_v46 = vld [vmem:[%s4516_s24 + $0x19f8] sm:$0xff]  ;;  %v1479_v52 = vld [vmem:[%s4516_s24 + $0x1ad0] sm:$0xff] }
 0x324   : > { %3889 = vmatprep.subr.bf16.mxu0 %v3888_v13  ;;  %v1317_v13 = vld [vmem:[%s4516_s24 + $0x15c0] sm:$0xff]  ;;  %v3904_v19 = vpack.c.bf16 %v1346_v61, %v1318_v60  ;;  %v3720_v26 = vpack.c.bf16 %v1452_v46, %v1424_v18  ;;  %v1480_v38 = vld [vmem:[%s4516_s24 + $0x1ad8] sm:$0xff]  ;;  %v1507_v50 = vld [vmem:[%s4516_s24 + $0x1bb0] sm:$0xff] }
 0x325   : > { %v1508_v39 = vld [vmem:[%s4516_s24 + $0x1bb8] sm:$0xff]  ;;  %v1513_v57 = vld [vmem:[%s4516_s24 + $0x1be0] sm:$0xff]  ;;  %v3726_v61 = vpack.c.bf16 %v1507_v50, %v1479_v52  ;;  %v699_v4 = vld [vmem:[%s4516_s24 + $0x270] sm:$0xff]  ;;  %v1576_v50 = vrot.slane %v5301_v53, %v5133_v41 }
 0x326   : > { %3699 = vmatpush1.bf16.msra.mxu1 %v3698_v7  ;;  %v1402_v7 = vld [vmem:[%s4516_s24 + $0x1868] sm:$0xff]  ;;  %v3724_v51 = vpack.c.bf16 %v1508_v39, %v1480_v38  ;;  %v644_v59 = vld [vmem:[%s4516_s24 + $0xb8] sm:$0xff]  ;;  %v727_v5 = vld [vmem:[%s4516_s24 + $0x350] sm:$0xff]  ;;  %v5444_v38 = vsub.s32 7, %v4522_v34 }
 0x327   : > { %3891 = vmatpush1.bf16.msra.mxu0 %v3890_v8  ;;  %3701 = vmatprep.subr.bf16.mxu1 %v3700_v9  ;;  %v3714_v8 = vpack.c.bf16 %v1339_v3, %v1311_v2  ;;  %v3906_v9 = vpack.c.bf16 %v1345_v27, %v1317_v13  ;;  %v3908_v16 = vpack.c.bf16 %v1402_v7, %v1374_v6  ;;  %v672_v60 = vld [vmem:[%s4516_s24 + $0x198] sm:$0xff]  ;;  %v671_v2 = vld [vmem:[%s4516_s24 + $0x190] sm:$0xff] }
 0x328   : > { %3893 = vmatprep.subr.bf16.mxu0 %v3892_v15  ;;  %v1373_v15 = vld [vmem:[%s4516_s24 + $0x1780] sm:$0xff]  ;;  %v700_v3 = vld [vmem:[%s4516_s24 + $0x278] sm:$0xff]  ;;  %v811_v18 = vld [vmem:[%s4516_s24 + $0x5f0] sm:$0xff] }
 0x329   : > { %v728_v13 = vld [vmem:[%s4516_s24 + $0x358] sm:$0xff]  ;;  %v839_v46 = vld [vmem:[%s4516_s24 + $0x6d0] sm:$0xff] }
 0x32a   : > { %3703 = vmatpush1.bf16.msra.mxu1 %v3702_v22  ;;  %v1458_v22 = vld [vmem:[%s4516_s24 + $0x1a28] sm:$0xff]  ;;  %v3796_v27 = vpack.c.bf16 %v728_v13, %v700_v3  ;;  %v756_v6 = vld [vmem:[%s4516_s24 + $0x438] sm:$0xff] }
 0x32b   : > { %3895 = vmatpush1.bf16.msra.mxu0 %v3894_v23  ;;  %3705 = vmatprep.subr.bf16.mxu1 %v3704_v25  ;;  %v3718_v23 = vpack.c.bf16 %v1395_v12, %v1367_v11  ;;  %v3910_v25 = vpack.c.bf16 %v1401_v17, %v1373_v15  ;;  %v3912_v36 = vpack.c.bf16 %v1458_v22, %v1430_v21  ;;  %v784_v7 = vld [vmem:[%s4516_s24 + $0x518] sm:$0xff]  ;;  %v783_v11 = vld [vmem:[%s4516_s24 + $0x510] sm:$0xff] }
 0x32c   : > { %3897 = vmatprep.subr.bf16.mxu0 %v3896_v32  ;;  %v1429_v32 = vld [vmem:[%s4516_s24 + $0x1940] sm:$0xff]  ;;  %v812_v12 = vld [vmem:[%s4516_s24 + $0x5f8] sm:$0xff] }
 0x32d   : > { %v840_v15 = vld [vmem:[%s4516_s24 + $0x6d8] sm:$0xff] }
 0x32e   : > { %3707 = vmatpush1.bf16.msra.mxu1 %v3706_v43  ;;  %v1514_v43 = vld [vmem:[%s4516_s24 + $0x1be8] sm:$0xff]  ;;  %v3804_v17 = vpack.c.bf16 %v840_v15, %v812_v12  ;;  %v868_v21 = vld [vmem:[%s4516_s24 + $0x7b8] sm:$0xff]  ;;  %v2712_v15 = vrot.slane %v2704_v28, %v4525_v42  ;;  %v1147_v28 = vld [vmem:[%s4516_s24 + $0x1070] sm:$0xff] }
 0x32f   : > { %3899 = vmatpush1.bf16.msra.mxu0 %v3898_v44  ;;  %3709 = vmatprep.subr.bf16.mxu1 %v3708_v48  ;;  %v3722_v44 = vpack.c.bf16 %v1451_v30, %v1423_v29  ;;  %v3914_v48 = vpack.c.bf16 %v1457_v37, %v1429_v32  ;;  %v3916_v56 = vpack.c.bf16 %v1514_v43, %v1486_v40  ;;  %v896_v22 = vld [vmem:[%s4516_s24 + $0x898] sm:$0xff]  ;;  %v895_v29 = vld [vmem:[%s4516_s24 + $0x890] sm:$0xff] }
 0x330   : > { %3901 = vmatprep.subr.bf16.mxu0 %v3900_v55  ;;  %v1485_v55 = vld [vmem:[%s4516_s24 + $0x1b00] sm:$0xff]  ;;  %v924_v30 = vld [vmem:[%s4516_s24 + $0x978] sm:$0xff]  ;;  %v923_v40 = vld [vmem:[%s4516_s24 + $0x970] sm:$0xff] }
 0x331   : > { %v952_v32 = vld [vmem:[%s4516_s24 + $0xa58] sm:$0xff]  ;;  %v951_v43 = vld [vmem:[%s4516_s24 + $0xa50] sm:$0xff] }
 0x332   : > { %3711 = vmatpush1.bf16.msra.mxu1 %v3710_v62  ;;  %v3918_v62 = vpack.c.bf16 %v1513_v57, %v1485_v55  ;;  %v3812_v39 = vpack.c.bf16 %v952_v32, %v924_v30  ;;  %v3814_v55 = vpack.c.bf16 %v951_v43, %v923_v40  ;;  %v1232_v30 = vld [vmem:[%s4516_s24 + $0x1318] sm:$0xff]  ;;  %v1231_v40 = vld [vmem:[%s4516_s24 + $0x1310] sm:$0xff] }
 0x333   : > { %3903 = vmatpush1.bf16.msra.mxu0 %v3902_v0  ;;  %3713 = vmatprep.subr.bf16.mxu1 %v3712_v1  ;;  %v3792_v0 = vpack.c.bf16 %v672_v60, %v644_v59  ;;  %v643_v1 = vld [vmem:[%s4516_s24 + $0xb0] sm:$0xff]  ;;  %v1260_v43 = vld [vmem:[%s4516_s24 + $0x13f8] sm:$0xff] }
 0x334   : > { %3905 = vmatprep.subr.bf16.mxu0 %v3904_v19  ;;  %v3794_v19 = vpack.c.bf16 %v671_v2, %v643_v1  ;;  %v979_v59 = vld [vmem:[%s4516_s24 + $0xb30] sm:$0xff] }
 0x335   : > { %v1007_v60 = vld [vmem:[%s4516_s24 + $0xc10] sm:$0xff] }
 0x336   : > { %3715 = vmatpush1.bf16.msra.mxu1 %v3714_v8  ;;  %v3798_v8 = vpack.c.bf16 %v727_v5, %v699_v4  ;;  %v3818_v4 = vpack.c.bf16 %v1007_v60, %v979_v59  ;;  %v1315_v59 = vld [vmem:[%s4516_s24 + $0x15b0] sm:$0xff] }
 0x337   : > { %3907 = vmatpush1.bf16.msra.mxu0 %v3906_v9  ;;  %3717 = vmatprep.subr.bf16.mxu1 %v3716_v10  ;;  %v3800_v9 = vpack.c.bf16 %v784_v7, %v756_v6  ;;  %v755_v10 = vld [vmem:[%s4516_s24 + $0x430] sm:$0xff] }
 0x338   : > { %3909 = vmatprep.subr.bf16.mxu0 %v3908_v16  ;;  %v3802_v16 = vpack.c.bf16 %v783_v11, %v755_v10  ;;  %v1035_v7 = vld [vmem:[%s4516_s24 + $0xcf0] sm:$0xff]  ;;  %v1092_v10 = vld [vmem:[%s4516_s24 + $0xeb8] sm:$0xff] }
 0x339   : > { %v1120_v11 = vld [vmem:[%s4516_s24 + $0xf98] sm:$0xff]  ;;  %v1343_v60 = vld [vmem:[%s4516_s24 + $0x1690] sm:$0xff] }
 0x33a   : > { %3719 = vmatpush1.bf16.msra.mxu1 %v3718_v23  ;;  %v3806_v23 = vpack.c.bf16 %v839_v46, %v811_v18  ;;  %v3824_v18 = vpack.c.bf16 %v1120_v11, %v1092_v10  ;;  %v1091_v46 = vld [vmem:[%s4516_s24 + $0xeb0] sm:$0xff]  ;;  %v1512_v10 = vld [vmem:[%s4516_s24 + $0x1bd8] sm:$0xff] }
 0x33b   : > { %3911 = vmatpush1.bf16.msra.mxu0 %v3910_v25  ;;  %3721 = vmatprep.subr.bf16.mxu1 %v3720_v26  ;;  %v3808_v25 = vpack.c.bf16 %v896_v22, %v868_v21  ;;  %v867_v26 = vld [vmem:[%s4516_s24 + $0x7b0] sm:$0xff] }
 0x33c   : > { %3913 = vmatprep.subr.bf16.mxu0 %v3912_v36  ;;  %v5441_v36 = vsub.s32 6, %v4522_v34  ;;  %v3810_v37 = vpack.c.bf16 %v895_v29, %v867_v26  ;;  %v1119_v21 = vld [vmem:[%s4516_s24 + $0xf90] sm:$0xff]  ;;  %v1204_v29 = vld [vmem:[%s4516_s24 + $0x1238] sm:$0xff] }
 0x33d   : > { %v3826_v14 = vpack.c.bf16 %v1119_v21, %v1091_v46  ;;  %v1175_v26 = vld [vmem:[%s4516_s24 + $0x1150] sm:$0xff]  ;;  %v676_v46 = vld [vmem:[%s4516_s24 + $0x1b8] sm:$0xff] }
 0x33e   : > { %3723 = vmatpush1.bf16.msra.mxu1 %v3722_v44  ;;  %v980_v44 = vld [vmem:[%s4516_s24 + $0xb38] sm:$0xff]  ;;  %v3830_v32 = vpack.c.bf16 %v1175_v26, %v1147_v28 }
 0x33f   : > { %3915 = vmatpush1.bf16.msra.mxu0 %v3914_v48  ;;  %3725 = vmatprep.subr.bf16.mxu1 %v3724_v51  ;;  %v1008_v48 = vld [vmem:[%s4516_s24 + $0xc18] sm:$0xff] }
 0x340   : > { %3917 = vmatprep.subr.bf16.mxu0 %v3916_v56  ;;  %v4076_v51 = vld [vmem:[%s5137_s9] sm:$0xff]  ;;  %v1580_v56 = vrot.slane %v5301_v53, %v5143_v47  ;;  %v3816_v57 = vpack.c.bf16 %v1008_v48, %v980_v44 }
 0x341   : > { %v1552_v52 = vrot.slane %v4076_v51, %v5441_v36  ;;  %v1556_v34 = vrot.slane %v4076_v51, %v5444_v38  ;;  %v1288_v44 = vld [vmem:[%s4516_s24 + $0x14d8] sm:$0xff] }
 0x342   : > { %3727 = vmatpush1.bf16.msra.mxu1 %v3726_v61  ;;  %v3836_v51 = vpack.c.bf16 %v1288_v44, %v1260_v43  ;;  %v759_v43 = vld [vmem:[%s4516_s24 + $0x450] sm:$0xff] }
 0x343   : > { %3919 = vmatpush1.bf16.msra.mxu0 %v3918_v62  ;;  %3793 = vmatprep.subr.bf16.mxu1 %v3792_v0  ;;  %v1036_v62 = vld [vmem:[%s4516_s24 + $0xcf8] sm:$0xff]  ;;  %v787_v44 = vld [vmem:[%s4516_s24 + $0x530] sm:$0xff] }
 0x344   : > { %v1064_v0 = vld [vmem:[%s4516_s24 + $0xdd8] sm:$0xff] }
 0x345   : > { %2369 = vmatmul.mubr.f32.vlgmr.msra.gmra.mrb[10].mxu1 %v4699_v63  ;;  %v3820_v6 = vpack.c.bf16 %v1064_v0, %v1036_v62  ;;  %v1400_v62 = vld [vmem:[%s4516_s24 + $0x1858] sm:$0xff]  ;;  %v3842_v0 = vpack.c.bf16 %v1343_v60, %v1315_v59  ;;  %v871_v60 = vld [vmem:[%s4516_s24 + $0x7d0] sm:$0xff] }
 0x346   : > { %2582 = vmatmul.mubr.f32.vlgmr.msra.gmra.mrb[12].mxu0 %v4699_v63  ;;  %3795 = vmatpush1.bf16.msra.mxu1 %v3794_v19 }
 0x347   : > { %2510 = vmatprep.mubr.f32.mxu1 %v4695_v58  ;;  %3797 = vmatprep.subr.bf16.mxu1 %v3796_v27 }
 0x34a   : > { %3799 = vmatpush1.bf16.msra.mxu1 %v3798_v8  ;;  %v1063_v8 = vld [vmem:[%s4516_s24 + $0xdd0] sm:$0xff] }
 0x34b   : > { %3801 = vmatprep.subr.bf16.mxu1 %v3800_v9 }
 0x34e   : > { %3803 = vmatpush1.bf16.msra.mxu1 %v3802_v16 }
 0x34f   : > { %3805 = vmatprep.subr.bf16.mxu1 %v3804_v17  ;;  %v3822_v17 = vpack.c.bf16 %v1063_v8, %v1035_v7  ;;  %v1427_v7 = vld [vmem:[%s4516_s24 + $0x1930] sm:$0xff] }
 0x350   : > { %v1455_v8 = vld [vmem:[%s4516_s24 + $0x1a10] sm:$0xff] }
 0x351   : > { %v3850_v11 = vpack.c.bf16 %v1455_v8, %v1427_v7  ;;  %v1568_v7 = vrot.slane %v5301_v53, %v5296_v49 }
 0x352   : > { %3807 = vmatpush1.bf16.msra.mxu1 %v3806_v23  ;;  %v1148_v23 = vld [vmem:[%s4516_s24 + $0x1078] sm:$0xff] }
 0x353   : > { %3809 = vmatprep.subr.bf16.mxu1 %v3808_v25  ;;  %v1176_v25 = vld [vmem:[%s4516_s24 + $0x1158] sm:$0xff] }
 0x354   : > { %v3828_v20 = vpack.c.bf16 %v1176_v25, %v1148_v23  ;;  %v647_v23 = vld [vmem:[%s4516_s24 + $0xd0] sm:$0xff] }
 0x355   : > { %v675_v25 = vld [vmem:[%s4516_s24 + $0x1b0] sm:$0xff] }
 0x356   : > { %3811 = vmatpush1.bf16.msra.mxu1 %v3810_v37  ;;  %v3832_v37 = vpack.c.bf16 %v1232_v30, %v1204_v29  ;;  %v3922_v28 = vpack.c.bf16 %v675_v25, %v647_v23  ;;  %v703_v29 = vld [vmem:[%s4516_s24 + $0x290] sm:$0xff] }
 0x357   : > { %3813 = vmatprep.subr.bf16.mxu1 %v3812_v39  ;;  %v1203_v39 = vld [vmem:[%s4516_s24 + $0x1230] sm:$0xff] }
 0x358   : > { %v1944_v61 = vpop.f32.mrb[4].mxu1  ;;  %v3834_v48 = vpack.c.bf16 %v1231_v40, %v1203_v39  ;;  %v731_v30 = vld [vmem:[%s4516_s24 + $0x370] sm:$0xff] }
 0x359   : > { %v1945_v1 = vadd.f32 %v1944_v61, %v1552_v52  ;;  %v2157_v2 = vpop.f32.mrb[6].mxu0  ;;  %v1946_v3 = vpop.f32.mrb[5].mxu1  ;;  %v1259_v52 = vld [vmem:[%s4516_s24 + $0x13f0] sm:$0xff]  ;;  %v1372_v61 = vld [vmem:[%s4516_s24 + $0x1778] sm:$0xff]  ;;  %v3926_v39 = vpack.c.bf16 %v731_v30, %v703_v29 }
 0x35a   : > { %v5461_v13 = vadd.f32 %v2157_v2, %v1576_v50  ;;  %v1947_v19 = vadd.f32 %v1946_v3, %v1556_v34  ;;  %v2159_v27 = vpop.f32.mrb[7].mxu0  ;;  %3815 = vmatpush1.bf16.msra.mxu1 %v3814_v55  ;;  %v1287_v50 = vld [vmem:[%s4516_s24 + $0x14d0] sm:$0xff]  ;;  %v1316_v34 = vld [vmem:[%s4516_s24 + $0x15b8] sm:$0xff] }
 0x35b   : > { %v5463_v5 = vadd.f32 %v2159_v27, %v1580_v56  ;;  %3817 = vmatprep.subr.bf16.mxu1 %v3816_v57  ;;  %v1344_v55 = vld [vmem:[%s4516_s24 + $0x1698] sm:$0xff]  ;;  %v3838_v56 = vpack.c.bf16 %v1287_v50, %v1259_v52  ;;  %v1371_v2 = vld [vmem:[%s4516_s24 + $0x1770] sm:$0xff]  ;;  %v3930_v52 = vpack.c.bf16 %v787_v44, %v759_v43 }
 0x35c   : > { %v2705_v9 = vcombine.low %v1945_v1, %v1947_v19  ;;  %v3840_v57 = vpack.c.bf16 %v1344_v55, %v1316_v34  ;;  %v3844_v1 = vpack.c.bf16 %v1400_v62, %v1372_v61  ;;  %v1399_v3 = vld [vmem:[%s4516_s24 + $0x1850] sm:$0xff]  ;;  %v1428_v19 = vld [vmem:[%s4516_s24 + $0x1938] sm:$0xff] }
 0x35d   : > { %v2738_v12 = vcombine.low %v5461_v13, %v5463_v5  ;;  %v1456_v27 = vld [vmem:[%s4516_s24 + $0x1a18] sm:$0xff]  ;;  %v815_v34 = vld [vmem:[%s4516_s24 + $0x610] sm:$0xff] }
 0x35e   : > { %v2719_v16 = vrot.slane %v2705_v9, %v4525_v42  ;;  %3819 = vmatpush1.bf16.msra.mxu1 %v3818_v4  ;;  %v3846_v4 = vpack.c.bf16 %v1399_v3, %v1371_v2  ;;  %v1484_v9 = vld [vmem:[%s4516_s24 + $0x1af8] sm:$0xff]  ;;  %v843_v55 = vld [vmem:[%s4516_s24 + $0x6f0] sm:$0xff] }
 0x35f   : > { %3821 = vmatprep.subr.bf16.mxu1 %v3820_v6  ;;  %v3848_v6 = vpack.c.bf16 %v1456_v27, %v1428_v19  ;;  %v899_v61 = vld [vmem:[%s4516_s24 + $0x8b0] sm:$0xff]  ;;  %v928_v62 = vld [vmem:[%s4516_s24 + $0x998] sm:$0xff] }
 0x360   : > { %v2720_v22 = vcombine.low %v2712_v15, %v2719_v16  ;;  %v3852_v15 = vpack.c.bf16 %v1512_v10, %v1484_v9  ;;  %v1483_v16 = vld [vmem:[%s4516_s24 + $0x1af0] sm:$0xff]  ;;  %v1572_v9 = vrot.slane %v5301_v53, %v5304_v54  ;;  %v1124_v43 = vld [vmem:[%s4516_s24 + $0xfb8] sm:$0xff] }
 0x361   : > { %v5532_v2 = vld [vmem:[%s5137_s9 + $0x10] sm:$0xff] }
 0x362   : > { %2814 = vst [vmem:[%s5360_s13 + $0x8] sm:$0xff] %v2720_v22  ;;  %3823 = vmatpush1.bf16.msra.mxu1 %v3822_v17  ;;  %v1511_v17 = vld [vmem:[%s4516_s24 + $0x1bd0] sm:$0xff]  ;;  %v1592_v8 = vrot.slane %v5532_v2, %v4680_v31 }
 0x363   : > { %3825 = vmatprep.subr.bf16.mxu1 %v3824_v18  ;;  %v648_v18 = vld [vmem:[%s4516_s24 + $0xd8] sm:$0xff]  ;;  %v3854_v21 = vpack.c.bf16 %v1511_v17, %v1483_v16  ;;  %v927_v19 = vld [vmem:[%s4516_s24 + $0x990] sm:$0xff] }
 0x364   : > { %v3920_v22 = vpack.c.bf16 %v676_v46, %v648_v18  ;;  %v955_v27 = vld [vmem:[%s4516_s24 + $0xa70] sm:$0xff]  ;;  %v1040_v46 = vld [vmem:[%s4516_s24 + $0xd18] sm:$0xff] }
 0x365   : > { %v3942_v10 = vpack.c.bf16 %v955_v27, %v927_v19  ;;  %v983_v16 = vld [vmem:[%s4516_s24 + $0xb50] sm:$0xff]  ;;  %v1264_v19 = vld [vmem:[%s4516_s24 + $0x1418] sm:$0xff] }
 0x366   : > { %3827 = vmatpush1.bf16.msra.mxu1 %v3826_v14  ;;  %v704_v14 = vld [vmem:[%s4516_s24 + $0x298] sm:$0xff]  ;;  %v1011_v17 = vld [vmem:[%s4516_s24 + $0xc30] sm:$0xff] }
 0x367   : > { %3829 = vmatprep.subr.bf16.mxu1 %v3828_v20  ;;  %v732_v20 = vld [vmem:[%s4516_s24 + $0x378] sm:$0xff] }
 0x368   : > { %v3924_v26 = vpack.c.bf16 %v732_v20, %v704_v14  ;;  %v1292_v27 = vld [vmem:[%s4516_s24 + $0x14f8] sm:$0xff] }
 0x36a   : > { %3831 = vmatpush1.bf16.msra.mxu1 %v3830_v32  ;;  %v760_v32 = vld [vmem:[%s4516_s24 + $0x458] sm:$0xff] }
 0x36b   : > { %3833 = vmatprep.subr.bf16.mxu1 %v3832_v37  ;;  %v788_v37 = vld [vmem:[%s4516_s24 + $0x538] sm:$0xff] }
 0x36c   : > { %v3928_v40 = vpack.c.bf16 %v788_v37, %v760_v32  ;;  %v1039_v32 = vld [vmem:[%s4516_s24 + $0xd10] sm:$0xff] }
 0x36d   : > { %v1067_v37 = vld [vmem:[%s4516_s24 + $0xdf0] sm:$0xff] }
 0x36e   : > { %3835 = vmatpush1.bf16.msra.mxu1 %v3834_v48  ;;  %v816_v48 = vld [vmem:[%s4516_s24 + $0x618] sm:$0xff] }
 0x36f   : > { %3837 = vmatprep.subr.bf16.mxu1 %v3836_v51  ;;  %v844_v51 = vld [vmem:[%s4516_s24 + $0x6f8] sm:$0xff] }
 0x370   : > { %v3932_v50 = vpack.c.bf16 %v844_v51, %v816_v48  ;;  %v2729_v48 = vrot.slane %v2721_v45, %v4525_v42  ;;  %v1151_v45 = vld [vmem:[%s4516_s24 + $0x1090] sm:$0xff] }
 0x372   : > { %3839 = vmatpush1.bf16.msra.mxu1 %v3838_v56  ;;  %v900_v56 = vld [vmem:[%s4516_s24 + $0x8b8] sm:$0xff] }
 0x373   : > { %3841 = vmatprep.subr.bf16.mxu1 %v3840_v57  ;;  %v3934_v57 = vpack.c.bf16 %v843_v55, %v815_v34  ;;  %v1095_v34 = vld [vmem:[%s4516_s24 + $0xed0] sm:$0xff] }
 0x374   : > { %v1123_v55 = vld [vmem:[%s4516_s24 + $0xfb0] sm:$0xff] }
 0x375   : > { %v3954_v24 = vpack.c.bf16 %v1123_v55, %v1095_v34  ;;  %v1584_v34 = vrot.slane %v5301_v53, %v5441_v36  ;;  %v1608_v55 = vrot.slane %v5532_v2, %v5133_v41  ;;  %v2746_v41 = vrot.slane %v2738_v12, %v4525_v42 }
 0x376   : > { %3843 = vmatpush1.bf16.msra.mxu1 %v3842_v0  ;;  %v956_v0 = vld [vmem:[%s4516_s24 + $0xa78] sm:$0xff] }
 0x377   : > { %3845 = vmatprep.subr.bf16.mxu1 %v3844_v1  ;;  %v3938_v1 = vpack.c.bf16 %v899_v61, %v871_v60  ;;  %v3940_v3 = vpack.c.bf16 %v956_v0, %v928_v62  ;;  %v1208_v60 = vld [vmem:[%s4516_s24 + $0x1258] sm:$0xff] }
 0x378   : > { %v1236_v61 = vld [vmem:[%s4516_s24 + $0x1338] sm:$0xff] }
 0x379   : > { %v3960_v0 = vpack.c.bf16 %v1236_v61, %v1208_v60 }
 0x37a   : > { %3847 = vmatpush1.bf16.msra.mxu1 %v3846_v4  ;;  %v984_v4 = vld [vmem:[%s4516_s24 + $0xb58] sm:$0xff] }
 0x37b   : > { %3849 = vmatprep.subr.bf16.mxu1 %v3848_v6  ;;  %v1012_v6 = vld [vmem:[%s4516_s24 + $0xc38] sm:$0xff] }
 0x37e   : > { %3851 = vmatpush1.bf16.msra.mxu1 %v3850_v11  ;;  %v1596_v11 = vrot.slane %v5532_v2, %v4683_v33 }
 0x37f   : > { %3853 = vmatprep.subr.bf16.mxu1 %v3852_v15  ;;  %v3944_v15 = vpack.c.bf16 %v1012_v6, %v984_v4  ;;  %v3964_v6 = vpack.c.bf16 %v1292_v27, %v1264_v19  ;;  %v1604_v27 = vrot.slane %v5532_v2, %v5304_v54 }
 0x382   : > { %3855 = vmatpush1.bf16.msra.mxu1 %v3854_v21  ;;  %v1068_v21 = vld [vmem:[%s4516_s24 + $0xdf8] sm:$0xff] }
 0x383   : > { %3921 = vmatprep.subr.bf16.mxu1 %v3920_v22  ;;  %v3948_v30 = vpack.c.bf16 %v1068_v21, %v1040_v46  ;;  %v1404_v46 = vld [vmem:[%s4516_s24 + $0x1878] sm:$0xff] }
 0x385   : > { %2511 = vmatmul.mubr.f32.vlgmr.msra.gmra.mrb[12].mxu1 %v4699_v63 }
 0x386   : > { %3923 = vmatpush1.bf16.msra.mxu1 %v3922_v28  ;;  %2652 = vmatprep.mubr.f32.mxu1 %v4695_v58  ;;  %v872_v58 = vld [vmem:[%s4516_s24 + $0x7d8] sm:$0xff] }
 0x387   : > { %3925 = vmatprep.subr.bf16.mxu1 %v3924_v26  ;;  %v3936_v59 = vpack.c.bf16 %v900_v56, %v872_v58  ;;  %v3946_v26 = vpack.c.bf16 %v1011_v17, %v983_v16  ;;  %v1152_v56 = vld [vmem:[%s4516_s24 + $0x1098] sm:$0xff]  ;;  %v1319_v16 = vld [vmem:[%s4516_s24 + $0x15d0] sm:$0xff] }
 0x388   : > { %v1347_v17 = vld [vmem:[%s4516_s24 + $0x16b0] sm:$0xff] }
 0x389   : > { %v3970_v21 = vpack.c.bf16 %v1347_v17, %v1319_v16 }
 0x38a   : > { %3927 = vmatpush1.bf16.msra.mxu1 %v3926_v39 }
 0x38b   : > { %3929 = vmatprep.subr.bf16.mxu1 %v3928_v40  ;;  %v1096_v40 = vld [vmem:[%s4516_s24 + $0xed8] sm:$0xff] }
 0x38e   : > { %3931 = vmatpush1.bf16.msra.mxu1 %v3930_v52  ;;  %v3950_v52 = vpack.c.bf16 %v1067_v37, %v1039_v32  ;;  %v1431_v32 = vld [vmem:[%s4516_s24 + $0x1950] sm:$0xff] }
 0x38f   : > { %3933 = vmatprep.subr.bf16.mxu1 %v3932_v50  ;;  %v3952_v50 = vpack.c.bf16 %v1124_v43, %v1096_v40  ;;  %v1459_v37 = vld [vmem:[%s4516_s24 + $0x1a30] sm:$0xff]  ;;  %v1516_v40 = vld [vmem:[%s4516_s24 + $0x1bf8] sm:$0xff] }
 0x390   : > { %v3978_v43 = vpack.c.bf16 %v1459_v37, %v1431_v32 }
 0x392   : > { %3935 = vmatpush1.bf16.msra.mxu1 %v3934_v57  ;;  %v1180_v57 = vld [vmem:[%s4516_s24 + $0x1178] sm:$0xff] }
 0x393   : > { %3937 = vmatprep.subr.bf16.mxu1 %v3936_v59  ;;  %v3956_v35 = vpack.c.bf16 %v1180_v57, %v1152_v56  ;;  %v1179_v59 = vld [vmem:[%s4516_s24 + $0x1170] sm:$0xff]  ;;  %v1612_v56 = vrot.slane %v5532_v2, %v5143_v47 }
 0x394   : > { %v3958_v62 = vpack.c.bf16 %v1179_v59, %v1151_v45  ;;  %v1520_v47 = vld [vmem:[%s5137_s9 + $0x18] sm:$0xf] }
 0x395   : > { %v1624_v19 = vrot.slane %v1520_v47, %v4680_v31 }
 0x396   : > { %3939 = vmatpush1.bf16.msra.mxu1 %v3938_v1  ;;  %v1207_v1 = vld [vmem:[%s4516_s24 + $0x1250] sm:$0xff] }
 0x397   : > { %3941 = vmatprep.subr.bf16.mxu1 %v3940_v3  ;;  %v1235_v3 = vld [vmem:[%s4516_s24 + $0x1330] sm:$0xff] }
 0x398   : > { %v2086_v18 = vpop.f32.mrb[6].mxu1  ;;  %v3962_v4 = vpack.c.bf16 %v1235_v3, %v1207_v1  ;;  %v1600_v3 = vrot.slane %v5532_v2, %v5296_v49 }
 0x399   : > { %v2087_v22 = vadd.f32 %v2086_v18, %v1568_v7  ;;  %v2299_v23 = vpop.f32.mrb[8].mxu0  ;;  %v2088_v25 = vpop.f32.mrb[7].mxu1  ;;  %v1263_v7 = vld [vmem:[%s4516_s24 + $0x1410] sm:$0xff]  ;;  %v1376_v18 = vld [vmem:[%s4516_s24 + $0x1798] sm:$0xff] }
 0x39a   : > { %v5550_v14 = vadd.f32 %v2299_v23, %v1592_v8  ;;  %v2089_v20 = vadd.f32 %v2088_v25, %v1572_v9  ;;  %v2301_v28 = vpop.f32.mrb[9].mxu0  ;;  %3943 = vmatpush1.bf16.msra.mxu1 %v3942_v10  ;;  %v1291_v8 = vld [vmem:[%s4516_s24 + $0x14f0] sm:$0xff]  ;;  %v1320_v9 = vld [vmem:[%s4516_s24 + $0x15d8] sm:$0xff] }
 0x39b   : > { %v5552_v29 = vadd.f32 %v2301_v28, %v1596_v11  ;;  %3945 = vmatprep.subr.bf16.mxu1 %v3944_v15  ;;  %v1348_v10 = vld [vmem:[%s4516_s24 + $0x16b8] sm:$0xff]  ;;  %v3966_v11 = vpack.c.bf16 %v1291_v8, %v1263_v7  ;;  %v1375_v23 = vld [vmem:[%s4516_s24 + $0x1790] sm:$0xff] }
 0x39c   : > { %v2722_v39 = vcombine.low %v2087_v22, %v2089_v20  ;;  %v3968_v15 = vpack.c.bf16 %v1348_v10, %v1320_v9  ;;  %v3972_v22 = vpack.c.bf16 %v1404_v46, %v1376_v18  ;;  %v1403_v25 = vld [vmem:[%s4516_s24 + $0x1870] sm:$0xff]  ;;  %v1432_v20 = vld [vmem:[%s4516_s24 + $0x1958] sm:$0xff]  ;;  %v1620_v18 = vrot.slane %v5532_v2, %v5444_v38 }
 0x39d   : > { %v2755_v44 = vcombine.low %v5550_v14, %v5552_v29  ;;  %v1460_v28 = vld [vmem:[%s4516_s24 + $0x1a38] sm:$0xff] }
 0x39e   : > { %v2736_v51 = vrot.slane %v2722_v39, %v4525_v42  ;;  %3947 = vmatpush1.bf16.msra.mxu1 %v3946_v26  ;;  %v3974_v26 = vpack.c.bf16 %v1403_v25, %v1375_v23  ;;  %v1488_v39 = vld [vmem:[%s4516_s24 + $0x1b18] sm:$0xff] }
 0x39f   : > { %3949 = vmatprep.subr.bf16.mxu1 %v3948_v30  ;;  %v3976_v30 = vpack.c.bf16 %v1460_v28, %v1432_v20  ;;  %v2763_v31 = vrot.slane %v2755_v44, %v4525_v42  ;;  %v1636_v20 = vrot.slane %v1520_v47, %v5304_v54 }
 0x3a0   : > { %v2737_v58 = vcombine.low %v2729_v48, %v2736_v51  ;;  %v3980_v48 = vpack.c.bf16 %v1516_v40, %v1488_v39  ;;  %v1487_v51 = vld [vmem:[%s4516_s24 + $0x1b10] sm:$0xff] }
 0x3a2   : > { %2815 = vst [vmem:[%s5360_s13 + $0x10] sm:$0xff] %v2737_v58  ;;  %3951 = vmatpush1.bf16.msra.mxu1 %v3950_v52  ;;  %v1515_v52 = vld [vmem:[%s4516_s24 + $0x1bf0] sm:$0xff]  ;;  %v1588_v58 = vrot.slane %v5301_v53, %v5444_v38 }
 0x3a3   : > { %3953 = vmatprep.subr.bf16.mxu1 %v3952_v50  ;;  %v3982_v50 = vpack.c.bf16 %v1515_v52, %v1487_v51 }
 0x3a6   : > { %3955 = vmatpush1.bf16.msra.mxu1 %v3954_v24 }
 0x3a7   : > { %3957 = vmatprep.subr.bf16.mxu1 %v3956_v35 }
 0x3aa   : > { %3959 = vmatpush1.bf16.msra.mxu1 %v3958_v62 }
 0x3ab   : > { %3961 = vmatprep.subr.bf16.mxu1 %v3960_v0 }
 0x3ae   : > { %3963 = vmatpush1.bf16.msra.mxu1 %v3962_v4  ;;  %v1628_v4 = vrot.slane %v1520_v47, %v4683_v33  ;;  %v1616_v33 = vrot.slane %v5532_v2, %v5441_v36  ;;  %v1632_v36 = vrot.slane %v1520_v47, %v5296_v49 }
 0x3af   : > { %3965 = vmatprep.subr.bf16.mxu1 %v3964_v6 }
 0x3b2   : > { %3967 = vmatpush1.bf16.msra.mxu1 %v3966_v11 }
 0x3b3   : > { %3969 = vmatprep.subr.bf16.mxu1 %v3968_v15 }
 0x3b6   : > { %3971 = vmatpush1.bf16.msra.mxu1 %v3970_v21 }
 0x3b7   : > { %3973 = vmatprep.subr.bf16.mxu1 %v3972_v22 }
 0x3ba   : > { %3975 = vmatpush1.bf16.msra.mxu1 %v3974_v26 }
 0x3bb   : > { %3977 = vmatprep.subr.bf16.mxu1 %v3976_v30 }
 0x3be   : > { %3979 = vmatpush1.bf16.msra.mxu1 %v3978_v43 }
 0x3bf   : > { %3981 = vmatprep.subr.bf16.mxu1 %v3980_v48 }
 0x3c2   : > { %3983 = vmatpush1.bf16.msra.mxu1 %v3982_v50 }
 0x3c5   : > { %2653 = vmatmul.mubr.f32.vlgmr.msra.gmra.mrb[14].mxu1 %v4699_v63 }
 0x3d8   : > { %v2228_v57 = vpop.f32.mrb[8].mxu1 }
 0x3d9   : > { %v2229_v24 = vadd.f32 %v2228_v57, %v1584_v34  ;;  %v2441_v35 = vpop.f32.mrb[10].mxu0  ;;  %v2230_v45 = vpop.f32.mrb[9].mxu1 }
 0x3da   : > { %v2442_v59 = vadd.f32 %v2441_v35, %v1608_v55  ;;  %v2231_v63 = vadd.f32 %v2230_v45, %v1588_v58  ;;  %v2443_v60 = vpop.f32.mrb[11].mxu0 }
 0x3db   : > { %v2444_v61 = vadd.f32 %v2443_v60, %v1612_v56 }
 0x3dc   : > { %v2739_v62 = vcombine.low %v2229_v24, %v2231_v63 }
 0x3dd   : > { %v2772_v0 = vcombine.low %v2442_v59, %v2444_v61 }
 0x3de   : > { %v2753_v53 = vrot.slane %v2739_v62, %v4525_v42 }
 0x3df   : > { %v2780_v14 = vrot.slane %v2772_v0, %v4525_v42 }
 0x3e0   : > { %v2754_v1 = vcombine.low %v2746_v41, %v2753_v53 }
 0x3e2   : > { %2816 = vst [vmem:[%s5360_s13 + $0x18] sm:$0xff] %v2754_v1 }
 0x418   : > { %v2370_v6 = vpop.f32.mrb[10].mxu1 }
 0x419   : > { %v2371_v7 = vadd.f32 %v2370_v6, %v1600_v3  ;;  %v2583_v13 = vpop.f32.mrb[12].mxu0  ;;  %v2372_v5 = vpop.f32.mrb[11].mxu1 }
 0x41a   : > { %v2584_v12 = vadd.f32 %v2583_v13, %v1624_v19  ;;  %v2373_v8 = vadd.f32 %v2372_v5, %v1604_v27  ;;  %v2585_v9 = vpop.f32.mrb[13].mxu0 }
 0x41b   : > { %v2586_v10 = vadd.f32 %v2585_v9, %v1628_v4 }
 0x41c   : > { %v2756_v11 = vcombine.low %v2371_v7, %v2373_v8 }
 0x41d   : > { %v2789_v15 = vcombine.low %v2584_v12, %v2586_v10 }
 0x41e   : > { %v2770_v16 = vrot.slane %v2756_v11, %v4525_v42 }
 0x41f   : > { %v2797_v32 = vrot.slane %v2789_v15, %v4525_v42 }
 0x420   : > { %v2771_v17 = vcombine.low %v2763_v31, %v2770_v16 }
 0x422   : > { %2817 = vst [vmem:[%s5360_s13 + $0x20] sm:$0xff] %v2771_v17 }
 0x458   : > { %v2512_v46 = vpop.f32.mrb[12].mxu1 }
 0x459   : > { %v2513_v21 = vadd.f32 %v2512_v46, %v1616_v33  ;;  %v2514_v22 = vpop.f32.mrb[13].mxu1 }
 0x45a   : > { %v2515_v23 = vadd.f32 %v2514_v22, %v1620_v18 }
 0x45c   : > { %v2773_v25 = vcombine.low %v2513_v21, %v2515_v23 }
 0x45e   : > { %v2787_v29 = vrot.slane %v2773_v25, %v4525_v42 }
 0x460   : > { %v2788_v44 = vcombine.low %v2780_v14, %v2787_v29 }
 0x462   : > { %2818 = vst [vmem:[%s5360_s13 + $0x28] sm:$0xff] %v2788_v44 }
 0x498   : > { %v2654_v38 = vpop.f32.mrb[14].mxu1 }
 0x499   : > { %v2655_v2 = vadd.f32 %v2654_v38, %v1632_v36  ;;  %v2656_v28 = vpop.f32.mrb[15].mxu1 }
 0x49a   : > { %v2657_v26 = vadd.f32 %v2656_v28, %v1636_v20 }
 0x49c   : > { %v2790_v30 = vcombine.low %v2655_v2, %v2657_v26 }
 0x49e   : > { %v2804_v37 = vrot.slane %v2790_v30, %v4525_v42 }
 0x4a0   : > { %v2805_v39 = vcombine.low %v2797_v32, %v2804_v37 }
 0x4a2   : > { %2819 = vst [vmem:[%s5360_s13 + $0x30] sm:$0xff] %v2805_v39 }
 0x4a3   : > { %4206 = shalt.err (!%p4203_p4)
}
 0x4a4   : > { %s4207_s15 = scalar_lea.hbm %s5640_s28, 896  ;;  %s4211_s7 = scalar_lea.hbm %s5689_s5, 19712 }
 0x4a5   : > { %p4208_p1 = scmp.ne.s32.totalorder %s5640_s28, %s4207_s15  ;;  %p4212_p11 = scmp.lt.u32.totalorder %s5640_s28, %s5689_s5 }
 0x4a6   : > { %p4213_p13 = scmp.lt.u32.totalorder %s4211_s7, %s4207_s15  ;;  %p4215_p8 = scmp.lt.u32.totalorder %s4207_s15, %s5640_s28 }
 0x4a7   : > { %p4209_p0 = pnand %p4208_p1, %p5728_p9 }
 0x4a8   : > { %p4214_p6 = por %p4213_p13, %p4212_p11 }
 0x4a9   : > { %p4210_p5 = pneg %p4209_p0 }
 0x4aa   : > { %p4216_p7 = por %p4215_p8, %p4214_p6 }
 0x4ac   : > { %p4217_p3 = pnand %p4216_p7, %p4210_p5 }
 0x4ae   : > { %4220 = shalt.err (!%p4217_p3)
}
 0x4af   : > { %4005 = dma.vmem_to_hbm [thread:$0]  (%p5728_p9), %s5642_s10, 896, %s5640_s28, %s2821_s11  }
 0x4b0 PF: > { %s5729_s29 = sld [smem:[#allocation16_spill]]  ;;  %p4030_p12 = scmp.ge.s32.totalorder %s4267_s21, 2 }
 0x4b1   : > { %s2847_s1 = sand.u32 1, %s4255_s18  }
 0x4b2   : > { %s2848_s6 = scalar_lea.sflag [#allocation4], %s2847_s1 }
 0x4b6   : > { %p5730_p10 = scmp.ne.s32.totalorder %s5729_s29, 0 }
 0x4b8   : > { %p4022_p2 = pnand %p4030_p12, %p5730_p10 }
 0x4ba   : > { %4250 = dma.done.wait (!%p4022_p2), %s2848_s6, 896  }
 0x4bb   : > { %4252 = vsyncadd (!%p4022_p2), %s2848_s6, 4294966400  ;;  %s5731_s21 = sld [smem:[#allocation14_spill]]  ;;  %s5732_s9 = sld [smem:[#allocation15_spill]] }
 0x4bc   : > { %s5733_s18 = smov %s4259_s19  ;;  %s5734_s19 = smov %s4263_s20 }
 0x4c1   : > { %p17_p4 = scmp.ge.s32.totalorder %s5731_s21, 24   ;;  %s5735_s20 = smov %s5732_s9 }
 0x4c3   :  { %19 = sbr.rel (!%p17_p4) target bundleno = 8 (0x8), region = 103 }
 0x4ca   :  { %2853 = vsyncpa [#allocation3], 1 }
 0x4cb   :  { %2855 = vsyncpa [#allocation3 + $0x1], 1 }
 0x4cc   :  { %2856 = vsyncpa [#allocation6], 1 }
 0x4cd   :  { %2857 = vsyncpa [#allocation4], 1 }
 0x4ce   :  { %2859 = vsyncpa [#allocation4 + $0x1], 1 }

// kernel: audio_embedding_processor.2
= control target key start
LH: loop header
LB: loop body
LE: loop exit
PB: predicated region body
PF: predicated region fallthrough
CT: control target
= control target key end

     0   :  { %s5715_s0 = inlined_call_operand.hbm [shape: f32[2,31744], index: 0, kind: input, shape index: {}]   ;;  %s5716_s1 = inlined_call_operand.hbm [shape: f32[31744,512], index: 1, kind: input, shape index: {}]   ;;  %s5717_s2 = inlined_call_operand.hbm [shape: f32[1,512], index: 2, kind: input, shape index: {}]   ;;  %s5718_s3 = inlined_call_operand.vmem [shape: f32[2,512], index: 3, kind: output, shape index: {}]  }
   0x1   :  { %5728 = sst [smem:[#allocation16_spill]] %s5716_s1 }
   0x2   :  { %5729 = sst [smem:[#allocation17_spill]] %s5718_s3 }
   0x3   :  { %8 = vsyncpa [#allocation4], 0 }
   0x4   :  { %10 = vsyncpa [#allocation4 + $0x1], 0 }
   0x5   :  { %11 = vsyncpa [#allocation6], 0 }
   0x6   :  { %13 = vsyncpa [#allocation6 + $0x1], 0  ;;  %s4207_s12 = smov 0   ;;  %s4209_s13 = smov 0  }
   0x7   :  { %s4211_s14 = smov 0   ;;  %s4213_s15 = smov 0  }
   0x8   :  { %s4215_s16 = smov 0   ;;  %s4217_s17 = smov 0  }
   0x9   :  { %s4219_s18 = smov 0   ;;  %s4221_s19 = smov 0  }
   0xa   :  { %s4223_s20 = smov 0   ;;  %s4225_s21 = smov 0  }
   0xb   :  { %s4227_s22 = smov 0   ;;  %s4229_s23 = smov 0  }
   0xc   :  { %s4231_s24 = smov 0   ;;  %s4233_s25 = smov 0  }
   0xd LB: > { %5730 = sst [smem:[#allocation11_spill]] %s4156_s20  ;;  %p5720_p0 = scmp.eq.s32.totalorder %s4176_s25, 0  ;;  %s4176_s25 = sphi %s4233_s25, %s19_s25   ;;  %s4172_s24 = sphi %s4231_s24, %s5778_s24   ;;  %s4168_s23 = sphi %s4229_s23, %s5777_s23   ;;  %s4164_s22 = sphi %s4227_s22, %s5776_s22   ;;  %s4160_s21 = sphi %s4225_s21, %s5775_s21   ;;  %s4156_s20 = sphi %s4223_s20, %s5774_s20   ;;  %s4152_s19 = sphi %s4221_s19, %s5773_s19   ;;  %s4148_s18 = sphi %s4219_s18, %s5772_s18   ;;  %s4144_s17 = sphi %s4217_s17, %s5771_s17   ;;  %s4140_s16 = sphi %s4215_s16, %s5770_s16   ;;  %s4136_s15 = sphi %s4213_s15, %s5769_s15   ;;  %s4132_s14 = sphi %s4211_s14, %s5768_s14   ;;  %s4128_s13 = sphi %s4209_s13, %s5767_s13   ;;  %s4124_s12 = sphi %s4207_s12, %s5766_s12  }
   0xe   : > { %5731 = sst [smem:[#allocation12_spill]] %s4160_s21  ;;  %p73_p1 = scmp.ne.s32.totalorder %s4144_s17, %s4140_s16 }
   0xf   : > { %p5719_p4 = scmp.lt.s32.totalorder %s4176_s25, 16  ;;  %s174_s28 = sand.u32 1, %s4176_s25  }
  0x10   : > { %p75_p3 = por %p73_p1, %p5720_p0  ;;  %s176_s29 = sand.u32 1, %s4144_s17  }
  0x11   : > { %s3816_s30 = smul.u32 7936, %s176_s29  ;;  %s2776_s4 = sshll.u32 %s4172_s24, 1 }
  0x12   : > { %s2791_s5 = smul.u32 1984, %s4168_s23  ;;  %p4293_p5 = pnand %p5719_p4, %p75_p3 }
  0x13   : > { %s178_s8 = scalar_lea.vmem [#allocation5], %s3816_s30  ;;  %s5733_s1 = sld [smem:[#allocation16_spill]] }
  0x14   : > { %s185_s7 = sadd.s32 %s2791_s5, %s2776_s4  ;;  %s188_s9 = sshll.u32 %s178_s8, 4  ;;  %s4297_s9 = int_to_ptr.vmem [resolvable:$true] %s188_s9 }
  0x15   : > { %s2778_s10 = sshll.u32 %s185_s7, 7  ;;  %p2782_p6 = scmp.ge.s32.totalorder %s4176_s25, 1 }
  0x16   : > { %s4305_s29 = scalar_lea.sflag [#allocation6], %s174_s28  ;;  %p3966_p8 = pneg %p4293_p5 }
  0x19   : > { %s4302_s26 = scalar_lea.hbm %s5733_s1, %s2778_s10  ;;  %s3969_s27 = scalar_lea.hbm %s5733_s1, 2031616 }
  0x1a   : > { %s3964_s21 = scalar_lea.hbm %s4302_s26, 126976  ;;  %p3970_p11 = scmp.lt.u32.totalorder %s4302_s26, %s5733_s1 }
  0x1b   : > { %p3965_p7 = scmp.ne.s32.totalorder %s4302_s26, %s3964_s21  ;;  %p3971_p12 = scmp.lt.u32.totalorder %s3969_s27, %s3964_s21 }
  0x1c   : > { %p3973_p1 = scmp.lt.u32.totalorder %s3964_s21, %s4302_s26 }
  0x1d   : > { %p3967_p9 = pnand %p3966_p8, %p3965_p7  ;;  %p3972_p13 = por %p3971_p12, %p3970_p11 }
  0x1f   : > { %p3968_p10 = pneg %p3967_p9  ;;  %p3974_p3 = por %p3973_p1, %p3972_p13 }
  0x21   : > { %p3975_p4 = pnand %p3974_p3, %p3968_p10 }
  0x23   : > { %3978 = shalt.err (!%p3975_p4)
}
  0x24   : > { %s3979_s28 = scalar_lea.vmem %s4297_s9, 126976  ;;  %s4178_s8 = smov [#allocation5]  }
  0x25   : > { %p3980_p7 = scmp.ne.s32.totalorder %s4297_s9, %s3979_s28  ;;  %s3984_s10 = sshll.u32 %s4178_s8, 4  ;;  %s3985_s10 = int_to_ptr.vmem [resolvable:$false] %s3984_s10 }
  0x26   : > { %s3986_s11 = scalar_lea.vmem %s3985_s10, 253952  ;;  %p3987_p0 = scmp.lt.s32.totalorder %s4297_s9, %s3985_s10 }
  0x27   : > { %p3982_p9 = pnand %p3980_p7, %p3966_p8  ;;  %p3988_p11 = scmp.lt.s32.totalorder %s3986_s11, %s3979_s28 }
  0x29   : > { %p3983_p2 = pneg %p3982_p9  ;;  %p3989_p12 = por %p3988_p11, %p3987_p0 }
  0x2b   : > { %p3990_p13 = pnand %p3989_p12, %p3983_p2 }
  0x2d   : > { %3993 = shalt.err (!%p3990_p13)
}
  0x2e   : > { %s4179_s21 = smov 512   ;;  %s4180_s30 = smov 256  }
  0x2f   : > { %s4181_s4 = smov 16   ;;  %p215_p0 = scmp.lt.s32.totalorder %s4176_s25, 17 }
  0x30   : > { %3831 = dma.hbm_to_vmem [thread:$0]  (!%p4293_p5), %s4302_s26, 126976, %s4297_s9, %s4305_s29, %s4179_s21, %s4180_s30, %s4181_s4  }
  0x31   : > { %p4336_p2 = pnand %p2782_p6, %p215_p0  ;;  %s5721_s5 = sadd.s32 4294967295, %s4176_s25  }
  0x32   : > { %s28_s7 = sadd.s32 1, %s4168_s23  ;;  %s38_s28 = sadd.s32 1, %s4156_s20 }
  0x33   : > { %s5734_s27 = scalar_select %p4336_p2, 1, 0 }
  0x34   : > { %p29_p4 = scmp.ge.s32.totalorder %s28_s7, 8  ;;  %p45_p8 = scmp.ne.s32.totalorder %s4156_s20, %s4152_s19 }
  0x35   : > { %p51_p10 = scmp.ne.s32.totalorder %s4152_s19, %s4148_s18  ;;  %s5736_s26 = sadd.s32 1, %s4172_s24 }
  0x36   : > { %s5780_s7 = smov (%p29_p4, %s28_s7), 0  ;;  %s5782_s26 = smov (!%p29_p4, %s5736_s26), %s4172_s24 }
  0x37   : > { %5735 = sst [smem:[#allocation13_spill]] %s5780_s7  ;;  %s35_s6 = ssub.s32 %s4168_s23, %s5780_s7 }
  0x38   : > { %p5737_p5 = scmp.eq.s32.totalorder %s4176_s25, 0  ;;  %p33_p1 = scmp.ge.s32.totalorder %s5782_s26, 2 }
  0x39   : > { %p36_p3 = scmp.eq.s32.totalorder %s35_s6, 0  ;;  %p4362_p7 = scmp.eq.s32.totalorder %s5721_s5, 0 }
  0x3a   : > { %p4356_p6 = por %p5737_p5, %p45_p8  ;;  %s155_s8 = sand.u32 1, %s4156_s20  }
  0x3b   : > { %s5784_s26 = smov (%p33_p1, %s5782_s26), 0  ;;  %p4374_p9 = por %p4362_p7, %p51_p10 }
  0x3c   : > { %5740 = sst [smem:[#allocation14_spill]] %s5784_s26  ;;  %s4380_s21 = ssub.s32 %s4172_s24, %s5784_s26 }
  0x3d   : > { %s4370_s10 = scalar_select %p36_p3, %s4156_s20, %s38_s28  }
  0x3e   : > { %s5742_s11 = scalar_select %p4374_p9, 1, 0 }
  0x3f   : > { %5741 = sst [smem:[#allocation15_spill]] %s4370_s10  ;;  %s63_s30 = sor.u32 %s4380_s21, %s35_s6 }
  0x40   : > { %p5743_p11 = scmp.ne.s32.totalorder %s4140_s16, %s4136_s15  ;;  %p64_p13 = scmp.eq.s32.totalorder %s63_s30, 0 }
  0x41   : > { %s3815_s5 = smul.u32 62, %s155_s8  ;;  %p5745_p0 = scmp.lt.s32.totalorder %s4176_s25, 16 }
  0x42   : > { %p4388_p12 = por %p5743_p11, %p4362_p7  ;;  %s5747_s1 = sadd.s32 1, %s4144_s17 }
  0x43   : > { %p4396_p4 = pnand %p5745_p0, %p4356_p6  ;;  %s2790_s6 = smul.u32 992, %s4168_s23 }
  0x44   : > { %s5744_s4 = scalar_select %p4388_p12, 1, 0 }
  0x45   : > { %s4403_s26 = scalar_select %p64_p13, %s4144_s17, %s5747_s1  }
  0x46   : > { %s159_s7 = scalar_lea.vmem [#allocation3], %s3815_s5  ;;  %s4409_s3 = scalar_lea.hbm %s5715_s0, %s2790_s6 }
  0x47   : > { %s167_s15 = sshll.u32 %s159_s7, 4  ;;  %s156_s9 = scalar_lea.sflag [#allocation4], %s155_s8  ;;  %s4411_s15 = int_to_ptr.vmem [resolvable:$true] %s167_s15 }
  0x48   : > { %s3994_s30 = scalar_lea.hbm %s4409_s3, 992  ;;  %p3996_p10 = pneg %p4396_p4 }
  0x49   : > { %p3995_p8 = scmp.ne.s32.totalorder %s4409_s3, %s3994_s30  ;;  %s3999_s20 = scalar_lea.hbm %s5715_s0, 7936 }
  0x4a   : > { %p4000_p1 = scmp.lt.u32.totalorder %s4409_s3, %s5715_s0  ;;  %p4001_p3 = scmp.lt.u32.totalorder %s3999_s20, %s3994_s30 }
  0x4b   : > { %p3997_p5 = pnand %p3996_p10, %p3995_p8  ;;  %p4003_p13 = scmp.lt.u32.totalorder %s3994_s30, %s4409_s3 }
  0x4c   : > { %p4002_p11 = por %p4001_p3, %p4000_p1 }
  0x4d   : > { %p3998_p6 = pneg %p3997_p5 }
  0x4e   : > { %p4004_p0 = por %p4003_p13, %p4002_p11 }
  0x50   : > { %p4005_p12 = pnand %p4004_p0, %p3998_p6 }
  0x52   : > { %4008 = shalt.err (!%p4005_p12)
}
  0x53   : > { %s4009_s8 = scalar_lea.vmem %s4411_s15, 992  ;;  %s4182_s6 = smov [#allocation3]  }
  0x54   : > { %p4010_p8 = scmp.ne.s32.totalorder %s4411_s15, %s4009_s8  ;;  %s4014_s1 = sshll.u32 %s4182_s6, 4  ;;  %s4015_s1 = int_to_ptr.vmem [resolvable:$false] %s4014_s1 }
  0x55   : > { %s4016_s5 = scalar_lea.vmem %s4015_s1, 1984  ;;  %p4017_p2 = scmp.lt.s32.totalorder %s4411_s15, %s4015_s1 }
  0x56   : > { %p4012_p5 = pnand %p4010_p8, %p3996_p10  ;;  %p4018_p1 = scmp.lt.s32.totalorder %s4016_s5, %s4009_s8 }
  0x58   : > { %p4013_p9 = pneg %p4012_p5  ;;  %p4019_p3 = por %p4018_p1, %p4017_p2 }
  0x5a   : > { %p4020_p11 = pnand %p4019_p3, %p4013_p9 }
  0x5c   : > { %4023 = shalt.err (!%p4020_p11)
}
  0x5d   : > { %3828 = dma.hbm_to_vmem [thread:$0]  (!%p4396_p4), %s4409_s3, 992, %s4411_s15, %s156_s9  }
  0x5e   : > { %p90_p2 = scmp.eq.s32.totalorder %s4380_s21, 0  ;;  %s92_s30 = sadd.s32 1, %s4132_s14 }
  0x5f   : > { %p99_p9 = scmp.ne.s32.totalorder %s4132_s14, %s4128_s13  ;;  %p105_p12 = scmp.ne.s32.totalorder %s4128_s13, %s4124_s12 }
  0x60   : > { %s4445_s28 = scalar_select %p90_p2, %s4132_s14, %s92_s30  }
  0x61   : > { %p5748_p10 = scmp.eq.s32.totalorder %s4176_s25, 0  ;;  %p4451_p13 = por %p105_p12, %p4362_p7 }
  0x62   : > { %s200_s7 = sand.u32 1, %s4132_s14   ;;  %s2792_s10 = sshll.u32 %s4172_s24, 5 }
  0x63   : > { %p101_p6 = por %p99_p9, %p5748_p10  ;;  %s2779_s8 = sshll.u32 %s200_s7, 1 }
  0x64   : > { %s5749_s20 = scalar_select %p4451_p13, 1, 0 }
  0x65   : > { %s4460_s3 = scalar_lea.hbm %s5717_s2, %s2792_s10  ;;  %p5750_p4 = scmp.lt.s32.totalorder %s4176_s25, 16 }
  0x66   : > { %s202_s18 = scalar_lea.vmem [#allocation7], %s2779_s8  ;;  %s4024_s15 = scalar_lea.hbm %s4460_s3, 32 }
  0x67   : > { %p4464_p0 = pnand %p5750_p4, %p101_p6  ;;  %s210_s21 = sshll.u32 %s202_s18, 4  ;;  %s211_s21 = int_to_ptr.vmem [resolvable:$true] %s210_s21 }
  0x68   : > { %p4025_p7 = scmp.ne.s32.totalorder %s4460_s3, %s4024_s15  ;;  %s4029_s30 = scalar_lea.hbm %s5717_s2, 64 }
  0x69   : > { %p4026_p8 = pneg %p4464_p0  ;;  %p4030_p3 = scmp.lt.u32.totalorder %s4460_s3, %s5717_s2 }
  0x6a   : > { %p4031_p11 = scmp.lt.u32.totalorder %s4029_s30, %s4024_s15  ;;  %p4033_p9 = scmp.lt.u32.totalorder %s4024_s15, %s4460_s3 }
  0x6b   : > { %p4027_p5 = pnand %p4026_p8, %p4025_p7 }
  0x6c   : > { %p4032_p2 = por %p4031_p11, %p4030_p3 }
  0x6d   : > { %p4028_p1 = pneg %p4027_p5 }
  0x6e   : > { %p4034_p12 = por %p4033_p9, %p4032_p2 }
  0x70   : > { %p4035_p10 = pnand %p4034_p12, %p4028_p1 }
  0x72   : > { %4038 = shalt.err (!%p4035_p10)
}
  0x73   : > { %s4039_s8 = scalar_lea.vmem %s211_s21, 32  ;;  %s4183_s6 = smov [#allocation7]  }
  0x74   : > { %p4040_p6 = scmp.ne.s32.totalorder %s211_s21, %s4039_s8  ;;  %s4044_s1 = sshll.u32 %s4183_s6, 4  ;;  %s4045_s1 = int_to_ptr.vmem [resolvable:$false] %s4044_s1 }
  0x75   : > { %s4046_s18 = scalar_lea.vmem %s4045_s1, 64  ;;  %p4047_p5 = scmp.lt.s32.totalorder %s211_s21, %s4045_s1 }
  0x76   : > { %p4042_p4 = pnand %p4040_p6, %p4026_p8  ;;  %p4048_p13 = scmp.lt.s32.totalorder %s4046_s18, %s4039_s8 }
  0x78   : > { %p4043_p7 = pneg %p4042_p4  ;;  %p4049_p3 = por %p4048_p13, %p4047_p5 }
  0x7a   : > { %p4050_p11 = pnand %p4049_p3, %p4043_p7 }
  0x7c   : > { %4053 = shalt.err (!%p4050_p11)
}
  0x7d   : > { %3834 = dma.hbm_to_vmem [thread:$0]  (!%p4464_p0), %s4460_s3, 32, %s211_s21, %s4305_s29  }
  0x7e   : > { %p5752_p1 = scmp.ne.s32.totalorder %s5734_s27, 0 }
  0x7f   : > { %s221_s15 = sand.u32 (!%p5752_p1), 1, %s4152_s19   ;;  %p5753_p8 = scmp.ne.s32.totalorder (!%p5752_p1), %s5742_s11, 0 }
  0x80   : > { %219 = sbr.rel (%p5752_p1) target bundleno = 925 (0x39d), region = 32  ;;  %s222_s5 = scalar_lea.sflag (!%p5752_p1), [#allocation4], %s221_s15 }
  0x81   : > { %s3817_s9 = smul.u32 (!%p5752_p1), 62, %s221_s15 }
  0x83   : > { %s4493_s30 = scalar_lea.vmem (!%p5752_p1), [#allocation3], %s3817_s9 }
  0x87   : > { %4111 = dma.done.wait (%p5753_p8), %s222_s5, 992  }
  0x88   : > { %4113 = vsyncadd (%p5753_p8), %s222_s5, 4294966304  ;;  %s5754_s12 = sadd.s32 4294967295, %s4176_s25   ;;  %s232_s3 = sand.u32 1, %s4140_s16  }
  0x89   : > { %s230_s29 = sand.u32 1, %s5754_s12   ;;  %s3818_s27 = smul.u32 7936, %s232_s3 }
  0x8a   : > { %s231_s21 = scalar_lea.sflag [#allocation6], %s230_s29  ;;  %p5755_p13 = scmp.ne.s32.totalorder %s5744_s4, 0 }
  0x8b   : > { %s4502_s7 = scalar_lea.vmem [#allocation5], %s3818_s27 }
  0x8c   : > { %4115 = dma.done.wait (%p5755_p13), %s231_s21, 126976  }
  0x8d   : > { %4117 = vsyncadd (%p5755_p13), %s231_s21, 4294840320  ;;  %s241_s10 = sand.u32 1, %s4128_s13   ;;  %p5756_p0 = scmp.ne.s32.totalorder %s5749_s20, 0 }
  0x8e   : > { %s4509_s11 = sshll.u32 %s241_s10, 1 }
  0x8f   : > { %s243_s8 = scalar_lea.vmem [#allocation7], %s4509_s11 }
  0x90   : > { %4119 = dma.done.wait (%p5756_p0), %s231_s21, 32  }
  0x91   : > { %4121 = vsyncadd (%p5756_p0), %s231_s21, 4294967264  ;;  %s2784_s6 = sshll.u32 %s4164_s22, 1  ;;  %s5757_s15 = sld [smem:[#allocation17_spill]] }
  0x92   : > { %p281_p2 = scmp.lt.s32.totalorder %s2784_s6, 3  ;;  %s5758_s5 = sld [smem:[#allocation12_spill]] }
  0x94   : > { %s5786_s6 = smov (!%p281_p2, %s2784_s6), 3 }
  0x95   : > { %s2785_s1 = sshll.u32 %s5786_s6, 1 }
  0x97   : > { %s4520_s9 = scalar_lea.vmem %s5757_s15, %s2785_s1 }
  0x98   : > { %p2786_p9 = scmp.ne.s32.totalorder %s5758_s5, 0 }
  0x99   : > { %v4184_v0 = vmov (!%p2786_p9), 0.0  }
  0x9a   : > { %289 = sbr.rel (%p2786_p9) target bundleno = 161 (0xa1), region = 48  ;;  %290 = vst [vmem:[#allocation2] sm:$0xf] (!%p2786_p9), %v4184_v0 }
  0xa1 PF: > { %v301_v1 = vld [vmem:[%s4502_s7 + $0x8] sm:$0xff]  ;;  %v303_v2 = vld [vmem:[%s4502_s7 + $0x18] sm:$0xff]  ;;  %v300_v6 = vld [vmem:[%s4502_s7] sm:$0xff]  ;;  %s5759_s22 = sld [smem:[#allocation12_spill]] }
  0xa2   : > { %v813_v3 = vld [vmem:[%s4502_s7 + $0x1008] sm:$0xff]  ;;  %v2793_v4 = vpack.c.bf16 %v303_v2, %v301_v1  ;;  %v815_v5 = vld [vmem:[%s4502_s7 + $0x1018] sm:$0xff]  ;;  %v302_v7 = vld [vmem:[%s4502_s7 + $0x10] sm:$0xff] }
  0xa3   : > { %v3305_v8 = vpack.c.bf16 %v815_v5, %v813_v3  ;;  %v2795_v9 = vpack.c.bf16 %v302_v7, %v300_v6  ;;  %v812_v10 = vld [vmem:[%s4502_s7 + $0x1000] sm:$0xff]  ;;  %v814_v11 = vld [vmem:[%s4502_s7 + $0x1010] sm:$0xff]  ;;  %v305_v12 = vld [vmem:[%s4502_s7 + $0x28] sm:$0xff] }
  0xa4   : > { %2794 = vmatprep.subr.bf16.mxu1 %v2793_v4  ;;  %v3307_v13 = vpack.c.bf16 %v814_v11, %v812_v10  ;;  %v307_v14 = vld [vmem:[%s4502_s7 + $0x38] sm:$0xff]  ;;  %v817_v15 = vld [vmem:[%s4502_s7 + $0x1028] sm:$0xff]  ;;  %v304_v19 = vld [vmem:[%s4502_s7 + $0x20] sm:$0xff] }
  0xa5   : > { %v819_v16 = vld [vmem:[%s4502_s7 + $0x1038] sm:$0xff]  ;;  %3306 = vmatprep.subr.bf16.mxu0 %v3305_v8  ;;  %2796 = vmatpush1.bf16.msra.mxu1 %v2795_v9  ;;  %v2797_v17 = vpack.c.bf16 %v307_v14, %v305_v12  ;;  %v306_v20 = vld [vmem:[%s4502_s7 + $0x30] sm:$0xff]  ;;  %v816_v21 = vld [vmem:[%s4502_s7 + $0x1020] sm:$0xff] }
  0xa6   : > { %v3309_v18 = vpack.c.bf16 %v819_v16, %v817_v15  ;;  %3308 = vmatpush1.bf16.msra.mxu0 %v3307_v13  ;;  %v2799_v22 = vpack.c.bf16 %v306_v20, %v304_v19  ;;  %v818_v23 = vld [vmem:[%s4502_s7 + $0x1030] sm:$0xff]  ;;  %v309_v24 = vld [vmem:[%s4502_s7 + $0x48] sm:$0xff]  ;;  %v311_v25 = vld [vmem:[%s4502_s7 + $0x58] sm:$0xff] }
  0xa7   : > { %2798 = vmatprep.subr.bf16.mxu1 %v2797_v17  ;;  %v3311_v26 = vpack.c.bf16 %v818_v23, %v816_v21  ;;  %v2801_v27 = vpack.c.bf16 %v311_v25, %v309_v24  ;;  %v821_v28 = vld [vmem:[%s4502_s7 + $0x1048] sm:$0xff]  ;;  %v823_v29 = vld [vmem:[%s4502_s7 + $0x1058] sm:$0xff]  ;;  %v308_v30 = vld [vmem:[%s4502_s7 + $0x40] sm:$0xff]  ;;  %p2787_p12 = scmp.ne.s32.totalorder %s5759_s22, 7 }
  0xa8   : > { %3310 = vmatprep.subr.bf16.mxu0 %v3309_v18  ;;  %v3313_v31 = vpack.c.bf16 %v823_v29, %v821_v28  ;;  %v310_v32 = vld [vmem:[%s4502_s7 + $0x50] sm:$0xff]  ;;  %v820_v33 = vld [vmem:[%s4502_s7 + $0x1040] sm:$0xff]  ;;  %v313_v36 = vld [vmem:[%s4502_s7 + $0x68] sm:$0xff] }
  0xa9   : > { %v822_v34 = vld [vmem:[%s4502_s7 + $0x1050] sm:$0xff]  ;;  %2800 = vmatpush1.bf16.msra.mxu1 %v2799_v22  ;;  %v2803_v35 = vpack.c.bf16 %v310_v32, %v308_v30  ;;  %v315_v37 = vld [vmem:[%s4502_s7 + $0x78] sm:$0xff]  ;;  %v825_v38 = vld [vmem:[%s4502_s7 + $0x1068] sm:$0xff] }
  0xaa   : > { %3312 = vmatpush1.bf16.msra.mxu0 %v3311_v26  ;;  %2802 = vmatprep.subr.bf16.mxu1 %v2801_v27  ;;  %v3315_v39 = vpack.c.bf16 %v822_v34, %v820_v33  ;;  %v2805_v40 = vpack.c.bf16 %v315_v37, %v313_v36  ;;  %v827_v41 = vld [vmem:[%s4502_s7 + $0x1078] sm:$0xff]  ;;  %v312_v42 = vld [vmem:[%s4502_s7 + $0x60] sm:$0xff]  ;;  %v314_v43 = vld [vmem:[%s4502_s7 + $0x70] sm:$0xff] }
  0xab   : > { %3314 = vmatprep.subr.bf16.mxu0 %v3313_v31  ;;  %v3317_v44 = vpack.c.bf16 %v827_v41, %v825_v38  ;;  %v824_v45 = vld [vmem:[%s4502_s7 + $0x1060] sm:$0xff]  ;;  %v826_v46 = vld [vmem:[%s4502_s7 + $0x1070] sm:$0xff]  ;;  %v317_v47 = vld [vmem:[%s4502_s7 + $0x88] sm:$0xff]  ;;  %v2807_v51 = vpack.c.bf16 %v314_v43, %v312_v42 }
  0xac   : > { %v319_v48 = vld [vmem:[%s4502_s7 + $0x98] sm:$0xff]  ;;  %v829_v49 = vld [vmem:[%s4502_s7 + $0x1088] sm:$0xff]  ;;  %v3319_v52 = vpack.c.bf16 %v826_v46, %v824_v45  ;;  %v316_v54 = vld [vmem:[%s4502_s7 + $0x80] sm:$0xff] }
  0xad   : > { %v831_v50 = vld [vmem:[%s4502_s7 + $0x1098] sm:$0xff]  ;;  %2804 = vmatpush1.bf16.msra.mxu1 %v2803_v35  ;;  %v2809_v53 = vpack.c.bf16 %v319_v48, %v317_v47  ;;  %v318_v55 = vld [vmem:[%s4502_s7 + $0x90] sm:$0xff]  ;;  %v828_v56 = vld [vmem:[%s4502_s7 + $0x1080] sm:$0xff]  ;;  %v4185_v47 = vmov 1983009808  }
  0xae   : > { %3316 = vmatpush1.bf16.msra.mxu0 %v3315_v39  ;;  %2806 = vmatprep.subr.bf16.mxu1 %v2805_v40  ;;  %v3321_v57 = vpack.c.bf16 %v831_v50, %v829_v49  ;;  %v830_v58 = vld [vmem:[%s4502_s7 + $0x1090] sm:$0xff]  ;;  %v321_v59 = vld [vmem:[%s4502_s7 + $0xa8] sm:$0xff]  ;;  %v323_v60 = vld [vmem:[%s4502_s7 + $0xb8] sm:$0xff]  ;;  %v2811_v63 = vpack.c.bf16 %v318_v55, %v316_v54  ;;  %v1302_v48 = vunpack.c.l.s4 %v4185_v47  ;;  %v1304_v49 = vlaneseq }
  0xaf   : > { %3318 = vmatprep.subr.bf16.mxu0 %v3317_v44  ;;  %v833_v61 = vld [vmem:[%s4502_s7 + $0x10a8] sm:$0xff]  ;;  %v835_v62 = vld [vmem:[%s4502_s7 + $0x10b8] sm:$0xff]  ;;  %v3323_v0 = vpack.c.bf16 %v830_v58, %v828_v56  ;;  %v2813_v1 = vpack.c.bf16 %v323_v60, %v321_v59  ;;  %v320_v2 = vld [vmem:[%s4502_s7 + $0xa0] sm:$0xff] }
  0xb0   : > { %v322_v3 = vld [vmem:[%s4502_s7 + $0xb0] sm:$0xff]  ;;  %v832_v4 = vld [vmem:[%s4502_s7 + $0x10a0] sm:$0xff]  ;;  %v3325_v5 = vpack.c.bf16 %v835_v62, %v833_v61  ;;  %v325_v7 = vld [vmem:[%s4502_s7 + $0xc8] sm:$0xff]  ;;  %v1303_v62 = vunpack.c.0.s8 %v1302_v48 }
  0xb1   : > { %2808 = vmatpush1.bf16.msra.mxu1 %v2807_v51  ;;  %v834_v6 = vld [vmem:[%s4502_s7 + $0x10b0] sm:$0xff]  ;;  %v327_v8 = vld [vmem:[%s4502_s7 + $0xd8] sm:$0xff]  ;;  %v837_v9 = vld [vmem:[%s4502_s7 + $0x10c8] sm:$0xff]  ;;  %v2815_v11 = vpack.c.bf16 %v322_v3, %v320_v2 }
  0xb2   : > { %3320 = vmatpush1.bf16.msra.mxu0 %v3319_v52  ;;  %2810 = vmatprep.subr.bf16.mxu1 %v2809_v53  ;;  %v839_v10 = vld [vmem:[%s4502_s7 + $0x10d8] sm:$0xff]  ;;  %v3327_v12 = vpack.c.bf16 %v834_v6, %v832_v4  ;;  %v2817_v13 = vpack.c.bf16 %v327_v8, %v325_v7  ;;  %v324_v14 = vld [vmem:[%s4502_s7 + $0xc0] sm:$0xff]  ;;  %v326_v15 = vld [vmem:[%s4502_s7 + $0xd0] sm:$0xff] }
  0xb3   : > { %3322 = vmatprep.subr.bf16.mxu0 %v3321_v57  ;;  %v836_v16 = vld [vmem:[%s4502_s7 + $0x10c0] sm:$0xff]  ;;  %v3329_v17 = vpack.c.bf16 %v839_v10, %v837_v9  ;;  %v838_v18 = vld [vmem:[%s4502_s7 + $0x10d0] sm:$0xff]  ;;  %v329_v19 = vld [vmem:[%s4502_s7 + $0xe8] sm:$0xff]  ;;  %v2819_v23 = vpack.c.bf16 %v326_v15, %v324_v14 }
  0xb4   : > { %v331_v20 = vld [vmem:[%s4502_s7 + $0xf8] sm:$0xff]  ;;  %v841_v21 = vld [vmem:[%s4502_s7 + $0x10e8] sm:$0xff]  ;;  %v3331_v24 = vpack.c.bf16 %v838_v18, %v836_v16  ;;  %v328_v26 = vld [vmem:[%s4502_s7 + $0xe0] sm:$0xff] }
  0xb5   : > { %2812 = vmatpush1.bf16.msra.mxu1 %v2811_v63  ;;  %v843_v22 = vld [vmem:[%s4502_s7 + $0x10f8] sm:$0xff]  ;;  %v2821_v25 = vpack.c.bf16 %v331_v20, %v329_v19  ;;  %v330_v27 = vld [vmem:[%s4502_s7 + $0xf0] sm:$0xff]  ;;  %v840_v28 = vld [vmem:[%s4502_s7 + $0x10e0] sm:$0xff]  ;;  %v4607_v63 = vshrl.u32 %v1304_v49, 7 }
  0xb6   : > { %3324 = vmatpush1.bf16.msra.mxu0 %v3323_v0  ;;  %2814 = vmatprep.subr.bf16.mxu1 %v2813_v1  ;;  %v3333_v29 = vpack.c.bf16 %v843_v22, %v841_v21  ;;  %v842_v30 = vld [vmem:[%s4502_s7 + $0x10f0] sm:$0xff]  ;;  %v333_v31 = vld [vmem:[%s4502_s7 + $0x108] sm:$0xff]  ;;  %v335_v32 = vld [vmem:[%s4502_s7 + $0x118] sm:$0xff]  ;;  %v2823_v35 = vpack.c.bf16 %v330_v27, %v328_v26 }
  0xb7   : > { %3326 = vmatprep.subr.bf16.mxu0 %v3325_v5  ;;  %v845_v33 = vld [vmem:[%s4502_s7 + $0x1108] sm:$0xff]  ;;  %v847_v34 = vld [vmem:[%s4502_s7 + $0x1118] sm:$0xff]  ;;  %v3335_v36 = vpack.c.bf16 %v842_v30, %v840_v28  ;;  %v2825_v37 = vpack.c.bf16 %v335_v32, %v333_v31  ;;  %v332_v38 = vld [vmem:[%s4502_s7 + $0x100] sm:$0xff] }
  0xb8   : > { %v334_v39 = vld [vmem:[%s4502_s7 + $0x110] sm:$0xff]  ;;  %v844_v40 = vld [vmem:[%s4502_s7 + $0x1100] sm:$0xff]  ;;  %v3337_v41 = vpack.c.bf16 %v847_v34, %v845_v33  ;;  %v337_v43 = vld [vmem:[%s4502_s7 + $0x128] sm:$0xff] }
  0xb9   : > { %2816 = vmatpush1.bf16.msra.mxu1 %v2815_v11  ;;  %v846_v42 = vld [vmem:[%s4502_s7 + $0x1110] sm:$0xff]  ;;  %v339_v44 = vld [vmem:[%s4502_s7 + $0x138] sm:$0xff]  ;;  %v849_v45 = vld [vmem:[%s4502_s7 + $0x1128] sm:$0xff]  ;;  %v2827_v50 = vpack.c.bf16 %v334_v39, %v332_v38 }
  0xba   : > { %3328 = vmatpush1.bf16.msra.mxu0 %v3327_v12  ;;  %2818 = vmatprep.subr.bf16.mxu1 %v2817_v13  ;;  %v851_v46 = vld [vmem:[%s4502_s7 + $0x1138] sm:$0xff]  ;;  %v3339_v51 = vpack.c.bf16 %v846_v42, %v844_v40  ;;  %v2829_v52 = vpack.c.bf16 %v339_v44, %v337_v43  ;;  %v336_v53 = vld [vmem:[%s4502_s7 + $0x120] sm:$0xff]  ;;  %v338_v54 = vld [vmem:[%s4502_s7 + $0x130] sm:$0xff]  ;;  %v4618_v12 = vsub.s32 %v1303_v62, %v4607_v63 }
  0xbb   : > { %3330 = vmatprep.subr.bf16.mxu0 %v3329_v17  ;;  %v848_v55 = vld [vmem:[%s4502_s7 + $0x1120] sm:$0xff]  ;;  %v3341_v56 = vpack.c.bf16 %v851_v46, %v849_v45  ;;  %v850_v57 = vld [vmem:[%s4502_s7 + $0x1130] sm:$0xff]  ;;  %v341_v58 = vld [vmem:[%s4502_s7 + $0x148] sm:$0xff]  ;;  %v2831_v0 = vpack.c.bf16 %v338_v54, %v336_v53 }
  0xbc   : > { %v343_v59 = vld [vmem:[%s4502_s7 + $0x158] sm:$0xff]  ;;  %v853_v60 = vld [vmem:[%s4502_s7 + $0x1148] sm:$0xff]  ;;  %v3343_v1 = vpack.c.bf16 %v850_v57, %v848_v55  ;;  %v340_v3 = vld [vmem:[%s4502_s7 + $0x140] sm:$0xff] }
  0xbd   : > { %2820 = vmatpush1.bf16.msra.mxu1 %v2819_v23  ;;  %v855_v61 = vld [vmem:[%s4502_s7 + $0x1158] sm:$0xff]  ;;  %v2833_v2 = vpack.c.bf16 %v343_v59, %v341_v58  ;;  %v342_v4 = vld [vmem:[%s4502_s7 + $0x150] sm:$0xff]  ;;  %v852_v5 = vld [vmem:[%s4502_s7 + $0x1140] sm:$0xff] }
  0xbe   : > { %3332 = vmatpush1.bf16.msra.mxu0 %v3331_v24  ;;  %2822 = vmatprep.subr.bf16.mxu1 %v2821_v25  ;;  %v3345_v6 = vpack.c.bf16 %v855_v61, %v853_v60  ;;  %v854_v7 = vld [vmem:[%s4502_s7 + $0x1150] sm:$0xff]  ;;  %v345_v8 = vld [vmem:[%s4502_s7 + $0x168] sm:$0xff]  ;;  %v347_v9 = vld [vmem:[%s4502_s7 + $0x178] sm:$0xff]  ;;  %v2835_v13 = vpack.c.bf16 %v342_v4, %v340_v3 }
  0xbf   : > { %3334 = vmatprep.subr.bf16.mxu0 %v3333_v29  ;;  %v857_v10 = vld [vmem:[%s4502_s7 + $0x1168] sm:$0xff]  ;;  %v859_v11 = vld [vmem:[%s4502_s7 + $0x1178] sm:$0xff]  ;;  %v344_v14 = vld [vmem:[%s4502_s7 + $0x160] sm:$0xff]  ;;  %v3347_v15 = vpack.c.bf16 %v854_v7, %v852_v5  ;;  %v2837_v16 = vpack.c.bf16 %v347_v9, %v345_v8 }
  0xc0   : > { %v346_v17 = vld [vmem:[%s4502_s7 + $0x170] sm:$0xff]  ;;  %v856_v18 = vld [vmem:[%s4502_s7 + $0x1160] sm:$0xff]  ;;  %v3349_v20 = vpack.c.bf16 %v859_v11, %v857_v10  ;;  %v349_v21 = vld [vmem:[%s4502_s7 + $0x188] sm:$0xff] }
  0xc1   : > { %2824 = vmatpush1.bf16.msra.mxu1 %v2823_v35  ;;  %v858_v19 = vld [vmem:[%s4502_s7 + $0x1170] sm:$0xff]  ;;  %v351_v22 = vld [vmem:[%s4502_s7 + $0x198] sm:$0xff]  ;;  %v4627_v23 = vld [vmem:[%s4493_s30] sm:$0xff]  ;;  %v2839_v28 = vpack.c.bf16 %v346_v17, %v344_v14 }
  0xc2   : > { %3336 = vmatpush1.bf16.msra.mxu0 %v3335_v36  ;;  %2826 = vmatprep.subr.bf16.mxu1 %v2825_v37  ;;  %v861_v24 = vld [vmem:[%s4502_s7 + $0x1188] sm:$0xff]  ;;  %v863_v25 = vld [vmem:[%s4502_s7 + $0x1198] sm:$0xff]  ;;  %v4633_v26 = vrot.slane %v4627_v23, %v4618_v12  ;;  %v3351_v30 = vpack.c.bf16 %v858_v19, %v856_v18  ;;  %v2841_v31 = vpack.c.bf16 %v351_v22, %v349_v21  ;;  %v348_v32 = vld [vmem:[%s4502_s7 + $0x180] sm:$0xff] }
  0xc3   : > { %3338 = vmatprep.subr.bf16.mxu0 %v3337_v41  ;;  %v4636_v27 = vld [vmem:[%s4493_s30 + $0x20] sm:$0xff]  ;;  %v350_v33 = vld [vmem:[%s4502_s7 + $0x190] sm:$0xff]  ;;  %v3353_v36 = vpack.c.bf16 %v863_v25, %v861_v24  ;;  %v355_v39 = vld [vmem:[%s4502_s7 + $0x1b8] sm:$0xff] }
  0xc4   : > { %v4640_v29 = vrot.slane %v4636_v27, %v4618_v12  ;;  %v860_v34 = vld [vmem:[%s4502_s7 + $0x1180] sm:$0xff]  ;;  %v1315_v35 = vcombine.high %v4633_v26, %v4633_v26  ;;  %v862_v37 = vld [vmem:[%s4502_s7 + $0x1190] sm:$0xff]  ;;  %v353_v38 = vld [vmem:[%s4502_s7 + $0x1a8] sm:$0xff]  ;;  %v2843_v43 = vpack.c.bf16 %v350_v33, %v348_v32 }
  0xc5   : > { %2828 = vmatpush1.bf16.msra.mxu1 %v2827_v50  ;;  %v865_v41 = vld [vmem:[%s4502_s7 + $0x11a8] sm:$0xff]  ;;  %v867_v42 = vld [vmem:[%s4502_s7 + $0x11b8] sm:$0xff]  ;;  %v3355_v44 = vpack.c.bf16 %v862_v37, %v860_v34  ;;  %v2845_v45 = vpack.c.bf16 %v355_v39, %v353_v38  ;;  %v352_v46 = vld [vmem:[%s4502_s7 + $0x1a0] sm:$0xff] }
  0xc6   : > { %3340 = vmatpush1.bf16.msra.mxu0 %v3339_v51  ;;  %2830 = vmatprep.subr.bf16.mxu1 %v2829_v52  ;;  %v1383_v40 = vcombine.high %v4640_v29, %v4640_v29  ;;  %v354_v47 = vld [vmem:[%s4502_s7 + $0x1b0] sm:$0xff]  ;;  %v864_v48 = vld [vmem:[%s4502_s7 + $0x11a0] sm:$0xff]  ;;  %v3357_v49 = vpack.c.bf16 %v867_v42, %v865_v41  ;;  %v357_v51 = vld [vmem:[%s4502_s7 + $0x1c8] sm:$0xff] }
  0xc7   : > { %3342 = vmatprep.subr.bf16.mxu0 %v3341_v56  ;;  %1530 = vmatprep.mubr.f32.mxu1 %v1315_v35  ;;  %v866_v50 = vld [vmem:[%s4502_s7 + $0x11b0] sm:$0xff]  ;;  %v359_v52 = vld [vmem:[%s4502_s7 + $0x1d8] sm:$0xff]  ;;  %v869_v53 = vld [vmem:[%s4502_s7 + $0x11c8] sm:$0xff]  ;;  %v2847_v55 = vpack.c.bf16 %v354_v47, %v352_v46 }
  0xc8   : > { %2098 = vmatprep.mubr.f32.mxu0 %v1383_v40  ;;  %v871_v54 = vld [vmem:[%s4502_s7 + $0x11d8] sm:$0xff]  ;;  %v3359_v56 = vpack.c.bf16 %v866_v50, %v864_v48  ;;  %v2849_v57 = vpack.c.bf16 %v359_v52, %v357_v51  ;;  %v356_v58 = vld [vmem:[%s4502_s7 + $0x1c0] sm:$0xff]  ;;  %v358_v59 = vld [vmem:[%s4502_s7 + $0x1d0] sm:$0xff] }
  0xc9   : > { %2832 = vmatpush1.bf16.msra.mxu1 %v2831_v0  ;;  %v868_v60 = vld [vmem:[%s4502_s7 + $0x11c0] sm:$0xff]  ;;  %v3361_v61 = vpack.c.bf16 %v871_v54, %v869_v53  ;;  %v870_v62 = vld [vmem:[%s4502_s7 + $0x11d0] sm:$0xff]  ;;  %v361_v0 = vld [vmem:[%s4502_s7 + $0x1e8] sm:$0xff]  ;;  %v2851_v4 = vpack.c.bf16 %v358_v59, %v356_v58 }
  0xca   : > { %3344 = vmatpush1.bf16.msra.mxu0 %v3343_v1  ;;  %2834 = vmatprep.subr.bf16.mxu1 %v2833_v2  ;;  %v363_v1 = vld [vmem:[%s4502_s7 + $0x1f8] sm:$0xff]  ;;  %v873_v2 = vld [vmem:[%s4502_s7 + $0x11e8] sm:$0xff]  ;;  %v3363_v5 = vpack.c.bf16 %v870_v62, %v868_v60  ;;  %v360_v7 = vld [vmem:[%s4502_s7 + $0x1e0] sm:$0xff] }
  0xcb   : > { %3346 = vmatprep.subr.bf16.mxu0 %v3345_v6  ;;  %v875_v3 = vld [vmem:[%s4502_s7 + $0x11f8] sm:$0xff]  ;;  %v2853_v6 = vpack.c.bf16 %v363_v1, %v361_v0  ;;  %v362_v8 = vld [vmem:[%s4502_s7 + $0x1f0] sm:$0xff]  ;;  %v872_v9 = vld [vmem:[%s4502_s7 + $0x11e0] sm:$0xff] }
  0xcc   : > { %v3365_v10 = vpack.c.bf16 %v875_v3, %v873_v2  ;;  %v874_v11 = vld [vmem:[%s4502_s7 + $0x11f0] sm:$0xff]  ;;  %v365_v14 = vld [vmem:[%s4502_s7 + $0x208] sm:$0xff]  ;;  %v879_v18 = vld [vmem:[%s4502_s7 + $0x1218] sm:$0xff]  ;;  %v2855_v19 = vpack.c.bf16 %v362_v8, %v360_v7 }
  0xcd   : > { %2836 = vmatpush1.bf16.msra.mxu1 %v2835_v13  ;;  %v1300_v13 = vcombine.high %v4627_v23, %v4627_v23  ;;  %v877_v17 = vld [vmem:[%s4502_s7 + $0x1208] sm:$0xff]  ;;  %v364_v22 = vld [vmem:[%s4502_s7 + $0x200] sm:$0xff]  ;;  %v366_v23 = vld [vmem:[%s4502_s7 + $0x210] sm:$0xff] }
  0xce   : > { %3348 = vmatpush1.bf16.msra.mxu0 %v3347_v15  ;;  %2838 = vmatprep.subr.bf16.mxu1 %v2837_v16  ;;  %v367_v15 = vld [vmem:[%s4502_s7 + $0x218] sm:$0xff]  ;;  %v1368_v16 = vcombine.high %v4636_v27, %v4636_v27  ;;  %v876_v24 = vld [vmem:[%s4502_s7 + $0x1200] sm:$0xff]  ;;  %v3369_v25 = vpack.c.bf16 %v879_v18, %v877_v17  ;;  %v878_v27 = vld [vmem:[%s4502_s7 + $0x1210] sm:$0xff]  ;;  %v2859_v35 = vpack.c.bf16 %v366_v23, %v364_v22 }
  0xcf   : > { %3350 = vmatprep.subr.bf16.mxu0 %v3349_v20  ;;  %v3367_v20 = vpack.c.bf16 %v874_v11, %v872_v9  ;;  %v2857_v21 = vpack.c.bf16 %v367_v15, %v365_v14  ;;  %v881_v32 = vld [vmem:[%s4502_s7 + $0x1228] sm:$0xff]  ;;  %v883_v33 = vld [vmem:[%s4502_s7 + $0x1238] sm:$0xff]  ;;  %v368_v38 = vld [vmem:[%s4502_s7 + $0x220] sm:$0xff] }
  0xd0   : > { %v4694_v34 = vrot.slane %v1368_v16, %v4618_v12  ;;  %v370_v39 = vld [vmem:[%s4502_s7 + $0x230] sm:$0xff]  ;;  %v880_v40 = vld [vmem:[%s4502_s7 + $0x1220] sm:$0xff]  ;;  %v3373_v41 = vpack.c.bf16 %v883_v33, %v881_v32  ;;  %v885_v46 = vld [vmem:[%s4502_s7 + $0x1248] sm:$0xff] }
  0xd1   : > { %2840 = vmatpush1.bf16.msra.mxu1 %v2839_v28  ;;  %v369_v28 = vld [vmem:[%s4502_s7 + $0x228] sm:$0xff]  ;;  %v882_v42 = vld [vmem:[%s4502_s7 + $0x1230] sm:$0xff]  ;;  %v887_v47 = vld [vmem:[%s4502_s7 + $0x1258] sm:$0xff] }
  0xd2   : > { %3352 = vmatpush1.bf16.msra.mxu0 %v3351_v30  ;;  %2842 = vmatprep.subr.bf16.mxu1 %v2841_v31  ;;  %v371_v30 = vld [vmem:[%s4502_s7 + $0x238] sm:$0xff]  ;;  %v4689_v31 = vrot.slane %v1300_v13, %v4618_v12  ;;  %v1384_v48 = vcombine.high %v4694_v34, %v4694_v34  ;;  %v3375_v50 = vpack.c.bf16 %v882_v42, %v880_v40  ;;  %v372_v52 = vld [vmem:[%s4502_s7 + $0x240] sm:$0xff]  ;;  %v378_v0 = vld [vmem:[%s4502_s7 + $0x270] sm:$0xff] }
  0xd3   : > { %3354 = vmatprep.subr.bf16.mxu0 %v3353_v36  ;;  %v3371_v36 = vpack.c.bf16 %v878_v27, %v876_v24  ;;  %v2861_v37 = vpack.c.bf16 %v371_v30, %v369_v28  ;;  %v884_v53 = vld [vmem:[%s4502_s7 + $0x1240] sm:$0xff]  ;;  %v3377_v54 = vpack.c.bf16 %v887_v47, %v885_v46  ;;  %v891_v58 = vld [vmem:[%s4502_s7 + $0x1278] sm:$0xff]  ;;  %v890_v3 = vld [vmem:[%s4502_s7 + $0x1270] sm:$0xff] }
  0xd4   : > { %v376_v62 = vld [vmem:[%s4502_s7 + $0x260] sm:$0xff]  ;;  %v895_v7 = vld [vmem:[%s4502_s7 + $0x1298] sm:$0xff]  ;;  %v382_v13 = vld [vmem:[%s4502_s7 + $0x290] sm:$0xff] }
  0xd5   : > { %2844 = vmatpush1.bf16.msra.mxu1 %v2843_v43  ;;  %v373_v43 = vld [vmem:[%s4502_s7 + $0x248] sm:$0xff]  ;;  %v888_v1 = vld [vmem:[%s4502_s7 + $0x1260] sm:$0xff]  ;;  %v2871_v8 = vpack.c.bf16 %v378_v0, %v376_v62  ;;  %v894_v16 = vld [vmem:[%s4502_s7 + $0x1290] sm:$0xff] }
  0xd6   : > { %3356 = vmatpush1.bf16.msra.mxu0 %v3355_v44  ;;  %2846 = vmatprep.subr.bf16.mxu1 %v2845_v45  ;;  %v375_v44 = vld [vmem:[%s4502_s7 + $0x258] sm:$0xff]  ;;  %v1316_v45 = vcombine.high %v4689_v31, %v4689_v31  ;;  %v3383_v9 = vpack.c.bf16 %v890_v3, %v888_v1  ;;  %v380_v11 = vld [vmem:[%s4502_s7 + $0x280] sm:$0xff]  ;;  %v385_v17 = vld [vmem:[%s4502_s7 + $0x2a8] sm:$0xff] }
  0xd7   : > { %3358 = vmatprep.subr.bf16.mxu0 %v3357_v49  ;;  %v2863_v49 = vpack.c.bf16 %v370_v39, %v368_v38  ;;  %v2865_v51 = vpack.c.bf16 %v375_v44, %v373_v43  ;;  %v892_v14 = vld [vmem:[%s4502_s7 + $0x1280] sm:$0xff]  ;;  %v387_v18 = vld [vmem:[%s4502_s7 + $0x2b8] sm:$0xff]  ;;  %v898_v30 = vld [vmem:[%s4502_s7 + $0x12b0] sm:$0xff] }
  0xd8   : > { %v3387_v22 = vpack.c.bf16 %v894_v16, %v892_v14  ;;  %v2877_v23 = vpack.c.bf16 %v387_v18, %v385_v17  ;;  %v384_v24 = vld [vmem:[%s4502_s7 + $0x2a0] sm:$0xff]  ;;  %v389_v32 = vld [vmem:[%s4502_s7 + $0x2c8] sm:$0xff]  ;;  %v391_v33 = vld [vmem:[%s4502_s7 + $0x2d8] sm:$0xff] }
  0xd9   : > { %2848 = vmatpush1.bf16.msra.mxu1 %v2847_v55  ;;  %v886_v55 = vld [vmem:[%s4502_s7 + $0x1250] sm:$0xff]  ;;  %v896_v27 = vld [vmem:[%s4502_s7 + $0x12a0] sm:$0xff]  ;;  %v2881_v39 = vpack.c.bf16 %v391_v33, %v389_v32  ;;  %v395_v46 = vld [vmem:[%s4502_s7 + $0x2f8] sm:$0xff] }
  0xda   : > { %3360 = vmatpush1.bf16.msra.mxu0 %v3359_v56  ;;  %2850 = vmatprep.subr.bf16.mxu1 %v2849_v57  ;;  %v377_v56 = vld [vmem:[%s4502_s7 + $0x268] sm:$0xff]  ;;  %v379_v57 = vld [vmem:[%s4502_s7 + $0x278] sm:$0xff]  ;;  %v3379_v60 = vpack.c.bf16 %v886_v55, %v884_v53  ;;  %v3391_v38 = vpack.c.bf16 %v898_v30, %v896_v27  ;;  %v388_v40 = vld [vmem:[%s4502_s7 + $0x2c0] sm:$0xff] }
  0xdb   : > { %3362 = vmatprep.subr.bf16.mxu0 %v3361_v61  ;;  %v2869_v61 = vpack.c.bf16 %v379_v57, %v377_v56  ;;  %v900_v42 = vld [vmem:[%s4502_s7 + $0x12c0] sm:$0xff]  ;;  %v902_v44 = vld [vmem:[%s4502_s7 + $0x12d0] sm:$0xff]  ;;  %v905_v47 = vld [vmem:[%s4502_s7 + $0x12e8] sm:$0xff] }
  0xdc   : > { %v904_v53 = vld [vmem:[%s4502_s7 + $0x12e0] sm:$0xff]  ;;  %v906_v55 = vld [vmem:[%s4502_s7 + $0x12f0] sm:$0xff]  ;;  %v397_v56 = vld [vmem:[%s4502_s7 + $0x308] sm:$0xff] }
  0xdd   : > { %2852 = vmatpush1.bf16.msra.mxu1 %v2851_v4  ;;  %v381_v4 = vld [vmem:[%s4502_s7 + $0x288] sm:$0xff]  ;;  %v399_v57 = vld [vmem:[%s4502_s7 + $0x318] sm:$0xff]  ;;  %v396_v62 = vld [vmem:[%s4502_s7 + $0x300] sm:$0xff] }
  0xde   : > { %3364 = vmatpush1.bf16.msra.mxu0 %v3363_v5  ;;  %2854 = vmatprep.subr.bf16.mxu1 %v2853_v6  ;;  %v383_v5 = vld [vmem:[%s4502_s7 + $0x298] sm:$0xff]  ;;  %v893_v6 = vld [vmem:[%s4502_s7 + $0x1288] sm:$0xff]  ;;  %v398_v0 = vld [vmem:[%s4502_s7 + $0x310] sm:$0xff] }
  0xdf   : > { %3366 = vmatprep.subr.bf16.mxu0 %v3365_v10  ;;  %v2873_v10 = vpack.c.bf16 %v383_v5, %v381_v4  ;;  %v3385_v15 = vpack.c.bf16 %v895_v7, %v893_v6  ;;  %v908_v1 = vld [vmem:[%s4502_s7 + $0x1300] sm:$0xff]  ;;  %v910_v3 = vld [vmem:[%s4502_s7 + $0x1310] sm:$0xff]  ;;  %v401_v4 = vld [vmem:[%s4502_s7 + $0x328] sm:$0xff] }
  0xe0   : > { %v403_v5 = vld [vmem:[%s4502_s7 + $0x338] sm:$0xff]  ;;  %v913_v6 = vld [vmem:[%s4502_s7 + $0x1328] sm:$0xff]  ;;  %v912_v14 = vld [vmem:[%s4502_s7 + $0x1320] sm:$0xff] }
  0xe1   : > { %2856 = vmatpush1.bf16.msra.mxu1 %v2855_v19  ;;  %v897_v19 = vld [vmem:[%s4502_s7 + $0x12a8] sm:$0xff]  ;;  %v915_v7 = vld [vmem:[%s4502_s7 + $0x1338] sm:$0xff]  ;;  %v914_v16 = vld [vmem:[%s4502_s7 + $0x1330] sm:$0xff] }
  0xe2   : > { %3368 = vmatpush1.bf16.msra.mxu0 %v3367_v20  ;;  %2858 = vmatprep.subr.bf16.mxu1 %v2857_v21  ;;  %v899_v20 = vld [vmem:[%s4502_s7 + $0x12b8] sm:$0xff]  ;;  %v2875_v21 = vpack.c.bf16 %v382_v13, %v380_v11  ;;  %v400_v11 = vld [vmem:[%s4502_s7 + $0x320] sm:$0xff]  ;;  %v402_v13 = vld [vmem:[%s4502_s7 + $0x330] sm:$0xff] }
  0xe3   : > { %3370 = vmatprep.subr.bf16.mxu0 %v3369_v25  ;;  %v386_v25 = vld [vmem:[%s4502_s7 + $0x2b0] sm:$0xff]  ;;  %v3389_v28 = vpack.c.bf16 %v899_v20, %v897_v19  ;;  %v405_v17 = vld [vmem:[%s4502_s7 + $0x348] sm:$0xff]  ;;  %v407_v18 = vld [vmem:[%s4502_s7 + $0x358] sm:$0xff] }
  0xe4   : > { %1531 = vmatmul.mubr.f32.vlgmr.msra.gmra.mrb[0].mxu1 %v4633_v26  ;;  %v374_v26 = vld [vmem:[%s4502_s7 + $0x250] sm:$0xff]  ;;  %v917_v19 = vld [vmem:[%s4502_s7 + $0x1348] sm:$0xff]  ;;  %v919_v20 = vld [vmem:[%s4502_s7 + $0x1358] sm:$0xff] }
  0xe5   : > { %2860 = vmatpush1.bf16.msra.mxu1 %v2859_v35  ;;  %2099 = vmatmul.mubr.f32.vlgmr.msra.gmra.mrb[0].mxu0 %v4640_v29  ;;  %v889_v29 = vld [vmem:[%s4502_s7 + $0x1268] sm:$0xff]  ;;  %v2867_v59 = vpack.c.bf16 %v374_v26, %v372_v52  ;;  %v392_v52 = vld [vmem:[%s4502_s7 + $0x2e0] sm:$0xff]  ;;  %v394_v26 = vld [vmem:[%s4502_s7 + $0x2f0] sm:$0xff] }
  0xe6   : > { %3372 = vmatpush1.bf16.msra.mxu0 %v3371_v36  ;;  %2862 = vmatprep.subr.bf16.mxu1 %v2861_v37  ;;  %v3381_v2 = vpack.c.bf16 %v891_v58, %v889_v29  ;;  %v901_v35 = vld [vmem:[%s4502_s7 + $0x12c8] sm:$0xff]  ;;  %v903_v36 = vld [vmem:[%s4502_s7 + $0x12d8] sm:$0xff]  ;;  %v2879_v37 = vpack.c.bf16 %v386_v25, %v384_v24  ;;  %v404_v24 = vld [vmem:[%s4502_s7 + $0x340] sm:$0xff] }
  0xe7   : > { %3374 = vmatprep.subr.bf16.mxu0 %v3373_v41  ;;  %1601 = vmatprep.mubr.f32.mxu1 %v1316_v45  ;;  %v390_v41 = vld [vmem:[%s4502_s7 + $0x2d0] sm:$0xff]  ;;  %v3393_v43 = vpack.c.bf16 %v903_v36, %v901_v35  ;;  %v393_v45 = vld [vmem:[%s4502_s7 + $0x2e8] sm:$0xff]  ;;  %v911_v58 = vld [vmem:[%s4502_s7 + $0x1318] sm:$0xff] }
  0xe8   : > { %2169 = vmatprep.mubr.f32.mxu0 %v1384_v48  ;;  %v907_v48 = vld [vmem:[%s4502_s7 + $0x12f8] sm:$0xff]  ;;  %v909_v29 = vld [vmem:[%s4502_s7 + $0x1308] sm:$0xff]  ;;  %v406_v25 = vld [vmem:[%s4502_s7 + $0x350] sm:$0xff] }
  0xe9   : > { %2864 = vmatpush1.bf16.msra.mxu1 %v2863_v49  ;;  %v2883_v49 = vpack.c.bf16 %v390_v41, %v388_v40  ;;  %v916_v27 = vld [vmem:[%s4502_s7 + $0x1340] sm:$0xff]  ;;  %v918_v30 = vld [vmem:[%s4502_s7 + $0x1350] sm:$0xff]  ;;  %v409_v32 = vld [vmem:[%s4502_s7 + $0x368] sm:$0xff] }
  0xea   : > { %3376 = vmatpush1.bf16.msra.mxu0 %v3375_v50  ;;  %2866 = vmatprep.subr.bf16.mxu1 %v2865_v51  ;;  %v3395_v50 = vpack.c.bf16 %v902_v44, %v900_v42  ;;  %v2885_v51 = vpack.c.bf16 %v395_v46, %v393_v45  ;;  %v411_v33 = vld [vmem:[%s4502_s7 + $0x378] sm:$0xff]  ;;  %v921_v35 = vld [vmem:[%s4502_s7 + $0x1368] sm:$0xff]  ;;  %v408_v40 = vld [vmem:[%s4502_s7 + $0x360] sm:$0xff] }
  0xeb   : > { %3378 = vmatprep.subr.bf16.mxu0 %v3377_v54  ;;  %v3397_v54 = vpack.c.bf16 %v907_v48, %v905_v47  ;;  %v923_v36 = vld [vmem:[%s4502_s7 + $0x1378] sm:$0xff]  ;;  %v410_v41 = vld [vmem:[%s4502_s7 + $0x370] sm:$0xff]  ;;  %v920_v42 = vld [vmem:[%s4502_s7 + $0x1360] sm:$0xff] }
  0xec   : > { %v922_v44 = vld [vmem:[%s4502_s7 + $0x1370] sm:$0xff]  ;;  %v413_v45 = vld [vmem:[%s4502_s7 + $0x388] sm:$0xff]  ;;  %v415_v46 = vld [vmem:[%s4502_s7 + $0x398] sm:$0xff] }
  0xed   : > { %2868 = vmatpush1.bf16.msra.mxu1 %v2867_v59  ;;  %v2887_v59 = vpack.c.bf16 %v394_v26, %v392_v52  ;;  %v925_v47 = vld [vmem:[%s4502_s7 + $0x1388] sm:$0xff]  ;;  %v927_v48 = vld [vmem:[%s4502_s7 + $0x1398] sm:$0xff]  ;;  %v412_v52 = vld [vmem:[%s4502_s7 + $0x380] sm:$0xff] }
  0xee   : > { %3380 = vmatpush1.bf16.msra.mxu0 %v3379_v60  ;;  %2870 = vmatprep.subr.bf16.mxu1 %v2869_v61  ;;  %v3399_v60 = vpack.c.bf16 %v906_v55, %v904_v53  ;;  %v2889_v61 = vpack.c.bf16 %v399_v57, %v397_v56  ;;  %v414_v26 = vld [vmem:[%s4502_s7 + $0x390] sm:$0xff]  ;;  %v924_v53 = vld [vmem:[%s4502_s7 + $0x1380] sm:$0xff]  ;;  %v417_v56 = vld [vmem:[%s4502_s7 + $0x3a8] sm:$0xff] }
  0xef   : > { %3382 = vmatprep.subr.bf16.mxu0 %v3381_v2  ;;  %v3401_v2 = vpack.c.bf16 %v911_v58, %v909_v29  ;;  %v926_v55 = vld [vmem:[%s4502_s7 + $0x1390] sm:$0xff]  ;;  %v419_v57 = vld [vmem:[%s4502_s7 + $0x3b8] sm:$0xff]  ;;  %v929_v29 = vld [vmem:[%s4502_s7 + $0x13a8] sm:$0xff] }
  0xf0   : > { %v931_v58 = vld [vmem:[%s4502_s7 + $0x13b8] sm:$0xff] }
  0xf1   : > { %2872 = vmatpush1.bf16.msra.mxu1 %v2871_v8  ;;  %v2891_v8 = vpack.c.bf16 %v398_v0, %v396_v62  ;;  %v416_v62 = vld [vmem:[%s4502_s7 + $0x3a0] sm:$0xff]  ;;  %v418_v0 = vld [vmem:[%s4502_s7 + $0x3b0] sm:$0xff] }
  0xf2   : > { %3384 = vmatpush1.bf16.msra.mxu0 %v3383_v9  ;;  %2874 = vmatprep.subr.bf16.mxu1 %v2873_v10  ;;  %v3403_v9 = vpack.c.bf16 %v910_v3, %v908_v1  ;;  %v2893_v10 = vpack.c.bf16 %v403_v5, %v401_v4  ;;  %v928_v1 = vld [vmem:[%s4502_s7 + $0x13a0] sm:$0xff]  ;;  %v930_v3 = vld [vmem:[%s4502_s7 + $0x13b0] sm:$0xff]  ;;  %v421_v4 = vld [vmem:[%s4502_s7 + $0x3c8] sm:$0xff] }
  0xf3   : > { %3386 = vmatprep.subr.bf16.mxu0 %v3385_v15  ;;  %v3405_v15 = vpack.c.bf16 %v915_v7, %v913_v6  ;;  %v423_v5 = vld [vmem:[%s4502_s7 + $0x3d8] sm:$0xff]  ;;  %v933_v6 = vld [vmem:[%s4502_s7 + $0x13c8] sm:$0xff] }
  0xf4   : > { %v935_v7 = vld [vmem:[%s4502_s7 + $0x13d8] sm:$0xff] }
  0xf5   : > { %2876 = vmatpush1.bf16.msra.mxu1 %v2875_v21  ;;  %v2895_v21 = vpack.c.bf16 %v402_v13, %v400_v11  ;;  %v420_v11 = vld [vmem:[%s4502_s7 + $0x3c0] sm:$0xff]  ;;  %v422_v13 = vld [vmem:[%s4502_s7 + $0x3d0] sm:$0xff] }
  0xf6   : > { %3388 = vmatpush1.bf16.msra.mxu0 %v3387_v22  ;;  %2878 = vmatprep.subr.bf16.mxu1 %v2877_v23  ;;  %v3407_v22 = vpack.c.bf16 %v914_v16, %v912_v14  ;;  %v2897_v23 = vpack.c.bf16 %v407_v18, %v405_v17  ;;  %v932_v14 = vld [vmem:[%s4502_s7 + $0x13c0] sm:$0xff]  ;;  %v934_v16 = vld [vmem:[%s4502_s7 + $0x13d0] sm:$0xff]  ;;  %v425_v17 = vld [vmem:[%s4502_s7 + $0x3e8] sm:$0xff] }
  0xf7   : > { %3390 = vmatprep.subr.bf16.mxu0 %v3389_v28  ;;  %v3409_v28 = vpack.c.bf16 %v919_v20, %v917_v19  ;;  %v427_v18 = vld [vmem:[%s4502_s7 + $0x3f8] sm:$0xff]  ;;  %v937_v19 = vld [vmem:[%s4502_s7 + $0x13e8] sm:$0xff] }
  0xf8   : > { %v939_v20 = vld [vmem:[%s4502_s7 + $0x13f8] sm:$0xff] }
  0xf9   : > { %2880 = vmatpush1.bf16.msra.mxu1 %v2879_v37  ;;  %v2899_v37 = vpack.c.bf16 %v406_v25, %v404_v24  ;;  %v424_v24 = vld [vmem:[%s4502_s7 + $0x3e0] sm:$0xff]  ;;  %v426_v25 = vld [vmem:[%s4502_s7 + $0x3f0] sm:$0xff] }
  0xfa   : > { %3392 = vmatpush1.bf16.msra.mxu0 %v3391_v38  ;;  %2882 = vmatprep.subr.bf16.mxu1 %v2881_v39  ;;  %v3411_v38 = vpack.c.bf16 %v918_v30, %v916_v27  ;;  %v2901_v39 = vpack.c.bf16 %v411_v33, %v409_v32  ;;  %v936_v27 = vld [vmem:[%s4502_s7 + $0x13e0] sm:$0xff]  ;;  %v938_v30 = vld [vmem:[%s4502_s7 + $0x13f0] sm:$0xff]  ;;  %v429_v32 = vld [vmem:[%s4502_s7 + $0x408] sm:$0xff] }
  0xfb   : > { %3394 = vmatprep.subr.bf16.mxu0 %v3393_v43  ;;  %v3413_v43 = vpack.c.bf16 %v923_v36, %v921_v35  ;;  %v431_v33 = vld [vmem:[%s4502_s7 + $0x418] sm:$0xff]  ;;  %v941_v35 = vld [vmem:[%s4502_s7 + $0x1408] sm:$0xff] }
  0xfc   : > { %v943_v36 = vld [vmem:[%s4502_s7 + $0x1418] sm:$0xff] }
  0xfd   : > { %2884 = vmatpush1.bf16.msra.mxu1 %v2883_v49  ;;  %v2903_v49 = vpack.c.bf16 %v410_v41, %v408_v40  ;;  %v428_v40 = vld [vmem:[%s4502_s7 + $0x400] sm:$0xff]  ;;  %v430_v41 = vld [vmem:[%s4502_s7 + $0x410] sm:$0xff] }
  0xfe   : > { %3396 = vmatpush1.bf16.msra.mxu0 %v3395_v50  ;;  %2886 = vmatprep.subr.bf16.mxu1 %v2885_v51  ;;  %v3415_v50 = vpack.c.bf16 %v922_v44, %v920_v42  ;;  %v2905_v51 = vpack.c.bf16 %v415_v46, %v413_v45  ;;  %v940_v42 = vld [vmem:[%s4502_s7 + $0x1400] sm:$0xff]  ;;  %v942_v44 = vld [vmem:[%s4502_s7 + $0x1410] sm:$0xff]  ;;  %v433_v45 = vld [vmem:[%s4502_s7 + $0x428] sm:$0xff] }
  0xff   : > { %3398 = vmatprep.subr.bf16.mxu0 %v3397_v54  ;;  %v3417_v54 = vpack.c.bf16 %v927_v48, %v925_v47  ;;  %v435_v46 = vld [vmem:[%s4502_s7 + $0x438] sm:$0xff]  ;;  %v945_v47 = vld [vmem:[%s4502_s7 + $0x1428] sm:$0xff] }
 0x100   : > { %v947_v48 = vld [vmem:[%s4502_s7 + $0x1438] sm:$0xff] }
 0x101   : > { %2888 = vmatpush1.bf16.msra.mxu1 %v2887_v59  ;;  %v2907_v59 = vpack.c.bf16 %v414_v26, %v412_v52  ;;  %v3435_v52 = vpack.c.bf16 %v942_v44, %v940_v42  ;;  %v2925_v26 = vpack.c.bf16 %v435_v46, %v433_v45  ;;  %v448_v44 = vld [vmem:[%s4502_s7 + $0x4a0] sm:$0xff]  ;;  %v450_v45 = vld [vmem:[%s4502_s7 + $0x4b0] sm:$0xff] }
 0x102   : > { %3400 = vmatpush1.bf16.msra.mxu0 %v3399_v60  ;;  %2890 = vmatprep.subr.bf16.mxu1 %v2889_v61  ;;  %v3419_v60 = vpack.c.bf16 %v926_v55, %v924_v53  ;;  %v2909_v61 = vpack.c.bf16 %v419_v57, %v417_v56  ;;  %v434_v53 = vld [vmem:[%s4502_s7 + $0x430] sm:$0xff]  ;;  %v3437_v57 = vpack.c.bf16 %v947_v48, %v945_v47  ;;  %v960_v46 = vld [vmem:[%s4502_s7 + $0x14a0] sm:$0xff] }
 0x103   : > { %3402 = vmatprep.subr.bf16.mxu0 %v3401_v2  ;;  %v3421_v2 = vpack.c.bf16 %v931_v58, %v929_v29  ;;  %v4841_v56 = vld [vmem:[%s4493_s30 + $0x28] sm:$0xff] }
 0x104   : > { %v946_v29 = vld [vmem:[%s4502_s7 + $0x1430] sm:$0xff]  ;;  %v437_v58 = vld [vmem:[%s4502_s7 + $0x448] sm:$0xff] }
 0x105   : > { %2892 = vmatpush1.bf16.msra.mxu1 %v2891_v8  ;;  %v2911_v8 = vpack.c.bf16 %v418_v0, %v416_v62  ;;  %v951_v62 = vld [vmem:[%s4502_s7 + $0x1458] sm:$0xff]  ;;  %v962_v48 = vld [vmem:[%s4502_s7 + $0x14b0] sm:$0xff] }
 0x106   : > { %3404 = vmatpush1.bf16.msra.mxu0 %v3403_v9  ;;  %2894 = vmatprep.subr.bf16.mxu1 %v2893_v10  ;;  %v3423_v9 = vpack.c.bf16 %v930_v3, %v928_v1  ;;  %v2913_v10 = vpack.c.bf16 %v423_v5, %v421_v4  ;;  %v436_v4 = vld [vmem:[%s4502_s7 + $0x440] sm:$0xff]  ;;  %v438_v5 = vld [vmem:[%s4502_s7 + $0x450] sm:$0xff] }
 0x107   : > { %3406 = vmatprep.subr.bf16.mxu0 %v3405_v15  ;;  %v3425_v15 = vpack.c.bf16 %v935_v7, %v933_v6  ;;  %v948_v6 = vld [vmem:[%s4502_s7 + $0x1440] sm:$0xff] }
 0x109   : > { %2896 = vmatpush1.bf16.msra.mxu1 %v2895_v21  ;;  %v2915_v21 = vpack.c.bf16 %v422_v13, %v420_v11  ;;  %v955_v11 = vld [vmem:[%s4502_s7 + $0x1478] sm:$0xff]  ;;  %v2931_v13 = vpack.c.bf16 %v438_v5, %v436_v4 }
 0x10a   : > { %3408 = vmatpush1.bf16.msra.mxu0 %v3407_v22  ;;  %2898 = vmatprep.subr.bf16.mxu1 %v2897_v23  ;;  %v3427_v22 = vpack.c.bf16 %v934_v16, %v932_v14  ;;  %v2917_v23 = vpack.c.bf16 %v427_v18, %v425_v17  ;;  %v440_v16 = vld [vmem:[%s4502_s7 + $0x460] sm:$0xff]  ;;  %v442_v17 = vld [vmem:[%s4502_s7 + $0x470] sm:$0xff] }
 0x10b   : > { %3410 = vmatprep.subr.bf16.mxu0 %v3409_v28  ;;  %v3429_v28 = vpack.c.bf16 %v939_v20, %v937_v19  ;;  %v952_v18 = vld [vmem:[%s4502_s7 + $0x1460] sm:$0xff]  ;;  %v954_v20 = vld [vmem:[%s4502_s7 + $0x1470] sm:$0xff] }
 0x10d   : > { %2900 = vmatpush1.bf16.msra.mxu1 %v2899_v37  ;;  %v2919_v37 = vpack.c.bf16 %v426_v25, %v424_v24  ;;  %v959_v24 = vld [vmem:[%s4502_s7 + $0x1498] sm:$0xff]  ;;  %v2935_v25 = vpack.c.bf16 %v442_v17, %v440_v16 }
 0x10e   : > { %3412 = vmatpush1.bf16.msra.mxu0 %v3411_v38  ;;  %2902 = vmatprep.subr.bf16.mxu1 %v2901_v39  ;;  %v3431_v38 = vpack.c.bf16 %v938_v30, %v936_v27  ;;  %v2921_v39 = vpack.c.bf16 %v431_v33, %v429_v32  ;;  %v3447_v27 = vpack.c.bf16 %v954_v20, %v952_v18  ;;  %v444_v30 = vld [vmem:[%s4502_s7 + $0x480] sm:$0xff]  ;;  %v446_v32 = vld [vmem:[%s4502_s7 + $0x490] sm:$0xff] }
 0x10f   : > { %3414 = vmatprep.subr.bf16.mxu0 %v3413_v43  ;;  %v3433_v43 = vpack.c.bf16 %v943_v36, %v941_v35  ;;  %v956_v33 = vld [vmem:[%s4502_s7 + $0x1480] sm:$0xff]  ;;  %v958_v36 = vld [vmem:[%s4502_s7 + $0x1490] sm:$0xff] }
 0x110   : > { %v3451_v42 = vpack.c.bf16 %v958_v36, %v956_v33  ;;  %v460_v18 = vld [vmem:[%s4502_s7 + $0x500] sm:$0xff] }
 0x111   : > { %2904 = vmatpush1.bf16.msra.mxu1 %v2903_v49  ;;  %v2923_v49 = vpack.c.bf16 %v430_v41, %v428_v40  ;;  %v963_v40 = vld [vmem:[%s4502_s7 + $0x14b8] sm:$0xff]  ;;  %v2939_v41 = vpack.c.bf16 %v446_v32, %v444_v30  ;;  %v972_v20 = vld [vmem:[%s4502_s7 + $0x1500] sm:$0xff] }
 0x112   : > { %3416 = vmatpush1.bf16.msra.mxu0 %v3415_v50  ;;  %2906 = vmatprep.subr.bf16.mxu1 %v2905_v51  ;;  %v432_v50 = vld [vmem:[%s4502_s7 + $0x420] sm:$0xff]  ;;  %v4832_v51 = vld [vmem:[%s4493_s30 + $0x8] sm:$0xff] }
 0x113   : > { %3418 = vmatprep.subr.bf16.mxu0 %v3417_v54  ;;  %v944_v54 = vld [vmem:[%s4502_s7 + $0x1420] sm:$0xff]  ;;  %v4838_v55 = vrot.slane %v4832_v51, %v4618_v12  ;;  %v2927_v1 = vpack.c.bf16 %v434_v53, %v432_v50  ;;  %v455_v50 = vld [vmem:[%s4502_s7 + $0x4d8] sm:$0xff]  ;;  %v2943_v53 = vpack.c.bf16 %v450_v45, %v448_v44 }
 0x114   : > { %v464_v33 = vld [vmem:[%s4502_s7 + $0x520] sm:$0xff] }
 0x115   : > { %2908 = vmatpush1.bf16.msra.mxu1 %v2907_v59  ;;  %v439_v59 = vld [vmem:[%s4502_s7 + $0x458] sm:$0xff]  ;;  %v1332_v0 = vcombine.high %v4838_v55, %v4838_v55  ;;  %v976_v36 = vld [vmem:[%s4502_s7 + $0x1520] sm:$0xff] }
 0x116   : > { %3420 = vmatpush1.bf16.msra.mxu0 %v3419_v60  ;;  %2910 = vmatprep.subr.bf16.mxu1 %v2909_v61  ;;  %v4848_v60 = vrot.slane %v4841_v56, %v4618_v12  ;;  %v949_v61 = vld [vmem:[%s4502_s7 + $0x1448] sm:$0xff]  ;;  %v2929_v3 = vpack.c.bf16 %v439_v59, %v437_v58  ;;  %v454_v58 = vld [vmem:[%s4502_s7 + $0x4d0] sm:$0xff]  ;;  %v964_v59 = vld [vmem:[%s4502_s7 + $0x14c0] sm:$0xff] }
 0x117   : > { %3422 = vmatprep.subr.bf16.mxu0 %v3421_v2  ;;  %v3441_v7 = vpack.c.bf16 %v951_v62, %v949_v61  ;;  %v966_v62 = vld [vmem:[%s4502_s7 + $0x14d0] sm:$0xff] }
 0x118   : > { %v1400_v2 = vcombine.high %v4848_v60, %v4848_v60  ;;  %v3459_v4 = vpack.c.bf16 %v966_v62, %v964_v59  ;;  %v472_v59 = vld [vmem:[%s4502_s7 + $0x560] sm:$0xff] }
 0x119   : > { %2912 = vmatpush1.bf16.msra.mxu1 %v2911_v8  ;;  %v950_v8 = vld [vmem:[%s4502_s7 + $0x1450] sm:$0xff]  ;;  %v984_v62 = vld [vmem:[%s4502_s7 + $0x1560] sm:$0xff] }
 0x11a   : > { %3424 = vmatpush1.bf16.msra.mxu0 %v3423_v9  ;;  %2914 = vmatprep.subr.bf16.mxu1 %v2913_v10  ;;  %v443_v9 = vld [vmem:[%s4502_s7 + $0x478] sm:$0xff]  ;;  %v953_v10 = vld [vmem:[%s4502_s7 + $0x1468] sm:$0xff]  ;;  %v3443_v14 = vpack.c.bf16 %v950_v8, %v948_v6  ;;  %v456_v6 = vld [vmem:[%s4502_s7 + $0x4e0] sm:$0xff] }
 0x11b   : > { %3426 = vmatprep.subr.bf16.mxu0 %v3425_v15  ;;  %v3445_v19 = vpack.c.bf16 %v955_v11, %v953_v10  ;;  %v968_v8 = vld [vmem:[%s4502_s7 + $0x14e0] sm:$0xff]  ;;  %v461_v10 = vld [vmem:[%s4502_s7 + $0x508] sm:$0xff]  ;;  %v463_v11 = vld [vmem:[%s4502_s7 + $0x518] sm:$0xff] }
 0x11c   : > { %v2953_v17 = vpack.c.bf16 %v463_v11, %v461_v10  ;;  %v990_v11 = vld [vmem:[%s4502_s7 + $0x1590] sm:$0xff] }
 0x11d   : > { %2916 = vmatpush1.bf16.msra.mxu1 %v2915_v21  ;;  %v445_v21 = vld [vmem:[%s4502_s7 + $0x488] sm:$0xff] }
 0x11e   : > { %3428 = vmatpush1.bf16.msra.mxu0 %v3427_v22  ;;  %2918 = vmatprep.subr.bf16.mxu1 %v2917_v23  ;;  %v447_v22 = vld [vmem:[%s4502_s7 + $0x498] sm:$0xff]  ;;  %v957_v23 = vld [vmem:[%s4502_s7 + $0x1488] sm:$0xff] }
 0x11f   : > { %3430 = vmatprep.subr.bf16.mxu0 %v3429_v28  ;;  %v2937_v28 = vpack.c.bf16 %v447_v22, %v445_v21  ;;  %v3449_v35 = vpack.c.bf16 %v959_v24, %v957_v23  ;;  %v974_v22 = vld [vmem:[%s4502_s7 + $0x1510] sm:$0xff]  ;;  %v465_v23 = vld [vmem:[%s4502_s7 + $0x528] sm:$0xff]  ;;  %v467_v24 = vld [vmem:[%s4502_s7 + $0x538] sm:$0xff] }
 0x120   : > { %v3467_v30 = vpack.c.bf16 %v974_v22, %v972_v20  ;;  %v2957_v32 = vpack.c.bf16 %v467_v24, %v465_v23  ;;  %v480_v20 = vld [vmem:[%s4502_s7 + $0x5a0] sm:$0xff]  ;;  %v994_v24 = vld [vmem:[%s4502_s7 + $0x15b0] sm:$0xff] }
 0x121   : > { %2920 = vmatpush1.bf16.msra.mxu1 %v2919_v37  ;;  %v449_v37 = vld [vmem:[%s4502_s7 + $0x4a8] sm:$0xff]  ;;  %v992_v22 = vld [vmem:[%s4502_s7 + $0x15a0] sm:$0xff] }
 0x122   : > { %3432 = vmatpush1.bf16.msra.mxu0 %v3431_v38  ;;  %2922 = vmatprep.subr.bf16.mxu1 %v2921_v39  ;;  %v451_v38 = vld [vmem:[%s4502_s7 + $0x4b8] sm:$0xff]  ;;  %v961_v39 = vld [vmem:[%s4502_s7 + $0x14a8] sm:$0xff] }
 0x123   : > { %3434 = vmatprep.subr.bf16.mxu0 %v3433_v43  ;;  %v2941_v43 = vpack.c.bf16 %v451_v38, %v449_v37  ;;  %v3453_v47 = vpack.c.bf16 %v963_v40, %v961_v39  ;;  %v978_v38 = vld [vmem:[%s4502_s7 + $0x1530] sm:$0xff]  ;;  %v469_v39 = vld [vmem:[%s4502_s7 + $0x548] sm:$0xff]  ;;  %v471_v40 = vld [vmem:[%s4502_s7 + $0x558] sm:$0xff] }
 0x124   : > { %1602 = vmatmul.mubr.f32.vlgmr.msra.gmra.mrb[0].mxu1 %v4689_v31  ;;  %v3439_v31 = vpack.c.bf16 %v946_v29, %v944_v54  ;;  %v3455_v54 = vpack.c.bf16 %v962_v48, %v960_v46  ;;  %v452_v29 = vld [vmem:[%s4502_s7 + $0x4c0] sm:$0xff]  ;;  %v3471_v44 = vpack.c.bf16 %v978_v38, %v976_v36  ;;  %v2961_v45 = vpack.c.bf16 %v471_v40, %v469_v39  ;;  %v998_v40 = vld [vmem:[%s4502_s7 + $0x15d0] sm:$0xff] }
 0x125   : > { %2924 = vmatpush1.bf16.msra.mxu1 %v2923_v49  ;;  %2170 = vmatmul.mubr.f32.vlgmr.msra.gmra.mrb[0].mxu0 %v4694_v34  ;;  %v441_v34 = vld [vmem:[%s4502_s7 + $0x468] sm:$0xff]  ;;  %v468_v46 = vld [vmem:[%s4502_s7 + $0x540] sm:$0xff] }
 0x126   : > { %3436 = vmatpush1.bf16.msra.mxu0 %v3435_v52  ;;  %2926 = vmatprep.subr.bf16.mxu1 %v2925_v26  ;;  %v2933_v15 = vpack.c.bf16 %v443_v9, %v441_v34  ;;  %v453_v49 = vld [vmem:[%s4502_s7 + $0x4c8] sm:$0xff]  ;;  %v967_v26 = vld [vmem:[%s4502_s7 + $0x14d8] sm:$0xff]  ;;  %v970_v9 = vld [vmem:[%s4502_s7 + $0x14f0] sm:$0xff] }
 0x127   : > { %3438 = vmatprep.subr.bf16.mxu0 %v3437_v57  ;;  %1672 = vmatprep.mubr.f32.mxu1 %v1332_v0  ;;  %v965_v52 = vld [vmem:[%s4502_s7 + $0x14c8] sm:$0xff]  ;;  %v2945_v57 = vpack.c.bf16 %v455_v50, %v453_v49  ;;  %v3463_v16 = vpack.c.bf16 %v970_v9, %v968_v8  ;;  %v980_v48 = vld [vmem:[%s4502_s7 + $0x1540] sm:$0xff]  ;;  %v982_v50 = vld [vmem:[%s4502_s7 + $0x1550] sm:$0xff] }
 0x128   : > { %2240 = vmatprep.mubr.f32.mxu0 %v1400_v2  ;;  %v3457_v61 = vpack.c.bf16 %v967_v26, %v965_v52  ;;  %v457_v0 = vld [vmem:[%s4502_s7 + $0x4e8] sm:$0xff]  ;;  %v475_v26 = vld [vmem:[%s4502_s7 + $0x578] sm:$0xff]  ;;  %v476_v8 = vld [vmem:[%s4502_s7 + $0x580] sm:$0xff] }
 0x129   : > { %2928 = vmatpush1.bf16.msra.mxu1 %v2927_v1  ;;  %v459_v1 = vld [vmem:[%s4502_s7 + $0x4f8] sm:$0xff]  ;;  %v969_v2 = vld [vmem:[%s4502_s7 + $0x14e8] sm:$0xff]  ;;  %v988_v9 = vld [vmem:[%s4502_s7 + $0x1580] sm:$0xff] }
 0x12a   : > { %3440 = vmatpush1.bf16.msra.mxu0 %v3439_v31  ;;  %2930 = vmatprep.subr.bf16.mxu1 %v2929_v3  ;;  %v971_v31 = vld [vmem:[%s4502_s7 + $0x14f8] sm:$0xff]  ;;  %v2947_v3 = vpack.c.bf16 %v454_v58, %v452_v29  ;;  %v2949_v5 = vpack.c.bf16 %v459_v1, %v457_v0  ;;  %v473_v52 = vld [vmem:[%s4502_s7 + $0x568] sm:$0xff]  ;;  %v3475_v29 = vpack.c.bf16 %v982_v50, %v980_v48  ;;  %v986_v1 = vld [vmem:[%s4502_s7 + $0x1570] sm:$0xff] }
 0x12b   : > { %3442 = vmatprep.subr.bf16.mxu0 %v3441_v7  ;;  %v458_v7 = vld [vmem:[%s4502_s7 + $0x4f0] sm:$0xff]  ;;  %v3461_v34 = vpack.c.bf16 %v971_v31, %v969_v2  ;;  %v2965_v58 = vpack.c.bf16 %v475_v26, %v473_v52  ;;  %v477_v2 = vld [vmem:[%s4502_s7 + $0x588] sm:$0xff]  ;;  %v479_v31 = vld [vmem:[%s4502_s7 + $0x598] sm:$0xff] }
 0x12c   : > { %v484_v36 = vld [vmem:[%s4502_s7 + $0x5c0] sm:$0xff]  ;;  %v1002_v26 = vld [vmem:[%s4502_s7 + $0x15f0] sm:$0xff] }
 0x12d   : > { %2932 = vmatpush1.bf16.msra.mxu1 %v2931_v13  ;;  %v973_v13 = vld [vmem:[%s4502_s7 + $0x1508] sm:$0xff]  ;;  %v996_v38 = vld [vmem:[%s4502_s7 + $0x15c0] sm:$0xff] }
 0x12e   : > { %3444 = vmatpush1.bf16.msra.mxu0 %v3443_v14  ;;  %2934 = vmatprep.subr.bf16.mxu1 %v2933_v15  ;;  %v975_v14 = vld [vmem:[%s4502_s7 + $0x1518] sm:$0xff]  ;;  %v2951_v15 = vpack.c.bf16 %v458_v7, %v456_v6  ;;  %v3479_v6 = vpack.c.bf16 %v986_v1, %v984_v62  ;;  %v2969_v7 = vpack.c.bf16 %v479_v31, %v477_v2  ;;  %v488_v48 = vld [vmem:[%s4502_s7 + $0x5e0] sm:$0xff]  ;;  %v494_v2 = vld [vmem:[%s4502_s7 + $0x610] sm:$0xff] }
 0x12f   : > { %3446 = vmatprep.subr.bf16.mxu0 %v3445_v19  ;;  %v462_v19 = vld [vmem:[%s4502_s7 + $0x510] sm:$0xff]  ;;  %v3465_v21 = vpack.c.bf16 %v975_v14, %v973_v13  ;;  %v481_v13 = vld [vmem:[%s4502_s7 + $0x5a8] sm:$0xff]  ;;  %v483_v14 = vld [vmem:[%s4502_s7 + $0x5b8] sm:$0xff] }
 0x130   : > { %v1000_v50 = vld [vmem:[%s4502_s7 + $0x15e0] sm:$0xff] }
 0x131   : > { %2936 = vmatpush1.bf16.msra.mxu1 %v2935_v25  ;;  %v977_v25 = vld [vmem:[%s4502_s7 + $0x1528] sm:$0xff]  ;;  %v3495_v62 = vpack.c.bf16 %v1002_v26, %v1000_v50  ;;  %v492_v1 = vld [vmem:[%s4502_s7 + $0x600] sm:$0xff] }
 0x132   : > { %3448 = vmatpush1.bf16.msra.mxu0 %v3447_v27  ;;  %2938 = vmatprep.subr.bf16.mxu1 %v2937_v28  ;;  %v979_v27 = vld [vmem:[%s4502_s7 + $0x1538] sm:$0xff]  ;;  %v2955_v28 = vpack.c.bf16 %v462_v19, %v460_v18  ;;  %v3483_v18 = vpack.c.bf16 %v990_v11, %v988_v9  ;;  %v2973_v19 = vpack.c.bf16 %v483_v14, %v481_v13  ;;  %v1004_v31 = vld [vmem:[%s4502_s7 + $0x1600] sm:$0xff]  ;;  %v498_v13 = vld [vmem:[%s4502_s7 + $0x630] sm:$0xff] }
 0x133   : > { %3450 = vmatprep.subr.bf16.mxu0 %v3449_v35  ;;  %v466_v35 = vld [vmem:[%s4502_s7 + $0x530] sm:$0xff]  ;;  %v3469_v37 = vpack.c.bf16 %v979_v27, %v977_v25  ;;  %v485_v25 = vld [vmem:[%s4502_s7 + $0x5c8] sm:$0xff]  ;;  %v487_v27 = vld [vmem:[%s4502_s7 + $0x5d8] sm:$0xff] }
 0x134   : > { %v496_v11 = vld [vmem:[%s4502_s7 + $0x620] sm:$0xff] }
 0x135   : > { %2940 = vmatpush1.bf16.msra.mxu1 %v2939_v41  ;;  %v981_v41 = vld [vmem:[%s4502_s7 + $0x1548] sm:$0xff]  ;;  %v1008_v14 = vld [vmem:[%s4502_s7 + $0x1620] sm:$0xff] }
 0x136   : > { %3452 = vmatpush1.bf16.msra.mxu0 %v3451_v42  ;;  %2942 = vmatprep.subr.bf16.mxu1 %v2941_v43  ;;  %v983_v42 = vld [vmem:[%s4502_s7 + $0x1558] sm:$0xff]  ;;  %v2959_v43 = vpack.c.bf16 %v466_v35, %v464_v33  ;;  %v3487_v33 = vpack.c.bf16 %v994_v24, %v992_v22  ;;  %v2977_v35 = vpack.c.bf16 %v487_v27, %v485_v25  ;;  %v500_v27 = vld [vmem:[%s4502_s7 + $0x640] sm:$0xff] }
 0x137   : > { %3454 = vmatprep.subr.bf16.mxu0 %v3453_v47  ;;  %v470_v47 = vld [vmem:[%s4502_s7 + $0x550] sm:$0xff]  ;;  %v3473_v49 = vpack.c.bf16 %v983_v42, %v981_v41  ;;  %v489_v41 = vld [vmem:[%s4502_s7 + $0x5e8] sm:$0xff]  ;;  %v491_v42 = vld [vmem:[%s4502_s7 + $0x5f8] sm:$0xff] }
 0x138   : > { %v508_v26 = vld [vmem:[%s4502_s7 + $0x680] sm:$0xff] }
 0x139   : > { %2944 = vmatpush1.bf16.msra.mxu1 %v2943_v53  ;;  %v985_v53 = vld [vmem:[%s4502_s7 + $0x1568] sm:$0xff] }
 0x13a   : > { %3456 = vmatpush1.bf16.msra.mxu0 %v3455_v54  ;;  %2946 = vmatprep.subr.bf16.mxu1 %v2945_v57  ;;  %v987_v54 = vld [vmem:[%s4502_s7 + $0x1578] sm:$0xff]  ;;  %v2963_v57 = vpack.c.bf16 %v470_v47, %v468_v46  ;;  %v3491_v46 = vpack.c.bf16 %v998_v40, %v996_v38  ;;  %v2981_v47 = vpack.c.bf16 %v491_v42, %v489_v41  ;;  %v504_v40 = vld [vmem:[%s4502_s7 + $0x660] sm:$0xff]  ;;  %v506_v41 = vld [vmem:[%s4502_s7 + $0x670] sm:$0xff] }
 0x13b   : > { %3458 = vmatprep.subr.bf16.mxu0 %v3457_v61  ;;  %v474_v61 = vld [vmem:[%s4502_s7 + $0x570] sm:$0xff]  ;;  %v3477_v0 = vpack.c.bf16 %v987_v54, %v985_v53  ;;  %v493_v53 = vld [vmem:[%s4502_s7 + $0x608] sm:$0xff]  ;;  %v495_v54 = vld [vmem:[%s4502_s7 + $0x618] sm:$0xff] }
 0x13c   : > { %v1016_v42 = vld [vmem:[%s4502_s7 + $0x1660] sm:$0xff] }
 0x13d   : > { %2948 = vmatpush1.bf16.msra.mxu1 %v2947_v3  ;;  %v989_v3 = vld [vmem:[%s4502_s7 + $0x1588] sm:$0xff] }
 0x13e   : > { %3460 = vmatpush1.bf16.msra.mxu0 %v3459_v4  ;;  %2950 = vmatprep.subr.bf16.mxu1 %v2949_v5  ;;  %v991_v4 = vld [vmem:[%s4502_s7 + $0x1598] sm:$0xff]  ;;  %v2967_v5 = vpack.c.bf16 %v474_v61, %v472_v59  ;;  %v1385_v59 = vcombine.high %v4841_v56, %v4841_v56 }
 0x13f   : > { %3462 = vmatprep.subr.bf16.mxu0 %v3461_v34  ;;  %v478_v34 = vld [vmem:[%s4502_s7 + $0x590] sm:$0xff]  ;;  %v3481_v10 = vpack.c.bf16 %v991_v4, %v989_v3  ;;  %v497_v4 = vld [vmem:[%s4502_s7 + $0x628] sm:$0xff] }
 0x140   : > { %v1006_v3 = vld [vmem:[%s4502_s7 + $0x1610] sm:$0xff] }
 0x141   : > { %2952 = vmatpush1.bf16.msra.mxu1 %v2951_v15  ;;  %v993_v15 = vld [vmem:[%s4502_s7 + $0x15a8] sm:$0xff]  ;;  %v3499_v9 = vpack.c.bf16 %v1006_v3, %v1004_v31  ;;  %v512_v31 = vld [vmem:[%s4502_s7 + $0x6a0] sm:$0xff] }
 0x142   : > { %3464 = vmatpush1.bf16.msra.mxu0 %v3463_v16  ;;  %2954 = vmatprep.subr.bf16.mxu1 %v2953_v17  ;;  %v995_v16 = vld [vmem:[%s4502_s7 + $0x15b8] sm:$0xff]  ;;  %v2971_v17 = vpack.c.bf16 %v478_v34, %v476_v8  ;;  %v4986_v8 = vrot.slane %v1385_v59, %v4618_v12  ;;  %v2987_v34 = vpack.c.bf16 %v494_v2, %v492_v1  ;;  %v1024_v3 = vld [vmem:[%s4502_s7 + $0x16a0] sm:$0xff] }
 0x143   : > { %3466 = vmatprep.subr.bf16.mxu0 %v3465_v21  ;;  %v482_v21 = vld [vmem:[%s4502_s7 + $0x5b0] sm:$0xff]  ;;  %v3485_v23 = vpack.c.bf16 %v995_v16, %v993_v15  ;;  %v515_v59 = vld [vmem:[%s4502_s7 + $0x6b8] sm:$0xff] }
 0x144   : > { %v1010_v16 = vld [vmem:[%s4502_s7 + $0x1630] sm:$0xff]  ;;  %v1401_v22 = vcombine.high %v4986_v8, %v4986_v8 }
 0x145   : > { %2956 = vmatpush1.bf16.msra.mxu1 %v2955_v28  ;;  %v997_v28 = vld [vmem:[%s4502_s7 + $0x15c8] sm:$0xff]  ;;  %v3503_v24 = vpack.c.bf16 %v1010_v16, %v1008_v14  ;;  %v516_v14 = vld [vmem:[%s4502_s7 + $0x6c0] sm:$0xff] }
 0x146   : > { %3468 = vmatpush1.bf16.msra.mxu0 %v3467_v30  ;;  %2958 = vmatprep.subr.bf16.mxu1 %v2957_v32  ;;  %v999_v30 = vld [vmem:[%s4502_s7 + $0x15d8] sm:$0xff]  ;;  %v2975_v32 = vpack.c.bf16 %v482_v21, %v480_v20  ;;  %v1013_v20 = vld [vmem:[%s4502_s7 + $0x1648] sm:$0xff]  ;;  %v1028_v16 = vld [vmem:[%s4502_s7 + $0x16c0] sm:$0xff] }
 0x147   : > { %3470 = vmatprep.subr.bf16.mxu0 %v3469_v37  ;;  %v486_v37 = vld [vmem:[%s4502_s7 + $0x5d0] sm:$0xff]  ;;  %v3489_v39 = vpack.c.bf16 %v999_v30, %v997_v28  ;;  %v1015_v21 = vld [vmem:[%s4502_s7 + $0x1658] sm:$0xff]  ;;  %v1012_v28 = vld [vmem:[%s4502_s7 + $0x1640] sm:$0xff] }
 0x148   : > { %v3505_v30 = vpack.c.bf16 %v1015_v21, %v1013_v20  ;;  %v523_v20 = vld [vmem:[%s4502_s7 + $0x6f8] sm:$0xff]  ;;  %v1033_v21 = vld [vmem:[%s4502_s7 + $0x16e8] sm:$0xff] }
 0x149   : > { %2960 = vmatpush1.bf16.msra.mxu1 %v2959_v43  ;;  %v1001_v43 = vld [vmem:[%s4502_s7 + $0x15e8] sm:$0xff] }
 0x14a   : > { %3472 = vmatpush1.bf16.msra.mxu0 %v3471_v44  ;;  %2962 = vmatprep.subr.bf16.mxu1 %v2961_v45  ;;  %v1003_v44 = vld [vmem:[%s4502_s7 + $0x15f8] sm:$0xff]  ;;  %v2979_v45 = vpack.c.bf16 %v486_v37, %v484_v36 }
 0x14b   : > { %3474 = vmatprep.subr.bf16.mxu0 %v3473_v49  ;;  %v490_v49 = vld [vmem:[%s4502_s7 + $0x5f0] sm:$0xff]  ;;  %v3493_v52 = vpack.c.bf16 %v1003_v44, %v1001_v43  ;;  %v1019_v36 = vld [vmem:[%s4502_s7 + $0x1678] sm:$0xff] }
 0x14c   : > { %v2983_v61 = vpack.c.bf16 %v490_v49, %v488_v48  ;;  %v1018_v44 = vld [vmem:[%s4502_s7 + $0x1670] sm:$0xff]  ;;  %v1023_v48 = vld [vmem:[%s4502_s7 + $0x1698] sm:$0xff]  ;;  %v2999_v49 = vpack.c.bf16 %v506_v41, %v504_v40  ;;  %v524_v40 = vld [vmem:[%s4502_s7 + $0x700] sm:$0xff] }
 0x14d   : > { %2964 = vmatpush1.bf16.msra.mxu1 %v2963_v57  ;;  %v1317_v57 = vcombine.high %v4832_v51, %v4832_v51  ;;  %v3511_v50 = vpack.c.bf16 %v1018_v44, %v1016_v42  ;;  %v526_v41 = vld [vmem:[%s4502_s7 + $0x710] sm:$0xff]  ;;  %v1036_v42 = vld [vmem:[%s4502_s7 + $0x1700] sm:$0xff] }
 0x14e   : > { %3476 = vmatpush1.bf16.msra.mxu0 %v3475_v29  ;;  %2966 = vmatprep.subr.bf16.mxu1 %v2965_v58  ;;  %v1005_v29 = vld [vmem:[%s4502_s7 + $0x1608] sm:$0xff]  ;;  %v1007_v58 = vld [vmem:[%s4502_s7 + $0x1618] sm:$0xff]  ;;  %v1038_v44 = vld [vmem:[%s4502_s7 + $0x1710] sm:$0xff] }
 0x14f   : > { %3478 = vmatprep.subr.bf16.mxu0 %v3477_v0  ;;  %v2985_v0 = vpack.c.bf16 %v495_v54, %v493_v53  ;;  %v3497_v51 = vpack.c.bf16 %v1007_v58, %v1005_v29  ;;  %v4981_v56 = vrot.slane %v1317_v57, %v4618_v12  ;;  %v510_v53 = vld [vmem:[%s4502_s7 + $0x690] sm:$0xff]  ;;  %v1020_v54 = vld [vmem:[%s4502_s7 + $0x1680] sm:$0xff]  ;;  %v513_v58 = vld [vmem:[%s4502_s7 + $0x6a8] sm:$0xff] }
 0x150   : > { %v1022_v29 = vld [vmem:[%s4502_s7 + $0x1690] sm:$0xff]  ;;  %v3005_v2 = vpack.c.bf16 %v515_v59, %v513_v58  ;;  %v533_v58 = vld [vmem:[%s4502_s7 + $0x748] sm:$0xff]  ;;  %v535_v59 = vld [vmem:[%s4502_s7 + $0x758] sm:$0xff] }
 0x151   : > { %2968 = vmatpush1.bf16.msra.mxu1 %v2967_v5  ;;  %v499_v5 = vld [vmem:[%s4502_s7 + $0x638] sm:$0xff]  ;;  %v3515_v1 = vpack.c.bf16 %v1022_v29, %v1020_v54  ;;  %v1040_v54 = vld [vmem:[%s4502_s7 + $0x1720] sm:$0xff]  ;;  %v1042_v29 = vld [vmem:[%s4502_s7 + $0x1730] sm:$0xff] }
 0x152   : > { %3480 = vmatpush1.bf16.msra.mxu0 %v3479_v6  ;;  %2970 = vmatprep.subr.bf16.mxu1 %v2969_v7  ;;  %v1009_v6 = vld [vmem:[%s4502_s7 + $0x1628] sm:$0xff]  ;;  %v1011_v7 = vld [vmem:[%s4502_s7 + $0x1638] sm:$0xff] }
 0x153   : > { %3482 = vmatprep.subr.bf16.mxu0 %v3481_v10  ;;  %v2989_v10 = vpack.c.bf16 %v499_v5, %v497_v4  ;;  %v3501_v15 = vpack.c.bf16 %v1011_v7, %v1009_v6  ;;  %v1026_v5 = vld [vmem:[%s4502_s7 + $0x16b0] sm:$0xff]  ;;  %v517_v6 = vld [vmem:[%s4502_s7 + $0x6c8] sm:$0xff]  ;;  %v519_v7 = vld [vmem:[%s4502_s7 + $0x6d8] sm:$0xff] }
 0x155   : > { %2972 = vmatpush1.bf16.msra.mxu1 %v2971_v17  ;;  %v501_v17 = vld [vmem:[%s4502_s7 + $0x648] sm:$0xff] }
 0x156   : > { %3484 = vmatpush1.bf16.msra.mxu0 %v3483_v18  ;;  %2974 = vmatprep.subr.bf16.mxu1 %v2973_v19  ;;  %v503_v18 = vld [vmem:[%s4502_s7 + $0x658] sm:$0xff]  ;;  %v1333_v19 = vcombine.high %v4981_v56, %v4981_v56 }
 0x157   : > { %3486 = vmatprep.subr.bf16.mxu0 %v3485_v23  ;;  %v2991_v23 = vpack.c.bf16 %v498_v13, %v496_v11  ;;  %v2993_v25 = vpack.c.bf16 %v503_v18, %v501_v17  ;;  %v3519_v11 = vpack.c.bf16 %v1026_v5, %v1024_v3  ;;  %v3009_v13 = vpack.c.bf16 %v519_v7, %v517_v6  ;;  %v1030_v18 = vld [vmem:[%s4502_s7 + $0x16d0] sm:$0xff]  ;;  %v1044_v3 = vld [vmem:[%s4502_s7 + $0x1740] sm:$0xff]  ;;  %v537_v6 = vld [vmem:[%s4502_s7 + $0x768] sm:$0xff] }
 0x158   : > { %v1046_v5 = vld [vmem:[%s4502_s7 + $0x1750] sm:$0xff]  ;;  %v539_v7 = vld [vmem:[%s4502_s7 + $0x778] sm:$0xff] }
 0x159   : > { %2976 = vmatpush1.bf16.msra.mxu1 %v2975_v32  ;;  %v1014_v32 = vld [vmem:[%s4502_s7 + $0x1650] sm:$0xff] }
 0x15a   : > { %3488 = vmatpush1.bf16.msra.mxu0 %v3487_v33  ;;  %2978 = vmatprep.subr.bf16.mxu1 %v2977_v35  ;;  %v505_v33 = vld [vmem:[%s4502_s7 + $0x668] sm:$0xff]  ;;  %v507_v35 = vld [vmem:[%s4502_s7 + $0x678] sm:$0xff]  ;;  %v3507_v38 = vpack.c.bf16 %v1014_v32, %v1012_v28  ;;  %v1032_v28 = vld [vmem:[%s4502_s7 + $0x16e0] sm:$0xff] }
 0x15b   : > { %3490 = vmatprep.subr.bf16.mxu0 %v3489_v39  ;;  %v2997_v39 = vpack.c.bf16 %v507_v35, %v505_v33  ;;  %v1034_v32 = vld [vmem:[%s4502_s7 + $0x16f0] sm:$0xff]  ;;  %v525_v33 = vld [vmem:[%s4502_s7 + $0x708] sm:$0xff]  ;;  %v527_v35 = vld [vmem:[%s4502_s7 + $0x718] sm:$0xff] }
 0x15d   : > { %2980 = vmatpush1.bf16.msra.mxu1 %v2979_v45  ;;  %v509_v45 = vld [vmem:[%s4502_s7 + $0x688] sm:$0xff] }
 0x15e   : > { %3492 = vmatpush1.bf16.msra.mxu0 %v3491_v46  ;;  %2982 = vmatprep.subr.bf16.mxu1 %v2981_v47  ;;  %v511_v46 = vld [vmem:[%s4502_s7 + $0x698] sm:$0xff]  ;;  %v1021_v47 = vld [vmem:[%s4502_s7 + $0x1688] sm:$0xff] }
 0x15f   : > { %3494 = vmatprep.subr.bf16.mxu0 %v3493_v52  ;;  %v3001_v52 = vpack.c.bf16 %v511_v46, %v509_v45  ;;  %v3513_v57 = vpack.c.bf16 %v1023_v48, %v1021_v47  ;;  %v529_v45 = vld [vmem:[%s4502_s7 + $0x728] sm:$0xff]  ;;  %v531_v46 = vld [vmem:[%s4502_s7 + $0x738] sm:$0xff] }
 0x160   : > { %v1041_v47 = vld [vmem:[%s4502_s7 + $0x1728] sm:$0xff]  ;;  %v1043_v48 = vld [vmem:[%s4502_s7 + $0x1738] sm:$0xff] }
 0x161   : > { %2984 = vmatpush1.bf16.msra.mxu1 %v2983_v61  ;;  %v1025_v61 = vld [vmem:[%s4502_s7 + $0x16a8] sm:$0xff] }
 0x162   : > { %3496 = vmatpush1.bf16.msra.mxu0 %v3495_v62  ;;  %2986 = vmatprep.subr.bf16.mxu1 %v2985_v0  ;;  %v1027_v62 = vld [vmem:[%s4502_s7 + $0x16b8] sm:$0xff]  ;;  %v3003_v0 = vpack.c.bf16 %v510_v53, %v508_v26  ;;  %v528_v26 = vld [vmem:[%s4502_s7 + $0x720] sm:$0xff]  ;;  %v530_v53 = vld [vmem:[%s4502_s7 + $0x730] sm:$0xff] }
 0x163   : > { %3498 = vmatprep.subr.bf16.mxu0 %v3497_v51  ;;  %v514_v51 = vld [vmem:[%s4502_s7 + $0x6b0] sm:$0xff]  ;;  %v3517_v4 = vpack.c.bf16 %v1027_v62, %v1025_v61  ;;  %v1045_v61 = vld [vmem:[%s4502_s7 + $0x1748] sm:$0xff]  ;;  %v1047_v62 = vld [vmem:[%s4502_s7 + $0x1758] sm:$0xff] }
 0x164   : > { %1673 = vmatmul.mubr.f32.vlgmr.msra.gmra.mrb[0].mxu1 %v4838_v55  ;;  %v502_v55 = vld [vmem:[%s4502_s7 + $0x650] sm:$0xff] }
 0x165   : > { %2988 = vmatpush1.bf16.msra.mxu1 %v2987_v34  ;;  %2241 = vmatmul.mubr.f32.vlgmr.msra.gmra.mrb[0].mxu0 %v4848_v60  ;;  %v1017_v60 = vld [vmem:[%s4502_s7 + $0x1668] sm:$0xff]  ;;  %v2995_v37 = vpack.c.bf16 %v502_v55, %v500_v27  ;;  %v520_v27 = vld [vmem:[%s4502_s7 + $0x6e0] sm:$0xff]  ;;  %v522_v55 = vld [vmem:[%s4502_s7 + $0x6f0] sm:$0xff] }
 0x166   : > { %3500 = vmatpush1.bf16.msra.mxu0 %v3499_v9  ;;  %2990 = vmatprep.subr.bf16.mxu1 %v2989_v10  ;;  %v3509_v43 = vpack.c.bf16 %v1019_v36, %v1017_v60  ;;  %v1029_v34 = vld [vmem:[%s4502_s7 + $0x16c8] sm:$0xff]  ;;  %v1031_v9 = vld [vmem:[%s4502_s7 + $0x16d8] sm:$0xff]  ;;  %v3007_v10 = vpack.c.bf16 %v514_v51, %v512_v31  ;;  %v532_v31 = vld [vmem:[%s4502_s7 + $0x740] sm:$0xff] }
 0x167   : > { %3502 = vmatprep.subr.bf16.mxu0 %v3501_v15  ;;  %1743 = vmatprep.mubr.f32.mxu1 %v1333_v19  ;;  %v518_v15 = vld [vmem:[%s4502_s7 + $0x6d0] sm:$0xff]  ;;  %v3521_v17 = vpack.c.bf16 %v1031_v9, %v1029_v34  ;;  %v521_v19 = vld [vmem:[%s4502_s7 + $0x6e8] sm:$0xff]  ;;  %v1039_v36 = vld [vmem:[%s4502_s7 + $0x1718] sm:$0xff] }
 0x168   : > { %2311 = vmatprep.mubr.f32.mxu0 %v1401_v22  ;;  %v1035_v22 = vld [vmem:[%s4502_s7 + $0x16f8] sm:$0xff]  ;;  %v1037_v60 = vld [vmem:[%s4502_s7 + $0x1708] sm:$0xff]  ;;  %v534_v51 = vld [vmem:[%s4502_s7 + $0x750] sm:$0xff] }
 0x169   : > { %2992 = vmatpush1.bf16.msra.mxu1 %v2991_v23  ;;  %v3011_v23 = vpack.c.bf16 %v518_v15, %v516_v14  ;;  %v1049_v34 = vld [vmem:[%s4502_s7 + $0x1768] sm:$0xff]  ;;  %v1051_v9 = vld [vmem:[%s4502_s7 + $0x1778] sm:$0xff]  ;;  %v536_v14 = vld [vmem:[%s4502_s7 + $0x760] sm:$0xff] }
 0x16a   : > { %3504 = vmatpush1.bf16.msra.mxu0 %v3503_v24  ;;  %2994 = vmatprep.subr.bf16.mxu1 %v2993_v25  ;;  %v3523_v24 = vpack.c.bf16 %v1030_v18, %v1028_v16  ;;  %v3013_v25 = vpack.c.bf16 %v523_v20, %v521_v19  ;;  %v538_v15 = vld [vmem:[%s4502_s7 + $0x770] sm:$0xff]  ;;  %v1048_v16 = vld [vmem:[%s4502_s7 + $0x1760] sm:$0xff]  ;;  %v541_v19 = vld [vmem:[%s4502_s7 + $0x788] sm:$0xff] }
 0x16b   : > { %3506 = vmatprep.subr.bf16.mxu0 %v3505_v30  ;;  %v3525_v30 = vpack.c.bf16 %v1035_v22, %v1033_v21  ;;  %v1050_v18 = vld [vmem:[%s4502_s7 + $0x1770] sm:$0xff]  ;;  %v543_v20 = vld [vmem:[%s4502_s7 + $0x798] sm:$0xff]  ;;  %v1053_v21 = vld [vmem:[%s4502_s7 + $0x1788] sm:$0xff] }
 0x16c   : > { %v1055_v22 = vld [vmem:[%s4502_s7 + $0x1798] sm:$0xff] }
 0x16d   : > { %2996 = vmatpush1.bf16.msra.mxu1 %v2995_v37  ;;  %v3015_v37 = vpack.c.bf16 %v522_v55, %v520_v27  ;;  %v540_v27 = vld [vmem:[%s4502_s7 + $0x780] sm:$0xff]  ;;  %v542_v55 = vld [vmem:[%s4502_s7 + $0x790] sm:$0xff] }
 0x16e   : > { %3508 = vmatpush1.bf16.msra.mxu0 %v3507_v38  ;;  %2998 = vmatprep.subr.bf16.mxu1 %v2997_v39  ;;  %v3527_v38 = vpack.c.bf16 %v1034_v32, %v1032_v28  ;;  %v3017_v39 = vpack.c.bf16 %v527_v35, %v525_v33  ;;  %v1052_v28 = vld [vmem:[%s4502_s7 + $0x1780] sm:$0xff]  ;;  %v1054_v32 = vld [vmem:[%s4502_s7 + $0x1790] sm:$0xff]  ;;  %v545_v33 = vld [vmem:[%s4502_s7 + $0x7a8] sm:$0xff] }
 0x16f   : > { %3510 = vmatprep.subr.bf16.mxu0 %v3509_v43  ;;  %v3529_v43 = vpack.c.bf16 %v1039_v36, %v1037_v60  ;;  %v547_v35 = vld [vmem:[%s4502_s7 + $0x7b8] sm:$0xff]  ;;  %v1057_v60 = vld [vmem:[%s4502_s7 + $0x17a8] sm:$0xff] }
 0x170   : > { %v1059_v36 = vld [vmem:[%s4502_s7 + $0x17b8] sm:$0xff] }
 0x171   : > { %3000 = vmatpush1.bf16.msra.mxu1 %v2999_v49  ;;  %v3019_v49 = vpack.c.bf16 %v526_v41, %v524_v40  ;;  %v544_v40 = vld [vmem:[%s4502_s7 + $0x7a0] sm:$0xff]  ;;  %v546_v41 = vld [vmem:[%s4502_s7 + $0x7b0] sm:$0xff] }
 0x172   : > { %3512 = vmatpush1.bf16.msra.mxu0 %v3511_v50  ;;  %3002 = vmatprep.subr.bf16.mxu1 %v3001_v52  ;;  %v3531_v50 = vpack.c.bf16 %v1038_v44, %v1036_v42  ;;  %v3021_v52 = vpack.c.bf16 %v531_v46, %v529_v45  ;;  %v1056_v42 = vld [vmem:[%s4502_s7 + $0x17a0] sm:$0xff]  ;;  %v1058_v44 = vld [vmem:[%s4502_s7 + $0x17b0] sm:$0xff]  ;;  %v549_v45 = vld [vmem:[%s4502_s7 + $0x7c8] sm:$0xff] }
 0x173   : > { %3514 = vmatprep.subr.bf16.mxu0 %v3513_v57  ;;  %v3533_v57 = vpack.c.bf16 %v1043_v48, %v1041_v47  ;;  %v551_v46 = vld [vmem:[%s4502_s7 + $0x7d8] sm:$0xff]  ;;  %v1061_v47 = vld [vmem:[%s4502_s7 + $0x17c8] sm:$0xff] }
 0x174   : > { %v1063_v48 = vld [vmem:[%s4502_s7 + $0x17d8] sm:$0xff] }
 0x175   : > { %3004 = vmatpush1.bf16.msra.mxu1 %v3003_v0  ;;  %v3023_v0 = vpack.c.bf16 %v530_v53, %v528_v26  ;;  %v548_v26 = vld [vmem:[%s4502_s7 + $0x7c0] sm:$0xff]  ;;  %v550_v53 = vld [vmem:[%s4502_s7 + $0x7d0] sm:$0xff] }
 0x176   : > { %3516 = vmatpush1.bf16.msra.mxu0 %v3515_v1  ;;  %3006 = vmatprep.subr.bf16.mxu1 %v3005_v2  ;;  %v3535_v1 = vpack.c.bf16 %v1042_v29, %v1040_v54  ;;  %v3025_v2 = vpack.c.bf16 %v535_v59, %v533_v58  ;;  %v1060_v54 = vld [vmem:[%s4502_s7 + $0x17c0] sm:$0xff]  ;;  %v1062_v29 = vld [vmem:[%s4502_s7 + $0x17d0] sm:$0xff]  ;;  %v553_v58 = vld [vmem:[%s4502_s7 + $0x7e8] sm:$0xff] }
 0x177   : > { %3518 = vmatprep.subr.bf16.mxu0 %v3517_v4  ;;  %v3537_v4 = vpack.c.bf16 %v1047_v62, %v1045_v61  ;;  %v555_v59 = vld [vmem:[%s4502_s7 + $0x7f8] sm:$0xff]  ;;  %v1065_v61 = vld [vmem:[%s4502_s7 + $0x17e8] sm:$0xff] }
 0x178   : > { %v1067_v62 = vld [vmem:[%s4502_s7 + $0x17f8] sm:$0xff] }
 0x179   : > { %3008 = vmatpush1.bf16.msra.mxu1 %v3007_v10  ;;  %v3027_v10 = vpack.c.bf16 %v534_v51, %v532_v31  ;;  %v552_v31 = vld [vmem:[%s4502_s7 + $0x7e0] sm:$0xff]  ;;  %v554_v51 = vld [vmem:[%s4502_s7 + $0x7f0] sm:$0xff] }
 0x17a   : > { %3520 = vmatpush1.bf16.msra.mxu0 %v3519_v11  ;;  %3010 = vmatprep.subr.bf16.mxu1 %v3009_v13  ;;  %v3539_v11 = vpack.c.bf16 %v1046_v5, %v1044_v3  ;;  %v3029_v13 = vpack.c.bf16 %v539_v7, %v537_v6  ;;  %v1064_v3 = vld [vmem:[%s4502_s7 + $0x17e0] sm:$0xff]  ;;  %v1066_v5 = vld [vmem:[%s4502_s7 + $0x17f0] sm:$0xff]  ;;  %v557_v6 = vld [vmem:[%s4502_s7 + $0x808] sm:$0xff] }
 0x17b   : > { %3522 = vmatprep.subr.bf16.mxu0 %v3521_v17  ;;  %v3541_v17 = vpack.c.bf16 %v1051_v9, %v1049_v34  ;;  %v559_v7 = vld [vmem:[%s4502_s7 + $0x818] sm:$0xff]  ;;  %v1069_v34 = vld [vmem:[%s4502_s7 + $0x1808] sm:$0xff] }
 0x17c   : > { %v1071_v9 = vld [vmem:[%s4502_s7 + $0x1818] sm:$0xff] }
 0x17d   : > { %3012 = vmatpush1.bf16.msra.mxu1 %v3011_v23  ;;  %v3031_v23 = vpack.c.bf16 %v538_v15, %v536_v14  ;;  %v3559_v14 = vpack.c.bf16 %v1066_v5, %v1064_v3  ;;  %v3049_v15 = vpack.c.bf16 %v559_v7, %v557_v6  ;;  %v572_v5 = vld [vmem:[%s4502_s7 + $0x880] sm:$0xff]  ;;  %v574_v6 = vld [vmem:[%s4502_s7 + $0x890] sm:$0xff] }
 0x17e   : > { %3524 = vmatpush1.bf16.msra.mxu0 %v3523_v24  ;;  %3014 = vmatprep.subr.bf16.mxu1 %v3013_v25  ;;  %v3543_v24 = vpack.c.bf16 %v1050_v18, %v1048_v16  ;;  %v3033_v25 = vpack.c.bf16 %v543_v20, %v541_v19  ;;  %v556_v16 = vld [vmem:[%s4502_s7 + $0x800] sm:$0xff]  ;;  %v3561_v19 = vpack.c.bf16 %v1071_v9, %v1069_v34  ;;  %v1070_v20 = vld [vmem:[%s4502_s7 + $0x1810] sm:$0xff] }
 0x17f   : > { %3526 = vmatprep.subr.bf16.mxu0 %v3525_v30  ;;  %v3545_v30 = vpack.c.bf16 %v1055_v22, %v1053_v21  ;;  %v1068_v18 = vld [vmem:[%s4502_s7 + $0x1800] sm:$0xff]  ;;  %v561_v21 = vld [vmem:[%s4502_s7 + $0x828] sm:$0xff]  ;;  %v563_v22 = vld [vmem:[%s4502_s7 + $0x838] sm:$0xff] }
 0x180   : > { %v1084_v7 = vld [vmem:[%s4502_s7 + $0x1880] sm:$0xff]  ;;  %v1086_v9 = vld [vmem:[%s4502_s7 + $0x1890] sm:$0xff] }
 0x181   : > { %3016 = vmatpush1.bf16.msra.mxu1 %v3015_v37  ;;  %v3035_v37 = vpack.c.bf16 %v542_v55, %v540_v27 }
 0x182   : > { %3528 = vmatpush1.bf16.msra.mxu0 %v3527_v38  ;;  %3018 = vmatprep.subr.bf16.mxu1 %v3017_v39  ;;  %v3547_v38 = vpack.c.bf16 %v1054_v32, %v1052_v28  ;;  %v3037_v39 = vpack.c.bf16 %v547_v35, %v545_v33  ;;  %v3563_v28 = vpack.c.bf16 %v1070_v20, %v1068_v18  ;;  %v560_v32 = vld [vmem:[%s4502_s7 + $0x820] sm:$0xff]  ;;  %v562_v33 = vld [vmem:[%s4502_s7 + $0x830] sm:$0xff] }
 0x183   : > { %3530 = vmatprep.subr.bf16.mxu0 %v3529_v43  ;;  %v3549_v43 = vpack.c.bf16 %v1059_v36, %v1057_v60  ;;  %v1072_v35 = vld [vmem:[%s4502_s7 + $0x1820] sm:$0xff]  ;;  %v1074_v36 = vld [vmem:[%s4502_s7 + $0x1830] sm:$0xff]  ;;  %v3579_v18 = vpack.c.bf16 %v1086_v9, %v1084_v7 }
 0x184   : > { %v576_v20 = vld [vmem:[%s4502_s7 + $0x8a0] sm:$0xff] }
 0x185   : > { %3020 = vmatpush1.bf16.msra.mxu1 %v3019_v49  ;;  %v3039_v49 = vpack.c.bf16 %v546_v41, %v544_v40  ;;  %v1077_v40 = vld [vmem:[%s4502_s7 + $0x1848] sm:$0xff]  ;;  %v1079_v41 = vld [vmem:[%s4502_s7 + $0x1858] sm:$0xff]  ;;  %v592_v7 = vld [vmem:[%s4502_s7 + $0x920] sm:$0xff] }
 0x186   : > { %3532 = vmatpush1.bf16.msra.mxu0 %v3531_v50  ;;  %3022 = vmatprep.subr.bf16.mxu1 %v3021_v52  ;;  %v3551_v50 = vpack.c.bf16 %v1058_v44, %v1056_v42  ;;  %v3041_v52 = vpack.c.bf16 %v551_v46, %v549_v45  ;;  %v3567_v44 = vpack.c.bf16 %v1074_v36, %v1072_v35  ;;  %v564_v46 = vld [vmem:[%s4502_s7 + $0x840] sm:$0xff] }
 0x187   : > { %3534 = vmatprep.subr.bf16.mxu0 %v3533_v57  ;;  %v3553_v57 = vpack.c.bf16 %v1063_v48, %v1061_v47  ;;  %v1076_v47 = vld [vmem:[%s4502_s7 + $0x1840] sm:$0xff]  ;;  %v3569_v48 = vpack.c.bf16 %v1079_v41, %v1077_v40  ;;  %v1094_v40 = vld [vmem:[%s4502_s7 + $0x18d0] sm:$0xff]  ;;  %v585_v41 = vld [vmem:[%s4502_s7 + $0x8e8] sm:$0xff] }
 0x188   : > { %v580_v36 = vld [vmem:[%s4502_s7 + $0x8c0] sm:$0xff] }
 0x189   : > { %3024 = vmatpush1.bf16.msra.mxu1 %v3023_v0  ;;  %v3043_v0 = vpack.c.bf16 %v550_v53, %v548_v26  ;;  %v1083_v26 = vld [vmem:[%s4502_s7 + $0x1878] sm:$0xff]  ;;  %v1104_v9 = vld [vmem:[%s4502_s7 + $0x1920] sm:$0xff] }
 0x18a   : > { %3536 = vmatpush1.bf16.msra.mxu0 %v3535_v1  ;;  %3026 = vmatprep.subr.bf16.mxu1 %v3025_v2  ;;  %v3555_v1 = vpack.c.bf16 %v1062_v29, %v1060_v54  ;;  %v3045_v2 = vpack.c.bf16 %v555_v59, %v553_v58  ;;  %v568_v29 = vld [vmem:[%s4502_s7 + $0x860] sm:$0xff]  ;;  %v570_v58 = vld [vmem:[%s4502_s7 + $0x870] sm:$0xff] }
 0x18b   : > { %3538 = vmatprep.subr.bf16.mxu0 %v3537_v4  ;;  %v3557_v4 = vpack.c.bf16 %v1067_v62, %v1065_v61  ;;  %v1080_v59 = vld [vmem:[%s4502_s7 + $0x1860] sm:$0xff]  ;;  %v1082_v62 = vld [vmem:[%s4502_s7 + $0x1870] sm:$0xff] }
 0x18c   : > { %v3575_v3 = vpack.c.bf16 %v1082_v62, %v1080_v59  ;;  %v588_v59 = vld [vmem:[%s4502_s7 + $0x900] sm:$0xff] }
 0x18d   : > { %3028 = vmatpush1.bf16.msra.mxu1 %v3027_v10  ;;  %v5115_v10 = vld [vmem:[%s4493_s30 + $0x10] sm:$0xff]  ;;  %v1100_v62 = vld [vmem:[%s4502_s7 + $0x1900] sm:$0xff] }
 0x18e   : > { %3540 = vmatpush1.bf16.msra.mxu0 %v3539_v11  ;;  %3030 = vmatprep.subr.bf16.mxu1 %v3029_v13  ;;  %v3047_v11 = vpack.c.bf16 %v554_v51, %v552_v31  ;;  %v5118_v13 = vld [vmem:[%s4493_s30 + $0x30] sm:$0xff]  ;;  %v3063_v51 = vpack.c.bf16 %v570_v58, %v568_v29 }
 0x18f   : > { %3542 = vmatprep.subr.bf16.mxu0 %v3541_v17  ;;  %v558_v17 = vld [vmem:[%s4502_s7 + $0x810] sm:$0xff]  ;;  %v5134_v27 = vrot.slane %v5118_v13, %v4618_v12  ;;  %v1087_v31 = vld [vmem:[%s4502_s7 + $0x1898] sm:$0xff] }
 0x190   : > { %v3051_v55 = vpack.c.bf16 %v558_v17, %v556_v16  ;;  %v1091_v16 = vld [vmem:[%s4502_s7 + $0x18b8] sm:$0xff]  ;;  %v3067_v17 = vpack.c.bf16 %v574_v6, %v572_v5 }
 0x191   : > { %3032 = vmatpush1.bf16.msra.mxu1 %v3031_v23  ;;  %v5128_v23 = vrot.slane %v5115_v10, %v4618_v12  ;;  %v1417_v42 = vcombine.high %v5134_v27, %v5134_v27 }
 0x192   : > { %3544 = vmatpush1.bf16.msra.mxu0 %v3543_v24  ;;  %3034 = vmatprep.subr.bf16.mxu1 %v3033_v25  ;;  %v1073_v24 = vld [vmem:[%s4502_s7 + $0x1828] sm:$0xff]  ;;  %v1075_v25 = vld [vmem:[%s4502_s7 + $0x1838] sm:$0xff] }
 0x193   : > { %3546 = vmatprep.subr.bf16.mxu0 %v3545_v30  ;;  %v3053_v30 = vpack.c.bf16 %v563_v22, %v561_v21  ;;  %v3565_v60 = vpack.c.bf16 %v1075_v25, %v1073_v24  ;;  %v578_v21 = vld [vmem:[%s4502_s7 + $0x8b0] sm:$0xff]  ;;  %v1088_v22 = vld [vmem:[%s4502_s7 + $0x18a0] sm:$0xff] }
 0x194   : > { %v1090_v25 = vld [vmem:[%s4502_s7 + $0x18b0] sm:$0xff] }
 0x195   : > { %3036 = vmatpush1.bf16.msra.mxu1 %v3035_v37  ;;  %v565_v37 = vld [vmem:[%s4502_s7 + $0x848] sm:$0xff]  ;;  %v3583_v35 = vpack.c.bf16 %v1090_v25, %v1088_v22  ;;  %v596_v22 = vld [vmem:[%s4502_s7 + $0x940] sm:$0xff] }
 0x196   : > { %3548 = vmatpush1.bf16.msra.mxu0 %v3547_v38  ;;  %3038 = vmatprep.subr.bf16.mxu1 %v3037_v39  ;;  %v567_v38 = vld [vmem:[%s4502_s7 + $0x858] sm:$0xff]  ;;  %v1349_v39 = vcombine.high %v5128_v23, %v5128_v23  ;;  %v1108_v25 = vld [vmem:[%s4502_s7 + $0x1940] sm:$0xff] }
 0x197   : > { %3550 = vmatprep.subr.bf16.mxu0 %v3549_v43  ;;  %v3055_v43 = vpack.c.bf16 %v562_v33, %v560_v32  ;;  %v3057_v45 = vpack.c.bf16 %v567_v38, %v565_v37  ;;  %v1095_v32 = vld [vmem:[%s4502_s7 + $0x18d8] sm:$0xff]  ;;  %v3071_v33 = vpack.c.bf16 %v578_v21, %v576_v20  ;;  %v582_v37 = vld [vmem:[%s4502_s7 + $0x8d0] sm:$0xff]  ;;  %v1092_v38 = vld [vmem:[%s4502_s7 + $0x18c0] sm:$0xff] }
 0x199   : > { %3040 = vmatpush1.bf16.msra.mxu1 %v3039_v49  ;;  %v1078_v49 = vld [vmem:[%s4502_s7 + $0x1850] sm:$0xff] }
 0x19a   : > { %3552 = vmatpush1.bf16.msra.mxu0 %v3551_v50  ;;  %3042 = vmatprep.subr.bf16.mxu1 %v3041_v52  ;;  %v569_v50 = vld [vmem:[%s4502_s7 + $0x868] sm:$0xff]  ;;  %v571_v52 = vld [vmem:[%s4502_s7 + $0x878] sm:$0xff]  ;;  %v3571_v54 = vpack.c.bf16 %v1078_v49, %v1076_v47  ;;  %v584_v47 = vld [vmem:[%s4502_s7 + $0x8e0] sm:$0xff] }
 0x19b   : > { %3554 = vmatprep.subr.bf16.mxu0 %v3553_v57  ;;  %v3061_v57 = vpack.c.bf16 %v571_v52, %v569_v50  ;;  %v1096_v49 = vld [vmem:[%s4502_s7 + $0x18e0] sm:$0xff]  ;;  %v1098_v52 = vld [vmem:[%s4502_s7 + $0x18f0] sm:$0xff] }
 0x19c   : > { %v3591_v29 = vpack.c.bf16 %v1098_v52, %v1096_v49  ;;  %v604_v49 = vld [vmem:[%s4502_s7 + $0x980] sm:$0xff] }
 0x19d   : > { %3044 = vmatpush1.bf16.msra.mxu1 %v3043_v0  ;;  %v573_v0 = vld [vmem:[%s4502_s7 + $0x888] sm:$0xff]  ;;  %v1116_v52 = vld [vmem:[%s4502_s7 + $0x1980] sm:$0xff] }
 0x19e   : > { %3556 = vmatpush1.bf16.msra.mxu0 %v3555_v1  ;;  %3046 = vmatprep.subr.bf16.mxu1 %v3045_v2  ;;  %v575_v1 = vld [vmem:[%s4502_s7 + $0x898] sm:$0xff]  ;;  %v1085_v2 = vld [vmem:[%s4502_s7 + $0x1888] sm:$0xff] }
 0x19f   : > { %3558 = vmatprep.subr.bf16.mxu0 %v3557_v4  ;;  %v3065_v4 = vpack.c.bf16 %v575_v1, %v573_v0  ;;  %v3577_v34 = vpack.c.bf16 %v1087_v31, %v1085_v2  ;;  %v1102_v1 = vld [vmem:[%s4502_s7 + $0x1910] sm:$0xff]  ;;  %v593_v2 = vld [vmem:[%s4502_s7 + $0x928] sm:$0xff]  ;;  %v595_v31 = vld [vmem:[%s4502_s7 + $0x938] sm:$0xff] }
 0x1a0   : > { %v3595_v5 = vpack.c.bf16 %v1102_v1, %v1100_v62  ;;  %v3085_v6 = vpack.c.bf16 %v595_v31, %v593_v2  ;;  %v608_v62 = vld [vmem:[%s4502_s7 + $0x9a0] sm:$0xff]  ;;  %v1122_v31 = vld [vmem:[%s4502_s7 + $0x19b0] sm:$0xff] }
 0x1a1   : > { %3048 = vmatpush1.bf16.msra.mxu1 %v3047_v11  ;;  %v577_v11 = vld [vmem:[%s4502_s7 + $0x8a8] sm:$0xff]  ;;  %v1120_v1 = vld [vmem:[%s4502_s7 + $0x19a0] sm:$0xff] }
 0x1a2   : > { %3560 = vmatpush1.bf16.msra.mxu0 %v3559_v14  ;;  %3050 = vmatprep.subr.bf16.mxu1 %v3049_v15  ;;  %v579_v14 = vld [vmem:[%s4502_s7 + $0x8b8] sm:$0xff]  ;;  %v1089_v15 = vld [vmem:[%s4502_s7 + $0x18a8] sm:$0xff] }
 0x1a3   : > { %3562 = vmatprep.subr.bf16.mxu0 %v3561_v19  ;;  %v3069_v19 = vpack.c.bf16 %v579_v14, %v577_v11  ;;  %v3581_v24 = vpack.c.bf16 %v1091_v16, %v1089_v15  ;;  %v1106_v14 = vld [vmem:[%s4502_s7 + $0x1930] sm:$0xff]  ;;  %v597_v15 = vld [vmem:[%s4502_s7 + $0x948] sm:$0xff]  ;;  %v599_v16 = vld [vmem:[%s4502_s7 + $0x958] sm:$0xff] }
 0x1a4   : > { %1744 = vmatmul.mubr.f32.vlgmr.msra.gmra.mrb[0].mxu1 %v4981_v56  ;;  %v566_v56 = vld [vmem:[%s4502_s7 + $0x850] sm:$0xff]  ;;  %v3599_v20 = vpack.c.bf16 %v1106_v14, %v1104_v9  ;;  %v3089_v21 = vpack.c.bf16 %v599_v16, %v597_v15  ;;  %v612_v9 = vld [vmem:[%s4502_s7 + $0x9c0] sm:$0xff] }
 0x1a5   : > { %3052 = vmatpush1.bf16.msra.mxu1 %v3051_v55  ;;  %2312 = vmatmul.mubr.f32.vlgmr.msra.gmra.mrb[0].mxu0 %v4986_v8  ;;  %v1081_v8 = vld [vmem:[%s4502_s7 + $0x1868] sm:$0xff]  ;;  %v3059_v53 = vpack.c.bf16 %v566_v56, %v564_v46  ;;  %v3587_v46 = vpack.c.bf16 %v1094_v40, %v1092_v38  ;;  %v600_v38 = vld [vmem:[%s4502_s7 + $0x960] sm:$0xff]  ;;  %v1126_v16 = vld [vmem:[%s4502_s7 + $0x19d0] sm:$0xff] }
 0x1a6   : > { %3564 = vmatpush1.bf16.msra.mxu0 %v3563_v28  ;;  %3054 = vmatprep.subr.bf16.mxu1 %v3053_v30  ;;  %v3573_v61 = vpack.c.bf16 %v1083_v26, %v1081_v8  ;;  %v581_v55 = vld [vmem:[%s4502_s7 + $0x8c8] sm:$0xff]  ;;  %v583_v28 = vld [vmem:[%s4502_s7 + $0x8d8] sm:$0xff]  ;;  %v1112_v40 = vld [vmem:[%s4502_s7 + $0x1960] sm:$0xff] }
 0x1a7   : > { %3566 = vmatprep.subr.bf16.mxu0 %v3565_v60  ;;  %1814 = vmatprep.mubr.f32.mxu1 %v1349_v39  ;;  %v1093_v30 = vld [vmem:[%s4502_s7 + $0x18c8] sm:$0xff]  ;;  %v3073_v60 = vpack.c.bf16 %v583_v28, %v581_v55  ;;  %v591_v26 = vld [vmem:[%s4502_s7 + $0x918] sm:$0xff]  ;;  %v1110_v28 = vld [vmem:[%s4502_s7 + $0x1950] sm:$0xff] }
 0x1a8   : > { %2382 = vmatprep.mubr.f32.mxu0 %v1417_v42  ;;  %v3585_v39 = vpack.c.bf16 %v1095_v32, %v1093_v30  ;;  %v587_v42 = vld [vmem:[%s4502_s7 + $0x8f8] sm:$0xff]  ;;  %v589_v8 = vld [vmem:[%s4502_s7 + $0x908] sm:$0xff]  ;;  %v1124_v14 = vld [vmem:[%s4502_s7 + $0x19c0] sm:$0xff] }
 0x1a9   : > { %3056 = vmatpush1.bf16.msra.mxu1 %v3055_v43  ;;  %v1097_v43 = vld [vmem:[%s4502_s7 + $0x18e8] sm:$0xff]  ;;  %v3077_v56 = vpack.c.bf16 %v587_v42, %v585_v41  ;;  %v3081_v58 = vpack.c.bf16 %v591_v26, %v589_v8  ;;  %v603_v32 = vld [vmem:[%s4502_s7 + $0x978] sm:$0xff]  ;;  %v1114_v42 = vld [vmem:[%s4502_s7 + $0x1970] sm:$0xff] }
 0x1aa   : > { %3568 = vmatpush1.bf16.msra.mxu0 %v3567_v44  ;;  %3058 = vmatprep.subr.bf16.mxu1 %v3057_v45  ;;  %v1099_v44 = vld [vmem:[%s4502_s7 + $0x18f8] sm:$0xff]  ;;  %v3075_v45 = vpack.c.bf16 %v582_v37, %v580_v36  ;;  %v601_v30 = vld [vmem:[%s4502_s7 + $0x968] sm:$0xff]  ;;  %v3603_v36 = vpack.c.bf16 %v1110_v28, %v1108_v25  ;;  %v1118_v26 = vld [vmem:[%s4502_s7 + $0x1990] sm:$0xff] }
 0x1ab   : > { %3570 = vmatprep.subr.bf16.mxu0 %v3569_v48  ;;  %v586_v48 = vld [vmem:[%s4502_s7 + $0x8f0] sm:$0xff]  ;;  %v3589_v50 = vpack.c.bf16 %v1099_v44, %v1097_v43  ;;  %v3093_v37 = vpack.c.bf16 %v603_v32, %v601_v30  ;;  %v605_v43 = vld [vmem:[%s4502_s7 + $0x988] sm:$0xff]  ;;  %v607_v44 = vld [vmem:[%s4502_s7 + $0x998] sm:$0xff] }
 0x1ac   : > { %v616_v25 = vld [vmem:[%s4502_s7 + $0x9e0] sm:$0xff]  ;;  %v1130_v32 = vld [vmem:[%s4502_s7 + $0x19f0] sm:$0xff] }
 0x1ad   : > { %3060 = vmatpush1.bf16.msra.mxu1 %v3059_v53  ;;  %v1101_v53 = vld [vmem:[%s4502_s7 + $0x1908] sm:$0xff]  ;;  %v1128_v28 = vld [vmem:[%s4502_s7 + $0x19e0] sm:$0xff] }
 0x1ae   : > { %3572 = vmatpush1.bf16.msra.mxu0 %v3571_v54  ;;  %3062 = vmatprep.subr.bf16.mxu1 %v3061_v57  ;;  %v1103_v54 = vld [vmem:[%s4502_s7 + $0x1918] sm:$0xff]  ;;  %v3079_v57 = vpack.c.bf16 %v586_v48, %v584_v47  ;;  %v3607_v47 = vpack.c.bf16 %v1114_v42, %v1112_v40  ;;  %v3097_v48 = vpack.c.bf16 %v607_v44, %v605_v43  ;;  %v620_v42 = vld [vmem:[%s4502_s7 + $0xa00] sm:$0xff]  ;;  %v622_v43 = vld [vmem:[%s4502_s7 + $0xa10] sm:$0xff] }
 0x1af   : > { %3574 = vmatprep.subr.bf16.mxu0 %v3573_v61  ;;  %v590_v61 = vld [vmem:[%s4502_s7 + $0x910] sm:$0xff]  ;;  %v3593_v0 = vpack.c.bf16 %v1103_v54, %v1101_v53  ;;  %v609_v53 = vld [vmem:[%s4502_s7 + $0x9a8] sm:$0xff]  ;;  %v611_v54 = vld [vmem:[%s4502_s7 + $0x9b8] sm:$0xff]  ;;  %v3623_v40 = vpack.c.bf16 %v1130_v32, %v1128_v28 }
 0x1b0   : > { %v1132_v44 = vld [vmem:[%s4502_s7 + $0x1a00] sm:$0xff] }
 0x1b1   : > { %3064 = vmatpush1.bf16.msra.mxu1 %v3063_v51  ;;  %v1105_v51 = vld [vmem:[%s4502_s7 + $0x1928] sm:$0xff]  ;;  %v636_v32 = vld [vmem:[%s4502_s7 + $0xa80] sm:$0xff] }
 0x1b2   : > { %3576 = vmatpush1.bf16.msra.mxu0 %v3575_v3  ;;  %3066 = vmatprep.subr.bf16.mxu1 %v3065_v4  ;;  %v1107_v3 = vld [vmem:[%s4502_s7 + $0x1938] sm:$0xff]  ;;  %v3083_v4 = vpack.c.bf16 %v590_v61, %v588_v59  ;;  %v3611_v59 = vpack.c.bf16 %v1118_v26, %v1116_v52  ;;  %v3101_v61 = vpack.c.bf16 %v611_v54, %v609_v53  ;;  %v624_v26 = vld [vmem:[%s4502_s7 + $0xa20] sm:$0xff]  ;;  %v626_v53 = vld [vmem:[%s4502_s7 + $0xa30] sm:$0xff] }
 0x1b3   : > { %3578 = vmatprep.subr.bf16.mxu0 %v3577_v34  ;;  %v594_v34 = vld [vmem:[%s4502_s7 + $0x930] sm:$0xff]  ;;  %v3597_v11 = vpack.c.bf16 %v1107_v3, %v1105_v51  ;;  %v613_v51 = vld [vmem:[%s4502_s7 + $0x9c8] sm:$0xff]  ;;  %v615_v3 = vld [vmem:[%s4502_s7 + $0x9d8] sm:$0xff] }
 0x1b4   : > { %v1136_v54 = vld [vmem:[%s4502_s7 + $0x1a20] sm:$0xff] }
 0x1b5   : > { %3068 = vmatpush1.bf16.msra.mxu1 %v3067_v17  ;;  %v1109_v17 = vld [vmem:[%s4502_s7 + $0x1948] sm:$0xff] }
 0x1b6   : > { %3580 = vmatpush1.bf16.msra.mxu0 %v3579_v18  ;;  %3070 = vmatprep.subr.bf16.mxu1 %v3069_v19  ;;  %v1111_v18 = vld [vmem:[%s4502_s7 + $0x1958] sm:$0xff]  ;;  %v3087_v19 = vpack.c.bf16 %v594_v34, %v592_v7  ;;  %v3615_v7 = vpack.c.bf16 %v1122_v31, %v1120_v1  ;;  %v3105_v34 = vpack.c.bf16 %v615_v3, %v613_v51  ;;  %v628_v3 = vld [vmem:[%s4502_s7 + $0xa40] sm:$0xff] }
 0x1b7   : > { %3582 = vmatprep.subr.bf16.mxu0 %v3581_v24  ;;  %v598_v24 = vld [vmem:[%s4502_s7 + $0x950] sm:$0xff]  ;;  %v3601_v55 = vpack.c.bf16 %v1111_v18, %v1109_v17  ;;  %v617_v17 = vld [vmem:[%s4502_s7 + $0x9e8] sm:$0xff]  ;;  %v619_v18 = vld [vmem:[%s4502_s7 + $0x9f8] sm:$0xff] }
 0x1b9   : > { %3072 = vmatpush1.bf16.msra.mxu1 %v3071_v33  ;;  %v1113_v33 = vld [vmem:[%s4502_s7 + $0x1968] sm:$0xff] }
 0x1ba   : > { %3584 = vmatpush1.bf16.msra.mxu0 %v3583_v35  ;;  %3074 = vmatprep.subr.bf16.mxu1 %v3073_v60  ;;  %v1115_v35 = vld [vmem:[%s4502_s7 + $0x1978] sm:$0xff]  ;;  %v3091_v60 = vpack.c.bf16 %v598_v24, %v596_v22  ;;  %v3619_v22 = vpack.c.bf16 %v1126_v16, %v1124_v14  ;;  %v3109_v24 = vpack.c.bf16 %v619_v18, %v617_v17  ;;  %v632_v16 = vld [vmem:[%s4502_s7 + $0xa60] sm:$0xff]  ;;  %v634_v17 = vld [vmem:[%s4502_s7 + $0xa70] sm:$0xff] }
 0x1bb   : > { %3586 = vmatprep.subr.bf16.mxu0 %v3585_v39  ;;  %v602_v39 = vld [vmem:[%s4502_s7 + $0x970] sm:$0xff]  ;;  %v3605_v41 = vpack.c.bf16 %v1115_v35, %v1113_v33  ;;  %v621_v33 = vld [vmem:[%s4502_s7 + $0xa08] sm:$0xff]  ;;  %v623_v35 = vld [vmem:[%s4502_s7 + $0xa18] sm:$0xff] }
 0x1bc   : > { %v1144_v18 = vld [vmem:[%s4502_s7 + $0x1a60] sm:$0xff] }
 0x1bd   : > { %3076 = vmatpush1.bf16.msra.mxu1 %v3075_v45  ;;  %v1117_v45 = vld [vmem:[%s4502_s7 + $0x1988] sm:$0xff] }
 0x1be   : > { %3588 = vmatpush1.bf16.msra.mxu0 %v3587_v46  ;;  %3078 = vmatprep.subr.bf16.mxu1 %v3077_v56  ;;  %v1119_v46 = vld [vmem:[%s4502_s7 + $0x1998] sm:$0xff]  ;;  %v3095_v56 = vpack.c.bf16 %v602_v39, %v600_v38  ;;  %v1402_v38 = vcombine.high %v5118_v13, %v5118_v13 }
 0x1bf   : > { %3590 = vmatprep.subr.bf16.mxu0 %v3589_v50  ;;  %v606_v50 = vld [vmem:[%s4502_s7 + $0x990] sm:$0xff]  ;;  %v3609_v8 = vpack.c.bf16 %v1119_v46, %v1117_v45  ;;  %v625_v46 = vld [vmem:[%s4502_s7 + $0xa28] sm:$0xff] }
 0x1c0   : > { %v1134_v45 = vld [vmem:[%s4502_s7 + $0x1a10] sm:$0xff] }
 0x1c1   : > { %3080 = vmatpush1.bf16.msra.mxu1 %v3079_v57  ;;  %v1121_v57 = vld [vmem:[%s4502_s7 + $0x19a8] sm:$0xff]  ;;  %v3627_v52 = vpack.c.bf16 %v1134_v45, %v1132_v44  ;;  %v640_v44 = vld [vmem:[%s4502_s7 + $0xaa0] sm:$0xff] }
 0x1c2   : > { %3592 = vmatpush1.bf16.msra.mxu0 %v3591_v29  ;;  %3082 = vmatprep.subr.bf16.mxu1 %v3081_v58  ;;  %v1123_v29 = vld [vmem:[%s4502_s7 + $0x19b8] sm:$0xff]  ;;  %v3099_v58 = vpack.c.bf16 %v606_v50, %v604_v49  ;;  %v5278_v49 = vrot.slane %v1402_v38, %v4618_v12  ;;  %v3115_v50 = vpack.c.bf16 %v622_v43, %v620_v42  ;;  %v1152_v45 = vld [vmem:[%s4502_s7 + $0x1aa0] sm:$0xff] }
 0x1c3   : > { %3594 = vmatprep.subr.bf16.mxu0 %v3593_v0  ;;  %v610_v0 = vld [vmem:[%s4502_s7 + $0x9b0] sm:$0xff]  ;;  %v3613_v2 = vpack.c.bf16 %v1123_v29, %v1121_v57  ;;  %v643_v38 = vld [vmem:[%s4502_s7 + $0xab8] sm:$0xff] }
 0x1c4   : > { %v1138_v29 = vld [vmem:[%s4502_s7 + $0x1a30] sm:$0xff]  ;;  %v1418_v1 = vcombine.high %v5278_v49, %v5278_v49 }
 0x1c5   : > { %3084 = vmatpush1.bf16.msra.mxu1 %v3083_v4  ;;  %v1125_v4 = vld [vmem:[%s4502_s7 + $0x19c8] sm:$0xff]  ;;  %v3631_v31 = vpack.c.bf16 %v1138_v29, %v1136_v54  ;;  %v644_v54 = vld [vmem:[%s4502_s7 + $0xac0] sm:$0xff] }
 0x1c6   : > { %3596 = vmatpush1.bf16.msra.mxu0 %v3595_v5  ;;  %3086 = vmatprep.subr.bf16.mxu1 %v3085_v6  ;;  %v1127_v5 = vld [vmem:[%s4502_s7 + $0x19d8] sm:$0xff]  ;;  %v3103_v6 = vpack.c.bf16 %v610_v0, %v608_v62  ;;  %v1141_v62 = vld [vmem:[%s4502_s7 + $0x1a48] sm:$0xff]  ;;  %v1156_v29 = vld [vmem:[%s4502_s7 + $0x1ac0] sm:$0xff] }
 0x1c7   : > { %3598 = vmatprep.subr.bf16.mxu0 %v3597_v11  ;;  %v614_v11 = vld [vmem:[%s4502_s7 + $0x9d0] sm:$0xff]  ;;  %v3617_v15 = vpack.c.bf16 %v1127_v5, %v1125_v4  ;;  %v1143_v0 = vld [vmem:[%s4502_s7 + $0x1a58] sm:$0xff]  ;;  %v1140_v4 = vld [vmem:[%s4502_s7 + $0x1a40] sm:$0xff] }
 0x1c8   : > { %v3633_v5 = vpack.c.bf16 %v1143_v0, %v1141_v62  ;;  %v651_v62 = vld [vmem:[%s4502_s7 + $0xaf8] sm:$0xff]  ;;  %v1161_v0 = vld [vmem:[%s4502_s7 + $0x1ae8] sm:$0xff] }
 0x1c9   : > { %3088 = vmatpush1.bf16.msra.mxu1 %v3087_v19  ;;  %v1129_v19 = vld [vmem:[%s4502_s7 + $0x19e8] sm:$0xff] }
 0x1ca   : > { %3600 = vmatpush1.bf16.msra.mxu0 %v3599_v20  ;;  %3090 = vmatprep.subr.bf16.mxu1 %v3089_v21  ;;  %v1131_v20 = vld [vmem:[%s4502_s7 + $0x19f8] sm:$0xff]  ;;  %v3107_v21 = vpack.c.bf16 %v614_v11, %v612_v9 }
 0x1cb   : > { %3602 = vmatprep.subr.bf16.mxu0 %v3601_v55  ;;  %v618_v55 = vld [vmem:[%s4502_s7 + $0x9f0] sm:$0xff]  ;;  %v3621_v30 = vpack.c.bf16 %v1131_v20, %v1129_v19  ;;  %v1147_v9 = vld [vmem:[%s4502_s7 + $0x1a78] sm:$0xff] }
 0x1cc   : > { %v3111_v39 = vpack.c.bf16 %v618_v55, %v616_v25  ;;  %v1146_v20 = vld [vmem:[%s4502_s7 + $0x1a70] sm:$0xff]  ;;  %v1151_v25 = vld [vmem:[%s4502_s7 + $0x1a98] sm:$0xff]  ;;  %v3127_v55 = vpack.c.bf16 %v634_v17, %v632_v16  ;;  %v652_v16 = vld [vmem:[%s4502_s7 + $0xb00] sm:$0xff] }
 0x1cd   : > { %3092 = vmatpush1.bf16.msra.mxu1 %v3091_v60  ;;  %v1334_v60 = vcombine.high %v5115_v10, %v5115_v10  ;;  %v3639_v28 = vpack.c.bf16 %v1146_v20, %v1144_v18  ;;  %v654_v17 = vld [vmem:[%s4502_s7 + $0xb10] sm:$0xff]  ;;  %v1164_v18 = vld [vmem:[%s4502_s7 + $0x1b00] sm:$0xff] }
 0x1ce   : > { %3604 = vmatpush1.bf16.msra.mxu0 %v3603_v36  ;;  %3094 = vmatprep.subr.bf16.mxu1 %v3093_v37  ;;  %v1133_v36 = vld [vmem:[%s4502_s7 + $0x1a08] sm:$0xff]  ;;  %v1135_v37 = vld [vmem:[%s4502_s7 + $0x1a18] sm:$0xff]  ;;  %v1166_v20 = vld [vmem:[%s4502_s7 + $0x1b10] sm:$0xff] }
 0x1cf   : > { %3606 = vmatprep.subr.bf16.mxu0 %v3605_v41  ;;  %v3113_v41 = vpack.c.bf16 %v623_v35, %v621_v33  ;;  %v3625_v10 = vpack.c.bf16 %v1135_v37, %v1133_v36  ;;  %v5273_v13 = vrot.slane %v1334_v60, %v4618_v12  ;;  %v638_v33 = vld [vmem:[%s4502_s7 + $0xa90] sm:$0xff]  ;;  %v1148_v35 = vld [vmem:[%s4502_s7 + $0x1a80] sm:$0xff]  ;;  %v641_v37 = vld [vmem:[%s4502_s7 + $0xaa8] sm:$0xff] }
 0x1d0   : > { %v1150_v36 = vld [vmem:[%s4502_s7 + $0x1a90] sm:$0xff]  ;;  %v3133_v43 = vpack.c.bf16 %v643_v38, %v641_v37  ;;  %v661_v37 = vld [vmem:[%s4502_s7 + $0xb48] sm:$0xff]  ;;  %v663_v38 = vld [vmem:[%s4502_s7 + $0xb58] sm:$0xff] }
 0x1d1   : > { %3096 = vmatpush1.bf16.msra.mxu1 %v3095_v56  ;;  %v627_v56 = vld [vmem:[%s4502_s7 + $0xa38] sm:$0xff]  ;;  %v3643_v42 = vpack.c.bf16 %v1150_v36, %v1148_v35  ;;  %v1168_v35 = vld [vmem:[%s4502_s7 + $0x1b20] sm:$0xff]  ;;  %v1170_v36 = vld [vmem:[%s4502_s7 + $0x1b30] sm:$0xff] }
 0x1d2   : > { %3608 = vmatpush1.bf16.msra.mxu0 %v3607_v47  ;;  %3098 = vmatprep.subr.bf16.mxu1 %v3097_v48  ;;  %v1137_v47 = vld [vmem:[%s4502_s7 + $0x1a28] sm:$0xff]  ;;  %v1139_v48 = vld [vmem:[%s4502_s7 + $0x1a38] sm:$0xff] }
 0x1d3   : > { %3610 = vmatprep.subr.bf16.mxu0 %v3609_v8  ;;  %v3117_v8 = vpack.c.bf16 %v627_v56, %v625_v46  ;;  %v3629_v57 = vpack.c.bf16 %v1139_v48, %v1137_v47  ;;  %v1154_v56 = vld [vmem:[%s4502_s7 + $0x1ab0] sm:$0xff]  ;;  %v645_v47 = vld [vmem:[%s4502_s7 + $0xac8] sm:$0xff]  ;;  %v647_v48 = vld [vmem:[%s4502_s7 + $0xad8] sm:$0xff] }
 0x1d5   : > { %3100 = vmatpush1.bf16.msra.mxu1 %v3099_v58  ;;  %v629_v58 = vld [vmem:[%s4502_s7 + $0xa48] sm:$0xff] }
 0x1d6   : > { %3612 = vmatpush1.bf16.msra.mxu0 %v3611_v59  ;;  %3102 = vmatprep.subr.bf16.mxu1 %v3101_v61  ;;  %v631_v59 = vld [vmem:[%s4502_s7 + $0xa58] sm:$0xff]  ;;  %v1350_v61 = vcombine.high %v5273_v13, %v5273_v13 }
 0x1d7   : > { %3614 = vmatprep.subr.bf16.mxu0 %v3613_v2  ;;  %v3119_v2 = vpack.c.bf16 %v626_v53, %v624_v26  ;;  %v3121_v51 = vpack.c.bf16 %v631_v59, %v629_v58  ;;  %v3647_v26 = vpack.c.bf16 %v1154_v56, %v1152_v45  ;;  %v3137_v53 = vpack.c.bf16 %v647_v48, %v645_v47  ;;  %v1158_v59 = vld [vmem:[%s4502_s7 + $0x1ad0] sm:$0xff]  ;;  %v1172_v45 = vld [vmem:[%s4502_s7 + $0x1b40] sm:$0xff]  ;;  %v665_v47 = vld [vmem:[%s4502_s7 + $0xb68] sm:$0xff] }
 0x1d8   : > { %v1174_v56 = vld [vmem:[%s4502_s7 + $0x1b50] sm:$0xff]  ;;  %v667_v48 = vld [vmem:[%s4502_s7 + $0xb78] sm:$0xff] }
 0x1d9   : > { %3104 = vmatpush1.bf16.msra.mxu1 %v3103_v6  ;;  %v1142_v6 = vld [vmem:[%s4502_s7 + $0x1a50] sm:$0xff] }
 0x1da   : > { %3616 = vmatpush1.bf16.msra.mxu0 %v3615_v7  ;;  %3106 = vmatprep.subr.bf16.mxu1 %v3105_v34  ;;  %v633_v7 = vld [vmem:[%s4502_s7 + $0xa68] sm:$0xff]  ;;  %v635_v34 = vld [vmem:[%s4502_s7 + $0xa78] sm:$0xff]  ;;  %v3635_v14 = vpack.c.bf16 %v1142_v6, %v1140_v4  ;;  %v1160_v4 = vld [vmem:[%s4502_s7 + $0x1ae0] sm:$0xff] }
 0x1db   : > { %3618 = vmatprep.subr.bf16.mxu0 %v3617_v15  ;;  %v3125_v15 = vpack.c.bf16 %v635_v34, %v633_v7  ;;  %v1162_v6 = vld [vmem:[%s4502_s7 + $0x1af0] sm:$0xff]  ;;  %v653_v7 = vld [vmem:[%s4502_s7 + $0xb08] sm:$0xff]  ;;  %v655_v34 = vld [vmem:[%s4502_s7 + $0xb18] sm:$0xff] }
 0x1dd   : > { %3108 = vmatpush1.bf16.msra.mxu1 %v3107_v21  ;;  %v637_v21 = vld [vmem:[%s4502_s7 + $0xa88] sm:$0xff] }
 0x1de   : > { %3620 = vmatpush1.bf16.msra.mxu0 %v3619_v22  ;;  %3110 = vmatprep.subr.bf16.mxu1 %v3109_v24  ;;  %v639_v22 = vld [vmem:[%s4502_s7 + $0xa98] sm:$0xff]  ;;  %v1149_v24 = vld [vmem:[%s4502_s7 + $0x1a88] sm:$0xff] }
 0x1df   : > { %3622 = vmatprep.subr.bf16.mxu0 %v3621_v30  ;;  %v3129_v30 = vpack.c.bf16 %v639_v22, %v637_v21  ;;  %v3641_v60 = vpack.c.bf16 %v1151_v25, %v1149_v24  ;;  %v657_v21 = vld [vmem:[%s4502_s7 + $0xb28] sm:$0xff]  ;;  %v659_v22 = vld [vmem:[%s4502_s7 + $0xb38] sm:$0xff] }
 0x1e0   : > { %v1169_v24 = vld [vmem:[%s4502_s7 + $0x1b28] sm:$0xff]  ;;  %v1171_v25 = vld [vmem:[%s4502_s7 + $0x1b38] sm:$0xff] }
 0x1e1   : > { %3112 = vmatpush1.bf16.msra.mxu1 %v3111_v39  ;;  %v1153_v39 = vld [vmem:[%s4502_s7 + $0x1aa8] sm:$0xff] }
 0x1e2   : > { %3624 = vmatpush1.bf16.msra.mxu0 %v3623_v40  ;;  %3114 = vmatprep.subr.bf16.mxu1 %v3113_v41  ;;  %v1155_v40 = vld [vmem:[%s4502_s7 + $0x1ab8] sm:$0xff]  ;;  %v3131_v41 = vpack.c.bf16 %v638_v33, %v636_v32  ;;  %v656_v32 = vld [vmem:[%s4502_s7 + $0xb20] sm:$0xff]  ;;  %v658_v33 = vld [vmem:[%s4502_s7 + $0xb30] sm:$0xff] }
 0x1e3   : > { %3626 = vmatprep.subr.bf16.mxu0 %v3625_v10  ;;  %v642_v10 = vld [vmem:[%s4502_s7 + $0xab0] sm:$0xff]  ;;  %v3645_v46 = vpack.c.bf16 %v1155_v40, %v1153_v39  ;;  %v1173_v39 = vld [vmem:[%s4502_s7 + $0x1b48] sm:$0xff]  ;;  %v1175_v40 = vld [vmem:[%s4502_s7 + $0x1b58] sm:$0xff] }
 0x1e4   : > { %1815 = vmatmul.mubr.f32.vlgmr.msra.gmra.mrb[0].mxu1 %v5128_v23  ;;  %v630_v23 = vld [vmem:[%s4502_s7 + $0xa50] sm:$0xff] }
 0x1e5   : > { %3116 = vmatpush1.bf16.msra.mxu1 %v3115_v50  ;;  %2383 = vmatmul.mubr.f32.vlgmr.msra.gmra.mrb[0].mxu0 %v5134_v27  ;;  %v1145_v27 = vld [vmem:[%s4502_s7 + $0x1a68] sm:$0xff]  ;;  %v3123_v11 = vpack.c.bf16 %v630_v23, %v628_v3  ;;  %v648_v3 = vld [vmem:[%s4502_s7 + $0xae0] sm:$0xff]  ;;  %v650_v23 = vld [vmem:[%s4502_s7 + $0xaf0] sm:$0xff] }
 0x1e6   : > { %3628 = vmatpush1.bf16.msra.mxu0 %v3627_v52  ;;  %3118 = vmatprep.subr.bf16.mxu1 %v3117_v8  ;;  %v3637_v19 = vpack.c.bf16 %v1147_v9, %v1145_v27  ;;  %v1157_v50 = vld [vmem:[%s4502_s7 + $0x1ac8] sm:$0xff]  ;;  %v1159_v52 = vld [vmem:[%s4502_s7 + $0x1ad8] sm:$0xff]  ;;  %v3135_v8 = vpack.c.bf16 %v642_v10, %v640_v44  ;;  %v660_v44 = vld [vmem:[%s4502_s7 + $0xb40] sm:$0xff] }
 0x1e7   : > { %3630 = vmatprep.subr.bf16.mxu0 %v3629_v57  ;;  %1885 = vmatprep.mubr.f32.mxu1 %v1350_v61  ;;  %v646_v57 = vld [vmem:[%s4502_s7 + $0xad0] sm:$0xff]  ;;  %v3649_v58 = vpack.c.bf16 %v1159_v52, %v1157_v50  ;;  %v649_v61 = vld [vmem:[%s4502_s7 + $0xae8] sm:$0xff]  ;;  %v1167_v9 = vld [vmem:[%s4502_s7 + $0x1b18] sm:$0xff] }
 0x1e8   : > { %2453 = vmatprep.mubr.f32.mxu0 %v1418_v1  ;;  %v1163_v1 = vld [vmem:[%s4502_s7 + $0x1af8] sm:$0xff]  ;;  %v1165_v27 = vld [vmem:[%s4502_s7 + $0x1b08] sm:$0xff]  ;;  %v662_v10 = vld [vmem:[%s4502_s7 + $0xb50] sm:$0xff] }
 0x1e9   : > { %3120 = vmatpush1.bf16.msra.mxu1 %v3119_v2  ;;  %v3139_v2 = vpack.c.bf16 %v646_v57, %v644_v54  ;;  %v1177_v50 = vld [vmem:[%s4502_s7 + $0x1b68] sm:$0xff]  ;;  %v1179_v52 = vld [vmem:[%s4502_s7 + $0x1b78] sm:$0xff]  ;;  %v664_v54 = vld [vmem:[%s4502_s7 + $0xb60] sm:$0xff] }
 0x1ea   : > { %3632 = vmatpush1.bf16.msra.mxu0 %v3631_v31  ;;  %3122 = vmatprep.subr.bf16.mxu1 %v3121_v51  ;;  %v3651_v31 = vpack.c.bf16 %v1158_v59, %v1156_v29  ;;  %v3141_v51 = vpack.c.bf16 %v651_v62, %v649_v61  ;;  %v666_v57 = vld [vmem:[%s4502_s7 + $0xb70] sm:$0xff]  ;;  %v1176_v29 = vld [vmem:[%s4502_s7 + $0x1b60] sm:$0xff]  ;;  %v669_v61 = vld [vmem:[%s4502_s7 + $0xb88] sm:$0xff] }
 0x1eb   : > { %3634 = vmatprep.subr.bf16.mxu0 %v3633_v5  ;;  %v3653_v5 = vpack.c.bf16 %v1163_v1, %v1161_v0  ;;  %v1178_v59 = vld [vmem:[%s4502_s7 + $0x1b70] sm:$0xff]  ;;  %v671_v62 = vld [vmem:[%s4502_s7 + $0xb98] sm:$0xff]  ;;  %v1181_v0 = vld [vmem:[%s4502_s7 + $0x1b88] sm:$0xff] }
 0x1ec   : > { %v1183_v1 = vld [vmem:[%s4502_s7 + $0x1b98] sm:$0xff] }
 0x1ed   : > { %3124 = vmatpush1.bf16.msra.mxu1 %v3123_v11  ;;  %v3143_v11 = vpack.c.bf16 %v650_v23, %v648_v3  ;;  %v668_v3 = vld [vmem:[%s4502_s7 + $0xb80] sm:$0xff]  ;;  %v670_v23 = vld [vmem:[%s4502_s7 + $0xb90] sm:$0xff] }
 0x1ee   : > { %3636 = vmatpush1.bf16.msra.mxu0 %v3635_v14  ;;  %3126 = vmatprep.subr.bf16.mxu1 %v3125_v15  ;;  %v3655_v14 = vpack.c.bf16 %v1162_v6, %v1160_v4  ;;  %v3145_v15 = vpack.c.bf16 %v655_v34, %v653_v7  ;;  %v1180_v4 = vld [vmem:[%s4502_s7 + $0x1b80] sm:$0xff]  ;;  %v1182_v6 = vld [vmem:[%s4502_s7 + $0x1b90] sm:$0xff]  ;;  %v673_v7 = vld [vmem:[%s4502_s7 + $0xba8] sm:$0xff] }
 0x1ef   : > { %3638 = vmatprep.subr.bf16.mxu0 %v3637_v19  ;;  %v3657_v19 = vpack.c.bf16 %v1167_v9, %v1165_v27  ;;  %v675_v34 = vld [vmem:[%s4502_s7 + $0xbb8] sm:$0xff]  ;;  %v1185_v27 = vld [vmem:[%s4502_s7 + $0x1ba8] sm:$0xff] }
 0x1f0   : > { %v1187_v9 = vld [vmem:[%s4502_s7 + $0x1bb8] sm:$0xff] }
 0x1f1   : > { %3128 = vmatpush1.bf16.msra.mxu1 %v3127_v55  ;;  %v3147_v55 = vpack.c.bf16 %v654_v17, %v652_v16  ;;  %v672_v16 = vld [vmem:[%s4502_s7 + $0xba0] sm:$0xff]  ;;  %v674_v17 = vld [vmem:[%s4502_s7 + $0xbb0] sm:$0xff] }
 0x1f2   : > { %3640 = vmatpush1.bf16.msra.mxu0 %v3639_v28  ;;  %3130 = vmatprep.subr.bf16.mxu1 %v3129_v30  ;;  %v3659_v28 = vpack.c.bf16 %v1166_v20, %v1164_v18  ;;  %v3149_v30 = vpack.c.bf16 %v659_v22, %v657_v21  ;;  %v1184_v18 = vld [vmem:[%s4502_s7 + $0x1ba0] sm:$0xff]  ;;  %v1186_v20 = vld [vmem:[%s4502_s7 + $0x1bb0] sm:$0xff]  ;;  %v677_v21 = vld [vmem:[%s4502_s7 + $0xbc8] sm:$0xff] }
 0x1f3   : > { %3642 = vmatprep.subr.bf16.mxu0 %v3641_v60  ;;  %v3661_v60 = vpack.c.bf16 %v1171_v25, %v1169_v24  ;;  %v679_v22 = vld [vmem:[%s4502_s7 + $0xbd8] sm:$0xff]  ;;  %v1189_v24 = vld [vmem:[%s4502_s7 + $0x1bc8] sm:$0xff] }
 0x1f4   : > { %v1191_v25 = vld [vmem:[%s4502_s7 + $0x1bd8] sm:$0xff] }
 0x1f5   : > { %3132 = vmatpush1.bf16.msra.mxu1 %v3131_v41  ;;  %v3151_v41 = vpack.c.bf16 %v658_v33, %v656_v32  ;;  %v676_v32 = vld [vmem:[%s4502_s7 + $0xbc0] sm:$0xff]  ;;  %v678_v33 = vld [vmem:[%s4502_s7 + $0xbd0] sm:$0xff] }
 0x1f6   : > { %3644 = vmatpush1.bf16.msra.mxu0 %v3643_v42  ;;  %3134 = vmatprep.subr.bf16.mxu1 %v3133_v43  ;;  %v3663_v42 = vpack.c.bf16 %v1170_v36, %v1168_v35  ;;  %v3153_v43 = vpack.c.bf16 %v663_v38, %v661_v37  ;;  %v1188_v35 = vld [vmem:[%s4502_s7 + $0x1bc0] sm:$0xff]  ;;  %v1190_v36 = vld [vmem:[%s4502_s7 + $0x1bd0] sm:$0xff]  ;;  %v681_v37 = vld [vmem:[%s4502_s7 + $0xbe8] sm:$0xff] }
 0x1f7   : > { %3646 = vmatprep.subr.bf16.mxu0 %v3645_v46  ;;  %v3665_v46 = vpack.c.bf16 %v1175_v40, %v1173_v39  ;;  %v683_v38 = vld [vmem:[%s4502_s7 + $0xbf8] sm:$0xff]  ;;  %v1193_v39 = vld [vmem:[%s4502_s7 + $0x1be8] sm:$0xff] }
 0x1f8   : > { %v1195_v40 = vld [vmem:[%s4502_s7 + $0x1bf8] sm:$0xff] }
 0x1f9   : > { %3136 = vmatpush1.bf16.msra.mxu1 %v3135_v8  ;;  %v3155_v8 = vpack.c.bf16 %v662_v10, %v660_v44  ;;  %v680_v44 = vld [vmem:[%s4502_s7 + $0xbe0] sm:$0xff]  ;;  %v682_v10 = vld [vmem:[%s4502_s7 + $0xbf0] sm:$0xff] }
 0x1fa   : > { %3648 = vmatpush1.bf16.msra.mxu0 %v3647_v26  ;;  %3138 = vmatprep.subr.bf16.mxu1 %v3137_v53  ;;  %v3667_v26 = vpack.c.bf16 %v1174_v56, %v1172_v45  ;;  %v3157_v53 = vpack.c.bf16 %v667_v48, %v665_v47  ;;  %v1192_v45 = vld [vmem:[%s4502_s7 + $0x1be0] sm:$0xff]  ;;  %v1194_v56 = vld [vmem:[%s4502_s7 + $0x1bf0] sm:$0xff]  ;;  %v685_v47 = vld [vmem:[%s4502_s7 + $0xc08] sm:$0xff] }
 0x1fb   : > { %3650 = vmatprep.subr.bf16.mxu0 %v3649_v58  ;;  %v3669_v58 = vpack.c.bf16 %v1179_v52, %v1177_v50  ;;  %v687_v48 = vld [vmem:[%s4502_s7 + $0xc18] sm:$0xff]  ;;  %v1197_v50 = vld [vmem:[%s4502_s7 + $0x1c08] sm:$0xff] }
 0x1fc   : > { %v1199_v52 = vld [vmem:[%s4502_s7 + $0x1c18] sm:$0xff] }
 0x1fd   : > { %3140 = vmatpush1.bf16.msra.mxu1 %v3139_v2  ;;  %v3159_v2 = vpack.c.bf16 %v666_v57, %v664_v54  ;;  %v3687_v54 = vpack.c.bf16 %v1194_v56, %v1192_v45  ;;  %v3177_v57 = vpack.c.bf16 %v687_v48, %v685_v47  ;;  %v700_v56 = vld [vmem:[%s4502_s7 + $0xc80] sm:$0xff]  ;;  %v702_v47 = vld [vmem:[%s4502_s7 + $0xc90] sm:$0xff] }
 0x1fe   : > { %3652 = vmatpush1.bf16.msra.mxu0 %v3651_v31  ;;  %3142 = vmatprep.subr.bf16.mxu1 %v3141_v51  ;;  %v3671_v31 = vpack.c.bf16 %v1178_v59, %v1176_v29  ;;  %v3161_v51 = vpack.c.bf16 %v671_v62, %v669_v61  ;;  %v684_v29 = vld [vmem:[%s4502_s7 + $0xc00] sm:$0xff]  ;;  %v3689_v61 = vpack.c.bf16 %v1199_v52, %v1197_v50  ;;  %v1198_v62 = vld [vmem:[%s4502_s7 + $0x1c10] sm:$0xff] }
 0x1ff   : > { %3654 = vmatprep.subr.bf16.mxu0 %v3653_v5  ;;  %v3673_v5 = vpack.c.bf16 %v1183_v1, %v1181_v0  ;;  %v1196_v59 = vld [vmem:[%s4502_s7 + $0x1c00] sm:$0xff]  ;;  %v689_v0 = vld [vmem:[%s4502_s7 + $0xc28] sm:$0xff]  ;;  %v691_v1 = vld [vmem:[%s4502_s7 + $0xc38] sm:$0xff] }
 0x200   : > { %v1212_v48 = vld [vmem:[%s4502_s7 + $0x1c80] sm:$0xff]  ;;  %v1214_v52 = vld [vmem:[%s4502_s7 + $0x1c90] sm:$0xff] }
 0x201   : > { %3144 = vmatpush1.bf16.msra.mxu1 %v3143_v11  ;;  %v3163_v11 = vpack.c.bf16 %v670_v23, %v668_v3 }
 0x202   : > { %3656 = vmatpush1.bf16.msra.mxu0 %v3655_v14  ;;  %3146 = vmatprep.subr.bf16.mxu1 %v3145_v15  ;;  %v3675_v14 = vpack.c.bf16 %v1182_v6, %v1180_v4  ;;  %v3165_v15 = vpack.c.bf16 %v675_v34, %v673_v7  ;;  %v3691_v4 = vpack.c.bf16 %v1198_v62, %v1196_v59  ;;  %v688_v6 = vld [vmem:[%s4502_s7 + $0xc20] sm:$0xff]  ;;  %v690_v7 = vld [vmem:[%s4502_s7 + $0xc30] sm:$0xff] }
 0x203   : > { %3658 = vmatprep.subr.bf16.mxu0 %v3657_v19  ;;  %v3677_v19 = vpack.c.bf16 %v1187_v9, %v1185_v27  ;;  %v1200_v34 = vld [vmem:[%s4502_s7 + $0x1c20] sm:$0xff]  ;;  %v1202_v9 = vld [vmem:[%s4502_s7 + $0x1c30] sm:$0xff]  ;;  %v3707_v59 = vpack.c.bf16 %v1214_v52, %v1212_v48 }
 0x204   : > { %v704_v62 = vld [vmem:[%s4502_s7 + $0xca0] sm:$0xff] }
 0x205   : > { %3148 = vmatpush1.bf16.msra.mxu1 %v3147_v55  ;;  %v3167_v55 = vpack.c.bf16 %v674_v17, %v672_v16  ;;  %v1205_v16 = vld [vmem:[%s4502_s7 + $0x1c48] sm:$0xff]  ;;  %v1207_v17 = vld [vmem:[%s4502_s7 + $0x1c58] sm:$0xff]  ;;  %v720_v48 = vld [vmem:[%s4502_s7 + $0xd20] sm:$0xff] }
 0x206   : > { %3660 = vmatpush1.bf16.msra.mxu0 %v3659_v28  ;;  %3150 = vmatprep.subr.bf16.mxu1 %v3149_v30  ;;  %v3679_v28 = vpack.c.bf16 %v1186_v20, %v1184_v18  ;;  %v3169_v30 = vpack.c.bf16 %v679_v22, %v677_v21  ;;  %v3695_v20 = vpack.c.bf16 %v1202_v9, %v1200_v34  ;;  %v692_v22 = vld [vmem:[%s4502_s7 + $0xc40] sm:$0xff] }
 0x207   : > { %3662 = vmatprep.subr.bf16.mxu0 %v3661_v60  ;;  %v3681_v60 = vpack.c.bf16 %v1191_v25, %v1189_v24  ;;  %v1204_v24 = vld [vmem:[%s4502_s7 + $0x1c40] sm:$0xff]  ;;  %v3697_v25 = vpack.c.bf16 %v1207_v17, %v1205_v16  ;;  %v1222_v16 = vld [vmem:[%s4502_s7 + $0x1cd0] sm:$0xff]  ;;  %v713_v17 = vld [vmem:[%s4502_s7 + $0xce8] sm:$0xff] }
 0x208   : > { %v708_v9 = vld [vmem:[%s4502_s7 + $0xcc0] sm:$0xff] }
 0x209   : > { %3152 = vmatpush1.bf16.msra.mxu1 %v3151_v41  ;;  %v3171_v41 = vpack.c.bf16 %v678_v33, %v676_v32  ;;  %v1211_v32 = vld [vmem:[%s4502_s7 + $0x1c78] sm:$0xff]  ;;  %v1232_v52 = vld [vmem:[%s4502_s7 + $0x1d20] sm:$0xff] }
 0x20a   : > { %3664 = vmatpush1.bf16.msra.mxu0 %v3663_v42  ;;  %3154 = vmatprep.subr.bf16.mxu1 %v3153_v43  ;;  %v3683_v42 = vpack.c.bf16 %v1190_v36, %v1188_v35  ;;  %v3173_v43 = vpack.c.bf16 %v683_v38, %v681_v37  ;;  %v696_v36 = vld [vmem:[%s4502_s7 + $0xc60] sm:$0xff]  ;;  %v698_v37 = vld [vmem:[%s4502_s7 + $0xc70] sm:$0xff] }
 0x20b   : > { %3666 = vmatprep.subr.bf16.mxu0 %v3665_v46  ;;  %v3685_v46 = vpack.c.bf16 %v1195_v40, %v1193_v39  ;;  %v1208_v38 = vld [vmem:[%s4502_s7 + $0x1c60] sm:$0xff]  ;;  %v1210_v40 = vld [vmem:[%s4502_s7 + $0x1c70] sm:$0xff] }
 0x20c   : > { %v3703_v45 = vpack.c.bf16 %v1210_v40, %v1208_v38  ;;  %v716_v38 = vld [vmem:[%s4502_s7 + $0xd00] sm:$0xff] }
 0x20d   : > { %3156 = vmatpush1.bf16.msra.mxu1 %v3155_v8  ;;  %v5407_v8 = vld [vmem:[%s4493_s30 + $0x18] sm:$0xff] }
 0x20e   : > { %3668 = vmatpush1.bf16.msra.mxu0 %v3667_v26  ;;  %3158 = vmatprep.subr.bf16.mxu1 %v3157_v53  ;;  %v3175_v26 = vpack.c.bf16 %v682_v10, %v680_v44  ;;  %v5410_v53 = vld [vmem:[%s4493_s30 + $0x38] sm:$0x3f]  ;;  %v3191_v10 = vpack.c.bf16 %v698_v37, %v696_v36 }
 0x20f   : > { %3670 = vmatprep.subr.bf16.mxu0 %v3669_v58  ;;  %v686_v58 = vld [vmem:[%s4502_s7 + $0xc10] sm:$0xff]  ;;  %v5426_v3 = vrot.slane %v5410_v53, %v4618_v12  ;;  %v1215_v44 = vld [vmem:[%s4502_s7 + $0x1c98] sm:$0xff]  ;;  %v1228_v40 = vld [vmem:[%s4502_s7 + $0x1d00] sm:$0xff] }
 0x210   : > { %v3179_v23 = vpack.c.bf16 %v686_v58, %v684_v29  ;;  %v1219_v29 = vld [vmem:[%s4502_s7 + $0x1cb8] sm:$0xff]  ;;  %v3195_v58 = vpack.c.bf16 %v702_v47, %v700_v56 }
 0x211   : > { %3160 = vmatpush1.bf16.msra.mxu1 %v3159_v2  ;;  %v5420_v2 = vrot.slane %v5407_v8, %v4618_v12  ;;  %v1434_v18 = vcombine.high %v5426_v3, %v5426_v3 }
 0x212   : > { %3672 = vmatpush1.bf16.msra.mxu0 %v3671_v31  ;;  %3162 = vmatprep.subr.bf16.mxu1 %v3161_v51  ;;  %v1201_v31 = vld [vmem:[%s4502_s7 + $0x1c28] sm:$0xff]  ;;  %v1203_v51 = vld [vmem:[%s4502_s7 + $0x1c38] sm:$0xff] }
 0x213   : > { %3674 = vmatprep.subr.bf16.mxu0 %v3673_v5  ;;  %v3181_v5 = vpack.c.bf16 %v691_v1, %v689_v0  ;;  %v3693_v27 = vpack.c.bf16 %v1203_v51, %v1201_v31  ;;  %v706_v0 = vld [vmem:[%s4502_s7 + $0xcb0] sm:$0xff]  ;;  %v1216_v1 = vld [vmem:[%s4502_s7 + $0x1ca0] sm:$0xff] }
 0x214   : > { %v1218_v51 = vld [vmem:[%s4502_s7 + $0x1cb0] sm:$0xff] }
 0x215   : > { %3164 = vmatpush1.bf16.msra.mxu1 %v3163_v11  ;;  %v693_v11 = vld [vmem:[%s4502_s7 + $0xc48] sm:$0xff]  ;;  %v3711_v34 = vpack.c.bf16 %v1218_v51, %v1216_v1  ;;  %v724_v1 = vld [vmem:[%s4502_s7 + $0xd40] sm:$0xff] }
 0x216   : > { %3676 = vmatpush1.bf16.msra.mxu0 %v3675_v14  ;;  %3166 = vmatprep.subr.bf16.mxu1 %v3165_v15  ;;  %v695_v14 = vld [vmem:[%s4502_s7 + $0xc58] sm:$0xff]  ;;  %v1366_v15 = vcombine.high %v5420_v2, %v5420_v2  ;;  %v1236_v51 = vld [vmem:[%s4502_s7 + $0x1d40] sm:$0xff] }
 0x217   : > { %3678 = vmatprep.subr.bf16.mxu0 %v3677_v19  ;;  %v3183_v19 = vpack.c.bf16 %v690_v7, %v688_v6  ;;  %v3185_v21 = vpack.c.bf16 %v695_v14, %v693_v11  ;;  %v1223_v6 = vld [vmem:[%s4502_s7 + $0x1cd8] sm:$0xff]  ;;  %v3199_v7 = vpack.c.bf16 %v706_v0, %v704_v62  ;;  %v710_v11 = vld [vmem:[%s4502_s7 + $0xcd0] sm:$0xff]  ;;  %v1220_v14 = vld [vmem:[%s4502_s7 + $0x1cc0] sm:$0xff] }
 0x219   : > { %3168 = vmatpush1.bf16.msra.mxu1 %v3167_v55  ;;  %v1206_v55 = vld [vmem:[%s4502_s7 + $0x1c50] sm:$0xff] }
 0x21a   : > { %3680 = vmatpush1.bf16.msra.mxu0 %v3679_v28  ;;  %3170 = vmatprep.subr.bf16.mxu1 %v3169_v30  ;;  %v697_v28 = vld [vmem:[%s4502_s7 + $0xc68] sm:$0xff]  ;;  %v699_v30 = vld [vmem:[%s4502_s7 + $0xc78] sm:$0xff]  ;;  %v3699_v35 = vpack.c.bf16 %v1206_v55, %v1204_v24  ;;  %v712_v24 = vld [vmem:[%s4502_s7 + $0xce0] sm:$0xff] }
 0x21b   : > { %3682 = vmatprep.subr.bf16.mxu0 %v3681_v60  ;;  %v3189_v60 = vpack.c.bf16 %v699_v30, %v697_v28  ;;  %v1224_v55 = vld [vmem:[%s4502_s7 + $0x1ce0] sm:$0xff]  ;;  %v1226_v30 = vld [vmem:[%s4502_s7 + $0x1cf0] sm:$0xff] }
 0x21c   : > { %v3719_v36 = vpack.c.bf16 %v1226_v30, %v1224_v55  ;;  %v732_v55 = vld [vmem:[%s4502_s7 + $0xd80] sm:$0xff] }
 0x21d   : > { %3172 = vmatpush1.bf16.msra.mxu1 %v3171_v41  ;;  %v701_v41 = vld [vmem:[%s4502_s7 + $0xc88] sm:$0xff]  ;;  %v1244_v30 = vld [vmem:[%s4502_s7 + $0x1d80] sm:$0xff] }
 0x21e   : > { %3684 = vmatpush1.bf16.msra.mxu0 %v3683_v42  ;;  %3174 = vmatprep.subr.bf16.mxu1 %v3173_v43  ;;  %v703_v42 = vld [vmem:[%s4502_s7 + $0xc98] sm:$0xff]  ;;  %v1213_v43 = vld [vmem:[%s4502_s7 + $0x1c88] sm:$0xff] }
 0x21f   : > { %3686 = vmatprep.subr.bf16.mxu0 %v3685_v46  ;;  %v3193_v46 = vpack.c.bf16 %v703_v42, %v701_v41  ;;  %v3705_v50 = vpack.c.bf16 %v1215_v44, %v1213_v43  ;;  %v1230_v42 = vld [vmem:[%s4502_s7 + $0x1d10] sm:$0xff]  ;;  %v721_v43 = vld [vmem:[%s4502_s7 + $0xd28] sm:$0xff]  ;;  %v723_v44 = vld [vmem:[%s4502_s7 + $0xd38] sm:$0xff] }
 0x220   : > { %v3723_v56 = vpack.c.bf16 %v1230_v42, %v1228_v40  ;;  %v3213_v47 = vpack.c.bf16 %v723_v44, %v721_v43  ;;  %v736_v40 = vld [vmem:[%s4502_s7 + $0xda0] sm:$0xff]  ;;  %v1250_v44 = vld [vmem:[%s4502_s7 + $0x1db0] sm:$0xff] }
 0x221   : > { %3176 = vmatpush1.bf16.msra.mxu1 %v3175_v26  ;;  %v705_v26 = vld [vmem:[%s4502_s7 + $0xca8] sm:$0xff]  ;;  %v1248_v42 = vld [vmem:[%s4502_s7 + $0x1da0] sm:$0xff] }
 0x222   : > { %3688 = vmatpush1.bf16.msra.mxu0 %v3687_v54  ;;  %3178 = vmatprep.subr.bf16.mxu1 %v3177_v57  ;;  %v707_v54 = vld [vmem:[%s4502_s7 + $0xcb8] sm:$0xff]  ;;  %v1217_v57 = vld [vmem:[%s4502_s7 + $0x1ca8] sm:$0xff] }
 0x223   : > { %3690 = vmatprep.subr.bf16.mxu0 %v3689_v61  ;;  %v3197_v61 = vpack.c.bf16 %v707_v54, %v705_v26  ;;  %v3709_v31 = vpack.c.bf16 %v1219_v29, %v1217_v57  ;;  %v1234_v54 = vld [vmem:[%s4502_s7 + $0x1d30] sm:$0xff]  ;;  %v725_v57 = vld [vmem:[%s4502_s7 + $0xd48] sm:$0xff]  ;;  %v727_v29 = vld [vmem:[%s4502_s7 + $0xd58] sm:$0xff] }
 0x224   : > { %1886 = vmatmul.mubr.f32.vlgmr.msra.gmra.mrb[0].mxu1 %v5273_v13  ;;  %v694_v13 = vld [vmem:[%s4502_s7 + $0xc50] sm:$0xff]  ;;  %v3727_v62 = vpack.c.bf16 %v1234_v54, %v1232_v52  ;;  %v3217_v0 = vpack.c.bf16 %v727_v29, %v725_v57  ;;  %v740_v52 = vld [vmem:[%s4502_s7 + $0xdc0] sm:$0xff] }
 0x225   : > { %3180 = vmatpush1.bf16.msra.mxu1 %v3179_v23  ;;  %2454 = vmatmul.mubr.f32.vlgmr.msra.gmra.mrb[0].mxu0 %v5278_v49  ;;  %v1209_v49 = vld [vmem:[%s4502_s7 + $0x1c68] sm:$0xff]  ;;  %v3187_v33 = vpack.c.bf16 %v694_v13, %v692_v22  ;;  %v3715_v22 = vpack.c.bf16 %v1222_v16, %v1220_v14  ;;  %v728_v14 = vld [vmem:[%s4502_s7 + $0xd60] sm:$0xff]  ;;  %v1254_v29 = vld [vmem:[%s4502_s7 + $0x1dd0] sm:$0xff] }
 0x226   : > { %3692 = vmatpush1.bf16.msra.mxu0 %v3691_v4  ;;  %3182 = vmatprep.subr.bf16.mxu1 %v3181_v5  ;;  %v3701_v39 = vpack.c.bf16 %v1211_v32, %v1209_v49  ;;  %v709_v23 = vld [vmem:[%s4502_s7 + $0xcc8] sm:$0xff]  ;;  %v711_v4 = vld [vmem:[%s4502_s7 + $0xcd8] sm:$0xff]  ;;  %v1240_v16 = vld [vmem:[%s4502_s7 + $0x1d60] sm:$0xff] }
 0x227   : > { %3694 = vmatprep.subr.bf16.mxu0 %v3693_v27  ;;  %1956 = vmatprep.mubr.f32.mxu1 %v1366_v15  ;;  %v1221_v5 = vld [vmem:[%s4502_s7 + $0x1cc8] sm:$0xff]  ;;  %v3201_v27 = vpack.c.bf16 %v711_v4, %v709_v23  ;;  %v719_v32 = vld [vmem:[%s4502_s7 + $0xd18] sm:$0xff]  ;;  %v1238_v4 = vld [vmem:[%s4502_s7 + $0x1d50] sm:$0xff] }
 0x228   : > { %2524 = vmatprep.mubr.f32.mxu0 %v1434_v18  ;;  %v3713_v15 = vpack.c.bf16 %v1223_v6, %v1221_v5  ;;  %v715_v18 = vld [vmem:[%s4502_s7 + $0xcf8] sm:$0xff]  ;;  %v717_v49 = vld [vmem:[%s4502_s7 + $0xd08] sm:$0xff]  ;;  %v1252_v54 = vld [vmem:[%s4502_s7 + $0x1dc0] sm:$0xff] }
 0x229   : > { %3184 = vmatpush1.bf16.msra.mxu1 %v3183_v19  ;;  %v1225_v19 = vld [vmem:[%s4502_s7 + $0x1ce8] sm:$0xff]  ;;  %v3205_v13 = vpack.c.bf16 %v715_v18, %v713_v17  ;;  %v3209_v37 = vpack.c.bf16 %v719_v32, %v717_v49  ;;  %v731_v6 = vld [vmem:[%s4502_s7 + $0xd78] sm:$0xff]  ;;  %v1242_v18 = vld [vmem:[%s4502_s7 + $0x1d70] sm:$0xff] }
 0x22a   : > { %3696 = vmatpush1.bf16.msra.mxu0 %v3695_v20  ;;  %3186 = vmatprep.subr.bf16.mxu1 %v3185_v21  ;;  %v1227_v20 = vld [vmem:[%s4502_s7 + $0x1cf8] sm:$0xff]  ;;  %v3203_v21 = vpack.c.bf16 %v710_v11, %v708_v9  ;;  %v729_v5 = vld [vmem:[%s4502_s7 + $0xd68] sm:$0xff]  ;;  %v3731_v9 = vpack.c.bf16 %v1238_v4, %v1236_v51  ;;  %v1246_v32 = vld [vmem:[%s4502_s7 + $0x1d90] sm:$0xff] }
 0x22b   : > { %3698 = vmatprep.subr.bf16.mxu0 %v3697_v25  ;;  %v714_v25 = vld [vmem:[%s4502_s7 + $0xcf0] sm:$0xff]  ;;  %v3717_v28 = vpack.c.bf16 %v1227_v20, %v1225_v19  ;;  %v3221_v11 = vpack.c.bf16 %v731_v6, %v729_v5  ;;  %v733_v19 = vld [vmem:[%s4502_s7 + $0xd88] sm:$0xff]  ;;  %v735_v20 = vld [vmem:[%s4502_s7 + $0xd98] sm:$0xff] }
 0x22c   : > { %v744_v51 = vld [vmem:[%s4502_s7 + $0xde0] sm:$0xff]  ;;  %v1258_v6 = vld [vmem:[%s4502_s7 + $0x1df0] sm:$0xff] }
 0x22d   : > { %3188 = vmatpush1.bf16.msra.mxu1 %v3187_v33  ;;  %v1229_v33 = vld [vmem:[%s4502_s7 + $0x1d08] sm:$0xff]  ;;  %v1256_v4 = vld [vmem:[%s4502_s7 + $0x1de0] sm:$0xff] }
 0x22e   : > { %3700 = vmatpush1.bf16.msra.mxu0 %v3699_v35  ;;  %3190 = vmatprep.subr.bf16.mxu1 %v3189_v60  ;;  %v1231_v35 = vld [vmem:[%s4502_s7 + $0x1d18] sm:$0xff]  ;;  %v3207_v60 = vpack.c.bf16 %v714_v25, %v712_v24  ;;  %v3735_v24 = vpack.c.bf16 %v1242_v18, %v1240_v16  ;;  %v3225_v25 = vpack.c.bf16 %v735_v20, %v733_v19  ;;  %v750_v18 = vld [vmem:[%s4502_s7 + $0xe10] sm:$0xff]  ;;  %v1260_v19 = vld [vmem:[%s4502_s7 + $0x1e00] sm:$0xff] }
 0x22f   : > { %3702 = vmatprep.subr.bf16.mxu0 %v3701_v39  ;;  %v718_v39 = vld [vmem:[%s4502_s7 + $0xd10] sm:$0xff]  ;;  %v3721_v41 = vpack.c.bf16 %v1231_v35, %v1229_v33  ;;  %v737_v33 = vld [vmem:[%s4502_s7 + $0xda8] sm:$0xff]  ;;  %v739_v35 = vld [vmem:[%s4502_s7 + $0xdb8] sm:$0xff] }
 0x231   : > { %3192 = vmatpush1.bf16.msra.mxu1 %v3191_v10  ;;  %v1233_v10 = vld [vmem:[%s4502_s7 + $0x1d28] sm:$0xff] }
 0x232   : > { %3704 = vmatpush1.bf16.msra.mxu0 %v3703_v45  ;;  %3194 = vmatprep.subr.bf16.mxu1 %v3193_v46  ;;  %v1235_v45 = vld [vmem:[%s4502_s7 + $0x1d38] sm:$0xff]  ;;  %v3211_v46 = vpack.c.bf16 %v718_v39, %v716_v38  ;;  %v3739_v38 = vpack.c.bf16 %v1246_v32, %v1244_v30  ;;  %v3229_v39 = vpack.c.bf16 %v739_v35, %v737_v33  ;;  %v754_v32 = vld [vmem:[%s4502_s7 + $0xe30] sm:$0xff]  ;;  %v1264_v33 = vld [vmem:[%s4502_s7 + $0x1e20] sm:$0xff] }
 0x233   : > { %3706 = vmatprep.subr.bf16.mxu0 %v3705_v50  ;;  %v722_v50 = vld [vmem:[%s4502_s7 + $0xd30] sm:$0xff]  ;;  %v3725_v26 = vpack.c.bf16 %v1235_v45, %v1233_v10  ;;  %v741_v10 = vld [vmem:[%s4502_s7 + $0xdc8] sm:$0xff]  ;;  %v743_v45 = vld [vmem:[%s4502_s7 + $0xdd8] sm:$0xff] }
 0x235   : > { %3196 = vmatpush1.bf16.msra.mxu1 %v3195_v58  ;;  %v1237_v58 = vld [vmem:[%s4502_s7 + $0x1d48] sm:$0xff] }
 0x236   : > { %3708 = vmatpush1.bf16.msra.mxu0 %v3707_v59  ;;  %3198 = vmatprep.subr.bf16.mxu1 %v3197_v61  ;;  %v1239_v59 = vld [vmem:[%s4502_s7 + $0x1d58] sm:$0xff]  ;;  %v3215_v61 = vpack.c.bf16 %v722_v50, %v720_v48  ;;  %v3743_v48 = vpack.c.bf16 %v1250_v44, %v1248_v42  ;;  %v3233_v50 = vpack.c.bf16 %v743_v45, %v741_v10  ;;  %v756_v44 = vld [vmem:[%s4502_s7 + $0xe40] sm:$0xff] }
 0x237   : > { %3710 = vmatprep.subr.bf16.mxu0 %v3709_v31  ;;  %v726_v31 = vld [vmem:[%s4502_s7 + $0xd50] sm:$0xff]  ;;  %v3729_v23 = vpack.c.bf16 %v1239_v59, %v1237_v58  ;;  %v745_v58 = vld [vmem:[%s4502_s7 + $0xde8] sm:$0xff]  ;;  %v747_v59 = vld [vmem:[%s4502_s7 + $0xdf8] sm:$0xff] }
 0x238   : > { %v1268_v10 = vld [vmem:[%s4502_s7 + $0x1e40] sm:$0xff] }
 0x239   : > { %3200 = vmatpush1.bf16.msra.mxu1 %v3199_v7  ;;  %v1241_v7 = vld [vmem:[%s4502_s7 + $0x1d68] sm:$0xff] }
 0x23a   : > { %3712 = vmatpush1.bf16.msra.mxu0 %v3711_v34  ;;  %3202 = vmatprep.subr.bf16.mxu1 %v3201_v27  ;;  %v1243_v34 = vld [vmem:[%s4502_s7 + $0x1d78] sm:$0xff]  ;;  %v3219_v27 = vpack.c.bf16 %v726_v31, %v724_v1  ;;  %v3747_v1 = vpack.c.bf16 %v1254_v29, %v1252_v54  ;;  %v3237_v31 = vpack.c.bf16 %v747_v59, %v745_v58  ;;  %v762_v29 = vld [vmem:[%s4502_s7 + $0xe70] sm:$0xff]  ;;  %v1272_v58 = vld [vmem:[%s4502_s7 + $0x1e60] sm:$0xff] }
 0x23b   : > { %3714 = vmatprep.subr.bf16.mxu0 %v3713_v15  ;;  %v730_v15 = vld [vmem:[%s4502_s7 + $0xd70] sm:$0xff]  ;;  %v3733_v17 = vpack.c.bf16 %v1243_v34, %v1241_v7  ;;  %v749_v7 = vld [vmem:[%s4502_s7 + $0xe08] sm:$0xff]  ;;  %v751_v34 = vld [vmem:[%s4502_s7 + $0xe18] sm:$0xff] }
 0x23c   : > { %v3241_v16 = vpack.c.bf16 %v751_v34, %v749_v7  ;;  %v1276_v7 = vld [vmem:[%s4502_s7 + $0x1e80] sm:$0xff] }
 0x23d   : > { %3204 = vmatpush1.bf16.msra.mxu1 %v3203_v21  ;;  %v1245_v21 = vld [vmem:[%s4502_s7 + $0x1d88] sm:$0xff] }
 0x23e   : > { %3716 = vmatpush1.bf16.msra.mxu0 %v3715_v22  ;;  %3206 = vmatprep.subr.bf16.mxu1 %v3205_v13  ;;  %v1247_v22 = vld [vmem:[%s4502_s7 + $0x1d98] sm:$0xff]  ;;  %v3223_v13 = vpack.c.bf16 %v730_v15, %v728_v14  ;;  %v3751_v15 = vpack.c.bf16 %v1258_v6, %v1256_v4  ;;  %v766_v6 = vld [vmem:[%s4502_s7 + $0xe90] sm:$0xff] }
 0x23f   : > { %3718 = vmatprep.subr.bf16.mxu0 %v3717_v28  ;;  %v734_v28 = vld [vmem:[%s4502_s7 + $0xd90] sm:$0xff]  ;;  %v3737_v49 = vpack.c.bf16 %v1247_v22, %v1245_v21  ;;  %v753_v22 = vld [vmem:[%s4502_s7 + $0xe28] sm:$0xff] }
 0x240   : > { %v1262_v21 = vld [vmem:[%s4502_s7 + $0x1e10] sm:$0xff] }
 0x241   : > { %3208 = vmatpush1.bf16.msra.mxu1 %v3207_v60  ;;  %v1249_v60 = vld [vmem:[%s4502_s7 + $0x1da8] sm:$0xff] }
 0x242   : > { %3720 = vmatpush1.bf16.msra.mxu0 %v3719_v36  ;;  %3210 = vmatprep.subr.bf16.mxu1 %v3209_v37  ;;  %v1251_v36 = vld [vmem:[%s4502_s7 + $0x1db8] sm:$0xff]  ;;  %v3227_v37 = vpack.c.bf16 %v734_v28, %v732_v55  ;;  %v3755_v28 = vpack.c.bf16 %v1262_v21, %v1260_v19  ;;  %v768_v19 = vld [vmem:[%s4502_s7 + $0xea0] sm:$0xff] }
 0x243   : > { %3722 = vmatprep.subr.bf16.mxu0 %v3721_v41  ;;  %v738_v41 = vld [vmem:[%s4502_s7 + $0xdb0] sm:$0xff]  ;;  %v3741_v43 = vpack.c.bf16 %v1251_v36, %v1249_v60  ;;  %v757_v36 = vld [vmem:[%s4502_s7 + $0xe48] sm:$0xff]  ;;  %v1280_v21 = vld [vmem:[%s4502_s7 + $0x1ea0] sm:$0xff] }
 0x244   : > { %v1266_v60 = vld [vmem:[%s4502_s7 + $0x1e30] sm:$0xff] }
 0x245   : > { %3212 = vmatpush1.bf16.msra.mxu1 %v3211_v46  ;;  %v1253_v46 = vld [vmem:[%s4502_s7 + $0x1dc8] sm:$0xff]  ;;  %v3759_v42 = vpack.c.bf16 %v1266_v60, %v1264_v33  ;;  %v772_v33 = vld [vmem:[%s4502_s7 + $0xec0] sm:$0xff] }
 0x246   : > { %3724 = vmatpush1.bf16.msra.mxu0 %v3723_v56  ;;  %3214 = vmatprep.subr.bf16.mxu1 %v3213_v47  ;;  %v1255_v56 = vld [vmem:[%s4502_s7 + $0x1dd8] sm:$0xff]  ;;  %v3231_v47 = vpack.c.bf16 %v738_v41, %v736_v40  ;;  %v1284_v60 = vld [vmem:[%s4502_s7 + $0x1ec0] sm:$0xff] }
 0x247   : > { %3726 = vmatprep.subr.bf16.mxu0 %v3725_v26  ;;  %v742_v26 = vld [vmem:[%s4502_s7 + $0xdd0] sm:$0xff]  ;;  %v3745_v57 = vpack.c.bf16 %v1255_v56, %v1253_v46  ;;  %v761_v56 = vld [vmem:[%s4502_s7 + $0xe68] sm:$0xff] }
 0x248   : > { %v1270_v46 = vld [vmem:[%s4502_s7 + $0x1e50] sm:$0xff] }
 0x249   : > { %3216 = vmatpush1.bf16.msra.mxu1 %v3215_v61  ;;  %v1257_v61 = vld [vmem:[%s4502_s7 + $0x1de8] sm:$0xff] }
 0x24a   : > { %3728 = vmatpush1.bf16.msra.mxu0 %v3727_v62  ;;  %3218 = vmatprep.subr.bf16.mxu1 %v3217_v0  ;;  %v1259_v62 = vld [vmem:[%s4502_s7 + $0x1df8] sm:$0xff]  ;;  %v3235_v0 = vpack.c.bf16 %v742_v26, %v740_v52  ;;  %v3763_v26 = vpack.c.bf16 %v1270_v46, %v1268_v10  ;;  %v778_v10 = vld [vmem:[%s4502_s7 + $0xef0] sm:$0xff] }
 0x24b   : > { %3730 = vmatprep.subr.bf16.mxu0 %v3729_v23  ;;  %v746_v23 = vld [vmem:[%s4502_s7 + $0xdf0] sm:$0xff]  ;;  %v3749_v5 = vpack.c.bf16 %v1259_v62, %v1257_v61  ;;  %v765_v62 = vld [vmem:[%s4502_s7 + $0xe88] sm:$0xff] }
 0x24c   : > { %v3239_v14 = vpack.c.bf16 %v746_v23, %v744_v51  ;;  %v1274_v61 = vld [vmem:[%s4502_s7 + $0x1e70] sm:$0xff] }
 0x24d   : > { %3220 = vmatpush1.bf16.msra.mxu1 %v3219_v27  ;;  %v1261_v27 = vld [vmem:[%s4502_s7 + $0x1e08] sm:$0xff]  ;;  %v3767_v23 = vpack.c.bf16 %v1274_v61, %v1272_v58  ;;  %v787_v58 = vld [vmem:[%s4502_s7 + $0xf38] sm:$0xff] }
 0x24e   : > { %3732 = vmatpush1.bf16.msra.mxu0 %v3731_v9  ;;  %3222 = vmatprep.subr.bf16.mxu1 %v3221_v11  ;;  %v1263_v9 = vld [vmem:[%s4502_s7 + $0x1e18] sm:$0xff]  ;;  %v1351_v11 = vcombine.high %v5407_v8, %v5407_v8  ;;  %v1265_v8 = vld [vmem:[%s4502_s7 + $0x1e28] sm:$0xff] }
 0x24f   : > { %3734 = vmatprep.subr.bf16.mxu0 %v3733_v17  ;;  %v748_v17 = vld [vmem:[%s4502_s7 + $0xe00] sm:$0xff]  ;;  %v3753_v20 = vpack.c.bf16 %v1263_v9, %v1261_v27  ;;  %v1278_v27 = vld [vmem:[%s4502_s7 + $0x1e90] sm:$0xff]  ;;  %v769_v9 = vld [vmem:[%s4502_s7 + $0xea8] sm:$0xff] }
 0x250   : > { %v3243_v55 = vpack.c.bf16 %v750_v18, %v748_v17  ;;  %v3771_v17 = vpack.c.bf16 %v1278_v27, %v1276_v7  ;;  %v795_v7 = vld [vmem:[%s4502_s7 + $0xf78] sm:$0xff] }
 0x251   : > { %3224 = vmatpush1.bf16.msra.mxu1 %v3223_v13  ;;  %v755_v13 = vld [vmem:[%s4502_s7 + $0xe38] sm:$0xff] }
 0x252   : > { %3736 = vmatpush1.bf16.msra.mxu0 %v3735_v24  ;;  %3226 = vmatprep.subr.bf16.mxu1 %v3225_v25  ;;  %v1267_v24 = vld [vmem:[%s4502_s7 + $0x1e38] sm:$0xff]  ;;  %v5565_v25 = vrot.slane %v1351_v11, %v4618_v12  ;;  %v3245_v30 = vpack.c.bf16 %v755_v13, %v753_v22  ;;  %v1282_v13 = vld [vmem:[%s4502_s7 + $0x1eb0] sm:$0xff] }
 0x253   : > { %3738 = vmatprep.subr.bf16.mxu0 %v3737_v49  ;;  %v752_v49 = vld [vmem:[%s4502_s7 + $0xe20] sm:$0xff]  ;;  %v3757_v35 = vpack.c.bf16 %v1267_v24, %v1265_v8  ;;  %v771_v11 = vld [vmem:[%s4502_s7 + $0xeb8] sm:$0xff]  ;;  %v773_v8 = vld [vmem:[%s4502_s7 + $0xec8] sm:$0xff] }
 0x254   : > { %v1367_v40 = vcombine.high %v5565_v25, %v5565_v25  ;;  %v3247_v41 = vpack.c.bf16 %v754_v32, %v752_v49  ;;  %v3261_v18 = vpack.c.bf16 %v771_v11, %v769_v9  ;;  %v775_v24 = vld [vmem:[%s4502_s7 + $0xed8] sm:$0xff]  ;;  %v3775_v49 = vpack.c.bf16 %v1282_v13, %v1280_v21  ;;  %v792_v9 = vld [vmem:[%s4502_s7 + $0xf60] sm:$0xff]  ;;  %v794_v11 = vld [vmem:[%s4502_s7 + $0xf70] sm:$0xff] }
 0x255   : > { %3228 = vmatpush1.bf16.msra.mxu1 %v3227_v37  ;;  %v759_v37 = vld [vmem:[%s4502_s7 + $0xe58] sm:$0xff]  ;;  %v3265_v32 = vpack.c.bf16 %v775_v24, %v773_v8  ;;  %v800_v8 = vld [vmem:[%s4502_s7 + $0xfa0] sm:$0xff]  ;;  %v802_v24 = vld [vmem:[%s4502_s7 + $0xfb0] sm:$0xff] }
 0x256   : > { %3740 = vmatpush1.bf16.msra.mxu0 %v3739_v38  ;;  %3230 = vmatprep.subr.bf16.mxu1 %v3229_v39  ;;  %v1269_v38 = vld [vmem:[%s4502_s7 + $0x1e48] sm:$0xff]  ;;  %v1271_v39 = vld [vmem:[%s4502_s7 + $0x1e58] sm:$0xff] }
 0x257   : > { %3742 = vmatprep.subr.bf16.mxu0 %v3741_v43  ;;  %v3249_v43 = vpack.c.bf16 %v759_v37, %v757_v36  ;;  %v3761_v45 = vpack.c.bf16 %v1271_v39, %v1269_v38  ;;  %v1286_v37 = vld [vmem:[%s4502_s7 + $0x1ed0] sm:$0xff]  ;;  %v777_v38 = vld [vmem:[%s4502_s7 + $0xee8] sm:$0xff]  ;;  %v779_v39 = vld [vmem:[%s4502_s7 + $0xef8] sm:$0xff] }
 0x258   : > { %v803_v21 = vld [vmem:[%s4502_s7 + $0xfb8] sm:$0xff] }
 0x259   : > { %3232 = vmatpush1.bf16.msra.mxu1 %v3231_v47  ;;  %v763_v47 = vld [vmem:[%s4502_s7 + $0xe78] sm:$0xff] }
 0x25a   : > { %3744 = vmatpush1.bf16.msra.mxu0 %v3743_v48  ;;  %3234 = vmatprep.subr.bf16.mxu1 %v3233_v50  ;;  %v4186_v48 = vmov 0.0   ;;  %v1275_v50 = vld [vmem:[%s4502_s7 + $0x1e78] sm:$0xff]  ;;  %v3253_v54 = vpack.c.bf16 %v763_v47, %v761_v56  ;;  %v1290_v56 = vld [vmem:[%s4502_s7 + $0x1ef0] sm:$0xff]  ;;  %v781_v47 = vld [vmem:[%s4502_s7 + $0xf08] sm:$0xff] }
 0x25b   : > { %3746 = vmatprep.subr.bf16.mxu0 %v3745_v57  ;;  %v760_v57 = vld [vmem:[%s4502_s7 + $0xe60] sm:$0xff] }
 0x25c   : > { %v3255_v51 = vpack.c.bf16 %v762_v29, %v760_v57  ;;  %v782_v57 = vld [vmem:[%s4502_s7 + $0xf10] sm:$0xff]  ;;  %v785_v29 = vld [vmem:[%s4502_s7 + $0xf28] sm:$0xff] }
 0x25d   : > { %3236 = vmatpush1.bf16.msra.mxu1 %v3235_v0  ;;  %v767_v0 = vld [vmem:[%s4502_s7 + $0xe98] sm:$0xff]  ;;  %v3277_v61 = vpack.c.bf16 %v787_v58, %v785_v29 }
 0x25e   : > { %3748 = vmatpush1.bf16.msra.mxu0 %v3747_v1  ;;  %3238 = vmatprep.subr.bf16.mxu1 %v3237_v31  ;;  %v1277_v1 = vld [vmem:[%s4502_s7 + $0x1e88] sm:$0xff]  ;;  %v1279_v31 = vld [vmem:[%s4502_s7 + $0x1e98] sm:$0xff]  ;;  %v3257_v4 = vpack.c.bf16 %v767_v0, %v765_v62  ;;  %v784_v62 = vld [vmem:[%s4502_s7 + $0xf20] sm:$0xff] }
 0x25f   : > { %3750 = vmatprep.subr.bf16.mxu0 %v3749_v5  ;;  %v764_v5 = vld [vmem:[%s4502_s7 + $0xe80] sm:$0xff]  ;;  %v3769_v34 = vpack.c.bf16 %v1279_v31, %v1277_v1  ;;  %v786_v0 = vld [vmem:[%s4502_s7 + $0xf30] sm:$0xff]  ;;  %v789_v1 = vld [vmem:[%s4502_s7 + $0xf48] sm:$0xff] }
 0x260   : > { %v791_v31 = vld [vmem:[%s4502_s7 + $0xf58] sm:$0xff] }
 0x261   : > { %3240 = vmatpush1.bf16.msra.mxu1 %v3239_v14  ;;  %v1281_v14 = vld [vmem:[%s4502_s7 + $0x1ea8] sm:$0xff] }
 0x262   : > { %3752 = vmatpush1.bf16.msra.mxu0 %v3751_v15  ;;  %3242 = vmatprep.subr.bf16.mxu1 %v3241_v16  ;;  %v1283_v15 = vld [vmem:[%s4502_s7 + $0x1eb8] sm:$0xff]  ;;  %v3259_v16 = vpack.c.bf16 %v766_v6, %v764_v5  ;;  %v790_v5 = vld [vmem:[%s4502_s7 + $0xf50] sm:$0xff]  ;;  %v793_v6 = vld [vmem:[%s4502_s7 + $0xf68] sm:$0xff] }
 0x263   : > { %3754 = vmatprep.subr.bf16.mxu0 %v3753_v20  ;;  %v770_v20 = vld [vmem:[%s4502_s7 + $0xeb0] sm:$0xff]  ;;  %v3773_v22 = vpack.c.bf16 %v1283_v15, %v1281_v14  ;;  %v3285_v27 = vpack.c.bf16 %v795_v7, %v793_v6  ;;  %v797_v14 = vld [vmem:[%s4502_s7 + $0xf88] sm:$0xff]  ;;  %v799_v15 = vld [vmem:[%s4502_s7 + $0xf98] sm:$0xff] }
 0x264   : > { %1957 = vmatmul.mubr.f32.vlgmr.msra.gmra.mrb[0].mxu1 %v5420_v2  ;;  %v758_v2 = vld [vmem:[%s4502_s7 + $0xe50] sm:$0xff] }
 0x265   : > { %3244 = vmatpush1.bf16.msra.mxu1 %v3243_v55  ;;  %2525 = vmatmul.mubr.f32.vlgmr.msra.gmra.mrb[0].mxu0 %v5426_v3  ;;  %v1273_v3 = vld [vmem:[%s4502_s7 + $0x1e68] sm:$0xff]  ;;  %v3251_v52 = vpack.c.bf16 %v758_v2, %v756_v44  ;;  %v3269_v44 = vpack.c.bf16 %v779_v39, %v777_v38  ;;  %v776_v2 = vld [vmem:[%s4502_s7 + $0xee0] sm:$0xff]  ;;  %v810_v39 = vld [vmem:[%s4502_s7 + $0xff0] sm:$0xff] }
 0x266   : > { %3756 = vmatpush1.bf16.msra.mxu0 %v3755_v28  ;;  %3246 = vmatprep.subr.bf16.mxu1 %v3245_v30  ;;  %v3765_v59 = vpack.c.bf16 %v1275_v50, %v1273_v3  ;;  %v1285_v55 = vld [vmem:[%s4502_s7 + $0x1ec8] sm:$0xff]  ;;  %v1287_v28 = vld [vmem:[%s4502_s7 + $0x1ed8] sm:$0xff]  ;;  %v3263_v30 = vpack.c.bf16 %v770_v20, %v768_v19  ;;  %v1419_v3 = vcombine.high %v5410_v53, %v5410_v53  ;;  %v798_v19 = vld [vmem:[%s4502_s7 + $0xf90] sm:$0xff] }
 0x267   : > { %3758 = vmatprep.subr.bf16.mxu0 %v3757_v35  ;;  %2595 = vmatprep.mubr.f32.mxu0 %v4186_v48  ;;  %v774_v35 = vld [vmem:[%s4502_s7 + $0xed0] sm:$0xff]  ;;  %v3777_v36 = vpack.c.bf16 %v1287_v28, %v1285_v55  ;;  %v783_v48 = vld [vmem:[%s4502_s7 + $0xf18] sm:$0xff]  ;;  %v3271_v50 = vpack.c.bf16 %v778_v10, %v776_v2  ;;  %v801_v20 = vld [vmem:[%s4502_s7 + $0xfa8] sm:$0xff] }
 0x268   : > { %2027 = vmatprep.mubr.f32.mxu1 %v1367_v40  ;;  %v1289_v40 = vld [vmem:[%s4502_s7 + $0x1ee8] sm:$0xff]  ;;  %v1433_v53 = vrot.slane %v1419_v3, %v4618_v12  ;;  %v3293_v13 = vpack.c.bf16 %v803_v21, %v801_v20  ;;  %v807_v28 = vld [vmem:[%s4502_s7 + $0xfd8] sm:$0xff]  ;;  %v808_v38 = vld [vmem:[%s4502_s7 + $0xfe0] sm:$0xff]  ;;  %v2628_v3 = vsub.s32 (!%p2787_p12), 1, %v4607_v63 }
 0x269   : > { %3248 = vmatpush1.bf16.msra.mxu1 %v3247_v41  ;;  %v1291_v41 = vld [vmem:[%s4502_s7 + $0x1ef8] sm:$0xff]  ;;  %v805_v55 = vld [vmem:[%s4502_s7 + $0xfc8] sm:$0xff] }
 0x26a   : > { %3760 = vmatpush1.bf16.msra.mxu0 %v3759_v42  ;;  %3250 = vmatprep.subr.bf16.mxu1 %v3249_v43  ;;  %v3267_v42 = vpack.c.bf16 %v774_v35, %v772_v33  ;;  %v3779_v43 = vpack.c.bf16 %v1286_v37, %v1284_v60  ;;  %v3781_v46 = vpack.c.bf16 %v1291_v41, %v1289_v40  ;;  %v806_v33 = vld [vmem:[%s4502_s7 + $0xfd0] sm:$0xff]  ;;  %v809_v35 = vld [vmem:[%s4502_s7 + $0xfe8] sm:$0xff]  ;;  %v811_v60 = vld [vmem:[%s4502_s7 + $0xff8] sm:$0xff] }
 0x26b   : > { %3762 = vmatprep.subr.bf16.mxu0 %v3761_v45  ;;  %v1288_v45 = vld [vmem:[%s4502_s7 + $0x1ee0] sm:$0xff]  ;;  %v3301_v37 = vpack.c.bf16 %v811_v60, %v809_v35  ;;  %v3303_v40 = vpack.c.bf16 %v810_v39, %v808_v38 }
 0x26d   : > { %3252 = vmatpush1.bf16.msra.mxu1 %v3251_v52  ;;  %v3783_v52 = vpack.c.bf16 %v1290_v56, %v1288_v45 }
 0x26e   : > { %3764 = vmatpush1.bf16.msra.mxu0 %v3763_v26  ;;  %3254 = vmatprep.subr.bf16.mxu1 %v3253_v54  ;;  %v3273_v26 = vpack.c.bf16 %v783_v48, %v781_v47  ;;  %v780_v54 = vld [vmem:[%s4502_s7 + $0xf00] sm:$0xff] }
 0x26f   : > { %3766 = vmatprep.subr.bf16.mxu0 %v3765_v59  ;;  %v3275_v59 = vpack.c.bf16 %v782_v57, %v780_v54  ;;  %v2620_v48 = vld [vmem:[%s243_s8] sm:$0x3] (!%p2787_p12) }
 0x271   : > { %3256 = vmatpush1.bf16.msra.mxu1 %v3255_v51  ;;  %v3279_v51 = vpack.c.bf16 %v786_v0, %v784_v62 }
 0x272   : > { %3768 = vmatpush1.bf16.msra.mxu0 %v3767_v23  ;;  %3258 = vmatprep.subr.bf16.mxu1 %v3257_v4  ;;  %v3281_v23 = vpack.c.bf16 %v791_v31, %v789_v1  ;;  %v788_v4 = vld [vmem:[%s4502_s7 + $0xf40] sm:$0xff] }
 0x273   : > { %3770 = vmatprep.subr.bf16.mxu0 %v3769_v34  ;;  %v3283_v34 = vpack.c.bf16 %v790_v5, %v788_v4 }
 0x275   : > { %3260 = vmatpush1.bf16.msra.mxu1 %v3259_v16  ;;  %v3287_v16 = vpack.c.bf16 %v794_v11, %v792_v9 }
 0x276   : > { %3772 = vmatpush1.bf16.msra.mxu0 %v3771_v17  ;;  %3262 = vmatprep.subr.bf16.mxu1 %v3261_v18  ;;  %v3289_v17 = vpack.c.bf16 %v799_v15, %v797_v14  ;;  %v796_v18 = vld [vmem:[%s4502_s7 + $0xf80] sm:$0xff] }
 0x277   : > { %3774 = vmatprep.subr.bf16.mxu0 %v3773_v22  ;;  %v3291_v22 = vpack.c.bf16 %v798_v19, %v796_v18 }
 0x279   : > { %3264 = vmatpush1.bf16.msra.mxu1 %v3263_v30  ;;  %v3295_v30 = vpack.c.bf16 %v802_v24, %v800_v8 }
 0x27a   : > { %3776 = vmatpush1.bf16.msra.mxu0 %v3775_v49  ;;  %3266 = vmatprep.subr.bf16.mxu1 %v3265_v32  ;;  %v3297_v49 = vpack.c.bf16 %v807_v28, %v805_v55  ;;  %v804_v32 = vld [vmem:[%s4502_s7 + $0xfc0] sm:$0xff] }
 0x27b   : > { %3778 = vmatprep.subr.bf16.mxu0 %v3777_v36  ;;  %v3299_v36 = vpack.c.bf16 %v806_v33, %v804_v32 }
 0x27d   : > { %3268 = vmatpush1.bf16.msra.mxu1 %v3267_v42 }
 0x27e   : > { %3780 = vmatpush1.bf16.msra.mxu0 %v3779_v43  ;;  %3270 = vmatprep.subr.bf16.mxu1 %v3269_v44 }
 0x27f   : > { %3782 = vmatprep.subr.bf16.mxu0 %v3781_v46  ;;  %v291_v46 = vld [vmem:[#allocation2] sm:$0xf] }
 0x281   : > { %3272 = vmatpush1.bf16.msra.mxu1 %v3271_v50 }
 0x282   : > { %3784 = vmatpush1.bf16.msra.mxu0 %v3783_v52  ;;  %3274 = vmatprep.subr.bf16.mxu1 %v3273_v26  ;;  %v2629_v52 = vrot.slane (!%p2787_p12), %v2620_v48, %v2628_v3 }
 0x285   : > { %2596 = vmatmul.mubr.f32.vlgmr.msra.gmra.mrb[0].mxu0 %v1433_v53  ;;  %3276 = vmatpush1.bf16.msra.mxu1 %v3275_v59 }
 0x286   : > { %3278 = vmatprep.subr.bf16.mxu1 %v3277_v61 }
 0x289   : > { %3280 = vmatpush1.bf16.msra.mxu1 %v3279_v51 }
 0x28a   : > { %3282 = vmatprep.subr.bf16.mxu1 %v3281_v23 }
 0x28d   : > { %3284 = vmatpush1.bf16.msra.mxu1 %v3283_v34 }
 0x28e   : > { %3286 = vmatprep.subr.bf16.mxu1 %v3285_v27 }
 0x291   : > { %3288 = vmatpush1.bf16.msra.mxu1 %v3287_v16 }
 0x292   : > { %3290 = vmatprep.subr.bf16.mxu1 %v3289_v17 }
 0x295   : > { %3292 = vmatpush1.bf16.msra.mxu1 %v3291_v22 }
 0x296   : > { %3294 = vmatprep.subr.bf16.mxu1 %v3293_v13 }
 0x299   : > { %3296 = vmatpush1.bf16.msra.mxu1 %v3295_v30 }
 0x29a   : > { %3298 = vmatprep.subr.bf16.mxu1 %v3297_v49 }
 0x29d   : > { %3300 = vmatpush1.bf16.msra.mxu1 %v3299_v36 }
 0x29e   : > { %3302 = vmatprep.subr.bf16.mxu1 %v3301_v37 }
 0x2a1   : > { %3304 = vmatpush1.bf16.msra.mxu1 %v3303_v40 }
 0x2a4   : > { %2028 = vmatmul.mubr.f32.vlgmr.msra.gmra.mrb[0].mxu1 %v5565_v25  ;;  %v2624_v25 = vsub.s32 (!%p2787_p12), 0, %v4607_v63 }
 0x2a6   : > { %v2625_v50 = vrot.slane (!%p2787_p12), %v2620_v48, %v2624_v25 }
 0x2a8   : > { %v2630_v26 = vcombine.low (!%p2787_p12), %v2625_v50, %v2629_v52 }
 0x2aa   : > { %v2637_v57 = vrot.slane (!%p2787_p12), %v2630_v26, %v4618_v12 }
 0x358   : > { %v2597_v41 = vpop.f32.mrb[0].mxu0 }
 0x359   : > { %v2599_v42 = vpop.f32.mrb[1].mxu0 }
 0x377   : > { %v2029_v43 = vpop.f32.mrb[0].mxu1 }
 0x378   : > { %v3785_v44 = vadd.f32 %v2597_v41, %v2029_v43  ;;  %v2031_v2 = vpop.f32.mrb[1].mxu1 }
 0x379   : > { %v3786_v10 = vadd.f32 %v2599_v42, %v2031_v2 }
 0x37b   : > { %v2604_v45 = vcombine.low %v3785_v44, %v3786_v10  ;;  %2618 = sbr.rel (%p2787_p12) target bundleno = 925 (0x39d), region = 52 }
 0x37d   : > { %v2611_v56 = vrot.slane %v2604_v45, %v4618_v12 }
 0x37f   : > { %v2613_v47 = vadd.f32 %v2611_v56, %v291_v46 }
 0x381   : > { %2614 = vst [vmem:[#allocation2] sm:$0xf] %v2613_v47 }
 0x388   : > { %v2619_v54 = vld [vmem:[#allocation2] sm:$0xf] }
 0x389   : > { %v2639_v29 = vadd.f32 %v2637_v57, %v2619_v54 }
 0x38b   : > { %v2641_v58 = vmul.f32 0.70710677, %v2639_v29  ;;  %v2640_v53 = vmul.f32 0.5, %v2639_v29 }
 0x38d   : > { %3962 = verf.f32 %v2641_v58 }
 0x397   : > { %v3963_v59 = vpop.eup %3962 }
 0x398   : > { %v2643_v61 = vadd.f32 1.0, %v3963_v59 }
 0x39a   : > { %v2644_v62 = vmul.f32 %v2643_v61, %v2640_v53 }
 0x39c   : > { %2645 = vst [vmem:[%s4520_s9] sm:$0xf] %v2644_v62 }
 0x39d PF: > { %s19_s25 = sadd.s32 1, %s4176_s25   ;;  %s5761_s30 = sld [smem:[#allocation11_spill]] }
 0x39e   : > { %p5668_p10 = scmp.ge.s32.totalorder %s19_s25, 18   ;;  %s5762_s29 = sld [smem:[#allocation15_spill]] }
 0x39f   : > { %s5763_s3 = sld [smem:[#allocation13_spill]]  ;;  %s5764_s27 = sld [smem:[#allocation14_spill]] }
 0x3a0   : > { %s5766_s12 = smov %s4128_s13  ;;  %s5767_s13 = smov %s4132_s14 }
 0x3a1   : > { %s5768_s14 = smov %s4445_s28  ;;  %s5769_s15 = smov %s4140_s16 }
 0x3a2   : > { %s5770_s16 = smov %s4144_s17  ;;  %s5771_s17 = smov %s4403_s26 }
 0x3a3   : > { %s5772_s18 = smov %s4152_s19  ;;  %s5773_s19 = smov %s5761_s30 }
 0x3a4   : > { %s5774_s20 = smov %s5762_s29  ;;  %s5775_s21 = smov %s4168_s23 }
 0x3a5   : > { %s5776_s22 = smov %s4172_s24  ;;  %s5777_s23 = smov %s5763_s3 }
 0x3a6   : > { %s5778_s24 = smov %s5764_s27  ;;  %18 = sbr.rel (!%p5668_p10) target bundleno = 13 (0xd), region = 104 }
 0x3ad   :  { %2668 = vsyncpa [#allocation4], 1 }
 0x3ae   :  { %2670 = vsyncpa [#allocation4 + $0x1], 1 }
 0x3af   :  { %2671 = vsyncpa [#allocation6], 1 }
 0x3b0   :  { %2673 = vsyncpa [#allocation6 + $0x1], 1 }

</bundles_post_ra>
